<compile_context>
chip_gen: v7x
topology: tpu7x:2x2x1
jax: 0.10.0
libtpu: 0.0.40
codegen_flags: <defaults>
</compile_context>

<pallas_src>
import functools

import jax
import jax.numpy as jnp
from jax import lax
from jax.experimental import pallas as pl
from jax.experimental.pallas import tpu as pltpu

_NEG = -1e30  # fill for padded vocab lanes of the fc bias (keeps argmax on real lanes)


def _round_up(x, m):
    return (x + m - 1) // m * m


# ----------------------------- Pallas kernel --------------------------------

def _seq2seq_kernel(
    src_emb_ref,      # [S*BP, E]        f32  (batch padded to BP, flattened time-major)
    trg_fused_ref,    # [T, BP, 3HP+VP]  f32  teacher-forced inputs, pre-projected
    tf_ref,           # [T]              int32 teacher-forcing flags (SMEM)
    wi_enc_ref,       # [E, 3*HP]
    wh_enc_ref,       # [HP, 3*HP]
    bi_enc_ref,       # [1, 3*HP]   b_ih with b_hh r/z gates folded in
    bhn_enc_ref,      # [1, HP]     b_hh n-gate only
    w_dec_fused_ref,  # [VP, 3*HP+VP]  emb_dec folded into decoder input-gate + fc weights
    wi_dec_c_ref,     # [HP, 3*HP]
    wh_dec_ref,       # [HP, 3*HP]
    bi_dec_ref,       # [1, 3*HP]   b_ih with b_hh r/z gates folded in
    bhn_dec_ref,      # [1, HP]     b_hh n-gate only
    wfc_h_ref,        # [HP, VP]
    wfc_c_ref,        # [HP, VP]
    bfc_ref,          # [1, VP]     padded lanes = _NEG
    out_ref,          # [T, BP, VP] f32
    xg_enc_scr,       # scratch VMEM [S*BP, 3*HP] f32
    fused_scr,        # scratch VMEM [BP, 3*HP+VP] f32 (current decoder input, projected)
    *, S, T, BP, HP, VP,
):
    f32 = jnp.float32
    G = 3 * HP

    bhn_enc = bhn_enc_ref[...]
    bhn_dec = bhn_dec_ref[...]

    def gru_step(xg, hg, h, bh_n):
        # PyTorch nn.GRU gate order (r, z, n).  xg already contains the input
        # bias plus the r/z hidden biases (folded in _prep); only the n-gate
        # hidden bias stays explicit because it sits inside r * (hg_n + bh_n).
        r = jax.nn.sigmoid(xg[:, 0:HP] + hg[:, 0:HP])
        z = jax.nn.sigmoid(xg[:, HP:2 * HP] + hg[:, HP:2 * HP])
        n = jnp.tanh(xg[:, 2 * HP:G] + r * (hg[:, 2 * HP:G] + bh_n))
        return n + z * (h - n)        # == (1 - z) * n + z * h

    # ---------------- encoder: GRU over src, final hidden = context ----------
    # Input projection hoisted out of the recurrence: one [S*BP, E] @ [E, 3HP]
    # matmul instead of S tiny serial matmuls on the critical path.
    xg_enc_scr[...] = (
        jnp.dot(src_emb_ref[...], wi_enc_ref[...], preferred_element_type=f32)
        + bi_enc_ref[...])

    def enc_body(t, h):
        row = pl.multiple_of(t * BP, BP)                                  # sublane-aligned
        xg = xg_enc_scr[pl.ds(row, BP), :]                                # [BP, 3HP]
        hg = jnp.dot(h, wh_enc_ref[...], preferred_element_type=f32)      # [BP, 3HP]
        return gru_step(xg, hg, h, bhn_enc)

    context = lax.fori_loop(0, S, enc_body, jnp.zeros((BP, HP), f32),
                            unroll=True)                                  # [BP, HP]

    # ---------------- decoder ------------------------------------------------
    # Loop-invariant context projections, computed once (biases folded in).
    ctx_gates = (jnp.dot(context, wi_dec_c_ref[...], preferred_element_type=f32)
                 + bi_dec_ref[...])                                       # [BP, 3HP]
    ctx_fc = (jnp.dot(context, wfc_c_ref[...], preferred_element_type=f32)
              + bfc_ref[...])                                             # [BP, VP]

    out_ref[0] = jnp.zeros((BP, VP), f32)                                 # outputs[0] stays zero
    lane_iota = lax.broadcasted_iota(jnp.int32, (BP, VP), 1)

    fused_scr[...] = trg_fused_ref[0]   # step-1 input is always trg[0] (pre-projected)

    def dec_body(t, hidden):
        fused = fused_scr[...]                                            # [BP, 3HP+VP]
        xg = fused[:, 0:G] + ctx_gates
        hg = jnp.dot(hidden, wh_dec_ref[...], preferred_element_type=f32) # [BP, 3HP]
        h_new = gru_step(xg, hg, hidden, bhn_dec)                         # [BP, HP]
        pred = (fused[:, G:G + VP]
                + jnp.dot(h_new, wfc_h_ref[...], preferred_element_type=f32)
                + ctx_fc)                                                 # [BP, VP]
        out_ref[t] = pred                                                 # lane-dense store

        # Next decoder input, already pushed through the fused weight.
        # Teacher-forced steps (and the final step, whose next input is unused)
        # read the precomputed row: no matmul, no argmax on the critical path.
        use_tf = jnp.logical_or(tf_ref[t] == 1, t == T - 1)

        @pl.when(use_tf)
        def _():
            fused_scr[...] = trg_fused_ref[t]

        @pl.when(jnp.logical_not(use_tf))
        def _():
            # top1 = output.max(1)[1] (first max index on ties).
            # Kept as max + masked-min (2 XLU reduces, slack under the MXU)
            # instead of jnp.argmax; lax.argmax lowering in Mosaic is not
            # guaranteed and the matmul dominates this branch anyway.
            maxv = jnp.max(pred, axis=1, keepdims=True)
            top1 = jnp.min(jnp.where(pred == maxv, lane_iota, VP),
                           axis=1, keepdims=True)
            top1_oh = (lane_iota == top1).astype(f32)                     # [BP, VP]
            # One matmul does: one-hot embedding gather + embedded->gates
            # + embedded->fc_out contribution.
            fused_scr[...] = jnp.dot(top1_oh, w_dec_fused_ref[...],
                                     preferred_element_type=f32)

        return h_new

    lax.fori_loop(1, T, dec_body, context, unroll=True)


# ----------------------------- wrapper / glue --------------------------------

def make_params(key, input_dim, output_dim, emb_dim, hid_dim):
    ks = jax.random.split(key, 12)

    def init(k, shape):
        return jax.random.normal(k, shape, jnp.float32) * 0.1

    return dict(
        emb_enc=init(ks[0], (input_dim, emb_dim)),
        w_ih_enc=init(ks[1], (3 * hid_dim, emb_dim)),
        w_hh_enc=init(ks[2], (3 * hid_dim, hid_dim)),
        b_ih_enc=init(ks[3], (3 * hid_dim,)),
        b_hh_enc=init(ks[4], (3 * hid_dim,)),
        emb_dec=init(ks[5], (output_dim, emb_dim)),
        w_ih_dec=init(ks[6], (3 * hid_dim, emb_dim + hid_dim)),
        w_hh_dec=init(ks[7], (3 * hid_dim, hid_dim)),
        b_ih_dec=init(ks[8], (3 * hid_dim,)),
        b_hh_dec=init(ks[9], (3 * hid_dim,)),
        w_fc=init(ks[10], (output_dim, emb_dim + 2 * hid_dim)),
        b_fc=init(ks[11], (output_dim,)),
    )


def _prep(params, E, H, V, HP, VP):
    """Pre-transpose, lane-pad, fold biases, and fuse emb_dec into downstream weights."""
    p = params
    hi = lax.Precision.HIGHEST

    def pad_gate_cols(w):  # [in, 3H] -> [in, 3HP], gate g at cols [g*HP, g*HP + H)
        parts = [jnp.pad(w[:, g * H:(g + 1) * H], ((0, 0), (0, HP - H))) for g in range(3)]
        return jnp.concatenate(parts, axis=1)

    def pad_rows(w, rp):   # [r, c] -> [rp, c]
        return jnp.pad(w, ((0, rp - w.shape[0]), (0, 0)))

    def fold_bias(b_ih, b_hh):
        # Fold the r/z hidden biases into the input-side bias; keep only the
        # n-gate hidden bias separate (needed inside r * (hg_n + bh_n)).
        bi = b_ih + jnp.concatenate([b_hh[:2 * H], jnp.zeros((H,), jnp.float32)])
        bi = pad_gate_cols(bi[None, :])                                   # [1, 3HP]
        bh_n = jnp.pad(b_hh[None, 2 * H:], ((0, 0), (0, HP - H)))         # [1, HP]
        return bi, bh_n

    wi_enc = pad_gate_cols(p['w_ih_enc'].T)                               # [E, 3HP]
    wh_enc = pad_rows(pad_gate_cols(p['w_hh_enc'].T), HP)                 # [HP, 3HP]
    bi_enc, bhn_enc = fold_bias(p['b_ih_enc'], p['b_hh_enc'])

    wi_dec_e = p['w_ih_dec'][:, :E].T                                     # [E, 3H]
    wi_dec_c = pad_rows(pad_gate_cols(p['w_ih_dec'][:, E:].T), HP)        # [HP, 3HP]
    wh_dec = pad_rows(pad_gate_cols(p['w_hh_dec'].T), HP)                 # [HP, 3HP]
    bi_dec, bhn_dec = fold_bias(p['b_ih_dec'], p['b_hh_dec'])

    wfc_e = p['w_fc'][:, :E].T                                            # [E, V]
    wfc_h = p['w_fc'][:, E:E + H].T                                       # [H, V]
    wfc_c = p['w_fc'][:, E + H:].T                                        # [H, V]

    # Fold the one-hot embedding gather into the downstream weights (exact,
    # because the decoder input is a one-hot row selector).
    # TODO(synk): at realistic vocab sizes keep only the [V,3H] gate fusion and
    # route the fc embedding term through the E-wide path (the VxV block below
    # is what blows v7x's 64 MiB VMEM first).
    w_gates_fused = jnp.dot(p['emb_dec'], wi_dec_e, precision=hi)         # [V, 3H]
    w_fc_fused = jnp.dot(p['emb_dec'], wfc_e, precision=hi)               # [V, V]
    w_dec_fused = jnp.concatenate(
        [pad_rows(pad_gate_cols(w_gates_fused), VP),
         pad_rows(jnp.pad(w_fc_fused, ((0, 0), (0, VP - V))), VP)],
        axis=1)                                                           # [VP, 3HP+VP]

    bfc = jnp.concatenate(
        [p['b_fc'], jnp.full((VP - V,), _NEG, jnp.float32)])[None, :]     # [1, VP]

    return dict(
        wi_enc=wi_enc, wh_enc=wh_enc, bi_enc=bi_enc, bhn_enc=bhn_enc,
        w_dec_fused=w_dec_fused, wi_dec_c=wi_dec_c, wh_dec=wh_dec,
        bi_dec=bi_dec, bhn_dec=bhn_dec,
        wfc_h=pad_rows(jnp.pad(wfc_h, ((0, 0), (0, VP - V))), HP),        # [HP, VP]
        wfc_c=pad_rows(jnp.pad(wfc_c, ((0, 0), (0, VP - V))), HP),        # [HP, VP]
        bfc=bfc,
    )


def seq2seq_pallas(src, trg, tf_flags, params):
    S, B = src.shape
    T = trg.shape[0]
    V, E = params['emb_dec'].shape
    H = params['w_hh_enc'].shape[1]
    BP = _round_up(B, 8)       # sublane-aligned batch
    HP = _round_up(H, 128)     # lane-aligned per-gate hidden width
    VP = _round_up(V, 128)     # lane-aligned vocab width
    kp = _prep(params, E, H, V, HP, VP)

    # glue: static src token embedding (padded), fused-weight gather of the
    # known teacher-forced trg tokens (so TF decoder steps need no matmul),
    # int teacher-forcing flags.
    src_emb = params['emb_enc'][src]                                      # [S, B, E]
    src_emb = jnp.pad(src_emb, ((0, 0), (0, BP - B), (0, 0))).reshape(S * BP, E)
    trg_fused = kp['w_dec_fused'][trg]                                    # [T, B, 3HP+VP]
    trg_fused = jnp.pad(trg_fused, ((0, 0), (0, BP - B), (0, 0)))         # [T, BP, 3HP+VP]
    tf = tf_flags.astype(jnp.int32)                                       # [T]

    kernel = functools.partial(_seq2seq_kernel, S=S, T=T, BP=BP, HP=HP, VP=VP)
    vmem = pl.BlockSpec(memory_space=pltpu.MemorySpace.VMEM)
    smem = pl.BlockSpec(memory_space=pltpu.MemorySpace.SMEM)

    ordered = [src_emb, trg_fused, tf,
               kp['wi_enc'], kp['wh_enc'], kp['bi_enc'], kp['bhn_enc'],
               kp['w_dec_fused'], kp['wi_dec_c'], kp['wh_dec'],
               kp['bi_dec'], kp['bhn_dec'],
               kp['wfc_h'], kp['wfc_c'], kp['bfc']]
    in_specs = [vmem, vmem, smem] + [vmem] * (len(ordered) - 3)

    # TODO(synk): on v7x with a batch spanning >1 sublane group, shard the batch
    # over the 2 TensorCores (grid + dimension_semantics=("parallel",)); at BP=8
    # there is nothing to split.
    out = pl.pallas_call(
        kernel,
        out_shape=jax.ShapeDtypeStruct((T, BP, VP), jnp.float32),
        in_specs=in_specs,
        out_specs=vmem,
        scratch_shapes=[pltpu.VMEM((S * BP, 3 * HP), jnp.float32),
                        pltpu.VMEM((BP, 3 * HP + VP), jnp.float32)],
    )(*ordered)
    return out[:, :B, :V]


# ----------------------------- pure-JAX reference ----------------------------

def seq2seq_ref(src, trg, tf_flags, params):
    S, B = src.shape
    T = trg.shape[0]
    V, E = params['emb_dec'].shape
    H = params['w_hh_enc'].shape[1]

    def gru(x, h, w_ih, w_hh, b_ih, b_hh):
        xg = x @ w_ih.T + b_ih
        hg = h @ w_hh.T + b_hh
        r = jax.nn.sigmoid(xg[:, :H] + hg[:, :H])
        z = jax.nn.sigmoid(xg[:, H:2 * H] + hg[:, H:2 * H])
        n = jnp.tanh(xg[:, 2 * H:] + r * hg[:, 2 * H:])
        return (1 - z) * n + z * h

    context = jnp.zeros((B, H), jnp.float32)
    for t in range(S):
        x = params['emb_enc'][src[t]]
        context = gru(x, context, params['w_ih_enc'], params['w_hh_enc'],
                      params['b_ih_enc'], params['b_hh_enc'])

    outputs = [jnp.zeros((B, V), jnp.float32)]
    hidden = context
    inp = trg[0]
    for t in range(1, T):
        emb = params['emb_dec'][inp]
        emb_con = jnp.concatenate([emb, context], axis=1)
        hidden = gru(emb_con, hidden, params['w_ih_dec'], params['w_hh_dec'],
                     params['b_ih_dec'], params['b_hh_dec'])
        out_cat = jnp.concatenate([emb, hidden, context], axis=1)
        pred = out_cat @ params['w_fc'].T + params['b_fc']
        outputs.append(pred)
        top1 = jnp.argmax(pred, axis=1).astype(trg.dtype)
        inp = jnp.where(tf_flags[t] == 1, trg[t], top1)
    return jnp.stack(outputs, axis=0)


# ----------------------------- main ------------------------------------------

if __name__ == "__main__":
    INPUT_DIM, OUTPUT_DIM = 16, 16   # src / trg vocab sizes
    EMB, HID = 8, 16                 # embedding / hidden dims (encoder.hid_dim == decoder.hid_dim)
    S, T, B = 6, 8, 4                # src len, trg len (max_len), batch

    key = jax.random.PRNGKey(0)
    kp_, ksrc, ktrg, ktf = jax.random.split(key, 4)

    params = make_params(kp_, INPUT_DIM, OUTPUT_DIM, EMB, HID)
    src = jax.random.randint(ksrc, (S, B), 0, INPUT_DIM, jnp.int32)
    trg = jax.random.randint(ktrg, (T, B), 0, OUTPUT_DIM, jnp.int32)
    # TODO(synk): python random.random() teacher forcing has no in-kernel equivalent with
    # identical RNG; replaced by a deterministic precomputed flag vector (ratio = 0.5).
    tf_flags = (jax.random.uniform(ktf, (T,)) < 0.5).astype(jnp.int32)

    out = jax.block_until_ready(seq2seq_pallas(src, trg, tf_flags, params))
    ref = seq2seq_ref(src, trg, tf_flags, params)

    assert out.shape == (T, B, OUTPUT_DIM)
    assert jnp.allclose(out, ref, atol=1e-3, rtol=1e-3), float(jnp.max(jnp.abs(out - ref)))
    print("KERNEL_OK")
</pallas_src>

<mosaic_0001>
module attributes {stable_mosaic.version = 11 : i64} {
  func.func @_seq2seq_kernel(%arg0: memref<48x8xf32, #tpu.memory_space<vmem>>, %arg1: memref<8x8x512xf32, #tpu.memory_space<vmem>>, %arg2: memref<8xi32, #tpu.memory_space<smem>>, %arg3: memref<8x384xf32, #tpu.memory_space<vmem>>, %arg4: memref<128x384xf32, #tpu.memory_space<vmem>>, %arg5: memref<1x384xf32, #tpu.memory_space<vmem>>, %arg6: memref<1x128xf32, #tpu.memory_space<vmem>>, %arg7: memref<128x512xf32, #tpu.memory_space<vmem>>, %arg8: memref<128x384xf32, #tpu.memory_space<vmem>>, %arg9: memref<128x384xf32, #tpu.memory_space<vmem>>, %arg10: memref<1x384xf32, #tpu.memory_space<vmem>>, %arg11: memref<1x128xf32, #tpu.memory_space<vmem>>, %arg12: memref<128x128xf32, #tpu.memory_space<vmem>>, %arg13: memref<128x128xf32, #tpu.memory_space<vmem>>, %arg14: memref<1x128xf32, #tpu.memory_space<vmem>>, %arg15: memref<8x8x128xf32, #tpu.memory_space<vmem>>, %arg16: memref<48x384xf32, #tpu.memory_space<vmem>>, %arg17: memref<8x512xf32, #tpu.memory_space<vmem>>) attributes {dimension_semantics = [], scalar_prefetch = 0 : i64, scratch_operands = 2 : i64, tpu.core_type = #tpu.core_type<tc>} {
    %c0 = arith.constant 0 : index
    %c0_0 = arith.constant 0 : index
    %0 = vector.load %arg6[%c0, %c0_0] : memref<1x128xf32, #tpu.memory_space<vmem>>, vector<1x128xf32>
    %c0_1 = arith.constant 0 : index
    %c0_2 = arith.constant 0 : index
    %1 = vector.load %arg11[%c0_1, %c0_2] : memref<1x128xf32, #tpu.memory_space<vmem>>, vector<1x128xf32>
    %c0_3 = arith.constant 0 : index
    %c0_4 = arith.constant 0 : index
    %2 = vector.load %arg0[%c0_3, %c0_4] : memref<48x8xf32, #tpu.memory_space<vmem>>, vector<48x8xf32>
    %c0_5 = arith.constant 0 : index
    %c0_6 = arith.constant 0 : index
    %3 = vector.load %arg3[%c0_5, %c0_6] : memref<8x384xf32, #tpu.memory_space<vmem>>, vector<8x384xf32>
    %cst = arith.constant dense<0.000000e+00> : vector<48x384xf32>
    %4 = tpu.matmul %2, %3, %cst {dimension_numbers = #tpu.dot_dimension_numbers<[1], [0], [0], [1], [0, 0, 1, 1], [], []>} : vector<48x8xf32>, vector<8x384xf32>, vector<48x384xf32> -> vector<48x384xf32>
    %c0_7 = arith.constant 0 : index
    %c0_8 = arith.constant 0 : index
    %5 = vector.load %arg5[%c0_7, %c0_8] : memref<1x384xf32, #tpu.memory_space<vmem>>, vector<1x384xf32>
    %6 = vector.broadcast %5 : vector<1x384xf32> to vector<48x384xf32>
    %7 = arith.addf %4, %6 : vector<48x384xf32>
    %c0_9 = arith.constant 0 : index
    %c0_10 = arith.constant 0 : index
    %8 = vector.load %arg16[%c0_9, %c0_10] : memref<48x384xf32, #tpu.memory_space<vmem>>, vector<48x384xf32>
    tpu.vector_store %arg16[%c0_9, %c0_10], %7 {strides = array<i32>} : memref<48x384xf32, #tpu.memory_space<vmem>>, vector<48x384xf32>,
    %cst_11 = arith.constant 0.000000e+00 : f32
    %9 = vector.broadcast %cst_11 : f32 to vector<8x128xf32>
    %c0_i32 = arith.constant 0 : i32
    %c8_i32 = arith.constant 8 : i32
    %10 = arith.muli %c0_i32, %c8_i32 : i32
    %11 = tpu.assume_multiple %10, 8 : i32
    %12 = arith.index_cast %11 : i32 to index
    %c0_12 = arith.constant 0 : index
    %13 = vector.load %arg16[%12, %c0_12] : memref<48x384xf32, #tpu.memory_space<vmem>>, vector<8x384xf32>
    %c0_13 = arith.constant 0 : index
    %c0_14 = arith.constant 0 : index
    %14 = vector.load %arg4[%c0_13, %c0_14] : memref<128x384xf32, #tpu.memory_space<vmem>>, vector<128x384xf32>
    %cst_15 = arith.constant dense<0.000000e+00> : vector<8x384xf32>
    %15 = tpu.matmul %9, %14, %cst_15 {dimension_numbers = #tpu.dot_dimension_numbers<[1], [0], [0], [1], [0, 0, 1, 1], [], []>} : vector<8x128xf32>, vector<128x384xf32>, vector<8x384xf32> -> vector<8x384xf32>
    %16 = vector.extract_strided_slice %13 {offsets = [0, 0], sizes = [8, 128], strides = [1, 1]} : vector<8x384xf32> to vector<8x128xf32>
    %17 = vector.extract_strided_slice %15 {offsets = [0, 0], sizes = [8, 128], strides = [1, 1]} : vector<8x384xf32> to vector<8x128xf32>
    %18 = arith.addf %16, %17 : vector<8x128xf32>
    %19 = arith.negf %18 : vector<8x128xf32>
    %20 = math.exp %19 : vector<8x128xf32>
    %cst_16 = arith.constant 1.000000e+00 : f32
    %21 = vector.broadcast %cst_16 : f32 to vector<8x128xf32>
    %22 = arith.addf %21, %20 : vector<8x128xf32>
    %23 = arith.divf %21, %22 : vector<8x128xf32>
    %24 = vector.extract_strided_slice %13 {offsets = [0, 128], sizes = [8, 128], strides = [1, 1]} : vector<8x384xf32> to vector<8x128xf32>
    %25 = vector.extract_strided_slice %15 {offsets = [0, 128], sizes = [8, 128], strides = [1, 1]} : vector<8x384xf32> to vector<8x128xf32>
    %26 = arith.addf %24, %25 : vector<8x128xf32>
    %27 = arith.negf %26 : vector<8x128xf32>
    %28 = math.exp %27 : vector<8x128xf32>
    %cst_17 = arith.constant 1.000000e+00 : f32
    %29 = vector.broadcast %cst_17 : f32 to vector<8x128xf32>
    %30 = arith.addf %29, %28 : vector<8x128xf32>
    %31 = arith.divf %29, %30 : vector<8x128xf32>
    %32 = vector.extract_strided_slice %13 {offsets = [0, 256], sizes = [8, 128], strides = [1, 1]} : vector<8x384xf32> to vector<8x128xf32>
    %33 = vector.extract_strided_slice %15 {offsets = [0, 256], sizes = [8, 128], strides = [1, 1]} : vector<8x384xf32> to vector<8x128xf32>
    %34 = vector.broadcast %0 : vector<1x128xf32> to vector<8x128xf32>
    %35 = arith.addf %33, %34 : vector<8x128xf32>
    %36 = arith.mulf %23, %35 : vector<8x128xf32>
    %37 = arith.addf %32, %36 : vector<8x128xf32>
    %38 = math.tanh %37 : vector<8x128xf32>
    %39 = arith.subf %9, %38 : vector<8x128xf32>
    %40 = arith.mulf %31, %39 : vector<8x128xf32>
    %41 = arith.addf %38, %40 : vector<8x128xf32>
    %c1_i32 = arith.constant 1 : i32
    %c8_i32_18 = arith.constant 8 : i32
    %42 = arith.muli %c1_i32, %c8_i32_18 : i32
    %43 = tpu.assume_multiple %42, 8 : i32
    %44 = arith.index_cast %43 : i32 to index
    %c0_19 = arith.constant 0 : index
    %45 = vector.load %arg16[%44, %c0_19] : memref<48x384xf32, #tpu.memory_space<vmem>>, vector<8x384xf32>
    %c0_20 = arith.constant 0 : index
    %c0_21 = arith.constant 0 : index
    %46 = vector.load %arg4[%c0_20, %c0_21] : memref<128x384xf32, #tpu.memory_space<vmem>>, vector<128x384xf32>
    %cst_22 = arith.constant dense<0.000000e+00> : vector<8x384xf32>
    %47 = tpu.matmul %41, %46, %cst_22 {dimension_numbers = #tpu.dot_dimension_numbers<[1], [0], [0], [1], [0, 0, 1, 1], [], []>} : vector<8x128xf32>, vector<128x384xf32>, vector<8x384xf32> -> vector<8x384xf32>
    %48 = vector.extract_strided_slice %45 {offsets = [0, 0], sizes = [8, 128], strides = [1, 1]} : vector<8x384xf32> to vector<8x128xf32>
    %49 = vector.extract_strided_slice %47 {offsets = [0, 0], sizes = [8, 128], strides = [1, 1]} : vector<8x384xf32> to vector<8x128xf32>
    %50 = arith.addf %48, %49 : vector<8x128xf32>
    %51 = arith.negf %50 : vector<8x128xf32>
    %52 = math.exp %51 : vector<8x128xf32>
    %cst_23 = arith.constant 1.000000e+00 : f32
    %53 = vector.broadcast %cst_23 : f32 to vector<8x128xf32>
    %54 = arith.addf %53, %52 : vector<8x128xf32>
    %55 = arith.divf %53, %54 : vector<8x128xf32>
    %56 = vector.extract_strided_slice %45 {offsets = [0, 128], sizes = [8, 128], strides = [1, 1]} : vector<8x384xf32> to vector<8x128xf32>
    %57 = vector.extract_strided_slice %47 {offsets = [0, 128], sizes = [8, 128], strides = [1, 1]} : vector<8x384xf32> to vector<8x128xf32>
    %58 = arith.addf %56, %57 : vector<8x128xf32>
    %59 = arith.negf %58 : vector<8x128xf32>
    %60 = math.exp %59 : vector<8x128xf32>
    %cst_24 = arith.constant 1.000000e+00 : f32
    %61 = vector.broadcast %cst_24 : f32 to vector<8x128xf32>
    %62 = arith.addf %61, %60 : vector<8x128xf32>
    %63 = arith.divf %61, %62 : vector<8x128xf32>
    %64 = vector.extract_strided_slice %45 {offsets = [0, 256], sizes = [8, 128], strides = [1, 1]} : vector<8x384xf32> to vector<8x128xf32>
    %65 = vector.extract_strided_slice %47 {offsets = [0, 256], sizes = [8, 128], strides = [1, 1]} : vector<8x384xf32> to vector<8x128xf32>
    %66 = vector.broadcast %0 : vector<1x128xf32> to vector<8x128xf32>
    %67 = arith.addf %65, %66 : vector<8x128xf32>
    %68 = arith.mulf %55, %67 : vector<8x128xf32>
    %69 = arith.addf %64, %68 : vector<8x128xf32>
    %70 = math.tanh %69 : vector<8x128xf32>
    %71 = arith.subf %41, %70 : vector<8x128xf32>
    %72 = arith.mulf %63, %71 : vector<8x128xf32>
    %73 = arith.addf %70, %72 : vector<8x128xf32>
    %c2_i32 = arith.constant 2 : i32
    %c8_i32_25 = arith.constant 8 : i32
    %74 = arith.muli %c2_i32, %c8_i32_25 : i32
    %75 = tpu.assume_multiple %74, 8 : i32
    %76 = arith.index_cast %75 : i32 to index
    %c0_26 = arith.constant 0 : index
    %77 = vector.load %arg16[%76, %c0_26] : memref<48x384xf32, #tpu.memory_space<vmem>>, vector<8x384xf32>
    %c0_27 = arith.constant 0 : index
    %c0_28 = arith.constant 0 : index
    %78 = vector.load %arg4[%c0_27, %c0_28] : memref<128x384xf32, #tpu.memory_space<vmem>>, vector<128x384xf32>
    %cst_29 = arith.constant dense<0.000000e+00> : vector<8x384xf32>
    %79 = tpu.matmul %73, %78, %cst_29 {dimension_numbers = #tpu.dot_dimension_numbers<[1], [0], [0], [1], [0, 0, 1, 1], [], []>} : vector<8x128xf32>, vector<128x384xf32>, vector<8x384xf32> -> vector<8x384xf32>
    %80 = vector.extract_strided_slice %77 {offsets = [0, 0], sizes = [8, 128], strides = [1, 1]} : vector<8x384xf32> to vector<8x128xf32>
    %81 = vector.extract_strided_slice %79 {offsets = [0, 0], sizes = [8, 128], strides = [1, 1]} : vector<8x384xf32> to vector<8x128xf32>
    %82 = arith.addf %80, %81 : vector<8x128xf32>
    %83 = arith.negf %82 : vector<8x128xf32>
    %84 = math.exp %83 : vector<8x128xf32>
    %cst_30 = arith.constant 1.000000e+00 : f32
    %85 = vector.broadcast %cst_30 : f32 to vector<8x128xf32>
    %86 = arith.addf %85, %84 : vector<8x128xf32>
    %87 = arith.divf %85, %86 : vector<8x128xf32>
    %88 = vector.extract_strided_slice %77 {offsets = [0, 128], sizes = [8, 128], strides = [1, 1]} : vector<8x384xf32> to vector<8x128xf32>
    %89 = vector.extract_strided_slice %79 {offsets = [0, 128], sizes = [8, 128], strides = [1, 1]} : vector<8x384xf32> to vector<8x128xf32>
    %90 = arith.addf %88, %89 : vector<8x128xf32>
    %91 = arith.negf %90 : vector<8x128xf32>
    %92 = math.exp %91 : vector<8x128xf32>
    %cst_31 = arith.constant 1.000000e+00 : f32
    %93 = vector.broadcast %cst_31 : f32 to vector<8x128xf32>
    %94 = arith.addf %93, %92 : vector<8x128xf32>
    %95 = arith.divf %93, %94 : vector<8x128xf32>
    %96 = vector.extract_strided_slice %77 {offsets = [0, 256], sizes = [8, 128], strides = [1, 1]} : vector<8x384xf32> to vector<8x128xf32>
    %97 = vector.extract_strided_slice %79 {offsets = [0, 256], sizes = [8, 128], strides = [1, 1]} : vector<8x384xf32> to vector<8x128xf32>
    %98 = vector.broadcast %0 : vector<1x128xf32> to vector<8x128xf32>
    %99 = arith.addf %97, %98 : vector<8x128xf32>
    %100 = arith.mulf %87, %99 : vector<8x128xf32>
    %101 = arith.addf %96, %100 : vector<8x128xf32>
    %102 = math.tanh %101 : vector<8x128xf32>
    %103 = arith.subf %73, %102 : vector<8x128xf32>
    %104 = arith.mulf %95, %103 : vector<8x128xf32>
    %105 = arith.addf %102, %104 : vector<8x128xf32>
    %c3_i32 = arith.constant 3 : i32
    %c8_i32_32 = arith.constant 8 : i32
    %106 = arith.muli %c3_i32, %c8_i32_32 : i32
    %107 = tpu.assume_multiple %106, 8 : i32
    %108 = arith.index_cast %107 : i32 to index
    %c0_33 = arith.constant 0 : index
    %109 = vector.load %arg16[%108, %c0_33] : memref<48x384xf32, #tpu.memory_space<vmem>>, vector<8x384xf32>
    %c0_34 = arith.constant 0 : index
    %c0_35 = arith.constant 0 : index
    %110 = vector.load %arg4[%c0_34, %c0_35] : memref<128x384xf32, #tpu.memory_space<vmem>>, vector<128x384xf32>
    %cst_36 = arith.constant dense<0.000000e+00> : vector<8x384xf32>
    %111 = tpu.matmul %105, %110, %cst_36 {dimension_numbers = #tpu.dot_dimension_numbers<[1], [0], [0], [1], [0, 0, 1, 1], [], []>} : vector<8x128xf32>, vector<128x384xf32>, vector<8x384xf32> -> vector<8x384xf32>
    %112 = vector.extract_strided_slice %109 {offsets = [0, 0], sizes = [8, 128], strides = [1, 1]} : vector<8x384xf32> to vector<8x128xf32>
    %113 = vector.extract_strided_slice %111 {offsets = [0, 0], sizes = [8, 128], strides = [1, 1]} : vector<8x384xf32> to vector<8x128xf32>
    %114 = arith.addf %112, %113 : vector<8x128xf32>
    %115 = arith.negf %114 : vector<8x128xf32>
    %116 = math.exp %115 : vector<8x128xf32>
    %cst_37 = arith.constant 1.000000e+00 : f32
    %117 = vector.broadcast %cst_37 : f32 to vector<8x128xf32>
    %118 = arith.addf %117, %116 : vector<8x128xf32>
    %119 = arith.divf %117, %118 : vector<8x128xf32>
    %120 = vector.extract_strided_slice %109 {offsets = [0, 128], sizes = [8, 128], strides = [1, 1]} : vector<8x384xf32> to vector<8x128xf32>
    %121 = vector.extract_strided_slice %111 {offsets = [0, 128], sizes = [8, 128], strides = [1, 1]} : vector<8x384xf32> to vector<8x128xf32>
    %122 = arith.addf %120, %121 : vector<8x128xf32>
    %123 = arith.negf %122 : vector<8x128xf32>
    %124 = math.exp %123 : vector<8x128xf32>
    %cst_38 = arith.constant 1.000000e+00 : f32
    %125 = vector.broadcast %cst_38 : f32 to vector<8x128xf32>
    %126 = arith.addf %125, %124 : vector<8x128xf32>
    %127 = arith.divf %125, %126 : vector<8x128xf32>
    %128 = vector.extract_strided_slice %109 {offsets = [0, 256], sizes = [8, 128], strides = [1, 1]} : vector<8x384xf32> to vector<8x128xf32>
    %129 = vector.extract_strided_slice %111 {offsets = [0, 256], sizes = [8, 128], strides = [1, 1]} : vector<8x384xf32> to vector<8x128xf32>
    %130 = vector.broadcast %0 : vector<1x128xf32> to vector<8x128xf32>
    %131 = arith.addf %129, %130 : vector<8x128xf32>
    %132 = arith.mulf %119, %131 : vector<8x128xf32>
    %133 = arith.addf %128, %132 : vector<8x128xf32>
    %134 = math.tanh %133 : vector<8x128xf32>
    %135 = arith.subf %105, %134 : vector<8x128xf32>
    %136 = arith.mulf %127, %135 : vector<8x128xf32>
    %137 = arith.addf %134, %136 : vector<8x128xf32>
    %c4_i32 = arith.constant 4 : i32
    %c8_i32_39 = arith.constant 8 : i32
    %138 = arith.muli %c4_i32, %c8_i32_39 : i32
    %139 = tpu.assume_multiple %138, 8 : i32
    %140 = arith.index_cast %139 : i32 to index
    %c0_40 = arith.constant 0 : index
    %141 = vector.load %arg16[%140, %c0_40] : memref<48x384xf32, #tpu.memory_space<vmem>>, vector<8x384xf32>
    %c0_41 = arith.constant 0 : index
    %c0_42 = arith.constant 0 : index
    %142 = vector.load %arg4[%c0_41, %c0_42] : memref<128x384xf32, #tpu.memory_space<vmem>>, vector<128x384xf32>
    %cst_43 = arith.constant dense<0.000000e+00> : vector<8x384xf32>
    %143 = tpu.matmul %137, %142, %cst_43 {dimension_numbers = #tpu.dot_dimension_numbers<[1], [0], [0], [1], [0, 0, 1, 1], [], []>} : vector<8x128xf32>, vector<128x384xf32>, vector<8x384xf32> -> vector<8x384xf32>
    %144 = vector.extract_strided_slice %141 {offsets = [0, 0], sizes = [8, 128], strides = [1, 1]} : vector<8x384xf32> to vector<8x128xf32>
    %145 = vector.extract_strided_slice %143 {offsets = [0, 0], sizes = [8, 128], strides = [1, 1]} : vector<8x384xf32> to vector<8x128xf32>
    %146 = arith.addf %144, %145 : vector<8x128xf32>
    %147 = arith.negf %146 : vector<8x128xf32>
    %148 = math.exp %147 : vector<8x128xf32>
    %cst_44 = arith.constant 1.000000e+00 : f32
    %149 = vector.broadcast %cst_44 : f32 to vector<8x128xf32>
    %150 = arith.addf %149, %148 : vector<8x128xf32>
    %151 = arith.divf %149, %150 : vector<8x128xf32>
    %152 = vector.extract_strided_slice %141 {offsets = [0, 128], sizes = [8, 128], strides = [1, 1]} : vector<8x384xf32> to vector<8x128xf32>
    %153 = vector.extract_strided_slice %143 {offsets = [0, 128], sizes = [8, 128], strides = [1, 1]} : vector<8x384xf32> to vector<8x128xf32>
    %154 = arith.addf %152, %153 : vector<8x128xf32>
    %155 = arith.negf %154 : vector<8x128xf32>
    %156 = math.exp %155 : vector<8x128xf32>
    %cst_45 = arith.constant 1.000000e+00 : f32
    %157 = vector.broadcast %cst_45 : f32 to vector<8x128xf32>
    %158 = arith.addf %157, %156 : vector<8x128xf32>
    %159 = arith.divf %157, %158 : vector<8x128xf32>
    %160 = vector.extract_strided_slice %141 {offsets = [0, 256], sizes = [8, 128], strides = [1, 1]} : vector<8x384xf32> to vector<8x128xf32>
    %161 = vector.extract_strided_slice %143 {offsets = [0, 256], sizes = [8, 128], strides = [1, 1]} : vector<8x384xf32> to vector<8x128xf32>
    %162 = vector.broadcast %0 : vector<1x128xf32> to vector<8x128xf32>
    %163 = arith.addf %161, %162 : vector<8x128xf32>
    %164 = arith.mulf %151, %163 : vector<8x128xf32>
    %165 = arith.addf %160, %164 : vector<8x128xf32>
    %166 = math.tanh %165 : vector<8x128xf32>
    %167 = arith.subf %137, %166 : vector<8x128xf32>
    %168 = arith.mulf %159, %167 : vector<8x128xf32>
    %169 = arith.addf %166, %168 : vector<8x128xf32>
    %c5_i32 = arith.constant 5 : i32
    %c8_i32_46 = arith.constant 8 : i32
    %170 = arith.muli %c5_i32, %c8_i32_46 : i32
    %171 = tpu.assume_multiple %170, 8 : i32
    %172 = arith.index_cast %171 : i32 to index
    %c0_47 = arith.constant 0 : index
    %173 = vector.load %arg16[%172, %c0_47] : memref<48x384xf32, #tpu.memory_space<vmem>>, vector<8x384xf32>
    %c0_48 = arith.constant 0 : index
    %c0_49 = arith.constant 0 : index
    %174 = vector.load %arg4[%c0_48, %c0_49] : memref<128x384xf32, #tpu.memory_space<vmem>>, vector<128x384xf32>
    %cst_50 = arith.constant dense<0.000000e+00> : vector<8x384xf32>
    %175 = tpu.matmul %169, %174, %cst_50 {dimension_numbers = #tpu.dot_dimension_numbers<[1], [0], [0], [1], [0, 0, 1, 1], [], []>} : vector<8x128xf32>, vector<128x384xf32>, vector<8x384xf32> -> vector<8x384xf32>
    %176 = vector.extract_strided_slice %173 {offsets = [0, 0], sizes = [8, 128], strides = [1, 1]} : vector<8x384xf32> to vector<8x128xf32>
    %177 = vector.extract_strided_slice %175 {offsets = [0, 0], sizes = [8, 128], strides = [1, 1]} : vector<8x384xf32> to vector<8x128xf32>
    %178 = arith.addf %176, %177 : vector<8x128xf32>
    %179 = arith.negf %178 : vector<8x128xf32>
    %180 = math.exp %179 : vector<8x128xf32>
    %cst_51 = arith.constant 1.000000e+00 : f32
    %181 = vector.broadcast %cst_51 : f32 to vector<8x128xf32>
    %182 = arith.addf %181, %180 : vector<8x128xf32>
    %183 = arith.divf %181, %182 : vector<8x128xf32>
    %184 = vector.extract_strided_slice %173 {offsets = [0, 128], sizes = [8, 128], strides = [1, 1]} : vector<8x384xf32> to vector<8x128xf32>
    %185 = vector.extract_strided_slice %175 {offsets = [0, 128], sizes = [8, 128], strides = [1, 1]} : vector<8x384xf32> to vector<8x128xf32>
    %186 = arith.addf %184, %185 : vector<8x128xf32>
    %187 = arith.negf %186 : vector<8x128xf32>
    %188 = math.exp %187 : vector<8x128xf32>
    %cst_52 = arith.constant 1.000000e+00 : f32
    %189 = vector.broadcast %cst_52 : f32 to vector<8x128xf32>
    %190 = arith.addf %189, %188 : vector<8x128xf32>
    %191 = arith.divf %189, %190 : vector<8x128xf32>
    %192 = vector.extract_strided_slice %173 {offsets = [0, 256], sizes = [8, 128], strides = [1, 1]} : vector<8x384xf32> to vector<8x128xf32>
    %193 = vector.extract_strided_slice %175 {offsets = [0, 256], sizes = [8, 128], strides = [1, 1]} : vector<8x384xf32> to vector<8x128xf32>
    %194 = vector.broadcast %0 : vector<1x128xf32> to vector<8x128xf32>
    %195 = arith.addf %193, %194 : vector<8x128xf32>
    %196 = arith.mulf %183, %195 : vector<8x128xf32>
    %197 = arith.addf %192, %196 : vector<8x128xf32>
    %198 = math.tanh %197 : vector<8x128xf32>
    %199 = arith.subf %169, %198 : vector<8x128xf32>
    %200 = arith.mulf %191, %199 : vector<8x128xf32>
    %201 = arith.addf %198, %200 : vector<8x128xf32>
    %c6_i32 = arith.constant 6 : i32
    %c0_53 = arith.constant 0 : index
    %c0_54 = arith.constant 0 : index
    %202 = vector.load %arg8[%c0_53, %c0_54] : memref<128x384xf32, #tpu.memory_space<vmem>>, vector<128x384xf32>
    %cst_55 = arith.constant dense<0.000000e+00> : vector<8x384xf32>
    %203 = tpu.matmul %201, %202, %cst_55 {dimension_numbers = #tpu.dot_dimension_numbers<[1], [0], [0], [1], [0, 0, 1, 1], [], []>} : vector<8x128xf32>, vector<128x384xf32>, vector<8x384xf32> -> vector<8x384xf32>
    %c0_56 = arith.constant 0 : index
    %c0_57 = arith.constant 0 : index
    %204 = vector.load %arg10[%c0_56, %c0_57] : memref<1x384xf32, #tpu.memory_space<vmem>>, vector<1x384xf32>
    %205 = vector.broadcast %204 : vector<1x384xf32> to vector<8x384xf32>
    %206 = arith.addf %203, %205 : vector<8x384xf32>
    %c0_58 = arith.constant 0 : index
    %c0_59 = arith.constant 0 : index
    %207 = vector.load %arg13[%c0_58, %c0_59] : memref<128x128xf32, #tpu.memory_space<vmem>>, vector<128x128xf32>
    %cst_60 = arith.constant dense<0.000000e+00> : vector<8x128xf32>
    %208 = tpu.matmul %201, %207, %cst_60 {dimension_numbers = #tpu.dot_dimension_numbers<[1], [0], [0], [1], [0, 0, 1, 1], [], []>} : vector<8x128xf32>, vector<128x128xf32>, vector<8x128xf32> -> vector<8x128xf32>
    %c0_61 = arith.constant 0 : index
    %c0_62 = arith.constant 0 : index
    %209 = vector.load %arg14[%c0_61, %c0_62] : memref<1x128xf32, #tpu.memory_space<vmem>>, vector<1x128xf32>
    %210 = vector.broadcast %209 : vector<1x128xf32> to vector<8x128xf32>
    %211 = arith.addf %208, %210 : vector<8x128xf32>
    %cst_63 = arith.constant 0.000000e+00 : f32
    %212 = vector.broadcast %cst_63 : f32 to vector<8x128xf32>
    %c0_64 = arith.constant 0 : index
    %c0_65 = arith.constant 0 : index
    %c0_66 = arith.constant 0 : index
    %213 = vector.load %arg15[%c0_64, %c0_65, %c0_66] : memref<8x8x128xf32, #tpu.memory_space<vmem>>, vector<1x8x128xf32>
    %214 = vector.shape_cast %213 : vector<1x8x128xf32> to vector<8x128xf32>
    %215 = vector.shape_cast %212 : vector<8x128xf32> to vector<1x8x128xf32>
    tpu.vector_store %arg15[%c0_64, %c0_65, %c0_66], %215 {strides = array<i32>} : memref<8x8x128xf32, #tpu.memory_space<vmem>>, vector<1x8x128xf32>,
    %216 = tpu.iota {dimensions = array<i32: 1>} : vector<8x128xi32>
    %c0_67 = arith.constant 0 : index
    %c0_68 = arith.constant 0 : index
    %c0_69 = arith.constant 0 : index
    %217 = vector.load %arg1[%c0_67, %c0_68, %c0_69] : memref<8x8x512xf32, #tpu.memory_space<vmem>>, vector<1x8x512xf32>
    %218 = vector.shape_cast %217 : vector<1x8x512xf32> to vector<8x512xf32>
    %c0_70 = arith.constant 0 : index
    %c0_71 = arith.constant 0 : index
    %219 = vector.load %arg17[%c0_70, %c0_71] : memref<8x512xf32, #tpu.memory_space<vmem>>, vector<8x512xf32>
    tpu.vector_store %arg17[%c0_70, %c0_71], %218 {strides = array<i32>} : memref<8x512xf32, #tpu.memory_space<vmem>>, vector<8x512xf32>,
    %c1_i32_72 = arith.constant 1 : i32
    %c0_73 = arith.constant 0 : index
    %c0_74 = arith.constant 0 : index
    %220 = vector.load %arg17[%c0_73, %c0_74] : memref<8x512xf32, #tpu.memory_space<vmem>>, vector<8x512xf32>
    %221 = vector.extract_strided_slice %220 {offsets = [0, 0], sizes = [8, 384], strides = [1, 1]} : vector<8x512xf32> to vector<8x384xf32>
    %222 = arith.addf %221, %206 : vector<8x384xf32>
    %c0_75 = arith.constant 0 : index
    %c0_76 = arith.constant 0 : index
    %223 = vector.load %arg9[%c0_75, %c0_76] : memref<128x384xf32, #tpu.memory_space<vmem>>, vector<128x384xf32>
    %cst_77 = arith.constant dense<0.000000e+00> : vector<8x384xf32>
    %224 = tpu.matmul %201, %223, %cst_77 {dimension_numbers = #tpu.dot_dimension_numbers<[1], [0], [0], [1], [0, 0, 1, 1], [], []>} : vector<8x128xf32>, vector<128x384xf32>, vector<8x384xf32> -> vector<8x384xf32>
    %225 = vector.extract_strided_slice %222 {offsets = [0, 0], sizes = [8, 128], strides = [1, 1]} : vector<8x384xf32> to vector<8x128xf32>
    %226 = vector.extract_strided_slice %224 {offsets = [0, 0], sizes = [8, 128], strides = [1, 1]} : vector<8x384xf32> to vector<8x128xf32>
    %227 = arith.addf %225, %226 : vector<8x128xf32>
    %228 = arith.negf %227 : vector<8x128xf32>
    %229 = math.exp %228 : vector<8x128xf32>
    %cst_78 = arith.constant 1.000000e+00 : f32
    %230 = vector.broadcast %cst_78 : f32 to vector<8x128xf32>
    %231 = arith.addf %230, %229 : vector<8x128xf32>
    %232 = arith.divf %230, %231 : vector<8x128xf32>
    %233 = vector.extract_strided_slice %222 {offsets = [0, 128], sizes = [8, 128], strides = [1, 1]} : vector<8x384xf32> to vector<8x128xf32>
    %234 = vector.extract_strided_slice %224 {offsets = [0, 128], sizes = [8, 128], strides = [1, 1]} : vector<8x384xf32> to vector<8x128xf32>
    %235 = arith.addf %233, %234 : vector<8x128xf32>
    %236 = arith.negf %235 : vector<8x128xf32>
    %237 = math.exp %236 : vector<8x128xf32>
    %cst_79 = arith.constant 1.000000e+00 : f32
    %238 = vector.broadcast %cst_79 : f32 to vector<8x128xf32>
    %239 = arith.addf %238, %237 : vector<8x128xf32>
    %240 = arith.divf %238, %239 : vector<8x128xf32>
    %241 = vector.extract_strided_slice %222 {offsets = [0, 256], sizes = [8, 128], strides = [1, 1]} : vector<8x384xf32> to vector<8x128xf32>
    %242 = vector.extract_strided_slice %224 {offsets = [0, 256], sizes = [8, 128], strides = [1, 1]} : vector<8x384xf32> to vector<8x128xf32>
    %243 = vector.broadcast %1 : vector<1x128xf32> to vector<8x128xf32>
    %244 = arith.addf %242, %243 : vector<8x128xf32>
    %245 = arith.mulf %232, %244 : vector<8x128xf32>
    %246 = arith.addf %241, %245 : vector<8x128xf32>
    %247 = math.tanh %246 : vector<8x128xf32>
    %248 = arith.subf %201, %247 : vector<8x128xf32>
    %249 = arith.mulf %240, %248 : vector<8x128xf32>
    %250 = arith.addf %247, %249 : vector<8x128xf32>
    %251 = vector.extract_strided_slice %220 {offsets = [0, 384], sizes = [8, 128], strides = [1, 1]} : vector<8x512xf32> to vector<8x128xf32>
    %c0_80 = arith.constant 0 : index
    %c0_81 = arith.constant 0 : index
    %252 = vector.load %arg12[%c0_80, %c0_81] : memref<128x128xf32, #tpu.memory_space<vmem>>, vector<128x128xf32>
    %cst_82 = arith.constant dense<0.000000e+00> : vector<8x128xf32>
    %253 = tpu.matmul %250, %252, %cst_82 {dimension_numbers = #tpu.dot_dimension_numbers<[1], [0], [0], [1], [0, 0, 1, 1], [], []>} : vector<8x128xf32>, vector<128x128xf32>, vector<8x128xf32> -> vector<8x128xf32>
    %254 = arith.addf %251, %253 : vector<8x128xf32>
    %255 = arith.addf %254, %211 : vector<8x128xf32>
    %256 = arith.index_cast %c1_i32_72 : i32 to index
    %c0_83 = arith.constant 0 : index
    %c0_84 = arith.constant 0 : index
    %257 = vector.load %arg15[%256, %c0_83, %c0_84] : memref<8x8x128xf32, #tpu.memory_space<vmem>>, vector<1x8x128xf32>
    %258 = vector.shape_cast %257 : vector<1x8x128xf32> to vector<8x128xf32>
    %259 = vector.shape_cast %255 : vector<8x128xf32> to vector<1x8x128xf32>
    tpu.vector_store %arg15[%256, %c0_83, %c0_84], %259 {strides = array<i32>} : memref<8x8x128xf32, #tpu.memory_space<vmem>>, vector<1x8x128xf32>,
    %260 = arith.index_cast %c1_i32_72 : i32 to index
    %261 = memref.load %arg2[%260] : memref<8xi32, #tpu.memory_space<smem>>
    %c1_i32_85 = arith.constant 1 : i32
    %262 = arith.cmpi eq, %261, %c1_i32_85 : i32
    %c7_i32 = arith.constant 7 : i32
    %263 = arith.cmpi eq, %c1_i32_72, %c7_i32 : i32
    %264 = arith.ori %262, %263 : i1
    %265 = arith.extui %264 : i1 to i32
    %c0_i32_86 = arith.constant 0 : i32
    %266 = arith.cmpi ne, %265, %c0_i32_86 : i32
    scf.if %266 {
      %570 = arith.index_cast %c1_i32_72 : i32 to index
      %c0_197 = arith.constant 0 : index
      %c0_198 = arith.constant 0 : index
      %571 = vector.load %arg1[%570, %c0_197, %c0_198] : memref<8x8x512xf32, #tpu.memory_space<vmem>>, vector<1x8x512xf32>
      %572 = vector.shape_cast %571 : vector<1x8x512xf32> to vector<8x512xf32>
      %c0_199 = arith.constant 0 : index
      %c0_200 = arith.constant 0 : index
      %573 = vector.load %arg17[%c0_199, %c0_200] : memref<8x512xf32, #tpu.memory_space<vmem>>, vector<8x512xf32>
      tpu.vector_store %arg17[%c0_199, %c0_200], %572 {strides = array<i32>} : memref<8x512xf32, #tpu.memory_space<vmem>>, vector<8x512xf32>,
    } else {
    }
    %true = arith.constant true
    %267 = arith.xori %264, %true : i1
    %268 = arith.extui %267 : i1 to i32
    %c0_i32_87 = arith.constant 0 : i32
    %269 = arith.cmpi ne, %268, %c0_i32_87 : i32
    scf.if %269 {
      %cst_197 = arith.constant dense<0xFF800000> : vector<8xf32>
      %570 = vector.multi_reduction <maximumf>, %255, %cst_197 [1] : vector<8x128xf32> to vector<8xf32>
      %571 = vector.shape_cast %570 : vector<8xf32> to vector<8x1xf32>
      %572 = vector.broadcast %571 : vector<8x1xf32> to vector<8x128xf32>
      %573 = arith.cmpf oeq, %255, %572 : vector<8x128xf32>
      %c128_i32 = arith.constant 128 : i32
      %574 = vector.broadcast %c128_i32 : i32 to vector<8x128xi32>
      %575 = arith.select %573, %216, %574 : vector<8x128xi1>, vector<8x128xi32>
      %cst_198 = arith.constant dense<2147483647> : vector<8xi32>
      %576 = vector.multi_reduction <minsi>, %575, %cst_198 [1] : vector<8x128xi32> to vector<8xi32>
      %577 = vector.shape_cast %576 : vector<8xi32> to vector<8x1xi32>
      %578 = vector.broadcast %577 : vector<8x1xi32> to vector<8x128xi32>
      %579 = arith.cmpi eq, %216, %578 : vector<8x128xi32>
      %580 = arith.extui %579 : vector<8x128xi1> to vector<8x128xi32>
      %581 = arith.sitofp %580 : vector<8x128xi32> to vector<8x128xf32>
      %c0_199 = arith.constant 0 : index
      %c0_200 = arith.constant 0 : index
      %582 = vector.load %arg7[%c0_199, %c0_200] : memref<128x512xf32, #tpu.memory_space<vmem>>, vector<128x512xf32>
      %cst_201 = arith.constant dense<0.000000e+00> : vector<8x512xf32>
      %583 = tpu.matmul %581, %582, %cst_201 {dimension_numbers = #tpu.dot_dimension_numbers<[1], [0], [0], [1], [0, 0, 1, 1], [], []>} : vector<8x128xf32>, vector<128x512xf32>, vector<8x512xf32> -> vector<8x512xf32>
      %c0_202 = arith.constant 0 : index
      %c0_203 = arith.constant 0 : index
      %584 = vector.load %arg17[%c0_202, %c0_203] : memref<8x512xf32, #tpu.memory_space<vmem>>, vector<8x512xf32>
      tpu.vector_store %arg17[%c0_202, %c0_203], %583 {strides = array<i32>} : memref<8x512xf32, #tpu.memory_space<vmem>>, vector<8x512xf32>,
    } else {
    }
    %c2_i32_88 = arith.constant 2 : i32
    %c0_89 = arith.constant 0 : index
    %c0_90 = arith.constant 0 : index
    %270 = vector.load %arg17[%c0_89, %c0_90] : memref<8x512xf32, #tpu.memory_space<vmem>>, vector<8x512xf32>
    %271 = vector.extract_strided_slice %270 {offsets = [0, 0], sizes = [8, 384], strides = [1, 1]} : vector<8x512xf32> to vector<8x384xf32>
    %272 = arith.addf %271, %206 : vector<8x384xf32>
    %c0_91 = arith.constant 0 : index
    %c0_92 = arith.constant 0 : index
    %273 = vector.load %arg9[%c0_91, %c0_92] : memref<128x384xf32, #tpu.memory_space<vmem>>, vector<128x384xf32>
    %cst_93 = arith.constant dense<0.000000e+00> : vector<8x384xf32>
    %274 = tpu.matmul %250, %273, %cst_93 {dimension_numbers = #tpu.dot_dimension_numbers<[1], [0], [0], [1], [0, 0, 1, 1], [], []>} : vector<8x128xf32>, vector<128x384xf32>, vector<8x384xf32> -> vector<8x384xf32>
    %275 = vector.extract_strided_slice %272 {offsets = [0, 0], sizes = [8, 128], strides = [1, 1]} : vector<8x384xf32> to vector<8x128xf32>
    %276 = vector.extract_strided_slice %274 {offsets = [0, 0], sizes = [8, 128], strides = [1, 1]} : vector<8x384xf32> to vector<8x128xf32>
    %277 = arith.addf %275, %276 : vector<8x128xf32>
    %278 = arith.negf %277 : vector<8x128xf32>
    %279 = math.exp %278 : vector<8x128xf32>
    %cst_94 = arith.constant 1.000000e+00 : f32
    %280 = vector.broadcast %cst_94 : f32 to vector<8x128xf32>
    %281 = arith.addf %280, %279 : vector<8x128xf32>
    %282 = arith.divf %280, %281 : vector<8x128xf32>
    %283 = vector.extract_strided_slice %272 {offsets = [0, 128], sizes = [8, 128], strides = [1, 1]} : vector<8x384xf32> to vector<8x128xf32>
    %284 = vector.extract_strided_slice %274 {offsets = [0, 128], sizes = [8, 128], strides = [1, 1]} : vector<8x384xf32> to vector<8x128xf32>
    %285 = arith.addf %283, %284 : vector<8x128xf32>
    %286 = arith.negf %285 : vector<8x128xf32>
    %287 = math.exp %286 : vector<8x128xf32>
    %cst_95 = arith.constant 1.000000e+00 : f32
    %288 = vector.broadcast %cst_95 : f32 to vector<8x128xf32>
    %289 = arith.addf %288, %287 : vector<8x128xf32>
    %290 = arith.divf %288, %289 : vector<8x128xf32>
    %291 = vector.extract_strided_slice %272 {offsets = [0, 256], sizes = [8, 128], strides = [1, 1]} : vector<8x384xf32> to vector<8x128xf32>
    %292 = vector.extract_strided_slice %274 {offsets = [0, 256], sizes = [8, 128], strides = [1, 1]} : vector<8x384xf32> to vector<8x128xf32>
    %293 = vector.broadcast %1 : vector<1x128xf32> to vector<8x128xf32>
    %294 = arith.addf %292, %293 : vector<8x128xf32>
    %295 = arith.mulf %282, %294 : vector<8x128xf32>
    %296 = arith.addf %291, %295 : vector<8x128xf32>
    %297 = math.tanh %296 : vector<8x128xf32>
    %298 = arith.subf %250, %297 : vector<8x128xf32>
    %299 = arith.mulf %290, %298 : vector<8x128xf32>
    %300 = arith.addf %297, %299 : vector<8x128xf32>
    %301 = vector.extract_strided_slice %270 {offsets = [0, 384], sizes = [8, 128], strides = [1, 1]} : vector<8x512xf32> to vector<8x128xf32>
    %c0_96 = arith.constant 0 : index
    %c0_97 = arith.constant 0 : index
    %302 = vector.load %arg12[%c0_96, %c0_97] : memref<128x128xf32, #tpu.memory_space<vmem>>, vector<128x128xf32>
    %cst_98 = arith.constant dense<0.000000e+00> : vector<8x128xf32>
    %303 = tpu.matmul %300, %302, %cst_98 {dimension_numbers = #tpu.dot_dimension_numbers<[1], [0], [0], [1], [0, 0, 1, 1], [], []>} : vector<8x128xf32>, vector<128x128xf32>, vector<8x128xf32> -> vector<8x128xf32>
    %304 = arith.addf %301, %303 : vector<8x128xf32>
    %305 = arith.addf %304, %211 : vector<8x128xf32>
    %306 = arith.index_cast %c2_i32_88 : i32 to index
    %c0_99 = arith.constant 0 : index
    %c0_100 = arith.constant 0 : index
    %307 = vector.load %arg15[%306, %c0_99, %c0_100] : memref<8x8x128xf32, #tpu.memory_space<vmem>>, vector<1x8x128xf32>
    %308 = vector.shape_cast %307 : vector<1x8x128xf32> to vector<8x128xf32>
    %309 = vector.shape_cast %305 : vector<8x128xf32> to vector<1x8x128xf32>
    tpu.vector_store %arg15[%306, %c0_99, %c0_100], %309 {strides = array<i32>} : memref<8x8x128xf32, #tpu.memory_space<vmem>>, vector<1x8x128xf32>,
    %310 = arith.index_cast %c2_i32_88 : i32 to index
    %311 = memref.load %arg2[%310] : memref<8xi32, #tpu.memory_space<smem>>
    %c1_i32_101 = arith.constant 1 : i32
    %312 = arith.cmpi eq, %311, %c1_i32_101 : i32
    %c7_i32_102 = arith.constant 7 : i32
    %313 = arith.cmpi eq, %c2_i32_88, %c7_i32_102 : i32
    %314 = arith.ori %312, %313 : i1
    %315 = arith.extui %314 : i1 to i32
    %c0_i32_103 = arith.constant 0 : i32
    %316 = arith.cmpi ne, %315, %c0_i32_103 : i32
    scf.if %316 {
      %570 = arith.index_cast %c2_i32_88 : i32 to index
      %c0_197 = arith.constant 0 : index
      %c0_198 = arith.constant 0 : index
      %571 = vector.load %arg1[%570, %c0_197, %c0_198] : memref<8x8x512xf32, #tpu.memory_space<vmem>>, vector<1x8x512xf32>
      %572 = vector.shape_cast %571 : vector<1x8x512xf32> to vector<8x512xf32>
      %c0_199 = arith.constant 0 : index
      %c0_200 = arith.constant 0 : index
      %573 = vector.load %arg17[%c0_199, %c0_200] : memref<8x512xf32, #tpu.memory_space<vmem>>, vector<8x512xf32>
      tpu.vector_store %arg17[%c0_199, %c0_200], %572 {strides = array<i32>} : memref<8x512xf32, #tpu.memory_space<vmem>>, vector<8x512xf32>,
    } else {
    }
    %true_104 = arith.constant true
    %317 = arith.xori %314, %true_104 : i1
    %318 = arith.extui %317 : i1 to i32
    %c0_i32_105 = arith.constant 0 : i32
    %319 = arith.cmpi ne, %318, %c0_i32_105 : i32
    scf.if %319 {
      %cst_197 = arith.constant dense<0xFF800000> : vector<8xf32>
      %570 = vector.multi_reduction <maximumf>, %305, %cst_197 [1] : vector<8x128xf32> to vector<8xf32>
      %571 = vector.shape_cast %570 : vector<8xf32> to vector<8x1xf32>
      %572 = vector.broadcast %571 : vector<8x1xf32> to vector<8x128xf32>
      %573 = arith.cmpf oeq, %305, %572 : vector<8x128xf32>
      %c128_i32 = arith.constant 128 : i32
      %574 = vector.broadcast %c128_i32 : i32 to vector<8x128xi32>
      %575 = arith.select %573, %216, %574 : vector<8x128xi1>, vector<8x128xi32>
      %cst_198 = arith.constant dense<2147483647> : vector<8xi32>
      %576 = vector.multi_reduction <minsi>, %575, %cst_198 [1] : vector<8x128xi32> to vector<8xi32>
      %577 = vector.shape_cast %576 : vector<8xi32> to vector<8x1xi32>
      %578 = vector.broadcast %577 : vector<8x1xi32> to vector<8x128xi32>
      %579 = arith.cmpi eq, %216, %578 : vector<8x128xi32>
      %580 = arith.extui %579 : vector<8x128xi1> to vector<8x128xi32>
      %581 = arith.sitofp %580 : vector<8x128xi32> to vector<8x128xf32>
      %c0_199 = arith.constant 0 : index
      %c0_200 = arith.constant 0 : index
      %582 = vector.load %arg7[%c0_199, %c0_200] : memref<128x512xf32, #tpu.memory_space<vmem>>, vector<128x512xf32>
      %cst_201 = arith.constant dense<0.000000e+00> : vector<8x512xf32>
      %583 = tpu.matmul %581, %582, %cst_201 {dimension_numbers = #tpu.dot_dimension_numbers<[1], [0], [0], [1], [0, 0, 1, 1], [], []>} : vector<8x128xf32>, vector<128x512xf32>, vector<8x512xf32> -> vector<8x512xf32>
      %c0_202 = arith.constant 0 : index
      %c0_203 = arith.constant 0 : index
      %584 = vector.load %arg17[%c0_202, %c0_203] : memref<8x512xf32, #tpu.memory_space<vmem>>, vector<8x512xf32>
      tpu.vector_store %arg17[%c0_202, %c0_203], %583 {strides = array<i32>} : memref<8x512xf32, #tpu.memory_space<vmem>>, vector<8x512xf32>,
    } else {
    }
    %c3_i32_106 = arith.constant 3 : i32
    %c0_107 = arith.constant 0 : index
    %c0_108 = arith.constant 0 : index
    %320 = vector.load %arg17[%c0_107, %c0_108] : memref<8x512xf32, #tpu.memory_space<vmem>>, vector<8x512xf32>
    %321 = vector.extract_strided_slice %320 {offsets = [0, 0], sizes = [8, 384], strides = [1, 1]} : vector<8x512xf32> to vector<8x384xf32>
    %322 = arith.addf %321, %206 : vector<8x384xf32>
    %c0_109 = arith.constant 0 : index
    %c0_110 = arith.constant 0 : index
    %323 = vector.load %arg9[%c0_109, %c0_110] : memref<128x384xf32, #tpu.memory_space<vmem>>, vector<128x384xf32>
    %cst_111 = arith.constant dense<0.000000e+00> : vector<8x384xf32>
    %324 = tpu.matmul %300, %323, %cst_111 {dimension_numbers = #tpu.dot_dimension_numbers<[1], [0], [0], [1], [0, 0, 1, 1], [], []>} : vector<8x128xf32>, vector<128x384xf32>, vector<8x384xf32> -> vector<8x384xf32>
    %325 = vector.extract_strided_slice %322 {offsets = [0, 0], sizes = [8, 128], strides = [1, 1]} : vector<8x384xf32> to vector<8x128xf32>
    %326 = vector.extract_strided_slice %324 {offsets = [0, 0], sizes = [8, 128], strides = [1, 1]} : vector<8x384xf32> to vector<8x128xf32>
    %327 = arith.addf %325, %326 : vector<8x128xf32>
    %328 = arith.negf %327 : vector<8x128xf32>
    %329 = math.exp %328 : vector<8x128xf32>
    %cst_112 = arith.constant 1.000000e+00 : f32
    %330 = vector.broadcast %cst_112 : f32 to vector<8x128xf32>
    %331 = arith.addf %330, %329 : vector<8x128xf32>
    %332 = arith.divf %330, %331 : vector<8x128xf32>
    %333 = vector.extract_strided_slice %322 {offsets = [0, 128], sizes = [8, 128], strides = [1, 1]} : vector<8x384xf32> to vector<8x128xf32>
    %334 = vector.extract_strided_slice %324 {offsets = [0, 128], sizes = [8, 128], strides = [1, 1]} : vector<8x384xf32> to vector<8x128xf32>
    %335 = arith.addf %333, %334 : vector<8x128xf32>
    %336 = arith.negf %335 : vector<8x128xf32>
    %337 = math.exp %336 : vector<8x128xf32>
    %cst_113 = arith.constant 1.000000e+00 : f32
    %338 = vector.broadcast %cst_113 : f32 to vector<8x128xf32>
    %339 = arith.addf %338, %337 : vector<8x128xf32>
    %340 = arith.divf %338, %339 : vector<8x128xf32>
    %341 = vector.extract_strided_slice %322 {offsets = [0, 256], sizes = [8, 128], strides = [1, 1]} : vector<8x384xf32> to vector<8x128xf32>
    %342 = vector.extract_strided_slice %324 {offsets = [0, 256], sizes = [8, 128], strides = [1, 1]} : vector<8x384xf32> to vector<8x128xf32>
    %343 = vector.broadcast %1 : vector<1x128xf32> to vector<8x128xf32>
    %344 = arith.addf %342, %343 : vector<8x128xf32>
    %345 = arith.mulf %332, %344 : vector<8x128xf32>
    %346 = arith.addf %341, %345 : vector<8x128xf32>
    %347 = math.tanh %346 : vector<8x128xf32>
    %348 = arith.subf %300, %347 : vector<8x128xf32>
    %349 = arith.mulf %340, %348 : vector<8x128xf32>
    %350 = arith.addf %347, %349 : vector<8x128xf32>
    %351 = vector.extract_strided_slice %320 {offsets = [0, 384], sizes = [8, 128], strides = [1, 1]} : vector<8x512xf32> to vector<8x128xf32>
    %c0_114 = arith.constant 0 : index
    %c0_115 = arith.constant 0 : index
    %352 = vector.load %arg12[%c0_114, %c0_115] : memref<128x128xf32, #tpu.memory_space<vmem>>, vector<128x128xf32>
    %cst_116 = arith.constant dense<0.000000e+00> : vector<8x128xf32>
    %353 = tpu.matmul %350, %352, %cst_116 {dimension_numbers = #tpu.dot_dimension_numbers<[1], [0], [0], [1], [0, 0, 1, 1], [], []>} : vector<8x128xf32>, vector<128x128xf32>, vector<8x128xf32> -> vector<8x128xf32>
    %354 = arith.addf %351, %353 : vector<8x128xf32>
    %355 = arith.addf %354, %211 : vector<8x128xf32>
    %356 = arith.index_cast %c3_i32_106 : i32 to index
    %c0_117 = arith.constant 0 : index
    %c0_118 = arith.constant 0 : index
    %357 = vector.load %arg15[%356, %c0_117, %c0_118] : memref<8x8x128xf32, #tpu.memory_space<vmem>>, vector<1x8x128xf32>
    %358 = vector.shape_cast %357 : vector<1x8x128xf32> to vector<8x128xf32>
    %359 = vector.shape_cast %355 : vector<8x128xf32> to vector<1x8x128xf32>
    tpu.vector_store %arg15[%356, %c0_117, %c0_118], %359 {strides = array<i32>} : memref<8x8x128xf32, #tpu.memory_space<vmem>>, vector<1x8x128xf32>,
    %360 = arith.index_cast %c3_i32_106 : i32 to index
    %361 = memref.load %arg2[%360] : memref<8xi32, #tpu.memory_space<smem>>
    %c1_i32_119 = arith.constant 1 : i32
    %362 = arith.cmpi eq, %361, %c1_i32_119 : i32
    %c7_i32_120 = arith.constant 7 : i32
    %363 = arith.cmpi eq, %c3_i32_106, %c7_i32_120 : i32
    %364 = arith.ori %362, %363 : i1
    %365 = arith.extui %364 : i1 to i32
    %c0_i32_121 = arith.constant 0 : i32
    %366 = arith.cmpi ne, %365, %c0_i32_121 : i32
    scf.if %366 {
      %570 = arith.index_cast %c3_i32_106 : i32 to index
      %c0_197 = arith.constant 0 : index
      %c0_198 = arith.constant 0 : index
      %571 = vector.load %arg1[%570, %c0_197, %c0_198] : memref<8x8x512xf32, #tpu.memory_space<vmem>>, vector<1x8x512xf32>
      %572 = vector.shape_cast %571 : vector<1x8x512xf32> to vector<8x512xf32>
      %c0_199 = arith.constant 0 : index
      %c0_200 = arith.constant 0 : index
      %573 = vector.load %arg17[%c0_199, %c0_200] : memref<8x512xf32, #tpu.memory_space<vmem>>, vector<8x512xf32>
      tpu.vector_store %arg17[%c0_199, %c0_200], %572 {strides = array<i32>} : memref<8x512xf32, #tpu.memory_space<vmem>>, vector<8x512xf32>,
    } else {
    }
    %true_122 = arith.constant true
    %367 = arith.xori %364, %true_122 : i1
    %368 = arith.extui %367 : i1 to i32
    %c0_i32_123 = arith.constant 0 : i32
    %369 = arith.cmpi ne, %368, %c0_i32_123 : i32
    scf.if %369 {
      %cst_197 = arith.constant dense<0xFF800000> : vector<8xf32>
      %570 = vector.multi_reduction <maximumf>, %355, %cst_197 [1] : vector<8x128xf32> to vector<8xf32>
      %571 = vector.shape_cast %570 : vector<8xf32> to vector<8x1xf32>
      %572 = vector.broadcast %571 : vector<8x1xf32> to vector<8x128xf32>
      %573 = arith.cmpf oeq, %355, %572 : vector<8x128xf32>
      %c128_i32 = arith.constant 128 : i32
      %574 = vector.broadcast %c128_i32 : i32 to vector<8x128xi32>
      %575 = arith.select %573, %216, %574 : vector<8x128xi1>, vector<8x128xi32>
      %cst_198 = arith.constant dense<2147483647> : vector<8xi32>
      %576 = vector.multi_reduction <minsi>, %575, %cst_198 [1] : vector<8x128xi32> to vector<8xi32>
      %577 = vector.shape_cast %576 : vector<8xi32> to vector<8x1xi32>
      %578 = vector.broadcast %577 : vector<8x1xi32> to vector<8x128xi32>
      %579 = arith.cmpi eq, %216, %578 : vector<8x128xi32>
      %580 = arith.extui %579 : vector<8x128xi1> to vector<8x128xi32>
      %581 = arith.sitofp %580 : vector<8x128xi32> to vector<8x128xf32>
      %c0_199 = arith.constant 0 : index
      %c0_200 = arith.constant 0 : index
      %582 = vector.load %arg7[%c0_199, %c0_200] : memref<128x512xf32, #tpu.memory_space<vmem>>, vector<128x512xf32>
      %cst_201 = arith.constant dense<0.000000e+00> : vector<8x512xf32>
      %583 = tpu.matmul %581, %582, %cst_201 {dimension_numbers = #tpu.dot_dimension_numbers<[1], [0], [0], [1], [0, 0, 1, 1], [], []>} : vector<8x128xf32>, vector<128x512xf32>, vector<8x512xf32> -> vector<8x512xf32>
      %c0_202 = arith.constant 0 : index
      %c0_203 = arith.constant 0 : index
      %584 = vector.load %arg17[%c0_202, %c0_203] : memref<8x512xf32, #tpu.memory_space<vmem>>, vector<8x512xf32>
      tpu.vector_store %arg17[%c0_202, %c0_203], %583 {strides = array<i32>} : memref<8x512xf32, #tpu.memory_space<vmem>>, vector<8x512xf32>,
    } else {
    }
    %c4_i32_124 = arith.constant 4 : i32
    %c0_125 = arith.constant 0 : index
    %c0_126 = arith.constant 0 : index
    %370 = vector.load %arg17[%c0_125, %c0_126] : memref<8x512xf32, #tpu.memory_space<vmem>>, vector<8x512xf32>
    %371 = vector.extract_strided_slice %370 {offsets = [0, 0], sizes = [8, 384], strides = [1, 1]} : vector<8x512xf32> to vector<8x384xf32>
    %372 = arith.addf %371, %206 : vector<8x384xf32>
    %c0_127 = arith.constant 0 : index
    %c0_128 = arith.constant 0 : index
    %373 = vector.load %arg9[%c0_127, %c0_128] : memref<128x384xf32, #tpu.memory_space<vmem>>, vector<128x384xf32>
    %cst_129 = arith.constant dense<0.000000e+00> : vector<8x384xf32>
    %374 = tpu.matmul %350, %373, %cst_129 {dimension_numbers = #tpu.dot_dimension_numbers<[1], [0], [0], [1], [0, 0, 1, 1], [], []>} : vector<8x128xf32>, vector<128x384xf32>, vector<8x384xf32> -> vector<8x384xf32>
    %375 = vector.extract_strided_slice %372 {offsets = [0, 0], sizes = [8, 128], strides = [1, 1]} : vector<8x384xf32> to vector<8x128xf32>
    %376 = vector.extract_strided_slice %374 {offsets = [0, 0], sizes = [8, 128], strides = [1, 1]} : vector<8x384xf32> to vector<8x128xf32>
    %377 = arith.addf %375, %376 : vector<8x128xf32>
    %378 = arith.negf %377 : vector<8x128xf32>
    %379 = math.exp %378 : vector<8x128xf32>
    %cst_130 = arith.constant 1.000000e+00 : f32
    %380 = vector.broadcast %cst_130 : f32 to vector<8x128xf32>
    %381 = arith.addf %380, %379 : vector<8x128xf32>
    %382 = arith.divf %380, %381 : vector<8x128xf32>
    %383 = vector.extract_strided_slice %372 {offsets = [0, 128], sizes = [8, 128], strides = [1, 1]} : vector<8x384xf32> to vector<8x128xf32>
    %384 = vector.extract_strided_slice %374 {offsets = [0, 128], sizes = [8, 128], strides = [1, 1]} : vector<8x384xf32> to vector<8x128xf32>
    %385 = arith.addf %383, %384 : vector<8x128xf32>
    %386 = arith.negf %385 : vector<8x128xf32>
    %387 = math.exp %386 : vector<8x128xf32>
    %cst_131 = arith.constant 1.000000e+00 : f32
    %388 = vector.broadcast %cst_131 : f32 to vector<8x128xf32>
    %389 = arith.addf %388, %387 : vector<8x128xf32>
    %390 = arith.divf %388, %389 : vector<8x128xf32>
    %391 = vector.extract_strided_slice %372 {offsets = [0, 256], sizes = [8, 128], strides = [1, 1]} : vector<8x384xf32> to vector<8x128xf32>
    %392 = vector.extract_strided_slice %374 {offsets = [0, 256], sizes = [8, 128], strides = [1, 1]} : vector<8x384xf32> to vector<8x128xf32>
    %393 = vector.broadcast %1 : vector<1x128xf32> to vector<8x128xf32>
    %394 = arith.addf %392, %393 : vector<8x128xf32>
    %395 = arith.mulf %382, %394 : vector<8x128xf32>
    %396 = arith.addf %391, %395 : vector<8x128xf32>
    %397 = math.tanh %396 : vector<8x128xf32>
    %398 = arith.subf %350, %397 : vector<8x128xf32>
    %399 = arith.mulf %390, %398 : vector<8x128xf32>
    %400 = arith.addf %397, %399 : vector<8x128xf32>
    %401 = vector.extract_strided_slice %370 {offsets = [0, 384], sizes = [8, 128], strides = [1, 1]} : vector<8x512xf32> to vector<8x128xf32>
    %c0_132 = arith.constant 0 : index
    %c0_133 = arith.constant 0 : index
    %402 = vector.load %arg12[%c0_132, %c0_133] : memref<128x128xf32, #tpu.memory_space<vmem>>, vector<128x128xf32>
    %cst_134 = arith.constant dense<0.000000e+00> : vector<8x128xf32>
    %403 = tpu.matmul %400, %402, %cst_134 {dimension_numbers = #tpu.dot_dimension_numbers<[1], [0], [0], [1], [0, 0, 1, 1], [], []>} : vector<8x128xf32>, vector<128x128xf32>, vector<8x128xf32> -> vector<8x128xf32>
    %404 = arith.addf %401, %403 : vector<8x128xf32>
    %405 = arith.addf %404, %211 : vector<8x128xf32>
    %406 = arith.index_cast %c4_i32_124 : i32 to index
    %c0_135 = arith.constant 0 : index
    %c0_136 = arith.constant 0 : index
    %407 = vector.load %arg15[%406, %c0_135, %c0_136] : memref<8x8x128xf32, #tpu.memory_space<vmem>>, vector<1x8x128xf32>
    %408 = vector.shape_cast %407 : vector<1x8x128xf32> to vector<8x128xf32>
    %409 = vector.shape_cast %405 : vector<8x128xf32> to vector<1x8x128xf32>
    tpu.vector_store %arg15[%406, %c0_135, %c0_136], %409 {strides = array<i32>} : memref<8x8x128xf32, #tpu.memory_space<vmem>>, vector<1x8x128xf32>,
    %410 = arith.index_cast %c4_i32_124 : i32 to index
    %411 = memref.load %arg2[%410] : memref<8xi32, #tpu.memory_space<smem>>
    %c1_i32_137 = arith.constant 1 : i32
    %412 = arith.cmpi eq, %411, %c1_i32_137 : i32
    %c7_i32_138 = arith.constant 7 : i32
    %413 = arith.cmpi eq, %c4_i32_124, %c7_i32_138 : i32
    %414 = arith.ori %412, %413 : i1
    %415 = arith.extui %414 : i1 to i32
    %c0_i32_139 = arith.constant 0 : i32
    %416 = arith.cmpi ne, %415, %c0_i32_139 : i32
    scf.if %416 {
      %570 = arith.index_cast %c4_i32_124 : i32 to index
      %c0_197 = arith.constant 0 : index
      %c0_198 = arith.constant 0 : index
      %571 = vector.load %arg1[%570, %c0_197, %c0_198] : memref<8x8x512xf32, #tpu.memory_space<vmem>>, vector<1x8x512xf32>
      %572 = vector.shape_cast %571 : vector<1x8x512xf32> to vector<8x512xf32>
      %c0_199 = arith.constant 0 : index
      %c0_200 = arith.constant 0 : index
      %573 = vector.load %arg17[%c0_199, %c0_200] : memref<8x512xf32, #tpu.memory_space<vmem>>, vector<8x512xf32>
      tpu.vector_store %arg17[%c0_199, %c0_200], %572 {strides = array<i32>} : memref<8x512xf32, #tpu.memory_space<vmem>>, vector<8x512xf32>,
    } else {
    }
    %true_140 = arith.constant true
    %417 = arith.xori %414, %true_140 : i1
    %418 = arith.extui %417 : i1 to i32
    %c0_i32_141 = arith.constant 0 : i32
    %419 = arith.cmpi ne, %418, %c0_i32_141 : i32
    scf.if %419 {
      %cst_197 = arith.constant dense<0xFF800000> : vector<8xf32>
      %570 = vector.multi_reduction <maximumf>, %405, %cst_197 [1] : vector<8x128xf32> to vector<8xf32>
      %571 = vector.shape_cast %570 : vector<8xf32> to vector<8x1xf32>
      %572 = vector.broadcast %571 : vector<8x1xf32> to vector<8x128xf32>
      %573 = arith.cmpf oeq, %405, %572 : vector<8x128xf32>
      %c128_i32 = arith.constant 128 : i32
      %574 = vector.broadcast %c128_i32 : i32 to vector<8x128xi32>
      %575 = arith.select %573, %216, %574 : vector<8x128xi1>, vector<8x128xi32>
      %cst_198 = arith.constant dense<2147483647> : vector<8xi32>
      %576 = vector.multi_reduction <minsi>, %575, %cst_198 [1] : vector<8x128xi32> to vector<8xi32>
      %577 = vector.shape_cast %576 : vector<8xi32> to vector<8x1xi32>
      %578 = vector.broadcast %577 : vector<8x1xi32> to vector<8x128xi32>
      %579 = arith.cmpi eq, %216, %578 : vector<8x128xi32>
      %580 = arith.extui %579 : vector<8x128xi1> to vector<8x128xi32>
      %581 = arith.sitofp %580 : vector<8x128xi32> to vector<8x128xf32>
      %c0_199 = arith.constant 0 : index
      %c0_200 = arith.constant 0 : index
      %582 = vector.load %arg7[%c0_199, %c0_200] : memref<128x512xf32, #tpu.memory_space<vmem>>, vector<128x512xf32>
      %cst_201 = arith.constant dense<0.000000e+00> : vector<8x512xf32>
      %583 = tpu.matmul %581, %582, %cst_201 {dimension_numbers = #tpu.dot_dimension_numbers<[1], [0], [0], [1], [0, 0, 1, 1], [], []>} : vector<8x128xf32>, vector<128x512xf32>, vector<8x512xf32> -> vector<8x512xf32>
      %c0_202 = arith.constant 0 : index
      %c0_203 = arith.constant 0 : index
      %584 = vector.load %arg17[%c0_202, %c0_203] : memref<8x512xf32, #tpu.memory_space<vmem>>, vector<8x512xf32>
      tpu.vector_store %arg17[%c0_202, %c0_203], %583 {strides = array<i32>} : memref<8x512xf32, #tpu.memory_space<vmem>>, vector<8x512xf32>,
    } else {
    }
    %c5_i32_142 = arith.constant 5 : i32
    %c0_143 = arith.constant 0 : index
    %c0_144 = arith.constant 0 : index
    %420 = vector.load %arg17[%c0_143, %c0_144] : memref<8x512xf32, #tpu.memory_space<vmem>>, vector<8x512xf32>
    %421 = vector.extract_strided_slice %420 {offsets = [0, 0], sizes = [8, 384], strides = [1, 1]} : vector<8x512xf32> to vector<8x384xf32>
    %422 = arith.addf %421, %206 : vector<8x384xf32>
    %c0_145 = arith.constant 0 : index
    %c0_146 = arith.constant 0 : index
    %423 = vector.load %arg9[%c0_145, %c0_146] : memref<128x384xf32, #tpu.memory_space<vmem>>, vector<128x384xf32>
    %cst_147 = arith.constant dense<0.000000e+00> : vector<8x384xf32>
    %424 = tpu.matmul %400, %423, %cst_147 {dimension_numbers = #tpu.dot_dimension_numbers<[1], [0], [0], [1], [0, 0, 1, 1], [], []>} : vector<8x128xf32>, vector<128x384xf32>, vector<8x384xf32> -> vector<8x384xf32>
    %425 = vector.extract_strided_slice %422 {offsets = [0, 0], sizes = [8, 128], strides = [1, 1]} : vector<8x384xf32> to vector<8x128xf32>
    %426 = vector.extract_strided_slice %424 {offsets = [0, 0], sizes = [8, 128], strides = [1, 1]} : vector<8x384xf32> to vector<8x128xf32>
    %427 = arith.addf %425, %426 : vector<8x128xf32>
    %428 = arith.negf %427 : vector<8x128xf32>
    %429 = math.exp %428 : vector<8x128xf32>
    %cst_148 = arith.constant 1.000000e+00 : f32
    %430 = vector.broadcast %cst_148 : f32 to vector<8x128xf32>
    %431 = arith.addf %430, %429 : vector<8x128xf32>
    %432 = arith.divf %430, %431 : vector<8x128xf32>
    %433 = vector.extract_strided_slice %422 {offsets = [0, 128], sizes = [8, 128], strides = [1, 1]} : vector<8x384xf32> to vector<8x128xf32>
    %434 = vector.extract_strided_slice %424 {offsets = [0, 128], sizes = [8, 128], strides = [1, 1]} : vector<8x384xf32> to vector<8x128xf32>
    %435 = arith.addf %433, %434 : vector<8x128xf32>
    %436 = arith.negf %435 : vector<8x128xf32>
    %437 = math.exp %436 : vector<8x128xf32>
    %cst_149 = arith.constant 1.000000e+00 : f32
    %438 = vector.broadcast %cst_149 : f32 to vector<8x128xf32>
    %439 = arith.addf %438, %437 : vector<8x128xf32>
    %440 = arith.divf %438, %439 : vector<8x128xf32>
    %441 = vector.extract_strided_slice %422 {offsets = [0, 256], sizes = [8, 128], strides = [1, 1]} : vector<8x384xf32> to vector<8x128xf32>
    %442 = vector.extract_strided_slice %424 {offsets = [0, 256], sizes = [8, 128], strides = [1, 1]} : vector<8x384xf32> to vector<8x128xf32>
    %443 = vector.broadcast %1 : vector<1x128xf32> to vector<8x128xf32>
    %444 = arith.addf %442, %443 : vector<8x128xf32>
    %445 = arith.mulf %432, %444 : vector<8x128xf32>
    %446 = arith.addf %441, %445 : vector<8x128xf32>
    %447 = math.tanh %446 : vector<8x128xf32>
    %448 = arith.subf %400, %447 : vector<8x128xf32>
    %449 = arith.mulf %440, %448 : vector<8x128xf32>
    %450 = arith.addf %447, %449 : vector<8x128xf32>
    %451 = vector.extract_strided_slice %420 {offsets = [0, 384], sizes = [8, 128], strides = [1, 1]} : vector<8x512xf32> to vector<8x128xf32>
    %c0_150 = arith.constant 0 : index
    %c0_151 = arith.constant 0 : index
    %452 = vector.load %arg12[%c0_150, %c0_151] : memref<128x128xf32, #tpu.memory_space<vmem>>, vector<128x128xf32>
    %cst_152 = arith.constant dense<0.000000e+00> : vector<8x128xf32>
    %453 = tpu.matmul %450, %452, %cst_152 {dimension_numbers = #tpu.dot_dimension_numbers<[1], [0], [0], [1], [0, 0, 1, 1], [], []>} : vector<8x128xf32>, vector<128x128xf32>, vector<8x128xf32> -> vector<8x128xf32>
    %454 = arith.addf %451, %453 : vector<8x128xf32>
    %455 = arith.addf %454, %211 : vector<8x128xf32>
    %456 = arith.index_cast %c5_i32_142 : i32 to index
    %c0_153 = arith.constant 0 : index
    %c0_154 = arith.constant 0 : index
    %457 = vector.load %arg15[%456, %c0_153, %c0_154] : memref<8x8x128xf32, #tpu.memory_space<vmem>>, vector<1x8x128xf32>
    %458 = vector.shape_cast %457 : vector<1x8x128xf32> to vector<8x128xf32>
    %459 = vector.shape_cast %455 : vector<8x128xf32> to vector<1x8x128xf32>
    tpu.vector_store %arg15[%456, %c0_153, %c0_154], %459 {strides = array<i32>} : memref<8x8x128xf32, #tpu.memory_space<vmem>>, vector<1x8x128xf32>,
    %460 = arith.index_cast %c5_i32_142 : i32 to index
    %461 = memref.load %arg2[%460] : memref<8xi32, #tpu.memory_space<smem>>
    %c1_i32_155 = arith.constant 1 : i32
    %462 = arith.cmpi eq, %461, %c1_i32_155 : i32
    %c7_i32_156 = arith.constant 7 : i32
    %463 = arith.cmpi eq, %c5_i32_142, %c7_i32_156 : i32
    %464 = arith.ori %462, %463 : i1
    %465 = arith.extui %464 : i1 to i32
    %c0_i32_157 = arith.constant 0 : i32
    %466 = arith.cmpi ne, %465, %c0_i32_157 : i32
    scf.if %466 {
      %570 = arith.index_cast %c5_i32_142 : i32 to index
      %c0_197 = arith.constant 0 : index
      %c0_198 = arith.constant 0 : index
      %571 = vector.load %arg1[%570, %c0_197, %c0_198] : memref<8x8x512xf32, #tpu.memory_space<vmem>>, vector<1x8x512xf32>
      %572 = vector.shape_cast %571 : vector<1x8x512xf32> to vector<8x512xf32>
      %c0_199 = arith.constant 0 : index
      %c0_200 = arith.constant 0 : index
      %573 = vector.load %arg17[%c0_199, %c0_200] : memref<8x512xf32, #tpu.memory_space<vmem>>, vector<8x512xf32>
      tpu.vector_store %arg17[%c0_199, %c0_200], %572 {strides = array<i32>} : memref<8x512xf32, #tpu.memory_space<vmem>>, vector<8x512xf32>,
    } else {
    }
    %true_158 = arith.constant true
    %467 = arith.xori %464, %true_158 : i1
    %468 = arith.extui %467 : i1 to i32
    %c0_i32_159 = arith.constant 0 : i32
    %469 = arith.cmpi ne, %468, %c0_i32_159 : i32
    scf.if %469 {
      %cst_197 = arith.constant dense<0xFF800000> : vector<8xf32>
      %570 = vector.multi_reduction <maximumf>, %455, %cst_197 [1] : vector<8x128xf32> to vector<8xf32>
      %571 = vector.shape_cast %570 : vector<8xf32> to vector<8x1xf32>
      %572 = vector.broadcast %571 : vector<8x1xf32> to vector<8x128xf32>
      %573 = arith.cmpf oeq, %455, %572 : vector<8x128xf32>
      %c128_i32 = arith.constant 128 : i32
      %574 = vector.broadcast %c128_i32 : i32 to vector<8x128xi32>
      %575 = arith.select %573, %216, %574 : vector<8x128xi1>, vector<8x128xi32>
      %cst_198 = arith.constant dense<2147483647> : vector<8xi32>
      %576 = vector.multi_reduction <minsi>, %575, %cst_198 [1] : vector<8x128xi32> to vector<8xi32>
      %577 = vector.shape_cast %576 : vector<8xi32> to vector<8x1xi32>
      %578 = vector.broadcast %577 : vector<8x1xi32> to vector<8x128xi32>
      %579 = arith.cmpi eq, %216, %578 : vector<8x128xi32>
      %580 = arith.extui %579 : vector<8x128xi1> to vector<8x128xi32>
      %581 = arith.sitofp %580 : vector<8x128xi32> to vector<8x128xf32>
      %c0_199 = arith.constant 0 : index
      %c0_200 = arith.constant 0 : index
      %582 = vector.load %arg7[%c0_199, %c0_200] : memref<128x512xf32, #tpu.memory_space<vmem>>, vector<128x512xf32>
      %cst_201 = arith.constant dense<0.000000e+00> : vector<8x512xf32>
      %583 = tpu.matmul %581, %582, %cst_201 {dimension_numbers = #tpu.dot_dimension_numbers<[1], [0], [0], [1], [0, 0, 1, 1], [], []>} : vector<8x128xf32>, vector<128x512xf32>, vector<8x512xf32> -> vector<8x512xf32>
      %c0_202 = arith.constant 0 : index
      %c0_203 = arith.constant 0 : index
      %584 = vector.load %arg17[%c0_202, %c0_203] : memref<8x512xf32, #tpu.memory_space<vmem>>, vector<8x512xf32>
      tpu.vector_store %arg17[%c0_202, %c0_203], %583 {strides = array<i32>} : memref<8x512xf32, #tpu.memory_space<vmem>>, vector<8x512xf32>,
    } else {
    }
    %c6_i32_160 = arith.constant 6 : i32
    %c0_161 = arith.constant 0 : index
    %c0_162 = arith.constant 0 : index
    %470 = vector.load %arg17[%c0_161, %c0_162] : memref<8x512xf32, #tpu.memory_space<vmem>>, vector<8x512xf32>
    %471 = vector.extract_strided_slice %470 {offsets = [0, 0], sizes = [8, 384], strides = [1, 1]} : vector<8x512xf32> to vector<8x384xf32>
    %472 = arith.addf %471, %206 : vector<8x384xf32>
    %c0_163 = arith.constant 0 : index
    %c0_164 = arith.constant 0 : index
    %473 = vector.load %arg9[%c0_163, %c0_164] : memref<128x384xf32, #tpu.memory_space<vmem>>, vector<128x384xf32>
    %cst_165 = arith.constant dense<0.000000e+00> : vector<8x384xf32>
    %474 = tpu.matmul %450, %473, %cst_165 {dimension_numbers = #tpu.dot_dimension_numbers<[1], [0], [0], [1], [0, 0, 1, 1], [], []>} : vector<8x128xf32>, vector<128x384xf32>, vector<8x384xf32> -> vector<8x384xf32>
    %475 = vector.extract_strided_slice %472 {offsets = [0, 0], sizes = [8, 128], strides = [1, 1]} : vector<8x384xf32> to vector<8x128xf32>
    %476 = vector.extract_strided_slice %474 {offsets = [0, 0], sizes = [8, 128], strides = [1, 1]} : vector<8x384xf32> to vector<8x128xf32>
    %477 = arith.addf %475, %476 : vector<8x128xf32>
    %478 = arith.negf %477 : vector<8x128xf32>
    %479 = math.exp %478 : vector<8x128xf32>
    %cst_166 = arith.constant 1.000000e+00 : f32
    %480 = vector.broadcast %cst_166 : f32 to vector<8x128xf32>
    %481 = arith.addf %480, %479 : vector<8x128xf32>
    %482 = arith.divf %480, %481 : vector<8x128xf32>
    %483 = vector.extract_strided_slice %472 {offsets = [0, 128], sizes = [8, 128], strides = [1, 1]} : vector<8x384xf32> to vector<8x128xf32>
    %484 = vector.extract_strided_slice %474 {offsets = [0, 128], sizes = [8, 128], strides = [1, 1]} : vector<8x384xf32> to vector<8x128xf32>
    %485 = arith.addf %483, %484 : vector<8x128xf32>
    %486 = arith.negf %485 : vector<8x128xf32>
    %487 = math.exp %486 : vector<8x128xf32>
    %cst_167 = arith.constant 1.000000e+00 : f32
    %488 = vector.broadcast %cst_167 : f32 to vector<8x128xf32>
    %489 = arith.addf %488, %487 : vector<8x128xf32>
    %490 = arith.divf %488, %489 : vector<8x128xf32>
    %491 = vector.extract_strided_slice %472 {offsets = [0, 256], sizes = [8, 128], strides = [1, 1]} : vector<8x384xf32> to vector<8x128xf32>
    %492 = vector.extract_strided_slice %474 {offsets = [0, 256], sizes = [8, 128], strides = [1, 1]} : vector<8x384xf32> to vector<8x128xf32>
    %493 = vector.broadcast %1 : vector<1x128xf32> to vector<8x128xf32>
    %494 = arith.addf %492, %493 : vector<8x128xf32>
    %495 = arith.mulf %482, %494 : vector<8x128xf32>
    %496 = arith.addf %491, %495 : vector<8x128xf32>
    %497 = math.tanh %496 : vector<8x128xf32>
    %498 = arith.subf %450, %497 : vector<8x128xf32>
    %499 = arith.mulf %490, %498 : vector<8x128xf32>
    %500 = arith.addf %497, %499 : vector<8x128xf32>
    %501 = vector.extract_strided_slice %470 {offsets = [0, 384], sizes = [8, 128], strides = [1, 1]} : vector<8x512xf32> to vector<8x128xf32>
    %c0_168 = arith.constant 0 : index
    %c0_169 = arith.constant 0 : index
    %502 = vector.load %arg12[%c0_168, %c0_169] : memref<128x128xf32, #tpu.memory_space<vmem>>, vector<128x128xf32>
    %cst_170 = arith.constant dense<0.000000e+00> : vector<8x128xf32>
    %503 = tpu.matmul %500, %502, %cst_170 {dimension_numbers = #tpu.dot_dimension_numbers<[1], [0], [0], [1], [0, 0, 1, 1], [], []>} : vector<8x128xf32>, vector<128x128xf32>, vector<8x128xf32> -> vector<8x128xf32>
    %504 = arith.addf %501, %503 : vector<8x128xf32>
    %505 = arith.addf %504, %211 : vector<8x128xf32>
    %506 = arith.index_cast %c6_i32_160 : i32 to index
    %c0_171 = arith.constant 0 : index
    %c0_172 = arith.constant 0 : index
    %507 = vector.load %arg15[%506, %c0_171, %c0_172] : memref<8x8x128xf32, #tpu.memory_space<vmem>>, vector<1x8x128xf32>
    %508 = vector.shape_cast %507 : vector<1x8x128xf32> to vector<8x128xf32>
    %509 = vector.shape_cast %505 : vector<8x128xf32> to vector<1x8x128xf32>
    tpu.vector_store %arg15[%506, %c0_171, %c0_172], %509 {strides = array<i32>} : memref<8x8x128xf32, #tpu.memory_space<vmem>>, vector<1x8x128xf32>,
    %510 = arith.index_cast %c6_i32_160 : i32 to index
    %511 = memref.load %arg2[%510] : memref<8xi32, #tpu.memory_space<smem>>
    %c1_i32_173 = arith.constant 1 : i32
    %512 = arith.cmpi eq, %511, %c1_i32_173 : i32
    %c7_i32_174 = arith.constant 7 : i32
    %513 = arith.cmpi eq, %c6_i32_160, %c7_i32_174 : i32
    %514 = arith.ori %512, %513 : i1
    %515 = arith.extui %514 : i1 to i32
    %c0_i32_175 = arith.constant 0 : i32
    %516 = arith.cmpi ne, %515, %c0_i32_175 : i32
    scf.if %516 {
      %570 = arith.index_cast %c6_i32_160 : i32 to index
      %c0_197 = arith.constant 0 : index
      %c0_198 = arith.constant 0 : index
      %571 = vector.load %arg1[%570, %c0_197, %c0_198] : memref<8x8x512xf32, #tpu.memory_space<vmem>>, vector<1x8x512xf32>
      %572 = vector.shape_cast %571 : vector<1x8x512xf32> to vector<8x512xf32>
      %c0_199 = arith.constant 0 : index
      %c0_200 = arith.constant 0 : index
      %573 = vector.load %arg17[%c0_199, %c0_200] : memref<8x512xf32, #tpu.memory_space<vmem>>, vector<8x512xf32>
      tpu.vector_store %arg17[%c0_199, %c0_200], %572 {strides = array<i32>} : memref<8x512xf32, #tpu.memory_space<vmem>>, vector<8x512xf32>,
    } else {
    }
    %true_176 = arith.constant true
    %517 = arith.xori %514, %true_176 : i1
    %518 = arith.extui %517 : i1 to i32
    %c0_i32_177 = arith.constant 0 : i32
    %519 = arith.cmpi ne, %518, %c0_i32_177 : i32
    scf.if %519 {
      %cst_197 = arith.constant dense<0xFF800000> : vector<8xf32>
      %570 = vector.multi_reduction <maximumf>, %505, %cst_197 [1] : vector<8x128xf32> to vector<8xf32>
      %571 = vector.shape_cast %570 : vector<8xf32> to vector<8x1xf32>
      %572 = vector.broadcast %571 : vector<8x1xf32> to vector<8x128xf32>
      %573 = arith.cmpf oeq, %505, %572 : vector<8x128xf32>
      %c128_i32 = arith.constant 128 : i32
      %574 = vector.broadcast %c128_i32 : i32 to vector<8x128xi32>
      %575 = arith.select %573, %216, %574 : vector<8x128xi1>, vector<8x128xi32>
      %cst_198 = arith.constant dense<2147483647> : vector<8xi32>
      %576 = vector.multi_reduction <minsi>, %575, %cst_198 [1] : vector<8x128xi32> to vector<8xi32>
      %577 = vector.shape_cast %576 : vector<8xi32> to vector<8x1xi32>
      %578 = vector.broadcast %577 : vector<8x1xi32> to vector<8x128xi32>
      %579 = arith.cmpi eq, %216, %578 : vector<8x128xi32>
      %580 = arith.extui %579 : vector<8x128xi1> to vector<8x128xi32>
      %581 = arith.sitofp %580 : vector<8x128xi32> to vector<8x128xf32>
      %c0_199 = arith.constant 0 : index
      %c0_200 = arith.constant 0 : index
      %582 = vector.load %arg7[%c0_199, %c0_200] : memref<128x512xf32, #tpu.memory_space<vmem>>, vector<128x512xf32>
      %cst_201 = arith.constant dense<0.000000e+00> : vector<8x512xf32>
      %583 = tpu.matmul %581, %582, %cst_201 {dimension_numbers = #tpu.dot_dimension_numbers<[1], [0], [0], [1], [0, 0, 1, 1], [], []>} : vector<8x128xf32>, vector<128x512xf32>, vector<8x512xf32> -> vector<8x512xf32>
      %c0_202 = arith.constant 0 : index
      %c0_203 = arith.constant 0 : index
      %584 = vector.load %arg17[%c0_202, %c0_203] : memref<8x512xf32, #tpu.memory_space<vmem>>, vector<8x512xf32>
      tpu.vector_store %arg17[%c0_202, %c0_203], %583 {strides = array<i32>} : memref<8x512xf32, #tpu.memory_space<vmem>>, vector<8x512xf32>,
    } else {
    }
    %c7_i32_178 = arith.constant 7 : i32
    %c0_179 = arith.constant 0 : index
    %c0_180 = arith.constant 0 : index
    %520 = vector.load %arg17[%c0_179, %c0_180] : memref<8x512xf32, #tpu.memory_space<vmem>>, vector<8x512xf32>
    %521 = vector.extract_strided_slice %520 {offsets = [0, 0], sizes = [8, 384], strides = [1, 1]} : vector<8x512xf32> to vector<8x384xf32>
    %522 = arith.addf %521, %206 : vector<8x384xf32>
    %c0_181 = arith.constant 0 : index
    %c0_182 = arith.constant 0 : index
    %523 = vector.load %arg9[%c0_181, %c0_182] : memref<128x384xf32, #tpu.memory_space<vmem>>, vector<128x384xf32>
    %cst_183 = arith.constant dense<0.000000e+00> : vector<8x384xf32>
    %524 = tpu.matmul %500, %523, %cst_183 {dimension_numbers = #tpu.dot_dimension_numbers<[1], [0], [0], [1], [0, 0, 1, 1], [], []>} : vector<8x128xf32>, vector<128x384xf32>, vector<8x384xf32> -> vector<8x384xf32>
    %525 = vector.extract_strided_slice %522 {offsets = [0, 0], sizes = [8, 128], strides = [1, 1]} : vector<8x384xf32> to vector<8x128xf32>
    %526 = vector.extract_strided_slice %524 {offsets = [0, 0], sizes = [8, 128], strides = [1, 1]} : vector<8x384xf32> to vector<8x128xf32>
    %527 = arith.addf %525, %526 : vector<8x128xf32>
    %528 = arith.negf %527 : vector<8x128xf32>
    %529 = math.exp %528 : vector<8x128xf32>
    %cst_184 = arith.constant 1.000000e+00 : f32
    %530 = vector.broadcast %cst_184 : f32 to vector<8x128xf32>
    %531 = arith.addf %530, %529 : vector<8x128xf32>
    %532 = arith.divf %530, %531 : vector<8x128xf32>
    %533 = vector.extract_strided_slice %522 {offsets = [0, 128], sizes = [8, 128], strides = [1, 1]} : vector<8x384xf32> to vector<8x128xf32>
    %534 = vector.extract_strided_slice %524 {offsets = [0, 128], sizes = [8, 128], strides = [1, 1]} : vector<8x384xf32> to vector<8x128xf32>
    %535 = arith.addf %533, %534 : vector<8x128xf32>
    %536 = arith.negf %535 : vector<8x128xf32>
    %537 = math.exp %536 : vector<8x128xf32>
    %cst_185 = arith.constant 1.000000e+00 : f32
    %538 = vector.broadcast %cst_185 : f32 to vector<8x128xf32>
    %539 = arith.addf %538, %537 : vector<8x128xf32>
    %540 = arith.divf %538, %539 : vector<8x128xf32>
    %541 = vector.extract_strided_slice %522 {offsets = [0, 256], sizes = [8, 128], strides = [1, 1]} : vector<8x384xf32> to vector<8x128xf32>
    %542 = vector.extract_strided_slice %524 {offsets = [0, 256], sizes = [8, 128], strides = [1, 1]} : vector<8x384xf32> to vector<8x128xf32>
    %543 = vector.broadcast %1 : vector<1x128xf32> to vector<8x128xf32>
    %544 = arith.addf %542, %543 : vector<8x128xf32>
    %545 = arith.mulf %532, %544 : vector<8x128xf32>
    %546 = arith.addf %541, %545 : vector<8x128xf32>
    %547 = math.tanh %546 : vector<8x128xf32>
    %548 = arith.subf %500, %547 : vector<8x128xf32>
    %549 = arith.mulf %540, %548 : vector<8x128xf32>
    %550 = arith.addf %547, %549 : vector<8x128xf32>
    %551 = vector.extract_strided_slice %520 {offsets = [0, 384], sizes = [8, 128], strides = [1, 1]} : vector<8x512xf32> to vector<8x128xf32>
    %c0_186 = arith.constant 0 : index
    %c0_187 = arith.constant 0 : index
    %552 = vector.load %arg12[%c0_186, %c0_187] : memref<128x128xf32, #tpu.memory_space<vmem>>, vector<128x128xf32>
    %cst_188 = arith.constant dense<0.000000e+00> : vector<8x128xf32>
    %553 = tpu.matmul %550, %552, %cst_188 {dimension_numbers = #tpu.dot_dimension_numbers<[1], [0], [0], [1], [0, 0, 1, 1], [], []>} : vector<8x128xf32>, vector<128x128xf32>, vector<8x128xf32> -> vector<8x128xf32>
    %554 = arith.addf %551, %553 : vector<8x128xf32>
    %555 = arith.addf %554, %211 : vector<8x128xf32>
    %556 = arith.index_cast %c7_i32_178 : i32 to index
    %c0_189 = arith.constant 0 : index
    %c0_190 = arith.constant 0 : index
    %557 = vector.load %arg15[%556, %c0_189, %c0_190] : memref<8x8x128xf32, #tpu.memory_space<vmem>>, vector<1x8x128xf32>
    %558 = vector.shape_cast %557 : vector<1x8x128xf32> to vector<8x128xf32>
    %559 = vector.shape_cast %555 : vector<8x128xf32> to vector<1x8x128xf32>
    tpu.vector_store %arg15[%556, %c0_189, %c0_190], %559 {strides = array<i32>} : memref<8x8x128xf32, #tpu.memory_space<vmem>>, vector<1x8x128xf32>,
    %560 = arith.index_cast %c7_i32_178 : i32 to index
    %561 = memref.load %arg2[%560] : memref<8xi32, #tpu.memory_space<smem>>
    %c1_i32_191 = arith.constant 1 : i32
    %562 = arith.cmpi eq, %561, %c1_i32_191 : i32
    %c7_i32_192 = arith.constant 7 : i32
    %563 = arith.cmpi eq, %c7_i32_178, %c7_i32_192 : i32
    %564 = arith.ori %562, %563 : i1
    %565 = arith.extui %564 : i1 to i32
    %c0_i32_193 = arith.constant 0 : i32
    %566 = arith.cmpi ne, %565, %c0_i32_193 : i32
    scf.if %566 {
      %570 = arith.index_cast %c7_i32_178 : i32 to index
      %c0_197 = arith.constant 0 : index
      %c0_198 = arith.constant 0 : index
      %571 = vector.load %arg1[%570, %c0_197, %c0_198] : memref<8x8x512xf32, #tpu.memory_space<vmem>>, vector<1x8x512xf32>
      %572 = vector.shape_cast %571 : vector<1x8x512xf32> to vector<8x512xf32>
      %c0_199 = arith.constant 0 : index
      %c0_200 = arith.constant 0 : index
      %573 = vector.load %arg17[%c0_199, %c0_200] : memref<8x512xf32, #tpu.memory_space<vmem>>, vector<8x512xf32>
      tpu.vector_store %arg17[%c0_199, %c0_200], %572 {strides = array<i32>} : memref<8x512xf32, #tpu.memory_space<vmem>>, vector<8x512xf32>,
    } else {
    }
    %true_194 = arith.constant true
    %567 = arith.xori %564, %true_194 : i1
    %568 = arith.extui %567 : i1 to i32
    %c0_i32_195 = arith.constant 0 : i32
    %569 = arith.cmpi ne, %568, %c0_i32_195 : i32
    scf.if %569 {
      %cst_197 = arith.constant dense<0xFF800000> : vector<8xf32>
      %570 = vector.multi_reduction <maximumf>, %555, %cst_197 [1] : vector<8x128xf32> to vector<8xf32>
      %571 = vector.shape_cast %570 : vector<8xf32> to vector<8x1xf32>
      %572 = vector.broadcast %571 : vector<8x1xf32> to vector<8x128xf32>
      %573 = arith.cmpf oeq, %555, %572 : vector<8x128xf32>
      %c128_i32 = arith.constant 128 : i32
      %574 = vector.broadcast %c128_i32 : i32 to vector<8x128xi32>
      %575 = arith.select %573, %216, %574 : vector<8x128xi1>, vector<8x128xi32>
      %cst_198 = arith.constant dense<2147483647> : vector<8xi32>
      %576 = vector.multi_reduction <minsi>, %575, %cst_198 [1] : vector<8x128xi32> to vector<8xi32>
      %577 = vector.shape_cast %576 : vector<8xi32> to vector<8x1xi32>
      %578 = vector.broadcast %577 : vector<8x1xi32> to vector<8x128xi32>
      %579 = arith.cmpi eq, %216, %578 : vector<8x128xi32>
      %580 = arith.extui %579 : vector<8x128xi1> to vector<8x128xi32>
      %581 = arith.sitofp %580 : vector<8x128xi32> to vector<8x128xf32>
      %c0_199 = arith.constant 0 : index
      %c0_200 = arith.constant 0 : index
      %582 = vector.load %arg7[%c0_199, %c0_200] : memref<128x512xf32, #tpu.memory_space<vmem>>, vector<128x512xf32>
      %cst_201 = arith.constant dense<0.000000e+00> : vector<8x512xf32>
      %583 = tpu.matmul %581, %582, %cst_201 {dimension_numbers = #tpu.dot_dimension_numbers<[1], [0], [0], [1], [0, 0, 1, 1], [], []>} : vector<8x128xf32>, vector<128x512xf32>, vector<8x512xf32> -> vector<8x512xf32>
      %c0_202 = arith.constant 0 : index
      %c0_203 = arith.constant 0 : index
      %584 = vector.load %arg17[%c0_202, %c0_203] : memref<8x512xf32, #tpu.memory_space<vmem>>, vector<8x512xf32>
      tpu.vector_store %arg17[%c0_202, %c0_203], %583 {strides = array<i32>} : memref<8x512xf32, #tpu.memory_space<vmem>>, vector<8x512xf32>,
    } else {
    }
    %c7_i32_196 = arith.constant 7 : i32
    return
  }
}

</mosaic_0001>

<bundles_post_ra>
// kernel: tpu_custom_call.1
= control target key start
LH: loop header
LB: loop body
LE: loop exit
PB: predicated region body
PF: predicated region fallthrough
CT: control target
= control target key end

     0   :  { %s9400_s0 = inlined_call_operand.vmem [shape: f32[48,8], index: 0, kind: input, shape index: {}]   ;;  %s9401_s1 = inlined_call_operand.hbm [shape: f32[8,8,512], index: 1, kind: input, shape index: {}]   ;;  %s9402_s2 = inlined_call_operand.vmem [shape: s32[8], index: 2, kind: input, shape index: {}]   ;;  %s9403_s3 = inlined_call_operand.vmem [shape: f32[8,384], index: 3, kind: input, shape index: {}]   ;;  %s9404_s4 = inlined_call_operand.hbm [shape: f32[128,384], index: 4, kind: input, shape index: {}]   ;;  %s9405_s5 = inlined_call_operand.vmem [shape: f32[1,384], index: 5, kind: input, shape index: {}]   ;;  %s9406_s6 = inlined_call_operand.vmem [shape: f32[1,128], index: 6, kind: input, shape index: {}]   ;;  %s9407_s7 = inlined_call_operand.hbm [shape: f32[128,512], index: 7, kind: input, shape index: {}]   ;;  %s9408_s8 = inlined_call_operand.hbm [shape: f32[128,384], index: 8, kind: input, shape index: {}]   ;;  %s9409_s9 = inlined_call_operand.hbm [shape: f32[128,384], index: 9, kind: input, shape index: {}]   ;;  %s9410_s10 = inlined_call_operand.vmem [shape: f32[1,384], index: 10, kind: input, shape index: {}]   ;;  %s9411_s11 = inlined_call_operand.vmem [shape: f32[1,128], index: 11, kind: input, shape index: {}]   ;;  %s9412_s12 = inlined_call_operand.hbm [shape: f32[128,128], index: 12, kind: input, shape index: {}]   ;;  %s9413_s13 = inlined_call_operand.hbm [shape: f32[128,128], index: 13, kind: input, shape index: {}]   ;;  %s9414_s14 = inlined_call_operand.vmem [shape: f32[1,128], index: 14, kind: input, shape index: {}]   ;;  %s9415_s15 = inlined_call_operand.hbm [shape: f32[8,8,128], index: 15, kind: output, shape index: {}]  }
   0x1   :  { %9417 = sst [smem:[#allocation25_spill]] %s9415_s15 }
   0x2   :  { %20 = vsyncpa [#allocation5], 0 }
   0x3   :  { %21 = vsyncpa [#allocation7], 0 }
   0x4   :  { %22 = vsyncpa [#allocation10], 0 }
   0x5   :  { %23 = vsyncpa [#allocation13], 0 }
   0x6   :  { %24 = vsyncpa [#allocation16], 0 }
   0x7   :  { %25 = vsyncpa [#allocation6], 0  ;;  %s8460_s18 = smov [#allocation9]   ;;  %s8260_s22 = scalar_lea.hbm %s9404_s4, 6144 }
   0x8   :  { %s57_s19 = sshll.u32 %s8460_s18, 4  ;;  %p8261_p0 = scmp.ne.s32.totalorder %s9404_s4, %s8260_s22  ;;  %s58_s19 = int_to_ptr.vmem [resolvable:$true] %s57_s19 }
   0x9   :  { %p8264_p1 = scmp.lt.u32.totalorder %s8260_s22, %s9404_s4 }
   0xb   :  { %p8266_p2 = pnand %p8264_p1, %p8261_p0 }
   0xd   :  { %8269 = shalt.err (!%p8266_p2)
}
   0xe   :  { %s8270_s27 = scalar_lea.vmem %s58_s19, 6144  ;;  %p8275_p4 = scmp.lt.s32.totalorder %s58_s19, %s58_s19 }
   0xf   :  { %p8271_p3 = scmp.ne.s32.totalorder %s58_s19, %s8270_s27  ;;  %p8276_p5 = scmp.lt.s32.totalorder %s8270_s27, %s8270_s27 }
  0x11   :  { %p8277_p6 = por %p8276_p5, %p8275_p4 }
  0x13   :  { %p8278_p7 = pnand %p8277_p6, %p8271_p3 }
  0x15   :  { %8281 = shalt.err (!%p8278_p7)
}
  0x16   :  { %s8461_s28 = smov 384   ;;  %s8462_s29 = smov 24  }
  0x17   :  { %63 = dma.hbm_to_vmem [thread:$0]  %s9404_s4, 6144, %s58_s19, [#allocation10], %s8461_s28, %s8461_s28, %s8462_s29  }
  0x18   :  { %s8463_s17 = smov [#allocation12]   ;;  %s8464_s20 = smov [#allocation15]  }
  0x19   :  { %s85_s18 = sshll.u32 %s8463_s17, 4  ;;  %s113_s21 = sshll.u32 %s8464_s20, 4  ;;  %s86_s18 = int_to_ptr.vmem [resolvable:$true] %s85_s18  ;;  %s114_s21 = int_to_ptr.vmem [resolvable:$true] %s113_s21 }
  0x1a   :  { %s8282_s24 = scalar_lea.hbm %s9408_s8, 6144 }
  0x1b   :  { %p8283_p8 = scmp.ne.s32.totalorder %s9408_s8, %s8282_s24  ;;  %p8286_p9 = scmp.lt.u32.totalorder %s8282_s24, %s9408_s8 }
  0x1d   :  { %p8288_p10 = pnand %p8286_p9, %p8283_p8 }
  0x1f   :  { %8291 = shalt.err (!%p8288_p10)
}
  0x20   :  { %s8292_s4 = scalar_lea.vmem %s86_s18, 6144  ;;  %p8297_p12 = scmp.lt.s32.totalorder %s86_s18, %s86_s18 }
  0x21   :  { %p8293_p11 = scmp.ne.s32.totalorder %s86_s18, %s8292_s4  ;;  %p8298_p13 = scmp.lt.s32.totalorder %s8292_s4, %s8292_s4 }
  0x23   :  { %p8299_p0 = por %p8298_p13, %p8297_p12 }
  0x25   :  { %p8300_p1 = pnand %p8299_p0, %p8293_p11 }
  0x27   :  { %8303 = shalt.err (!%p8300_p1)
}
  0x28   :  { %91 = dma.hbm_to_vmem [thread:$0]  %s9408_s8, 6144, %s86_s18, [#allocation13], %s8461_s28, %s8461_s28, %s8462_s29  }
  0x29   :  { %s8304_s17 = scalar_lea.hbm %s9412_s12, 2048 }
  0x2a   :  { %p8305_p2 = scmp.ne.s32.totalorder %s9412_s12, %s8304_s17  ;;  %p8308_p3 = scmp.lt.u32.totalorder %s8304_s17, %s9412_s12 }
  0x2c   :  { %p8310_p4 = pnand %p8308_p3, %p8305_p2 }
  0x2e   :  { %8313 = shalt.err (!%p8310_p4)
}
  0x2f   :  { %s8314_s25 = scalar_lea.vmem %s114_s21, 2048  ;;  %p8319_p6 = scmp.lt.s32.totalorder %s114_s21, %s114_s21 }
  0x30   :  { %p8315_p5 = scmp.ne.s32.totalorder %s114_s21, %s8314_s25  ;;  %p8320_p7 = scmp.lt.s32.totalorder %s8314_s25, %s8314_s25 }
  0x32   :  { %p8321_p8 = por %p8320_p7, %p8319_p6 }
  0x34   :  { %p8322_p9 = pnand %p8321_p8, %p8315_p5 }
  0x36   :  { %8325 = shalt.err (!%p8322_p9)
}
  0x37   :  { %s8465_s8 = smov 128   ;;  %s8466_s18 = smov 8  }
  0x38   :  { %119 = dma.hbm_to_vmem [thread:$0]  %s9412_s12, 2048, %s114_s21, [#allocation16], %s8465_s8, %s8465_s8, %s8466_s18  }
  0x39   :  { %s8467_s4 = smov [#allocation4]   ;;  %s8326_s15 = scalar_lea.hbm %s9401_s1, 4096 }
  0x3a   :  { %s33_s19 = sshll.u32 %s8467_s4, 4  ;;  %p8327_p10 = scmp.ne.s32.totalorder %s9401_s1, %s8326_s15  ;;  %s34_s19 = int_to_ptr.vmem [resolvable:$true] %s33_s19 }
  0x3b   :  { %p8330_p11 = scmp.lt.u32.totalorder %s8326_s15, %s9401_s1 }
  0x3d   :  { %p8332_p12 = pnand %p8330_p11, %p8327_p10 }
  0x3f   :  { %8335 = shalt.err (!%p8332_p12)
}
  0x40   :  { %s8336_s24 = scalar_lea.vmem %s34_s19, 4096  ;;  %p8341_p0 = scmp.lt.s32.totalorder %s34_s19, %s34_s19 }
  0x41   :  { %p8337_p13 = scmp.ne.s32.totalorder %s34_s19, %s8336_s24  ;;  %p8342_p1 = scmp.lt.s32.totalorder %s8336_s24, %s8336_s24 }
  0x43   :  { %p8343_p2 = por %p8342_p1, %p8341_p0 }
  0x45   :  { %p8344_p3 = pnand %p8343_p2, %p8337_p13 }
  0x47   :  { %8347 = shalt.err (!%p8344_p3)
}
  0x48   :  { %s8468_s12 = smov 512   ;;  %s8469_s21 = smov 32  }
  0x49   :  { %39 = dma.hbm_to_vmem [thread:$0]  %s9401_s1, 4096, %s34_s19, [#allocation5], %s8468_s12, %s8468_s12, %s8469_s21  }
  0x4a   :  { %s46_s30 = sshll.u32 %s9402_s2, 4  ;;  %s47_s30 = int_to_ptr.vmem [resolvable:$true] %s46_s30 }
  0x4b   :  { %s8348_s16 = scalar_lea.vmem %s47_s30, 16  ;;  %p8353_p5 = scmp.lt.s32.totalorder %s47_s30, %s47_s30 }
  0x4c   :  { %p8349_p4 = scmp.ne.s32.totalorder %s47_s30, %s8348_s16  ;;  %p8354_p6 = scmp.lt.s32.totalorder %s8348_s16, %s8348_s16 }
  0x4e   :  { %p8355_p7 = por %p8354_p6, %p8353_p5 }
  0x50   :  { %p8356_p8 = pnand %p8355_p7, %p8349_p4 }
  0x52   :  { %8359 = shalt.err (!%p8356_p8)
}
  0x53   :  { %s8470_s15 = smov [#allocation8]   ;;  %s8471_s17 = smov [#allocation11]  }
  0x54   :  { %49 = dma.vmem_to_smem %s47_s30, 16, %s8470_s15, [#allocation7]  }
  0x55   :  { %s73_s20 = sshll.u32 %s8471_s17, 4  ;;  %s8472_s22 = smov [#allocation14]   ;;  %s74_s20 = int_to_ptr.vmem [resolvable:$true] %s73_s20 }
  0x56   :  { %s97_s23 = sshll.u32 %s8472_s22, 4  ;;  %s8360_s24 = scalar_lea.hbm %s9407_s7, 8192  ;;  %s98_s23 = int_to_ptr.vmem [resolvable:$true] %s97_s23 }
  0x57   :  { %p8361_p9 = scmp.ne.s32.totalorder %s9407_s7, %s8360_s24  ;;  %p8364_p10 = scmp.lt.u32.totalorder %s8360_s24, %s9407_s7 }
  0x59   :  { %p8366_p11 = pnand %p8364_p10, %p8361_p9 }
  0x5b   :  { %8369 = shalt.err (!%p8366_p11)
}
  0x5c   :  { %s8370_s4 = scalar_lea.vmem %s74_s20, 8192  ;;  %p8375_p13 = scmp.lt.s32.totalorder %s74_s20, %s74_s20 }
  0x5d   :  { %p8371_p12 = scmp.ne.s32.totalorder %s74_s20, %s8370_s4  ;;  %p8376_p0 = scmp.lt.s32.totalorder %s8370_s4, %s8370_s4 }
  0x5f   :  { %p8377_p1 = por %p8376_p0, %p8375_p13 }
  0x61   :  { %p8378_p2 = pnand %p8377_p1, %p8371_p12 }
  0x63   :  { %8381 = shalt.err (!%p8378_p2)
}
  0x64   :  { %79 = dma.hbm_to_vmem [thread:$0]  %s9407_s7, 8192, %s74_s20, [#allocation10], %s8468_s12, %s8468_s12, %s8469_s21  }
  0x65   :  { %s8382_s22 = scalar_lea.hbm %s9409_s9, 6144 }
  0x66   :  { %p8383_p3 = scmp.ne.s32.totalorder %s9409_s9, %s8382_s22  ;;  %p8386_p4 = scmp.lt.u32.totalorder %s8382_s22, %s9409_s9 }
  0x68   :  { %p8388_p5 = pnand %p8386_p4, %p8383_p3 }
  0x6a   :  { %8391 = shalt.err (!%p8388_p5)
}
  0x6b   :  { %s8392_s25 = scalar_lea.vmem %s98_s23, 6144  ;;  %p8397_p7 = scmp.lt.s32.totalorder %s98_s23, %s98_s23 }
  0x6c   :  { %p8393_p6 = scmp.ne.s32.totalorder %s98_s23, %s8392_s25  ;;  %p8398_p8 = scmp.lt.s32.totalorder %s8392_s25, %s8392_s25 }
  0x6e   :  { %p8399_p9 = por %p8398_p8, %p8397_p7 }
  0x70   :  { %p8400_p10 = pnand %p8399_p9, %p8393_p6 }
  0x72   :  { %8403 = shalt.err (!%p8400_p10)
}
  0x73   :  { %103 = dma.hbm_to_vmem [thread:$0]  %s9409_s9, 6144, %s98_s23, [#allocation13], %s8461_s28, %s8461_s28, %s8462_s29  }
  0x74   :  { %s8473_s21 = smov [#allocation17]   ;;  %s8404_s4 = scalar_lea.hbm %s9413_s13, 2048 }
  0x75   :  { %s125_s20 = sshll.u32 %s8473_s21, 4  ;;  %p8405_p11 = scmp.ne.s32.totalorder %s9413_s13, %s8404_s4  ;;  %s126_s20 = int_to_ptr.vmem [resolvable:$true] %s125_s20 }
  0x76   :  { %p8408_p12 = scmp.lt.u32.totalorder %s8404_s4, %s9413_s13 }
  0x78   :  { %p8410_p13 = pnand %p8408_p12, %p8405_p11 }
  0x7a   :  { %8413 = shalt.err (!%p8410_p13)
}
  0x7b   :  { %s8414_s22 = scalar_lea.vmem %s126_s20, 2048  ;;  %p8419_p1 = scmp.lt.s32.totalorder %s126_s20, %s126_s20 }
  0x7c   :  { %p8415_p0 = scmp.ne.s32.totalorder %s126_s20, %s8414_s22  ;;  %p8420_p2 = scmp.lt.s32.totalorder %s8414_s22, %s8414_s22 }
  0x7e   :  { %p8421_p3 = por %p8420_p2, %p8419_p1 }
  0x80   :  { %p8422_p4 = pnand %p8421_p3, %p8415_p0 }
  0x82   :  { %8425 = shalt.err (!%p8422_p4)
}
  0x83   :  { %131 = dma.hbm_to_vmem [thread:$0]  %s9413_s13, 2048, %s126_s20, [#allocation16], %s8465_s8, %s8465_s8, %s8466_s18  }
  0x84   :  { %8448 = dma.done.wait [#allocation5], 4096  }
  0x85   :  { %8449 = vsyncadd [#allocation5], 4294963200 }
  0x86   :  { %8450 = dma.done.wait [#allocation7], 16  }
  0x87   :  { %8451 = vsyncadd [#allocation7], 4294967280 }
  0x88   :  { %8452 = dma.done.wait [#allocation10], 14336  }
  0x89   :  { %8453 = vsyncadd [#allocation10], 4294952960 }
  0x8a   :  { %8454 = dma.done.wait [#allocation13], 12288  }
  0x8b   :  { %8455 = vsyncadd [#allocation13], 4294955008 }
  0x8c   :  { %8456 = dma.done.wait [#allocation16], 4096  }
  0x8d   :  { %8457 = vsyncadd [#allocation16], 4294963200 }
  0x8e   :  { %158 = sfence }
  0x8f   :  { %v168_v0 = vld [vmem:[%s9403_s3 + $0x8] sm:$0xff]  ;;  %v167_v1 = vld [vmem:[%s9403_s3] sm:$0xff]  ;;  %vm187_vm0 = vcmask 64512   ;;  %v8474_v3 = vmov 0.0   ;;  %v429_v8 = vld [vmem:[#allocation9 + $0x18] sm:$0xff]  ;;  %v8475_v37 = vmov 0.0|0.0  }
  0x90   :  { %v427_v2 = vld [vmem:[#allocation9 + $0x8] sm:$0xff]  ;;  %206 = vmatprep.subr.mxu0 %v168_v0  ;;  %270 = vmatprep.mubr.f32.mxu0 %v8474_v3  ;;  %1781 = vst [vmem:[#allocation18] sm:$0xff] %v8474_v3  ;;  %v430_v4 = vld [vmem:[#allocation9 + $0x20] sm:$0xff]  ;;  %v433_v9 = vld [vmem:[#allocation9 + $0x38] sm:$0xff]  ;;  %vm8476_vm1 = vmmov 0  }
  0x91   :  { %v161_v5 = vld [vmem:[%s9400_s0] sm:$0xff]  ;;  %207 = vmatpush1.msra.mxu0 %v167_v1  ;;  %v8689_v7 = vpack.c.bf16 %v430_v4, %v427_v2  ;;  %v436_v10 = vld [vmem:[#allocation9 + $0x50] sm:$0xff]  ;;  %v435_v14 = vld [vmem:[#allocation9 + $0x48] sm:$0xff] }
  0x92   :  { %v426_v6 = vld [vmem:[#allocation9] sm:$0xff]  ;;  %5936 = vmatprep.mubr.msk.f32.mxu1 %vm187_vm0, %v161_v5  ;;  %5476 = vmatmul.mubr.msk.f32.vlgmr.msra.gmra.mrb[0].mxu0 %vm187_vm0, %v161_v5  ;;  %v8695_v12 = vpack.c.bf16 %v436_v10, %v433_v9  ;;  %v432_v13 = vld [vmem:[#allocation9 + $0x30] sm:$0xff]  ;;  %v439_v15 = vld [vmem:[#allocation9 + $0x68] sm:$0xff] }
  0x93   :  { %v8693_v11 = vpack.c.bf16 %v429_v8, %v426_v6  ;;  %6716 = vmatprep.subr.bf16.mxu0 %v8689_v7  ;;  %v442_v16 = vld [vmem:[#allocation9 + $0x80] sm:$0xff]  ;;  %276 = vmatprep.mubr.f32.mxu0 %v8474_v3  ;;  %v8700_v17 = vpack.c.bf16 %v435_v14, %v432_v13  ;;  %v162_v18 = vld [vmem:[%s9400_s0 + $0x8] sm:$0xff]  ;;  %v441_v21 = vld [vmem:[#allocation9 + $0x78] sm:$0xff] }
  0x94   :  { %v8706_v19 = vpack.c.bf16 %v442_v16, %v439_v15  ;;  %v438_v20 = vld [vmem:[#allocation9 + $0x60] sm:$0xff]  ;;  %v445_v22 = vld [vmem:[#allocation9 + $0x98] sm:$0xff]  ;;  %v448_v23 = vld [vmem:[#allocation9 + $0xb0] sm:$0xff] }
  0x95   :  { %6718 = vmatpush1.bf16.msra.mxu0 %v8693_v11  ;;  %v163_v24 = vld [vmem:[%s9400_s0 + $0x10] sm:$0xff]  ;;  %v8714_v25 = vpack.c.bf16 %v441_v21, %v438_v20  ;;  %v8717_v26 = vpack.c.bf16 %v448_v23, %v445_v22  ;;  %v447_v28 = vld [vmem:[#allocation9 + $0xa8] sm:$0xff]  ;;  %v454_v31 = vld [vmem:[#allocation9 + $0xe0] sm:$0xff] }
  0x96   :  { %6720 = vmatprep.subr.bf16.mxu0 %v8695_v12  ;;  %5477 = vmatmul.mubr.msk.f32.gmra.mrb[2].mxu0 %vm187_vm0, %v162_v18  ;;  %v444_v27 = vld [vmem:[#allocation9 + $0x90] sm:$0xff]  ;;  %v451_v30 = vld [vmem:[#allocation9 + $0xc8] sm:$0xff]  ;;  %v164_v32 = vld [vmem:[%s9400_s0 + $0x18] sm:$0xff] }
  0x97   :  { %282 = vmatprep.mubr.f32.mxu0 %v8474_v3  ;;  %v169_v29 = vld [vmem:[%s9403_s3 + $0x10] sm:$0xff]  ;;  %v431_v34 = vld [vmem:[#allocation9 + $0x28] sm:$0xff]  ;;  %v8728_v35 = vpack.c.bf16 %v447_v28, %v444_v27  ;;  %v450_v36 = vld [vmem:[#allocation9 + $0xc0] sm:$0xff]  ;;  %v8734_v39 = vpack.c.bf16 %v454_v31, %v451_v30  ;;  %v172_v27 = vlaneseq }
  0x98   :  { %5934 = vmatprep.subr.mxu1 %v169_v29  ;;  %v428_v33 = vld [vmem:[#allocation9 + $0x10] sm:$0xff]  ;;  %v453_v40 = vld [vmem:[#allocation9 + $0xd8] sm:$0xff]  ;;  %v434_v41 = vld [vmem:[#allocation9 + $0x40] sm:$0xff] }
  0x99   :  { %6722 = vmatpush1.bf16.msra.mxu0 %v8700_v17  ;;  %5935 = vmatpush3.msra.mxu1 %v169_v29  ;;  %v8731_v38 = vpack.c.bf16 %v431_v34, %v428_v33  ;;  %v437_v42 = vld [vmem:[#allocation9 + $0x58] sm:$0xff]  ;;  %v460_v44 = vld [vmem:[#allocation9 + $0x110] sm:$0xff]  ;;  %v165_v46 = vld [vmem:[%s9400_s0 + $0x20] sm:$0xff]  ;;  %v8747_v49 = vpack.c.bf16 %v453_v40, %v450_v36  ;;  %v8846_v28 = vand.u32 127, %v172_v27  ;;  %v8848_v29 = vshrl.u32 %v172_v27, 7 }
  0x9a   :  { %6724 = vmatprep.subr.bf16.mxu0 %v8706_v19  ;;  %5478 = vmatmul.mubr.msk.f32.gmra.mrb[4].mxu0 %vm187_vm0, %v163_v24  ;;  %v457_v43 = vld [vmem:[#allocation9 + $0xf8] sm:$0xff]  ;;  %v8739_v45 = vpack.c.bf16 %v437_v42, %v434_v41  ;;  %v440_v47 = vld [vmem:[#allocation9 + $0x70] sm:$0xff]  ;;  %v443_v48 = vld [vmem:[#allocation9 + $0x88] sm:$0xff] }
  0x9b   :  { %288 = vmatprep.mubr.f32.mxu0 %v8474_v3  ;;  %6747 = vmatprep.subr.bf16.mxu1 %v8475_v37  ;;  %v8751_v50 = vpack.c.bf16 %v460_v44, %v457_v43  ;;  %v456_v51 = vld [vmem:[#allocation9 + $0xf0] sm:$0xff]  ;;  %v459_v52 = vld [vmem:[#allocation9 + $0x108] sm:$0xff]  ;;  %v466_v54 = vld [vmem:[#allocation9 + $0x140] sm:$0xff]  ;;  %v8756_v55 = vpack.c.bf16 %v443_v48, %v440_v47  ;;  %v182_v30 = vsub.s32 2, %v8848_v29 }
  0x9c   :  { %5937 = vmatmul.mubr.msk.f32.vlgmr.msra.gmra.mrb[0].mxu1 %vm187_vm0, %v162_v18  ;;  %v463_v53 = vld [vmem:[#allocation9 + $0x128] sm:$0xff]  ;;  %v446_v57 = vld [vmem:[#allocation9 + $0xa0] sm:$0xff]  ;;  %v449_v58 = vld [vmem:[#allocation9 + $0xb8] sm:$0xff]  ;;  %v8764_v59 = vpack.c.bf16 %v459_v52, %v456_v51  ;;  %v174_v51 = vsub.s32 0, %v8848_v29 }
  0x9d   :  { %6726 = vmatpush1.bf16.msra.mxu0 %v8714_v25  ;;  %6749 = vmatpush3.bf16.msra.mxu1 %v8731_v38  ;;  %v166_v56 = vld [vmem:[%s9400_s0 + $0x28] sm:$0xff]  ;;  %v8768_v60 = vpack.c.bf16 %v466_v54, %v463_v53  ;;  %v462_v61 = vld [vmem:[#allocation9 + $0x120] sm:$0xff]  ;;  %v465_v62 = vld [vmem:[#allocation9 + $0x138] sm:$0xff]  ;;  %v8773_v1 = vpack.c.bf16 %v449_v58, %v446_v57 }
  0x9e   :  { %6728 = vmatprep.subr.bf16.mxu0 %v8717_v26  ;;  %5479 = vmatmul.mubr.msk.f32.gmra.mrb[6].mxu0 %vm187_vm0, %v164_v32  ;;  %v469_v63 = vld [vmem:[#allocation9 + $0x158] sm:$0xff]  ;;  %v472_v0 = vld [vmem:[#allocation9 + $0x170] sm:$0xff]  ;;  %v455_v4 = vld [vmem:[#allocation9 + $0xe8] sm:$0xff]  ;;  %v8778_v5 = vpack.c.bf16 %v465_v62, %v462_v61 }
  0x9f   :  { %294 = vmatprep.mubr.f32.mxu0 %v8474_v3  ;;  %6750 = vmatprep.subr.bf16.mxu1 %v8475_v37  ;;  %v452_v2 = vld [vmem:[#allocation9 + $0xd0] sm:$0xff]  ;;  %v8783_v6 = vpack.c.bf16 %v472_v0, %v469_v63  ;;  %v471_v9 = vld [vmem:[#allocation9 + $0x168] sm:$0xff]  ;;  %v458_v13 = vld [vmem:[#allocation9 + $0x100] sm:$0xff] }
  0xa0   :  { %5939 = vmatprep.mubr.msk.f32.mxu1 %vm187_vm0, %v163_v24  ;;  %v468_v8 = vld [vmem:[#allocation9 + $0x150] sm:$0xff]  ;;  %v8786_v10 = vpack.c.bf16 %v455_v4, %v452_v2  ;;  %v461_v14 = vld [vmem:[#allocation9 + $0x118] sm:$0xff]  ;;  %v467_v20 = vld [vmem:[#allocation9 + $0x148] sm:$0xff] }
  0xa1   :  { %6730 = vmatpush1.bf16.msra.mxu0 %v8728_v35  ;;  %5940 = vmatmul.mubr.msk.f32.gmra.mrb[2].mxu1 %vm187_vm0, %v164_v32  ;;  %v8790_v15 = vpack.c.bf16 %v471_v9, %v468_v8  ;;  %v8794_v16 = vpack.c.bf16 %v461_v14, %v458_v13  ;;  %v464_v18 = vld [vmem:[#allocation9 + $0x130] sm:$0xff]  ;;  %v470_v22 = vld [vmem:[#allocation9 + $0x160] sm:$0xff]  ;;  %v473_v23 = vld [vmem:[#allocation9 + $0x178] sm:$0xff] }
  0xa2   :  { %6732 = vmatprep.subr.bf16.mxu0 %v8734_v39  ;;  %5480 = vmatmul.mubr.msk.f32.gmra.mrb[8].mxu0 %vm187_vm0, %v165_v46  ;;  %v8800_v21 = vpack.c.bf16 %v467_v20, %v464_v18  ;;  %v8808_v24 = vpack.c.bf16 %v473_v23, %v470_v22  ;;  %v170_v31 = vld [vmem:[%s9405_s5] sm:$0x7] }
  0xa3   :  { %6752 = vmatpush3.bf16.msra.mxu1 %v8739_v45  ;;  %300 = vmatprep.mubr.f32.mxu0 %v8474_v3  ;;  %v183_v32 = vrot.slane %v170_v31, %v182_v30  ;;  %v8869_v52 = vrot.slane %v170_v31, %v174_v51  ;;  %v8881_v9 = vld [vmem:[%s9406_s6] ss:$0 sm:$0xff] }
  0xa4   :  { %6753 = vmatprep.subr.bf16.mxu1 %v8475_v37  ;;  %5942 = vmatprep.mubr.msk.f32.mxu1 %vm187_vm0, %v165_v46 }
  0xa5   :  { %6734 = vmatpush1.bf16.msra.mxu0 %v8747_v49  ;;  %5943 = vmatmul.mubr.msk.f32.gmra.mrb[4].mxu1 %vm187_vm0, %v166_v56 }
  0xa6   :  { %6736 = vmatprep.subr.bf16.mxu0 %v8751_v50  ;;  %5481 = vmatmul.mubr.msk.f32.gmra.mrb[10].mxu0 %vm187_vm0, %v166_v56  ;;  %v178_v56 = vsub.s32 1, %v8848_v29 }
  0xa7   :  { %6755 = vmatpush3.bf16.msra.mxu1 %v8756_v55  ;;  %538 = vmatprep.mubr.f32.mxu0 %v8474_v3 }
  0xa8   :  { %6756 = vmatprep.subr.bf16.mxu1 %v8475_v37  ;;  %5977 = vmatprep.mubr.msk.f32.mxu1 %vm8476_vm1, %v8474_v3  ;;  %v8875_v61 = vrot.slane %v170_v31, %v178_v56 }
  0xa9   :  { %6738 = vmatpush1.bf16.msra.mxu0 %v8764_v59 }
  0xaa   :  { %6740 = vmatprep.subr.bf16.mxu0 %v8768_v60 }
  0xab   :  { %6758 = vmatpush3.bf16.msra.mxu1 %v8773_v1 }
  0xac   :  { %6759 = vmatprep.subr.bf16.mxu1 %v8475_v37 }
  0xad   :  { %6742 = vmatpush1.bf16.msra.mxu0 %v8778_v5 }
  0xae   :  { %6744 = vmatprep.subr.bf16.mxu0 %v8783_v6 }
  0xaf   :  { %6761 = vmatpush3.bf16.msra.mxu1 %v8786_v10 }
  0xb0   :  { %6762 = vmatprep.subr.bf16.mxu1 %v8475_v37 }
  0xb1   :  { %6746 = vmatpush1.bf16.msra.mxu0 %v8790_v15 }
  0xb2   :  { %6772 = vmatprep.subr.bf16.mxu0 %v8689_v7 }
  0xb3   :  { %6764 = vmatpush3.bf16.msra.mxu1 %v8794_v16 }
  0xb4   :  { %539 = vmatmul.mubr.f32.vlgmr.msra.gmra.mrb[0].mxu0 %v8474_v3  ;;  %6765 = vmatprep.subr.bf16.mxu1 %v8475_v37 }
  0xb5   :  { %6774 = vmatpush1.bf16.msra.mxu0 %v8693_v11  ;;  %712 = vmatprep.mubr.f32.mxu0 %v8474_v3 }
  0xb6   :  { %6776 = vmatprep.subr.bf16.mxu0 %v8695_v12 }
  0xb7   :  { %6767 = vmatpush3.bf16.msra.mxu1 %v8800_v21 }
  0xb8   :  { %6768 = vmatprep.subr.bf16.mxu1 %v8475_v37 }
  0xb9   :  { %6778 = vmatpush1.bf16.msra.mxu0 %v8700_v17 }
  0xba   :  { %6780 = vmatprep.subr.bf16.mxu0 %v8706_v19 }
  0xbb   :  { %6770 = vmatpush3.bf16.msra.mxu1 %v8808_v24 }
  0xbc   :  { %6803 = vmatprep.subr.bf16.mxu1 %v8475_v37 }
  0xbd   :  { %6782 = vmatpush1.bf16.msra.mxu0 %v8714_v25 }
  0xbe   :  { %5978 = vmatmul.mubr.f32.vlgmr.msra.gmra.mrb[6].mxu1 %v8474_v3  ;;  %6784 = vmatprep.subr.bf16.mxu0 %v8717_v26 }
  0xbf   :  { %6805 = vmatpush3.bf16.msra.mxu1 %v8731_v38  ;;  %6012 = vmatprep.mubr.msk.f32.mxu1 %vm8476_vm1, %v8474_v3 }
  0xc0   :  { %6806 = vmatprep.subr.bf16.mxu1 %v8475_v37 }
  0xc1   :  { %6786 = vmatpush1.bf16.msra.mxu0 %v8728_v35 }
  0xc2   :  { %6788 = vmatprep.subr.bf16.mxu0 %v8734_v39 }
  0xc3   :  { %6808 = vmatpush3.bf16.msra.mxu1 %v8739_v45 }
  0xc4   :  { %6809 = vmatprep.subr.bf16.mxu1 %v8475_v37 }
  0xc5   :  { %6790 = vmatpush1.bf16.msra.mxu0 %v8747_v49 }
  0xc6   :  { %6792 = vmatprep.subr.bf16.mxu0 %v8751_v50 }
  0xc7   :  { %6811 = vmatpush3.bf16.msra.mxu1 %v8756_v55 }
  0xc8   :  { %6812 = vmatprep.subr.bf16.mxu1 %v8475_v37 }
  0xc9   :  { %6794 = vmatpush1.bf16.msra.mxu0 %v8764_v59 }
  0xca   :  { %6796 = vmatprep.subr.bf16.mxu0 %v8768_v60 }
  0xcb   :  { %6814 = vmatpush3.bf16.msra.mxu1 %v8773_v1 }
  0xcc   :  { %6815 = vmatprep.subr.bf16.mxu1 %v8475_v37 }
  0xcd   :  { %6798 = vmatpush1.bf16.msra.mxu0 %v8778_v5 }
  0xce   :  { %6800 = vmatprep.subr.bf16.mxu0 %v8783_v6 }
  0xcf   :  { %6817 = vmatpush3.bf16.msra.mxu1 %v8786_v10 }
  0xd0   :  { %6818 = vmatprep.subr.bf16.mxu1 %v8475_v37 }
  0xd1   :  { %6802 = vmatpush1.bf16.msra.mxu0 %v8790_v15 }
  0xd2   :  { %6828 = vmatprep.subr.bf16.mxu0 %v8689_v7 }
  0xd3   :  { %6820 = vmatpush3.bf16.msra.mxu1 %v8794_v16 }
  0xd4   :  { %6821 = vmatprep.subr.bf16.mxu1 %v8475_v37 }
  0xd7   :  { %6823 = vmatpush3.bf16.msra.mxu1 %v8800_v21 }
  0xd8   :  { %6824 = vmatprep.subr.bf16.mxu1 %v8475_v37 }
  0xdb   :  { %6826 = vmatpush3.bf16.msra.mxu1 %v8808_v24 }
  0xdc   :  { %6859 = vmatprep.subr.bf16.mxu1 %v8475_v37 }
 0x16f   :  { %v5938_v33 = vpop.f32.mrb[0].mxu1 }
 0x170   :  { %v8856_v34 = vadd.f32 %v5938_v33, %v183_v32  ;;  %v373_v36 = vpop.f32.mrb[1].mxu1 }
 0x171   :  { %v374_v20 = vadd.f32 %v373_v36, %v183_v32 }
 0x174   :  { %v5941_v40 = vpop.f32.mrb[2].mxu1 }
 0x175   :  { %v8858_v41 = vadd.f32 %v5941_v40, %v183_v32  ;;  %v383_v42 = vpop.f32.mrb[3].mxu1 }
 0x176   :  { %v8860_v43 = vadd.f32 %v383_v42, %v183_v32 }
 0x178   :  { %v5944_v44 = vpop.f32.mrb[4].mxu1 }
 0x179   :  { %v8862_v46 = vadd.f32 %v5944_v44, %v183_v32  ;;  %v393_v47 = vpop.f32.mrb[5].mxu1 }
 0x17a   :  { %v8864_v48 = vadd.f32 %v393_v47, %v183_v32 }
 0x187   :  { %v540_v53 = vpop.f32.mrb[0].mxu0 }
 0x188   :  { %v8075_v54 = vadd.f32 %v540_v53, %v8869_v52  ;;  %v542_v57 = vpop.f32.mrb[1].mxu0 }
 0x189   :  { %v8076_v62 = vadd.f32 %v542_v57, %v8875_v61 }
 0x18a   :  { %v5488_v58 = vmul.f32 -1.442695, %v8075_v54 }
 0x18b   :  { %v5489_v2 = vmul.f32 -1.442695, %v8076_v62 }
 0x18c   :  { %8129 = vpow2.f32 %v5488_v58 }
 0x18d   :  { %8131 = vpow2.f32 %v5489_v2 }
 0x191   :  { %v611_v63 = vpop.f32.mrb[6].mxu1 }
 0x192   :  { %v5979_v0 = vpop.f32.mrb[7].mxu1  ;;  %v635_v13 = vadd.f32 %v8881_v9, %v611_v63 }
 0x196   :  { %v8130_v4 = vpop.eup %8129 }
 0x197   :  { %v619_v8 = vadd.f32 1.0, %v8130_v4  ;;  %v8132_v14 = vpop.eup %8131 }
 0x198   :  { %v626_v23 = vadd.f32 1.0, %v8132_v14 }
 0x199   :  { %8133 = vrcp.f32 %v619_v8 }
 0x1a3   :  { %v8134_v18 = vpop.eup %8133 }
 0x1a4   :  { %v636_v22 = vmul.f32 %v8134_v18, %v635_v13 }
 0x1a6   :  { %v637_v27 = vadd.f32 %v636_v22, %v374_v20 }
 0x1a8   :  { %8135 = vtanh.f32 %v637_v27 }
 0x1a9   :  { %8137 = vrcp.f32 %v626_v23 }
 0x1b2   :  { %v8136_v31 = vpop.eup %8135 }
 0x1b3   :  { %v639_v33 = vsub.f32 0.0, %v8136_v31  ;;  %v8138_v40 = vpop.eup %8137 }
 0x1b5   :  { %v640_v42 = vmul.f32 %v8138_v40, %v639_v33 }
 0x1b7   :  { %v641_v44 = vadd.f32 %v8136_v31, %v640_v42 }
 0x1b9   :  { %713 = vmatmul.mubr.f32.vlgmr.msra.gmra.mrb[2].mxu0 %v641_v44  ;;  %6013 = vmatmul.mubr.f32.vlgmr.msra.gmra.mrb[8].mxu1 %v641_v44 }
 0x1ba   :  { %6830 = vmatpush1.bf16.msra.mxu0 %v8693_v11  ;;  %6861 = vmatpush3.bf16.msra.mxu1 %v8731_v38 }
 0x1bb   :  { %6832 = vmatprep.subr.bf16.mxu0 %v8695_v12  ;;  %6862 = vmatprep.subr.bf16.mxu1 %v8475_v37 }
 0x1bc   :  { %880 = vmatprep.mubr.f32.mxu0 %v8474_v3  ;;  %6047 = vmatprep.mubr.msk.f32.mxu1 %vm8476_vm1, %v8474_v3 }
 0x1be   :  { %6834 = vmatpush1.bf16.msra.mxu0 %v8700_v17  ;;  %6864 = vmatpush3.bf16.msra.mxu1 %v8739_v45 }
 0x1bf   :  { %6836 = vmatprep.subr.bf16.mxu0 %v8706_v19  ;;  %6865 = vmatprep.subr.bf16.mxu1 %v8475_v37 }
 0x1c2   :  { %6838 = vmatpush1.bf16.msra.mxu0 %v8714_v25  ;;  %6867 = vmatpush3.bf16.msra.mxu1 %v8756_v55 }
 0x1c3   :  { %6840 = vmatprep.subr.bf16.mxu0 %v8717_v26  ;;  %6868 = vmatprep.subr.bf16.mxu1 %v8475_v37 }
 0x1c6   :  { %6842 = vmatpush1.bf16.msra.mxu0 %v8728_v35  ;;  %6870 = vmatpush3.bf16.msra.mxu1 %v8773_v1 }
 0x1c7   :  { %6844 = vmatprep.subr.bf16.mxu0 %v8734_v39  ;;  %6871 = vmatprep.subr.bf16.mxu1 %v8475_v37 }
 0x1ca   :  { %6846 = vmatpush1.bf16.msra.mxu0 %v8747_v49  ;;  %6873 = vmatpush3.bf16.msra.mxu1 %v8786_v10 }
 0x1cb   :  { %6848 = vmatprep.subr.bf16.mxu0 %v8751_v50  ;;  %6874 = vmatprep.subr.bf16.mxu1 %v8475_v37 }
 0x1ce   :  { %6850 = vmatpush1.bf16.msra.mxu0 %v8764_v59  ;;  %6876 = vmatpush3.bf16.msra.mxu1 %v8794_v16 }
 0x1cf   :  { %6852 = vmatprep.subr.bf16.mxu0 %v8768_v60  ;;  %6877 = vmatprep.subr.bf16.mxu1 %v8475_v37 }
 0x1d2   :  { %6854 = vmatpush1.bf16.msra.mxu0 %v8778_v5  ;;  %6879 = vmatpush3.bf16.msra.mxu1 %v8800_v21 }
 0x1d3   :  { %6856 = vmatprep.subr.bf16.mxu0 %v8783_v6  ;;  %6880 = vmatprep.subr.bf16.mxu1 %v8475_v37 }
 0x1d6   :  { %6858 = vmatpush1.bf16.msra.mxu0 %v8790_v15  ;;  %6882 = vmatpush3.bf16.msra.mxu1 %v8808_v24 }
 0x1d7   :  { %6884 = vmatprep.subr.bf16.mxu0 %v8689_v7  ;;  %6915 = vmatprep.subr.bf16.mxu1 %v8475_v37 }
 0x28c   :  { %v714_v32 = vpop.f32.mrb[2].mxu0  ;;  %v785_v36 = vpop.f32.mrb[8].mxu1 }
 0x28d   :  { %v8077_v47 = vadd.f32 %v714_v32, %v8869_v52  ;;  %v716_v53 = vpop.f32.mrb[3].mxu0  ;;  %v6014_v54 = vpop.f32.mrb[9].mxu1  ;;  %v803_v4 = vadd.f32 %v8881_v9, %v785_v36 }
 0x28e   :  { %v8078_v58 = vadd.f32 %v716_v53, %v8875_v61 }
 0x28f   :  { %v5491_v57 = vmul.f32 -1.442695, %v8077_v47 }
 0x290   :  { %v5492_v62 = vmul.f32 -1.442695, %v8078_v58 }
 0x291   :  { %8139 = vpow2.f32 %v5491_v57 }
 0x292   :  { %8141 = vpow2.f32 %v5492_v62 }
 0x29b   :  { %v8140_v63 = vpop.eup %8139 }
 0x29c   :  { %v793_v0 = vadd.f32 1.0, %v8140_v63  ;;  %v8142_v2 = vpop.eup %8141 }
 0x29d   :  { %v800_v18 = vadd.f32 1.0, %v8142_v2 }
 0x29e   :  { %8143 = vrcp.f32 %v793_v0 }
 0x2a8   :  { %v8144_v8 = vpop.eup %8143 }
 0x2a9   :  { %v804_v13 = vmul.f32 %v8144_v8, %v803_v4 }
 0x2ab   :  { %v805_v14 = vadd.f32 %v804_v13, %v8856_v34 }
 0x2ad   :  { %8145 = vtanh.f32 %v805_v14 }
 0x2ae   :  { %8147 = vrcp.f32 %v800_v18 }
 0x2b7   :  { %v8146_v20 = vpop.eup %8145 }
 0x2b8   :  { %v807_v22 = vsub.f32 %v641_v44, %v8146_v20  ;;  %v8148_v23 = vpop.eup %8147 }
 0x2ba   :  { %v808_v27 = vmul.f32 %v8148_v23, %v807_v22 }
 0x2bc   :  { %v809_v31 = vadd.f32 %v8146_v20, %v808_v27 }
 0x2be   :  { %881 = vmatmul.mubr.f32.vlgmr.msra.gmra.mrb[4].mxu0 %v809_v31  ;;  %6048 = vmatmul.mubr.f32.vlgmr.msra.gmra.mrb[10].mxu1 %v809_v31 }
 0x2bf   :  { %6886 = vmatpush1.bf16.msra.mxu0 %v8693_v11  ;;  %6917 = vmatpush3.bf16.msra.mxu1 %v8731_v38 }
 0x2c0   :  { %6888 = vmatprep.subr.bf16.mxu0 %v8695_v12  ;;  %6918 = vmatprep.subr.bf16.mxu1 %v8475_v37 }
 0x2c1   :  { %1048 = vmatprep.mubr.f32.mxu0 %v8474_v3  ;;  %6082 = vmatprep.mubr.msk.f32.mxu1 %vm8476_vm1, %v8474_v3 }
 0x2c3   :  { %6890 = vmatpush1.bf16.msra.mxu0 %v8700_v17  ;;  %6920 = vmatpush3.bf16.msra.mxu1 %v8739_v45 }
 0x2c4   :  { %6892 = vmatprep.subr.bf16.mxu0 %v8706_v19  ;;  %6921 = vmatprep.subr.bf16.mxu1 %v8475_v37 }
 0x2c7   :  { %6894 = vmatpush1.bf16.msra.mxu0 %v8714_v25  ;;  %6923 = vmatpush3.bf16.msra.mxu1 %v8756_v55 }
 0x2c8   :  { %6896 = vmatprep.subr.bf16.mxu0 %v8717_v26  ;;  %6924 = vmatprep.subr.bf16.mxu1 %v8475_v37 }
 0x2cb   :  { %6898 = vmatpush1.bf16.msra.mxu0 %v8728_v35  ;;  %6926 = vmatpush3.bf16.msra.mxu1 %v8773_v1 }
 0x2cc   :  { %6900 = vmatprep.subr.bf16.mxu0 %v8734_v39  ;;  %6927 = vmatprep.subr.bf16.mxu1 %v8475_v37 }
 0x2cf   :  { %6902 = vmatpush1.bf16.msra.mxu0 %v8747_v49  ;;  %6929 = vmatpush3.bf16.msra.mxu1 %v8786_v10 }
 0x2d0   :  { %6904 = vmatprep.subr.bf16.mxu0 %v8751_v50  ;;  %6930 = vmatprep.subr.bf16.mxu1 %v8475_v37 }
 0x2d3   :  { %6906 = vmatpush1.bf16.msra.mxu0 %v8764_v59  ;;  %6932 = vmatpush3.bf16.msra.mxu1 %v8794_v16 }
 0x2d4   :  { %6908 = vmatprep.subr.bf16.mxu0 %v8768_v60  ;;  %6933 = vmatprep.subr.bf16.mxu1 %v8475_v37 }
 0x2d7   :  { %6910 = vmatpush1.bf16.msra.mxu0 %v8778_v5  ;;  %6935 = vmatpush3.bf16.msra.mxu1 %v8800_v21 }
 0x2d8   :  { %6912 = vmatprep.subr.bf16.mxu0 %v8783_v6  ;;  %6936 = vmatprep.subr.bf16.mxu1 %v8475_v37 }
 0x2db   :  { %6914 = vmatpush1.bf16.msra.mxu0 %v8790_v15  ;;  %6938 = vmatpush3.bf16.msra.mxu1 %v8808_v24 }
 0x2dc   :  { %6940 = vmatprep.subr.bf16.mxu0 %v8689_v7  ;;  %6971 = vmatprep.subr.bf16.mxu1 %v8475_v37 }
 0x391   :  { %v882_v34 = vpop.f32.mrb[4].mxu0  ;;  %v953_v33 = vpop.f32.mrb[10].mxu1 }
 0x392   :  { %v8079_v40 = vadd.f32 %v882_v34, %v8869_v52  ;;  %v884_v42 = vpop.f32.mrb[5].mxu0  ;;  %v6049_v44 = vpop.f32.mrb[11].mxu1  ;;  %v971_v58 = vadd.f32 %v8881_v9, %v953_v33 }
 0x393   :  { %v8080_v36 = vadd.f32 %v884_v42, %v8875_v61 }
 0x394   :  { %v5493_v32 = vmul.f32 -1.442695, %v8079_v40 }
 0x395   :  { %v5494_v47 = vmul.f32 -1.442695, %v8080_v36 }
 0x396   :  { %8149 = vpow2.f32 %v5493_v32 }
 0x397   :  { %8151 = vpow2.f32 %v5494_v47 }
 0x3a0   :  { %v8150_v53 = vpop.eup %8149 }
 0x3a1   :  { %v961_v54 = vadd.f32 1.0, %v8150_v53  ;;  %v8152_v57 = vpop.eup %8151 }
 0x3a2   :  { %v968_v2 = vadd.f32 1.0, %v8152_v57 }
 0x3a3   :  { %8153 = vrcp.f32 %v961_v54 }
 0x3ad   :  { %v8154_v62 = vpop.eup %8153 }
 0x3ae   :  { %v972_v63 = vmul.f32 %v8154_v62, %v971_v58 }
 0x3b0   :  { %v973_v0 = vadd.f32 %v972_v63, %v8860_v43 }
 0x3b2   :  { %8155 = vtanh.f32 %v973_v0  ;;  %v1485_v0 = vld [vmem:[#allocation12 + $0x18] sm:$0xff] }
 0x3b3   :  { %8157 = vrcp.f32 %v968_v2  ;;  %v1484_v2 = vld [vmem:[#allocation12 + $0x10] sm:$0xff] }
 0x3bc   :  { %v8156_v4 = vpop.eup %8155 }
 0x3bd   :  { %v975_v8 = vsub.f32 %v809_v31, %v8156_v4  ;;  %v8158_v13 = vpop.eup %8157 }
 0x3bf   :  { %v976_v14 = vmul.f32 %v8158_v13, %v975_v8  ;;  %v1487_v8 = vld [vmem:[#allocation12 + $0x28] sm:$0xff] }
 0x3c0   :  { %v7084_v13 = vpack.c.bf16 %v1487_v8, %v1484_v2  ;;  %v1518_v2 = vld [vmem:[#allocation12 + $0x120] sm:$0xff]  ;;  %v1520_v8 = vld [vmem:[#allocation12 + $0x130] sm:$0xff] }
 0x3c1   :  { %v977_v18 = vadd.f32 %v8156_v4, %v976_v14  ;;  %v1489_v14 = vld [vmem:[#allocation12 + $0x38] sm:$0xff] }
 0x3c3   :  { %1049 = vmatmul.mubr.f32.vlgmr.msra.gmra.mrb[6].mxu0 %v977_v18  ;;  %6083 = vmatmul.mubr.f32.vlgmr.msra.gmra.mrb[12].mxu1 %v977_v18 }
 0x3c4   :  { %6942 = vmatpush1.bf16.msra.mxu0 %v8693_v11  ;;  %6973 = vmatpush3.bf16.msra.mxu1 %v8731_v38 }
 0x3c5   :  { %6944 = vmatprep.subr.bf16.mxu0 %v8695_v12  ;;  %6974 = vmatprep.subr.bf16.mxu1 %v8475_v37 }
 0x3c6   :  { %1216 = vmatprep.mubr.f32.mxu0 %v8474_v3  ;;  %6117 = vmatprep.mubr.msk.f32.mxu1 %vm8476_vm1, %v8474_v3 }
 0x3c8   :  { %6946 = vmatpush1.bf16.msra.mxu0 %v8700_v17  ;;  %6976 = vmatpush3.bf16.msra.mxu1 %v8739_v45 }
 0x3c9   :  { %6948 = vmatprep.subr.bf16.mxu0 %v8706_v19  ;;  %6977 = vmatprep.subr.bf16.mxu1 %v8475_v37 }
 0x3cc   :  { %6950 = vmatpush1.bf16.msra.mxu0 %v8714_v25  ;;  %6979 = vmatpush3.bf16.msra.mxu1 %v8756_v55 }
 0x3cd   :  { %6952 = vmatprep.subr.bf16.mxu0 %v8717_v26  ;;  %6980 = vmatprep.subr.bf16.mxu1 %v8475_v37 }
 0x3d0   :  { %6954 = vmatpush1.bf16.msra.mxu0 %v8728_v35  ;;  %6982 = vmatpush3.bf16.msra.mxu1 %v8773_v1 }
 0x3d1   :  { %6956 = vmatprep.subr.bf16.mxu0 %v8734_v39  ;;  %6983 = vmatprep.subr.bf16.mxu1 %v8475_v37 }
 0x3d4   :  { %6958 = vmatpush1.bf16.msra.mxu0 %v8747_v49  ;;  %6985 = vmatpush3.bf16.msra.mxu1 %v8786_v10 }
 0x3d5   :  { %6960 = vmatprep.subr.bf16.mxu0 %v8751_v50  ;;  %6986 = vmatprep.subr.bf16.mxu1 %v8475_v37 }
 0x3d8   :  { %6962 = vmatpush1.bf16.msra.mxu0 %v8764_v59  ;;  %6988 = vmatpush3.bf16.msra.mxu1 %v8794_v16 }
 0x3d9   :  { %6964 = vmatprep.subr.bf16.mxu0 %v8768_v60  ;;  %6989 = vmatprep.subr.bf16.mxu1 %v8475_v37 }
 0x3dc   :  { %6966 = vmatpush1.bf16.msra.mxu0 %v8778_v5  ;;  %6991 = vmatpush3.bf16.msra.mxu1 %v8800_v21 }
 0x3dd   :  { %6968 = vmatprep.subr.bf16.mxu0 %v8783_v6  ;;  %6992 = vmatprep.subr.bf16.mxu1 %v8475_v37 }
 0x3e0   :  { %6970 = vmatpush1.bf16.msra.mxu0 %v8790_v15  ;;  %6994 = vmatpush3.bf16.msra.mxu1 %v8808_v24 }
 0x3e1   :  { %6996 = vmatprep.subr.bf16.mxu0 %v8689_v7  ;;  %7027 = vmatprep.subr.bf16.mxu1 %v8475_v37 }
 0x496   :  { %v1050_v43 = vpop.f32.mrb[6].mxu0  ;;  %v1121_v20 = vpop.f32.mrb[12].mxu1 }
 0x497   :  { %v8081_v22 = vadd.f32 %v1050_v43, %v8869_v52  ;;  %v1052_v23 = vpop.f32.mrb[7].mxu0  ;;  %v6084_v27 = vpop.f32.mrb[13].mxu1  ;;  %v1139_v7 = vadd.f32 %v8881_v9, %v1121_v20  ;;  %v1488_v20 = vld [vmem:[#allocation12 + $0x30] sm:$0xff] }
 0x498   :  { %v8082_v34 = vadd.f32 %v1052_v23, %v8875_v61  ;;  %v1490_v23 = vld [vmem:[#allocation12 + $0x40] sm:$0xff] }
 0x499   :  { %v5495_v31 = vmul.f32 -1.442695, %v8081_v22  ;;  %v1491_v22 = vld [vmem:[#allocation12 + $0x48] sm:$0xff] }
 0x49a   :  { %v5496_v33 = vmul.f32 -1.442695, %v8082_v34  ;;  %v7057_v27 = vpack.c.bf16 %v1491_v22, %v1488_v20  ;;  %v1528_v20 = vld [vmem:[#allocation12 + $0x170] sm:$0xff] }
 0x49b   :  { %8159 = vpow2.f32 %v5495_v31  ;;  %v1493_v31 = vld [vmem:[#allocation12 + $0x58] sm:$0xff] }
 0x49c   :  { %8161 = vpow2.f32 %v5496_v33  ;;  %v7087_v34 = vpack.c.bf16 %v1493_v31, %v1490_v23  ;;  %v1495_v33 = vld [vmem:[#allocation12 + $0x68] sm:$0xff]  ;;  %v1524_v23 = vld [vmem:[#allocation12 + $0x150] sm:$0xff]  ;;  %v1526_v31 = vld [vmem:[#allocation12 + $0x160] sm:$0xff] }
 0x4a5   :  { %v8160_v40 = vpop.eup %8159 }
 0x4a6   :  { %v1129_v42 = vadd.f32 1.0, %v8160_v40  ;;  %v8162_v44 = vpop.eup %8161  ;;  %v1498_v40 = vld [vmem:[#allocation12 + $0x80] sm:$0xff] }
 0x4a7   :  { %v1136_v53 = vadd.f32 1.0, %v8162_v44  ;;  %v1494_v44 = vld [vmem:[#allocation12 + $0x60] sm:$0xff] }
 0x4a8   :  { %8163 = vrcp.f32 %v1129_v42  ;;  %v7059_v42 = vpack.c.bf16 %v1498_v40, %v1495_v33  ;;  %v1529_v33 = vld [vmem:[#allocation12 + $0x178] sm:$0xff] }
 0x4a9   :  { %v7105_v40 = vpack.c.bf16 %v1529_v33, %v1526_v31  ;;  %v1695_v31 = vld [vmem:[#allocation17 + $0x38] sm:$0xff]  ;;  %v1820_v33 = vld [vmem:[#allocation14 + $0xa8] sm:$0xff] }
 0x4b2   :  { %v8164_v32 = vpop.eup %8163 }
 0x4b3   :  { %v1140_v36 = vmul.f32 %v8164_v32, %v1139_v7  ;;  %v1497_v7 = vld [vmem:[#allocation12 + $0x78] sm:$0xff]  ;;  %v1496_v32 = vld [vmem:[#allocation12 + $0x70] sm:$0xff] }
 0x4b5   :  { %v1141_v47 = vadd.f32 %v1140_v36, %v8858_v41  ;;  %v7061_v36 = vpack.c.bf16 %v1497_v7, %v1494_v44  ;;  %v1803_v44 = vld [vmem:[#allocation14 + $0x20] sm:$0xff] }
 0x4b7   :  { %8165 = vtanh.f32 %v1141_v47  ;;  %v1499_v47 = vld [vmem:[#allocation12 + $0x88] sm:$0xff] }
 0x4b8   :  { %8167 = vrcp.f32 %v1136_v53  ;;  %v7090_v53 = vpack.c.bf16 %v1499_v47, %v1496_v32 }
 0x4c1   :  { %v8166_v54 = vpop.eup %8165 }
 0x4c2   :  { %v1143_v57 = vsub.f32 %v977_v18, %v8166_v54  ;;  %v8168_v58 = vpop.eup %8167  ;;  %v1492_v18 = vld [vmem:[#allocation12 + $0x50] sm:$0xff] }
 0x4c3   :  { %v7055_v43 = vpack.c.bf16 %v1492_v18, %v1489_v14  ;;  %v1523_v14 = vld [vmem:[#allocation12 + $0x148] sm:$0xff] }
 0x4c4   :  { %v1144_v62 = vmul.f32 %v8168_v58, %v1143_v57  ;;  %v1504_v57 = vld [vmem:[#allocation12 + $0xb0] sm:$0xff]  ;;  %v7102_v18 = vpack.c.bf16 %v1523_v14, %v1520_v8  ;;  %v1811_v8 = vld [vmem:[#allocation14 + $0x60] sm:$0xff]  ;;  %v1818_v14 = vld [vmem:[#allocation14 + $0x98] sm:$0xff] }
 0x4c6   :  { %v1145_v63 = vadd.f32 %v8166_v54, %v1144_v62  ;;  %v1501_v54 = vld [vmem:[#allocation12 + $0x98] sm:$0xff]  ;;  %v1500_v62 = vld [vmem:[#allocation12 + $0x90] sm:$0xff] }
 0x4c7   :  { %v7063_v58 = vpack.c.bf16 %v1504_v57, %v1501_v54 }
 0x4c8   :  { %1217 = vmatmul.mubr.f32.vlgmr.msra.gmra.mrb[8].mxu0 %v1145_v63  ;;  %6118 = vmatmul.mubr.f32.vlgmr.msra.gmra.mrb[14].mxu1 %v1145_v63 }
 0x4c9   :  { %6998 = vmatpush1.bf16.msra.mxu0 %v8693_v11  ;;  %7029 = vmatpush3.bf16.msra.mxu1 %v8731_v38 }
 0x4ca   :  { %7000 = vmatprep.subr.bf16.mxu0 %v8695_v12  ;;  %7030 = vmatprep.subr.bf16.mxu1 %v8475_v37 }
 0x4cb   :  { %1384 = vmatprep.mubr.f32.mxu0 %v8474_v3  ;;  %6152 = vmatprep.mubr.msk.f32.mxu1 %vm8476_vm1, %v8474_v3 }
 0x4cd   :  { %7002 = vmatpush1.bf16.msra.mxu0 %v8700_v17  ;;  %7032 = vmatpush3.bf16.msra.mxu1 %v8739_v45 }
 0x4ce   :  { %7004 = vmatprep.subr.bf16.mxu0 %v8706_v19  ;;  %7033 = vmatprep.subr.bf16.mxu1 %v8475_v37 }
 0x4d1   :  { %7006 = vmatpush1.bf16.msra.mxu0 %v8714_v25  ;;  %7035 = vmatpush3.bf16.msra.mxu1 %v8756_v55 }
 0x4d2   :  { %7008 = vmatprep.subr.bf16.mxu0 %v8717_v26  ;;  %7036 = vmatprep.subr.bf16.mxu1 %v8475_v37 }
 0x4d5   :  { %7010 = vmatpush1.bf16.msra.mxu0 %v8728_v35  ;;  %7038 = vmatpush3.bf16.msra.mxu1 %v8773_v1 }
 0x4d6   :  { %7012 = vmatprep.subr.bf16.mxu0 %v8734_v39  ;;  %7039 = vmatprep.subr.bf16.mxu1 %v8475_v37 }
 0x4d9   :  { %7014 = vmatpush1.bf16.msra.mxu0 %v8747_v49  ;;  %7041 = vmatpush3.bf16.msra.mxu1 %v8786_v10 }
 0x4da   :  { %7016 = vmatprep.subr.bf16.mxu0 %v8751_v50  ;;  %7042 = vmatprep.subr.bf16.mxu1 %v8475_v37 }
 0x4dd   :  { %7018 = vmatpush1.bf16.msra.mxu0 %v8764_v59  ;;  %7044 = vmatpush3.bf16.msra.mxu1 %v8794_v16 }
 0x4de   :  { %7020 = vmatprep.subr.bf16.mxu0 %v8768_v60  ;;  %7045 = vmatprep.subr.bf16.mxu1 %v8475_v37 }
 0x4e1   :  { %7022 = vmatpush1.bf16.msra.mxu0 %v8778_v5  ;;  %7047 = vmatpush3.bf16.msra.mxu1 %v8800_v21  ;;  %v1483_v21 = vld [vmem:[#allocation12 + $0x8] sm:$0xff] }
 0x4e2   :  { %7024 = vmatprep.subr.bf16.mxu0 %v8783_v6  ;;  %7048 = vmatprep.subr.bf16.mxu1 %v8475_v37 }
 0x4e5   :  { %7026 = vmatpush1.bf16.msra.mxu0 %v8790_v15  ;;  %7050 = vmatpush3.bf16.msra.mxu1 %v8808_v24  ;;  %v1486_v24 = vld [vmem:[#allocation12 + $0x20] sm:$0xff] }
 0x4e6   :  { %7083 = vmatprep.subr.bf16.mxu1 %v8475_v37  ;;  %v7051_v41 = vpack.c.bf16 %v1486_v24, %v1483_v21  ;;  %v1517_v21 = vld [vmem:[#allocation12 + $0x118] sm:$0xff] }
 0x4e8   :  { %7052 = vmatprep.subr.bf16.mxu0 %v7051_v41  ;;  %v1519_v41 = vld [vmem:[#allocation12 + $0x128] sm:$0xff] }
 0x59b   :  { %v1218_v11 = vpop.f32.mrb[8].mxu0  ;;  %v1289_v12 = vpop.f32.mrb[14].mxu1 }
 0x59c   :  { %v8083_v17 = vadd.f32 %v1218_v11, %v8869_v52  ;;  %v1220_v19 = vpop.f32.mrb[9].mxu0  ;;  %v6119_v25 = vpop.f32.mrb[15].mxu1  ;;  %v1307_v50 = vadd.f32 %v8881_v9, %v1289_v12  ;;  %v1502_v11 = vld [vmem:[#allocation12 + $0xa0] sm:$0xff] }
 0x59d   :  { %v8084_v35 = vadd.f32 %v1220_v19, %v8875_v61  ;;  %v1507_v25 = vld [vmem:[#allocation12 + $0xc8] sm:$0xff] }
 0x59e   :  { %v5497_v26 = vmul.f32 -1.442695, %v8083_v17  ;;  %v1505_v17 = vld [vmem:[#allocation12 + $0xb8] sm:$0xff] }
 0x59f   :  { %v5498_v38 = vmul.f32 -1.442695, %v8084_v35  ;;  %v7093_v19 = vpack.c.bf16 %v1505_v17, %v1502_v11 }
 0x5a0   :  { %8169 = vpow2.f32 %v5497_v26  ;;  %v1510_v26 = vld [vmem:[#allocation12 + $0xe0] sm:$0xff] }
 0x5a1   :  { %8171 = vpow2.f32 %v5498_v38  ;;  %v7067_v35 = vpack.c.bf16 %v1510_v26, %v1507_v25  ;;  %v1506_v38 = vld [vmem:[#allocation12 + $0xc0] sm:$0xff] }
 0x5aa   :  { %v8170_v39 = vpop.eup %8169 }
 0x5ab   :  { %v1297_v45 = vadd.f32 1.0, %v8170_v39  ;;  %v8172_v49 = vpop.eup %8171  ;;  %v1509_v39 = vld [vmem:[#allocation12 + $0xd8] sm:$0xff] }
 0x5ac   :  { %v1304_v1 = vadd.f32 1.0, %v8172_v49  ;;  %v7069_v49 = vpack.c.bf16 %v1509_v39, %v1506_v38  ;;  %v1688_v38 = vld [vmem:[#allocation17] sm:$0xff] }
 0x5ad   :  { %8173 = vrcp.f32 %v1297_v45  ;;  %v1508_v45 = vld [vmem:[#allocation12 + $0xd0] sm:$0xff] }
 0x5b7   :  { %v8174_v55 = vpop.eup %8173 }
 0x5b8   :  { %v1308_v59 = vmul.f32 %v8174_v55, %v1307_v50  ;;  %v1511_v50 = vld [vmem:[#allocation12 + $0xe8] sm:$0xff] }
 0x5b9   :  { %v7096_v55 = vpack.c.bf16 %v1511_v50, %v1508_v45  ;;  %v1799_v45 = vld [vmem:[#allocation14] sm:$0xff] }
 0x5ba   :  { %v1309_v60 = vadd.f32 %v1308_v59, %v8864_v48  ;;  %v1482_v48 = vld [vmem:[#allocation12] sm:$0xff]  ;;  %v1513_v59 = vld [vmem:[#allocation12 + $0xf8] sm:$0xff] }
 0x5bb   :  { %v7053_v4 = vpack.c.bf16 %v1485_v0, %v1482_v48  ;;  %v1522_v48 = vld [vmem:[#allocation12 + $0x140] sm:$0xff] }
 0x5bc   :  { %8175 = vtanh.f32 %v1309_v60  ;;  %v1516_v60 = vld [vmem:[#allocation12 + $0x110] sm:$0xff]  ;;  %v7075_v0 = vpack.c.bf16 %v1522_v48, %v1519_v41  ;;  %v1815_v41 = vld [vmem:[#allocation14 + $0x80] sm:$0xff] }
 0x5bd   :  { %8177 = vrcp.f32 %v1304_v1  ;;  %v7071_v1 = vpack.c.bf16 %v1516_v60, %v1513_v59  ;;  %v1809_v59 = vld [vmem:[#allocation14 + $0x50] sm:$0xff] }
 0x5c6   :  { %v8176_v5 = vpop.eup %8175 }
 0x5c7   :  { %v1311_v6 = vsub.f32 %v1145_v63, %v8176_v5  ;;  %v8178_v10 = vpop.eup %8177  ;;  %v1503_v63 = vld [vmem:[#allocation12 + $0xa8] sm:$0xff] }
 0x5c8   :  { %v7065_v12 = vpack.c.bf16 %v1503_v63, %v1500_v62 }
 0x5c9   :  { %v1312_v15 = vmul.f32 %v8178_v10, %v1311_v6  ;;  %v1515_v6 = vld [vmem:[#allocation12 + $0x108] sm:$0xff]  ;;  %v1514_v10 = vld [vmem:[#allocation12 + $0x100] sm:$0xff] }
 0x5ca   :  { %v7099_v24 = vpack.c.bf16 %v1517_v21, %v1514_v10  ;;  %v1691_v10 = vld [vmem:[#allocation17 + $0x18] sm:$0xff]  ;;  %v1808_v21 = vld [vmem:[#allocation14 + $0x48] sm:$0xff] }
 0x5cb   :  { %v9039_v16 = vadd.f32 %v8176_v5, %v1312_v15  ;;  %v1512_v5 = vld [vmem:[#allocation12 + $0xf0] sm:$0xff] }
 0x5cc   :  { %v7073_v15 = vpack.c.bf16 %v1515_v6, %v1512_v5  ;;  %v1690_v5 = vld [vmem:[#allocation17 + $0x10] sm:$0xff] }
 0x5cd   :  { %1385 = vmatmul.mubr.f32.vlgmr.msra.gmra.mrb[10].mxu0 %v9039_v16  ;;  %6153 = vmatmul.mubr.f32.vlgmr.msra.gmra.mrb[16].mxu1 %v9039_v16 }
 0x5ce   :  { %1611 = vmatprep.mubr.f32.mxu0 %v8474_v3  ;;  %6187 = vmatprep.mubr.msk.f32.mxu1 %vm8476_vm1, %v8474_v3 }
 0x5cf   :  { %7054 = vmatpush1.bf16.msra.mxu0 %v7053_v4  ;;  %7085 = vmatpush3.bf16.msra.mxu1 %v7084_v13  ;;  %v1521_v4 = vld [vmem:[#allocation12 + $0x138] sm:$0xff] }
 0x5d0   :  { %7086 = vmatprep.subr.bf16.mxu1 %v8475_v37  ;;  %7056 = vmatprep.subr.bf16.mxu0 %v7055_v43  ;;  %v7077_v13 = vpack.c.bf16 %v1521_v4, %v1518_v2  ;;  %v1525_v43 = vld [vmem:[#allocation12 + $0x158] sm:$0xff]  ;;  %v1693_v4 = vld [vmem:[#allocation17 + $0x28] sm:$0xff] }
 0x5d1   :  { %v7079_v22 = vpack.c.bf16 %v1528_v20, %v1525_v43  ;;  %v9064_v43 = vld [vmem:[#allocation18] sm:$0xff] }
 0x5d3   :  { %7058 = vmatpush1.bf16.msra.mxu0 %v7057_v27  ;;  %7088 = vmatpush3.bf16.msra.mxu1 %v7087_v34  ;;  %v1527_v27 = vld [vmem:[#allocation12 + $0x168] sm:$0xff] }
 0x5d4   :  { %7089 = vmatprep.subr.bf16.mxu1 %v8475_v37  ;;  %7060 = vmatprep.subr.bf16.mxu0 %v7059_v42  ;;  %v7081_v34 = vpack.c.bf16 %v1527_v27, %v1524_v23  ;;  %v1800_v42 = vld [vmem:[#allocation14 + $0x8] sm:$0xff]  ;;  %v1694_v23 = vld [vmem:[#allocation17 + $0x30] sm:$0xff] }
 0x5d5   :  { %v7131_v7 = vpack.c.bf16 %v1803_v44, %v1800_v42  ;;  %v1827_v42 = vld [vmem:[#allocation14 + $0xe0] sm:$0xff]  ;;  %v7117_v44 = vpack.c.bf16 %v1695_v31, %v1694_v23  ;;  %v1825_v23 = vld [vmem:[#allocation14 + $0xd0] sm:$0xff] }
 0x5d7   :  { %7062 = vmatpush1.bf16.msra.mxu0 %v7061_v36  ;;  %7091 = vmatpush3.bf16.msra.mxu1 %v7090_v53 }
 0x5d8   :  { %7092 = vmatprep.subr.bf16.mxu1 %v8475_v37  ;;  %7064 = vmatprep.subr.bf16.mxu0 %v7063_v58 }
 0x5db   :  { %7066 = vmatpush1.bf16.msra.mxu0 %v7065_v12  ;;  %7094 = vmatpush3.bf16.msra.mxu1 %v7093_v19 }
 0x5dc   :  { %7095 = vmatprep.subr.bf16.mxu1 %v8475_v37  ;;  %7068 = vmatprep.subr.bf16.mxu0 %v7067_v35 }
 0x5df   :  { %7070 = vmatpush1.bf16.msra.mxu0 %v7069_v49  ;;  %7097 = vmatpush3.bf16.msra.mxu1 %v7096_v55  ;;  %v1802_v49 = vld [vmem:[#allocation14 + $0x18] sm:$0xff] }
 0x5e0   :  { %7098 = vmatprep.subr.bf16.mxu1 %v8475_v37  ;;  %7072 = vmatprep.subr.bf16.mxu0 %v7071_v1  ;;  %v1806_v55 = vld [vmem:[#allocation14 + $0x38] sm:$0xff] }
 0x5e3   :  { %7074 = vmatpush1.bf16.msra.mxu0 %v7073_v15  ;;  %7100 = vmatpush3.bf16.msra.mxu1 %v7099_v24  ;;  %v1805_v15 = vld [vmem:[#allocation14 + $0x30] sm:$0xff]  ;;  %v1812_v24 = vld [vmem:[#allocation14 + $0x68] sm:$0xff] }
 0x5e4   :  { %7101 = vmatprep.subr.bf16.mxu1 %v8475_v37  ;;  %7076 = vmatprep.subr.bf16.mxu0 %v7075_v0  ;;  %v7137_v48 = vpack.c.bf16 %v1808_v21, %v1805_v15  ;;  %v1692_v0 = vld [vmem:[#allocation17 + $0x20] sm:$0xff]  ;;  %v7139_v2 = vpack.c.bf16 %v1815_v41, %v1812_v24  ;;  %v1844_v15 = vld [vmem:[#allocation14 + $0x168] sm:$0xff]  ;;  %v1801_v41 = vld [vmem:[#allocation14 + $0x10] sm:$0xff] }
 0x5e5   :  { %v7114_v20 = vpack.c.bf16 %v1693_v4, %v1692_v0  ;;  %v1807_v0 = vld [vmem:[#allocation14 + $0x40] sm:$0xff] }
 0x5e7   :  { %7078 = vmatpush1.bf16.msra.mxu0 %v7077_v13  ;;  %7103 = vmatpush3.bf16.msra.mxu1 %v7102_v18  ;;  %v1814_v13 = vld [vmem:[#allocation14 + $0x78] sm:$0xff]  ;;  %v1821_v18 = vld [vmem:[#allocation14 + $0xb0] sm:$0xff] }
 0x5e8   :  { %7104 = vmatprep.subr.bf16.mxu1 %v8475_v37  ;;  %7080 = vmatprep.subr.bf16.mxu0 %v7079_v22  ;;  %v7141_v22 = vpack.c.bf16 %v1814_v13, %v1811_v8  ;;  %v7143_v27 = vpack.c.bf16 %v1821_v18, %v1818_v14  ;;  %v1813_v8 = vld [vmem:[#allocation14 + $0x70] sm:$0xff]  ;;  %v1816_v13 = vld [vmem:[#allocation14 + $0x88] sm:$0xff]  ;;  %v1819_v18 = vld [vmem:[#allocation14 + $0xa0] sm:$0xff] }
 0x5e9   :  { %v7170_v14 = vpack.c.bf16 %v1816_v13, %v1813_v8 }
 0x5eb   :  { %7082 = vmatpush1.bf16.msra.mxu0 %v7081_v34  ;;  %7106 = vmatpush3.bf16.msra.mxu1 %v7105_v40  ;;  %v1817_v34 = vld [vmem:[#allocation14 + $0x90] sm:$0xff]  ;;  %v1824_v40 = vld [vmem:[#allocation14 + $0xc8] sm:$0xff] }
 0x5ec   :  { %7107 = vmatprep.subr.bf16.mxu0 %v8475_v37  ;;  %7132 = vmatprep.subr.bf16.mxu1 %v7131_v7  ;;  %v7145_v7 = vpack.c.bf16 %v1820_v33, %v1817_v34  ;;  %v1831_v34 = vld [vmem:[#allocation14 + $0x100] sm:$0xff]  ;;  %v1834_v33 = vld [vmem:[#allocation14 + $0x118] sm:$0xff] }
 0x6a0   :  { %v1386_v32 = vpop.f32.mrb[10].mxu0  ;;  %v1457_v36 = vpop.f32.mrb[16].mxu1 }
 0x6a1   :  { %v8085_v47 = vadd.f32 %v1386_v32, %v8869_v52  ;;  %v1388_v53 = vpop.f32.mrb[11].mxu0  ;;  %v6154_v54 = vpop.f32.mrb[17].mxu1  ;;  %v1475_v17 = vadd.f32 %v8881_v9, %v1457_v36  ;;  %v7133_v9 = vpack.c.bf16 %v1802_v49, %v1799_v45  ;;  %v1696_v32 = vld [vmem:[#allocation17 + $0x40] sm:$0xff]  ;;  %v7147_v36 = vpack.c.bf16 %v1827_v42, %v1824_v40  ;;  %v1701_v45 = vld [vmem:[#allocation17 + $0x68] sm:$0xff]  ;;  %v1837_v40 = vld [vmem:[#allocation14 + $0x130] sm:$0xff] }
 0x6a2   :  { %v8086_v58 = vadd.f32 %v1388_v53, %v8875_v61  ;;  %v1689_v61 = vld [vmem:[#allocation17 + $0x8] sm:$0xff]  ;;  %v1823_v53 = vld [vmem:[#allocation14 + $0xc0] sm:$0xff]  ;;  %v1826_v54 = vld [vmem:[#allocation14 + $0xd8] sm:$0xff] }
 0x6a3   :  { %v5499_v57 = vmul.f32 -1.442695, %v8085_v47  ;;  %v7108_v1 = vpack.c.bf16 %v1689_v61, %v1688_v38  ;;  %v1697_v47 = vld [vmem:[#allocation17 + $0x48] sm:$0xff]  ;;  %v1835_v49 = vld [vmem:[#allocation14 + $0x120] sm:$0xff] }
 0x6a4   :  { %v5500_v62 = vmul.f32 -1.442695, %v8086_v58  ;;  %v1833_v58 = vld [vmem:[#allocation14 + $0x110] sm:$0xff]  ;;  %v1840_v42 = vld [vmem:[#allocation14 + $0x148] sm:$0xff] }
 0x6a5   :  { %8179 = vpow2.f32 %v5499_v57  ;;  %v1830_v57 = vld [vmem:[#allocation14 + $0xf8] sm:$0xff] }
 0x6a6   :  { %8181 = vpow2.f32 %v5500_v62  ;;  %v7120_v62 = vpack.c.bf16 %v1697_v47, %v1696_v32  ;;  %v1846_v32 = vld [vmem:[#allocation14 + $0x178] sm:$0xff]  ;;  %v9091_v47 = vld [vmem:[#allocation4 + $0x10] sm:$0xff] }
 0x6a7   :  { %1790 = vst [vmem:[#allocation3 + $0x10] sm:$0xff] %v9091_v47 }
 0x6af   :  { %v8180_v63 = vpop.eup %8179 }
 0x6b0   :  { %v1465_v11 = vadd.f32 1.0, %v8180_v63  ;;  %v8182_v12 = vpop.eup %8181  ;;  %v7149_v63 = vpack.c.bf16 %v1826_v54, %v1823_v53  ;;  %v1784_v53 = vld [vmem:[#allocation4] sm:$0xff]  ;;  %v1785_v54 = vld [vmem:[#allocation4 + $0x8] sm:$0xff] }
 0x6b1   :  { %v1472_v35 = vadd.f32 1.0, %v8182_v12  ;;  %v7151_v12 = vpack.c.bf16 %v1833_v58, %v1830_v57  ;;  %1788 = vst [vmem:[#allocation3] sm:$0xff] %v1784_v53  ;;  %1789 = vst [vmem:[#allocation3 + $0x8] sm:$0xff] %v1785_v54  ;;  %v2015_v57 = vld [vmem:[#allocation15] sm:$0xff]  ;;  %v2016_v58 = vld [vmem:[#allocation15 + $0x8] sm:$0xff] }
 0x6b2   :  { %8183 = vrcp.f32 %v1465_v11  ;;  %v1698_v11 = vld [vmem:[#allocation17 + $0x50] sm:$0xff] }
 0x6bc   :  { %v8184_v19 = vpop.eup %8183 }
 0x6bd   :  { %v1476_v25 = vmul.f32 %v8184_v19, %v1475_v17  ;;  %v1699_v17 = vld [vmem:[#allocation17 + $0x58] sm:$0xff]  ;;  %v1829_v19 = vld [vmem:[#allocation14 + $0xf0] sm:$0xff] }
 0x6bf   :  { %v1477_v26 = vadd.f32 %v1476_v25, %v8862_v46  ;;  %v7135_v46 = vpack.c.bf16 %v1809_v59, %v1806_v55  ;;  %v1832_v25 = vld [vmem:[#allocation14 + $0x108] sm:$0xff]  ;;  %v1842_v55 = vld [vmem:[#allocation14 + $0x158] sm:$0xff]  ;;  %v1845_v59 = vld [vmem:[#allocation14 + $0x170] sm:$0xff] }
 0x6c0   :  { %v7153_v38 = vpack.c.bf16 %v1832_v25, %v1829_v19  ;;  %v2020_v19 = vld [vmem:[#allocation15 + $0x28] sm:$0xff] }
 0x6c1   :  { %8185 = vtanh.f32 %v1477_v26  ;;  %v1836_v26 = vld [vmem:[#allocation14 + $0x128] sm:$0xff] }
 0x6c2   :  { %8187 = vrcp.f32 %v1472_v35  ;;  %v1839_v35 = vld [vmem:[#allocation14 + $0x140] sm:$0xff] }
 0x6c3   :  { %v7155_v61 = vpack.c.bf16 %v1839_v35, %v1836_v26  ;;  %v2021_v26 = vld [vmem:[#allocation15 + $0x30] sm:$0xff]  ;;  %v2022_v35 = vld [vmem:[#allocation15 + $0x38] sm:$0xff] }
 0x6cb   :  { %v8186_v52 = vpop.eup %8185 }
 0x6cc   :  { %v1479_v39 = vsub.f32 %v9039_v16, %v8186_v52  ;;  %v8188_v50 = vpop.eup %8187  ;;  %v7111_v16 = vpack.c.bf16 %v1691_v10, %v1690_v5  ;;  %v7159_v5 = vpack.c.bf16 %v1845_v59, %v1842_v55  ;;  %v1841_v10 = vld [vmem:[#allocation14 + $0x150] sm:$0xff]  ;;  %v2027_v55 = vld [vmem:[#allocation15 + $0x60] sm:$0xff]  ;;  %v2028_v59 = vld [vmem:[#allocation15 + $0x68] sm:$0xff] }
 0x6cd   :  { %v7161_v24 = vpack.c.bf16 %v1844_v15, %v1841_v10 }
 0x6ce   :  { %v1480_v60 = vmul.f32 %v8188_v50, %v1479_v39  ;;  %v1700_v39 = vld [vmem:[#allocation17 + $0x60] sm:$0xff]  ;;  %v1838_v50 = vld [vmem:[#allocation14 + $0x138] sm:$0xff] }
 0x6d0   :  { %v9059_v6 = vadd.f32 %v8186_v52, %v1480_v60  ;;  %v7123_v52 = vpack.c.bf16 %v1699_v17, %v1698_v11  ;;  %v7126_v60 = vpack.c.bf16 %v1701_v45, %v1700_v39  ;;  %v2018_v11 = vld [vmem:[#allocation15 + $0x18] sm:$0xff]  ;;  %v2019_v17 = vld [vmem:[#allocation15 + $0x20] sm:$0xff]  ;;  %v2024_v39 = vld [vmem:[#allocation15 + $0x48] sm:$0xff] }
 0x6d1   :  { %v7194_v25 = vpack.c.bf16 %v2020_v19, %v2019_v17  ;;  %v2025_v45 = vld [vmem:[#allocation15 + $0x50] sm:$0xff] }
 0x6d2   :  { %1612 = vmatmul.mubr.f32.vlgmr.msra.gmra.mrb[12].mxu0 %v9059_v6  ;;  %6188 = vmatmul.mubr.f32.vlgmr.msra.gmra.mrb[18].mxu1 %v9059_v6 }
 0x6d3   :  { %7109 = vmatpush3.bf16.msra.mxu0 %v7108_v1  ;;  %7134 = vmatpush1.bf16.msra.mxu1 %v7133_v9  ;;  %v7157_v1 = vpack.c.bf16 %v1838_v50, %v1835_v49  ;;  %v1702_v9 = vld [vmem:[#allocation17 + $0x70] sm:$0xff]  ;;  %v2026_v49 = vld [vmem:[#allocation15 + $0x58] sm:$0xff] }
 0x6d4   :  { %7110 = vmatprep.subr.bf16.mxu0 %v8475_v37  ;;  %7136 = vmatprep.subr.bf16.mxu1 %v7135_v46  ;;  %v1703_v46 = vld [vmem:[#allocation17 + $0x78] sm:$0xff]  ;;  %v7203_v50 = vpack.c.bf16 %v2026_v49, %v2025_v45 }
 0x6d5   :  { %6222 = vmatprep.mubr.msk.f32.mxu0 %vm8476_vm1, %v9064_v43  ;;  %1911 = vmatprep.mubr.f32.mxu1 %v9064_v43  ;;  %v7129_v21 = vpack.c.bf16 %v1703_v46, %v1702_v9  ;;  %v2030_v9 = vld [vmem:[#allocation15 + $0x78] sm:$0xff] }
 0x6d6   :  { %v1787_v46 = vld [vmem:[#allocation4 + $0x18] sm:$0xff] }
 0x6d7   :  { %7112 = vmatpush3.bf16.msra.mxu0 %v7111_v16  ;;  %7138 = vmatpush1.bf16.msra.mxu1 %v7137_v48  ;;  %v1804_v16 = vld [vmem:[#allocation14 + $0x28] sm:$0xff]  ;;  %1791 = vst [vmem:[#allocation3 + $0x18] sm:$0xff] %v1787_v46 }
 0x6d8   :  { %7113 = vmatprep.subr.bf16.mxu0 %v8475_v37  ;;  %7140 = vmatprep.subr.bf16.mxu1 %v7139_v2  ;;  %v7164_v48 = vpack.c.bf16 %v1804_v16, %v1801_v41  ;;  %v1810_v2 = vld [vmem:[#allocation14 + $0x58] sm:$0xff]  ;;  %v1530_v41 = vld [vmem:[%s9410_s10] sm:$0x7] }
 0x6d9   :  { %v7167_v4 = vpack.c.bf16 %v1810_v2, %v1807_v0  ;;  %v1535_v16 = vrot.slane %v1530_v41, %v174_v51 }
 0x6db   :  { %7115 = vmatpush3.bf16.msra.mxu0 %v7114_v20  ;;  %7142 = vmatpush1.bf16.msra.mxu1 %v7141_v22  ;;  %v1822_v20 = vld [vmem:[#allocation14 + $0xb8] sm:$0xff] }
 0x6dc   :  { %7116 = vmatprep.subr.bf16.mxu0 %v8475_v37  ;;  %7144 = vmatprep.subr.bf16.mxu1 %v7143_v27  ;;  %v7173_v22 = vpack.c.bf16 %v1822_v20, %v1819_v18  ;;  %v1828_v27 = vld [vmem:[#allocation14 + $0xe8] sm:$0xff] }
 0x6dd   :  { %v7176_v31 = vpack.c.bf16 %v1828_v27, %v1825_v23 }
 0x6df   :  { %7118 = vmatpush3.bf16.msra.mxu0 %v7117_v44  ;;  %7146 = vmatpush1.bf16.msra.mxu1 %v7145_v7  ;;  %v7182_v44 = vpack.c.bf16 %v1840_v42, %v1837_v40  ;;  %v1843_v7 = vld [vmem:[#allocation14 + $0x160] sm:$0xff] }
 0x6e0   :  { %7119 = vmatprep.subr.bf16.mxu0 %v8475_v37  ;;  %7148 = vmatprep.subr.bf16.mxu1 %v7147_v36  ;;  %v7185_v36 = vpack.c.bf16 %v1846_v32, %v1843_v7 }
 0x6e3   :  { %7121 = vmatpush3.bf16.msra.mxu0 %v7120_v62  ;;  %7150 = vmatpush1.bf16.msra.mxu1 %v7149_v63  ;;  %v2017_v62 = vld [vmem:[#allocation15 + $0x10] sm:$0xff]  ;;  %v7188_v63 = vpack.c.bf16 %v2016_v58, %v2015_v57 }
 0x6e4   :  { %7122 = vmatprep.subr.bf16.mxu0 %v8475_v37  ;;  %7152 = vmatprep.subr.bf16.mxu1 %v7151_v12  ;;  %v7191_v12 = vpack.c.bf16 %v2018_v11, %v2017_v62  ;;  %v5501_v11 = vld [vmem:[%s9414_s14] ss:$0 sm:$0xff] }
 0x6e7   :  { %7124 = vmatpush3.bf16.msra.mxu0 %v7123_v52  ;;  %7154 = vmatpush1.bf16.msra.mxu1 %v7153_v38  ;;  %v7197_v52 = vpack.c.bf16 %v2022_v35, %v2021_v26  ;;  %v2023_v38 = vld [vmem:[#allocation15 + $0x40] sm:$0xff] }
 0x6e8   :  { %7125 = vmatprep.subr.bf16.mxu0 %v8475_v37  ;;  %7156 = vmatprep.subr.bf16.mxu1 %v7155_v61  ;;  %v7200_v61 = vpack.c.bf16 %v2024_v39, %v2023_v38 }
 0x6eb   :  { %7127 = vmatpush3.bf16.msra.mxu0 %v7126_v60  ;;  %7158 = vmatpush1.bf16.msra.mxu1 %v7157_v1  ;;  %v7206_v60 = vpack.c.bf16 %v2028_v59, %v2027_v55  ;;  %v2029_v1 = vld [vmem:[#allocation15 + $0x70] sm:$0xff] }
 0x6ec   :  { %7128 = vmatprep.subr.bf16.mxu0 %v8475_v37  ;;  %7160 = vmatprep.subr.bf16.mxu1 %v7159_v5  ;;  %v7209_v5 = vpack.c.bf16 %v2030_v9, %v2029_v1 }
 0x6ef   :  { %7130 = vmatpush3.bf16.msra.mxu0 %v7129_v21  ;;  %7162 = vmatpush1.bf16.msra.mxu1 %v7161_v24 }
 0x6f0   :  { %7163 = vmatprep.subr.bf16.mxu0 %v8475_v37  ;;  %7187 = vmatprep.subr.bf16.mxu1 %v8475_v37 }
 0x6f2   :  { %6223 = vmatmul.mubr.f32.vlgmr.msra.gmra.mrb[14].mxu0 %v9059_v6  ;;  %1912 = vmatmul.mubr.f32.vlgmr.msra.gmra.mrb[20].mxu1 %v9059_v6 }
 0x6f3   :  { %7165 = vmatpush3.bf16.msra.mxu0 %v7164_v48  ;;  %6257 = vmatprep.mubr.msk.f32.mxu0 %vm8476_vm1, %v9064_v43  ;;  %v1539_v48 = vrot.slane %v1530_v41, %v178_v56  ;;  %v1543_v56 = vrot.slane %v1530_v41, %v182_v30 }
 0x6f4   :  { %7166 = vmatprep.subr.bf16.mxu0 %v8475_v37  ;;  %6292 = vmatprep.mubr.msk.f32.mxu1 %vm8476_vm1, %v9064_v43  ;;  %v7179_v43 = vpack.c.bf16 %v1834_v33, %v1831_v34  ;;  %v9119_v33 = vld [vmem:[%s9411_s11] ss:$0 sm:$0xff]  ;;  %s5505_s11 = sld [smem:[#allocation8 + $0x1]] }
 0x6f5   :  { %7189 = vmatpush3.bf16.msra.mxu1 %v7188_v63 }
 0x6f6   :  { %7190 = vmatprep.subr.bf16.mxu1 %v8475_v37 }
 0x6f7   :  { %7168 = vmatpush3.bf16.msra.mxu0 %v7167_v4 }
 0x6f8   :  { %7169 = vmatprep.subr.bf16.mxu0 %v8475_v37 }
 0x6f9   :  { %7192 = vmatpush3.bf16.msra.mxu1 %v7191_v12 }
 0x6fa   :  { %7193 = vmatprep.subr.bf16.mxu1 %v8475_v37  ;;  %p5506_p5 = scmp.ne.s32.totalorder %s5505_s11, 1 }
 0x6fb   :  { %7171 = vmatpush3.bf16.msra.mxu0 %v7170_v14  ;;  %v2112_v26 = vld [vmem:[#allocation4 + $0x28] sm:$0xff] (!%p5506_p5)  ;;  %v2113_v35 = vld [vmem:[#allocation4 + $0x30] sm:$0xff] (!%p5506_p5) }
 0x6fc   :  { %7172 = vmatprep.subr.bf16.mxu0 %v8475_v37  ;;  %2116 = vst [vmem:[#allocation3 + $0x8] sm:$0xff] (!%p5506_p5), %v2112_v26  ;;  %2117 = vst [vmem:[#allocation3 + $0x10] sm:$0xff] (!%p5506_p5), %v2113_v35 }
 0x6fd   :  { %7195 = vmatpush3.bf16.msra.mxu1 %v7194_v25 }
 0x6fe   :  { %7196 = vmatprep.subr.bf16.mxu1 %v8475_v37 }
 0x6ff   :  { %7174 = vmatpush3.bf16.msra.mxu0 %v7173_v22 }
 0x700   :  { %7175 = vmatprep.subr.bf16.mxu0 %v8475_v37 }
 0x701   :  { %7198 = vmatpush3.bf16.msra.mxu1 %v7197_v52  ;;  %v2114_v52 = vld [vmem:[#allocation4 + $0x38] sm:$0xff] (!%p5506_p5) }
 0x702   :  { %7199 = vmatprep.subr.bf16.mxu1 %v8475_v37  ;;  %2118 = vst [vmem:[#allocation3 + $0x18] sm:$0xff] (!%p5506_p5), %v2114_v52 }
 0x703   :  { %7177 = vmatpush3.bf16.msra.mxu0 %v7176_v31 }
 0x704   :  { %7178 = vmatprep.subr.bf16.mxu0 %v8475_v37 }
 0x705   :  { %7201 = vmatpush3.bf16.msra.mxu1 %v7200_v61 }
 0x706   :  { %7202 = vmatprep.subr.bf16.mxu1 %v8475_v37 }
 0x707   :  { %7180 = vmatpush3.bf16.msra.mxu0 %v7179_v43 }
 0x708   :  { %7181 = vmatprep.subr.bf16.mxu0 %v8475_v37 }
 0x709   :  { %7204 = vmatpush3.bf16.msra.mxu1 %v7203_v50 }
 0x70a   :  { %7205 = vmatprep.subr.bf16.mxu1 %v8475_v37 }
 0x70b   :  { %7183 = vmatpush3.bf16.msra.mxu0 %v7182_v44 }
 0x70c   :  { %7184 = vmatprep.subr.bf16.mxu0 %v8475_v37 }
 0x70d   :  { %7207 = vmatpush3.bf16.msra.mxu1 %v7206_v60 }
 0x70e   :  { %7208 = vmatprep.subr.bf16.mxu1 %v8475_v37 }
 0x70f   :  { %7186 = vmatpush3.bf16.msra.mxu0 %v7185_v36 }
 0x711   :  { %7210 = vmatpush3.bf16.msra.mxu1 %v7209_v5 }
 0x712   :  { %6258 = vmatmul.mubr.f32.vlgmr.msra.gmra.mrb[16].mxu0 %v9059_v6 }
 0x7a5   :  { %v1613_v10 = vpop.f32.mrb[12].mxu0  ;;  %v1684_v15 = vpop.f32.mrb[18].mxu1 }
 0x7a6   :  { %v1615_v21 = vpop.f32.mrb[13].mxu0  ;;  %v6189_v24 = vpop.f32.mrb[19].mxu1  ;;  %v9108_v0 = vadd.f32 %v1613_v10, %v1535_v16  ;;  %v9121_v43 = vadd.f32 %v1684_v15, %v1543_v56 }
 0x7a7   :  { %v9110_v2 = vadd.f32 %v1615_v21, %v1539_v48 }
 0x7a8   :  { %v1796_v4 = vadd.f32 %v1784_v53, %v9108_v0  ;;  %v1798_v36 = vadd.f32 %v9091_v47, %v9121_v43 }
 0x7a9   :  { %v1797_v14 = vadd.f32 %v1785_v54, %v9110_v2 }
 0x7c5   :  { %v1777_v8 = vpop.f32.mrb[14].mxu0  ;;  %v1913_v13 = vpop.f32.mrb[20].mxu1 }
 0x7c6   :  { %v1988_v18 = vadd.f32 %v1913_v13, %v1796_v4  ;;  %v6224_v20 = vpop.f32.mrb[15].mxu0  ;;  %v1915_v22 = vpop.f32.mrb[21].mxu1  ;;  %v9133_v12 = vadd.f32 %v5501_v11, %v1777_v8 }
 0x7c7   :  { %v1995_v23 = vadd.f32 %v1915_v22, %v1797_v14 }
 0x7c8   :  { %v5502_v27 = vmul.f32 -1.442695, %v1988_v18 }
 0x7c9   :  { %v5503_v31 = vmul.f32 -1.442695, %v1995_v23 }
 0x7ca   :  { %8189 = vpow2.f32 %v5502_v27 }
 0x7cb   :  { %8191 = vpow2.f32 %v5503_v31 }
 0x7d4   :  { %v8190_v51 = vpop.eup %8189 }
 0x7d5   :  { %v1992_v34 = vadd.f32 1.0, %v8190_v51  ;;  %v8192_v42 = vpop.eup %8191 }
 0x7d6   :  { %v1999_v54 = vadd.f32 1.0, %v8192_v42 }
 0x7d7   :  { %8193 = vrcp.f32 %v1992_v34 }
 0x7e1   :  { %v8194_v32 = vpop.eup %8193 }
 0x7e5   :  { %v1984_v40 = vpop.f32.mrb[16].mxu0 }
 0x7e6   :  { %v2008_v44 = vadd.f32 %v9119_v33, %v1984_v40  ;;  %v6259_v7 = vpop.f32.mrb[17].mxu0 }
 0x7e8   :  { %v2009_v53 = vmul.f32 %v8194_v32, %v2008_v44 }
 0x7ea   :  { %v2010_v29 = vadd.f32 %v2009_v53, %v1798_v36 }
 0x7ec   :  { %8195 = vtanh.f32 %v2010_v29 }
 0x7ed   :  { %8197 = vrcp.f32 %v1999_v54 }
 0x7f6   :  { %v8196_v30 = vpop.eup %8195 }
 0x7f7   :  { %v2012_v57 = vsub.f32 %v9059_v6, %v8196_v30  ;;  %v8198_v58 = vpop.eup %8197  ;;  %v2111_v6 = vld [vmem:[#allocation4 + $0x20] sm:$0xff] (!%p5506_p5) }
 0x7f8   :  { %2115 = vst [vmem:[#allocation3] sm:$0xff] (!%p5506_p5), %v2111_v6 }
 0x7f9   :  { %v2013_v62 = vmul.f32 %v8198_v58, %v2012_v57 }
 0x7fb   :  { %v9127_v63 = vadd.f32 %v8196_v30, %v2013_v62 }
 0x7fd   :  { %6293 = vmatmul.mubr.f32.vlgmr.msra.gmra.mrb[22].mxu1 %v9127_v63 }
 0x8cf   :  { %2109 = sbr.rel (%p5506_p5) target bundleno = 2262 (0x8d6), region = 97 }
 0x8d0   :  { %v2097_v47 = vpop.f32.mrb[22].mxu1 }
 0x8d1   :  { %v2101_v17 = vadd.f32 %v2097_v47, %v1787_v46  ;;  %v6294_v19 = vpop.f32.mrb[23].mxu1 }
 0x8d3   :  { %v2102_v25 = vadd.f32 %v2101_v17, %v9133_v12 }
 0x8d5   :  { %2104 = vst [vmem:[#allocation18 + $0x8] sm:$0xff] %v2102_v25 }
 0x8d6 PF:  { %p5507_p6 = scmp.eq.s32.totalorder %s5505_s11, 1 }
 0x8d7   :  { %2123 = vmax.xlane.f32.xlu0 (!%p5507_p6), %v2102_v25  ;;  %v2145_v49 = vld [vmem:[#allocation11 + $0x8] sm:$0xff] (!%p5507_p6)  ;;  %v2147_v55 = vld [vmem:[#allocation11 + $0x18] sm:$0xff] (!%p5507_p6)  ;;  %v2144_v1 = vld [vmem:[#allocation11] sm:$0xff] (!%p5507_p6) }
 0x8d8   :  { %2122 = sbr.rel (%p5507_p6) target bundleno = 2916 (0xb64), region = 101  ;;  %v2149_v50 = vld [vmem:[#allocation11 + $0x28] sm:$0xff] (!%p5507_p6)  ;;  %v2151_v60 = vld [vmem:[#allocation11 + $0x38] sm:$0xff] (!%p5507_p6)  ;;  %v2148_v9 = vld [vmem:[#allocation11 + $0x20] sm:$0xff] (!%p5507_p6) }
 0x8d9   :  { %v7211_v59 = vpack.c.bf16 (!%p5507_p6), %v2149_v50, %v2145_v49  ;;  %v7243_v5 = vpack.c.bf16 (!%p5507_p6), %v2151_v60, %v2147_v55  ;;  %v7213_v46 = vpack.c.bf16 (!%p5507_p6), %v2148_v9, %v2144_v1  ;;  %v2146_v10 = vld [vmem:[#allocation11 + $0x10] sm:$0xff] (!%p5507_p6)  ;;  %v2153_v21 = vld [vmem:[#allocation11 + $0x48] sm:$0xff] (!%p5507_p6)  ;;  %v2155_v16 = vld [vmem:[#allocation11 + $0x58] sm:$0xff] (!%p5507_p6) }
 0x8da   :  { %v2150_v15 = vld [vmem:[#allocation11 + $0x30] sm:$0xff] (!%p5507_p6)  ;;  %v2157_v41 = vld [vmem:[#allocation11 + $0x68] sm:$0xff] (!%p5507_p6)  ;;  %v2159_v48 = vld [vmem:[#allocation11 + $0x78] sm:$0xff] (!%p5507_p6) }
 0x8db   :  { %7212 = vmatprep.subr.bf16.mxu0 (!%p5507_p6), %v7211_v59  ;;  %v7245_v24 = vpack.c.bf16 (!%p5507_p6), %v2150_v15, %v2146_v10  ;;  %7244 = vmatprep.subr.bf16.mxu1 (!%p5507_p6), %v7243_v5  ;;  %v7215_v4 = vpack.c.bf16 (!%p5507_p6), %v2157_v41, %v2153_v21  ;;  %v7247_v8 = vpack.c.bf16 (!%p5507_p6), %v2159_v48, %v2155_v16  ;;  %v2152_v13 = vld [vmem:[#allocation11 + $0x40] sm:$0xff] (!%p5507_p6)  ;;  %v2154_v18 = vld [vmem:[#allocation11 + $0x50] sm:$0xff] (!%p5507_p6)  ;;  %v2161_v23 = vld [vmem:[#allocation11 + $0x88] sm:$0xff] (!%p5507_p6) }
 0x8dc   :  { %7214 = vmatpush1.bf16.msra.mxu0 (!%p5507_p6), %v7213_v46  ;;  %v2156_v14 = vld [vmem:[#allocation11 + $0x60] sm:$0xff] (!%p5507_p6)  ;;  %v2158_v22 = vld [vmem:[#allocation11 + $0x70] sm:$0xff] (!%p5507_p6)  ;;  %v2165_v27 = vld [vmem:[#allocation11 + $0xa8] sm:$0xff] (!%p5507_p6) }
 0x8dd   :  { %7246 = vmatpush1.bf16.msra.mxu1 (!%p5507_p6), %v7245_v24  ;;  %v7217_v20 = vpack.c.bf16 (!%p5507_p6), %v2156_v14, %v2152_v13  ;;  %7216 = vmatprep.subr.bf16.mxu0 (!%p5507_p6), %v7215_v4  ;;  %v7249_v51 = vpack.c.bf16 (!%p5507_p6), %v2158_v22, %v2154_v18  ;;  %v7219_v31 = vpack.c.bf16 (!%p5507_p6), %v2165_v27, %v2161_v23  ;;  %v2163_v34 = vld [vmem:[#allocation11 + $0x98] sm:$0xff] (!%p5507_p6)  ;;  %v2160_v40 = vld [vmem:[#allocation11 + $0x80] sm:$0xff] (!%p5507_p6)  ;;  %v2162_v7 = vld [vmem:[#allocation11 + $0x90] sm:$0xff] (!%p5507_p6) }
 0x8de   :  { %7248 = vmatprep.subr.bf16.mxu1 (!%p5507_p6), %v7247_v8  ;;  %v2167_v56 = vld [vmem:[#allocation11 + $0xb8] sm:$0xff] (!%p5507_p6)  ;;  %v2164_v44 = vld [vmem:[#allocation11 + $0xa0] sm:$0xff] (!%p5507_p6)  ;;  %v2166_v32 = vld [vmem:[#allocation11 + $0xb0] sm:$0xff] (!%p5507_p6) }
 0x8df   :  { %v7251_v42 = vpack.c.bf16 %v2167_v56, %v2163_v34  ;;  %v7221_v36 = vpack.c.bf16 %v2164_v44, %v2160_v40  ;;  %v2169_v53 = vld [vmem:[#allocation11 + $0xc8] sm:$0xff]  ;;  %v2171_v29 = vld [vmem:[#allocation11 + $0xd8] sm:$0xff]  ;;  %v7253_v30 = vpack.c.bf16 %v2166_v32, %v2162_v7  ;;  %v2168_v62 = vld [vmem:[#allocation11 + $0xc0] sm:$0xff] }
 0x8e0   :  { %7218 = vmatpush1.bf16.msra.mxu0 %v7217_v20  ;;  %v2173_v54 = vld [vmem:[#allocation11 + $0xe8] sm:$0xff]  ;;  %v2175_v58 = vld [vmem:[#allocation11 + $0xf8] sm:$0xff]  ;;  %v2172_v11 = vld [vmem:[#allocation11 + $0xe0] sm:$0xff] }
 0x8e1   :  { %7250 = vmatpush1.bf16.msra.mxu1 %v7249_v51  ;;  %7220 = vmatprep.subr.bf16.mxu0 %v7219_v31  ;;  %v7223_v57 = vpack.c.bf16 %v2173_v54, %v2169_v53  ;;  %v7255_v47 = vpack.c.bf16 %v2175_v58, %v2171_v29  ;;  %v2170_v17 = vld [vmem:[#allocation11 + $0xd0] sm:$0xff]  ;;  %v2181_v6 = vld [vmem:[#allocation11 + $0x128] sm:$0xff]  ;;  %v2179_v26 = vld [vmem:[#allocation11 + $0x118] sm:$0xff]  ;;  %v7225_v52 = vpack.c.bf16 %v2172_v11, %v2168_v62 }
 0x8e2   :  { %7252 = vmatprep.subr.bf16.mxu1 %v7251_v42  ;;  %v2174_v19 = vld [vmem:[#allocation11 + $0xf0] sm:$0xff]  ;;  %v2183_v35 = vld [vmem:[#allocation11 + $0x138] sm:$0xff]  ;;  %v2176_v49 = vld [vmem:[#allocation11 + $0x100] sm:$0xff] }
 0x8e3   :  { %v2180_v50 = vld [vmem:[#allocation11 + $0x120] sm:$0xff]  ;;  %v2178_v55 = vld [vmem:[#allocation11 + $0x110] sm:$0xff]  ;;  %v7259_v59 = vpack.c.bf16 %v2183_v35, %v2179_v26  ;;  %v2185_v1 = vld [vmem:[#allocation11 + $0x148] sm:$0xff] }
 0x8e4   :  { %7222 = vmatpush1.bf16.msra.mxu0 %v7221_v36  ;;  %v2182_v60 = vld [vmem:[#allocation11 + $0x130] sm:$0xff]  ;;  %v2189_v9 = vld [vmem:[#allocation11 + $0x168] sm:$0xff]  ;;  %v2187_v5 = vld [vmem:[#allocation11 + $0x158] sm:$0xff]  ;;  %v7229_v10 = vpack.c.bf16 %v2180_v50, %v2176_v49 }
 0x8e5   :  { %7254 = vmatpush1.bf16.msra.mxu1 %v7253_v30  ;;  %7224 = vmatprep.subr.bf16.mxu0 %v7223_v57  ;;  %v2191_v46 = vld [vmem:[#allocation11 + $0x178] sm:$0xff]  ;;  %v7261_v15 = vpack.c.bf16 %v2182_v60, %v2178_v55  ;;  %v7231_v21 = vpack.c.bf16 %v2189_v9, %v2185_v1  ;;  %v2184_v24 = vld [vmem:[#allocation11 + $0x140] sm:$0xff]  ;;  %v2186_v16 = vld [vmem:[#allocation11 + $0x150] sm:$0xff] }
 0x8e6   :  { %7256 = vmatprep.subr.bf16.mxu1 %v7255_v47  ;;  %v2188_v41 = vld [vmem:[#allocation11 + $0x160] sm:$0xff]  ;;  %v7263_v48 = vpack.c.bf16 %v2191_v46, %v2187_v5  ;;  %v2190_v4 = vld [vmem:[#allocation11 + $0x170] sm:$0xff]  ;;  %v2193_v8 = vld [vmem:[#allocation11 + $0x188] sm:$0xff] }
 0x8e7   :  { %v2197_v13 = vld [vmem:[#allocation11 + $0x1a8] sm:$0xff]  ;;  %v2195_v14 = vld [vmem:[#allocation11 + $0x198] sm:$0xff]  ;;  %v7233_v20 = vpack.c.bf16 %v2188_v41, %v2184_v24  ;;  %v7265_v22 = vpack.c.bf16 %v2190_v4, %v2186_v16  ;;  %v2192_v27 = vld [vmem:[#allocation11 + $0x180] sm:$0xff] }
 0x8e8   :  { %7226 = vmatpush1.bf16.msra.mxu0 %v7225_v52  ;;  %v2199_v18 = vld [vmem:[#allocation11 + $0x1b8] sm:$0xff]  ;;  %v7235_v23 = vpack.c.bf16 %v2197_v13, %v2193_v8  ;;  %v2196_v51 = vld [vmem:[#allocation11 + $0x1a0] sm:$0xff]  ;;  %v2194_v34 = vld [vmem:[#allocation11 + $0x190] sm:$0xff] }
 0x8e9   :  { %v7267_v31 = vpack.c.bf16 %v2199_v18, %v2195_v14  ;;  %v2198_v56 = vld [vmem:[#allocation11 + $0x1b0] sm:$0xff]  ;;  %v7237_v40 = vpack.c.bf16 %v2196_v51, %v2192_v27  ;;  %v2201_v53 = vld [vmem:[#allocation11 + $0x1c8] sm:$0xff]  ;;  %v2203_v29 = vld [vmem:[#allocation11 + $0x1d8] sm:$0xff] }
 0x8ea   :  { %v7269_v42 = vpack.c.bf16 %v2198_v56, %v2194_v34  ;;  %v2205_v54 = vld [vmem:[#allocation11 + $0x1e8] sm:$0xff]  ;;  %v2207_v57 = vld [vmem:[#allocation11 + $0x1f8] sm:$0xff]  ;;  %v2200_v58 = vld [vmem:[#allocation11 + $0x1c0] sm:$0xff] }
 0x8eb   :  { %v7239_v30 = vpack.c.bf16 %v2205_v54, %v2201_v53  ;;  %v2204_v62 = vld [vmem:[#allocation11 + $0x1e0] sm:$0xff]  ;;  %v7271_v11 = vpack.c.bf16 %v2207_v57, %v2203_v29 }
 0x8ec   :  { %v7241_v47 = vpack.c.bf16 %v2204_v62, %v2200_v58 }
 0x964   :  { %v2124_v38 = vpop.xlane.xlu0 %2123 }
 0x965   :  { %vm2125_vm2 = vcmp.eq.f32.partialorder %v2102_v25, %v2124_v38  ;;  %v2177_v25 = vld [vmem:[#allocation11 + $0x108] sm:$0xff]  ;;  %v7257_v38 = vpack.c.bf16 %v2174_v19, %v2170_v17  ;;  %v2202_v17 = vld [vmem:[#allocation11 + $0x1d0] sm:$0xff] }
 0x966   :  { %v9137_v39 = vsel %vm2125_vm2, %v8846_v28, 128  ;;  %v2206_v19 = vld [vmem:[#allocation11 + $0x1f0] sm:$0xff] }
 0x967   :  { %v2128_v61 = vshra.s32 %v9137_v39, 16  ;;  %7258 = vmatpush1.bf16.msra.mxu1 %v7257_v38  ;;  %v2127_v44 = vand.u32 65535, %v9137_v39  ;;  %v8477_v39 = vmov 0.0   ;;  %v8478_v38 = vmov 1.0  }
 0x968   :  { %7260 = vmatprep.subr.bf16.mxu1 %v7259_v59  ;;  %2272 = vmatprep.mubr.f32.mxu0 %v8477_v39 }
 0x969   :  { %v9140_v45 = vcvt.s32.f32 %v2128_v61  ;;  %v7227_v61 = vpack.c.bf16 %v2181_v6, %v2177_v25  ;;  %v2129_v32 = vcvt.s32.f32 %v2127_v44  ;;  %v7273_v25 = vpack.c.bf16 %v2206_v19, %v2202_v17  ;;  %2343 = vmatprep.mubr.f32.mxu1 %v8477_v39 }
 0x96b   :  { %2131 = vmin.xlane.f32.xlu0 %v9140_v45  ;;  %7228 = vmatprep.subr.bf16.mxu0 %v7227_v61 }
 0x96c   :  { %7230 = vmatpush1.bf16.msra.mxu0 %v7229_v10  ;;  %7262 = vmatpush1.bf16.msra.mxu1 %v7261_v15 }
 0x96d   :  { %7232 = vmatprep.subr.bf16.mxu0 %v7231_v21  ;;  %7264 = vmatprep.subr.bf16.mxu1 %v7263_v48 }
 0x970   :  { %7234 = vmatpush1.bf16.msra.mxu0 %v7233_v20  ;;  %7266 = vmatpush1.bf16.msra.mxu1 %v7265_v22 }
 0x971   :  { %7236 = vmatprep.subr.bf16.mxu0 %v7235_v23  ;;  %7268 = vmatprep.subr.bf16.mxu1 %v7267_v31 }
 0x974   :  { %7238 = vmatpush1.bf16.msra.mxu0 %v7237_v40  ;;  %7270 = vmatpush1.bf16.msra.mxu1 %v7269_v42 }
 0x975   :  { %7240 = vmatprep.subr.bf16.mxu0 %v7239_v30  ;;  %7272 = vmatprep.subr.bf16.mxu1 %v7271_v11 }
 0x978   :  { %7242 = vmatpush1.bf16.msra.mxu0 %v7241_v47  ;;  %7274 = vmatpush1.bf16.msra.mxu1 %v7273_v25 }
 0x9f8   :  { %v2132_v7 = vpop.xlane.xlu0 %2131 }
 0x9f9   :  { %vm2133_vm3 = vcmp.eq.f32.partialorder %v9140_v45, %v2132_v7  ;;  %v2138_v45 = vcvt.f32.s32 %v2132_v7 }
 0x9fa   :  { %v2134_v36 = vsel %vm2133_vm3, %v2129_v32, inf }
 0x9fb   :  { %2135 = vmin.xlane.f32.xlu1 %v2134_v36  ;;  %v2139_v26 = vshll.u32 %v2138_v45, 16 }
 0xa88   :  { %v2136_v6 = vpop.xlane.xlu1 %2135 }
 0xa89   :  { %v2137_v35 = vcvt.f32.s32 %v2136_v6 }
 0xa8b   :  { %v2140_v52 = vadd.s32 %v2139_v26, %v2137_v35 }
 0xa8d   :  { %vm2141_vm4 = vcmp.eq.s32.totalorder %v8846_v28, %v2140_v52 }
 0xa8e   :  { %5509 = vmatmul.mubr.msk.f32.vlgmr.msra.gmra.mrb[0].mxu0 %vm2141_vm4, %v8478_v38  ;;  %5510 = vmatmul.mubr.msk.f32.vlgmr.msra.gmra.mrb[0].mxu1 %vm2141_vm4, %v8478_v38 }
 0xb61   :  { %v2274_v61 = vpop.f32.mrb[0].mxu0  ;;  %v2345_v49 = vpop.f32.mrb[0].mxu1 }
 0xb62   :  { %2350 = vst [vmem:[#allocation3] sm:$0xff] %v2274_v61  ;;  %2352 = vst [vmem:[#allocation3 + $0x10] sm:$0xff] %v2345_v49  ;;  %v2276_v50 = vpop.f32.mrb[1].mxu0  ;;  %v2347_v55 = vpop.f32.mrb[1].mxu1 }
 0xb63   :  { %2351 = vst [vmem:[#allocation3 + $0x8] sm:$0xff] %v2276_v50  ;;  %2353 = vst [vmem:[#allocation3 + $0x18] sm:$0xff] %v2347_v55 }
 0xb64 PF:  { %v2362_v59 = vld [vmem:[#allocation14 + $0x8] sm:$0xff]  ;;  %v2365_v60 = vld [vmem:[#allocation14 + $0x20] sm:$0xff]  ;;  %7307 = vmatprep.subr.bf16.mxu1 %v8475_v37  ;;  %2473 = vmatprep.mubr.f32.mxu0 %v8474_v3  ;;  %v2364_v5 = vld [vmem:[#allocation14 + $0x18] sm:$0xff]  ;;  %s5513_s14 = sld [smem:[#allocation8 + $0x2]] }
 0xb65   :  { %v2361_v1 = vld [vmem:[#allocation14] sm:$0xff]  ;;  %v7275_v9 = vpack.c.bf16 %v2365_v60, %v2362_v59  ;;  %v2368_v46 = vld [vmem:[#allocation14 + $0x38] sm:$0xff]  ;;  %v2371_v10 = vld [vmem:[#allocation14 + $0x50] sm:$0xff]  ;;  %6327 = vmatprep.mubr.msk.f32.mxu1 %vm8476_vm1, %v8474_v3 }
 0xb66   :  { %v7277_v15 = vpack.c.bf16 %v2364_v5, %v2361_v1  ;;  %v7279_v21 = vpack.c.bf16 %v2371_v10, %v2368_v46  ;;  %v2367_v24 = vld [vmem:[#allocation14 + $0x30] sm:$0xff]  ;;  %v2370_v41 = vld [vmem:[#allocation14 + $0x48] sm:$0xff]  ;;  %v2377_v48 = vld [vmem:[#allocation14 + $0x80] sm:$0xff] }
 0xb67   :  { %v2374_v16 = vld [vmem:[#allocation14 + $0x68] sm:$0xff]  ;;  %7276 = vmatprep.subr.bf16.mxu0 %v7275_v9  ;;  %v7281_v4 = vpack.c.bf16 %v2370_v41, %v2367_v24  ;;  %v2373_v13 = vld [vmem:[#allocation14 + $0x60] sm:$0xff]  ;;  %v2376_v14 = vld [vmem:[#allocation14 + $0x78] sm:$0xff] }
 0xb68   :  { %7278 = vmatpush1.bf16.msra.mxu0 %v7277_v15  ;;  %v7283_v8 = vpack.c.bf16 %v2377_v48, %v2374_v16  ;;  %v2380_v18 = vld [vmem:[#allocation14 + $0x98] sm:$0xff]  ;;  %v2383_v20 = vld [vmem:[#allocation14 + $0xb0] sm:$0xff]  ;;  %v7285_v22 = vpack.c.bf16 %v2376_v14, %v2373_v13  ;;  %v2382_v51 = vld [vmem:[#allocation14 + $0xa8] sm:$0xff] }
 0xb69   :  { %7280 = vmatprep.subr.bf16.mxu0 %v7279_v21  ;;  %v2379_v23 = vld [vmem:[#allocation14 + $0x90] sm:$0xff]  ;;  %v7287_v27 = vpack.c.bf16 %v2383_v20, %v2380_v18  ;;  %v2366_v34 = vld [vmem:[#allocation14 + $0x28] sm:$0xff]  ;;  %v2389_v40 = vld [vmem:[#allocation14 + $0xe0] sm:$0xff] }
 0xb6a   :  { %v2363_v31 = vld [vmem:[#allocation14 + $0x10] sm:$0xff]  ;;  %v2386_v56 = vld [vmem:[#allocation14 + $0xc8] sm:$0xff]  ;;  %v2369_v44 = vld [vmem:[#allocation14 + $0x40] sm:$0xff]  ;;  %v7289_v32 = vpack.c.bf16 %v2382_v51, %v2379_v23  ;;  %p5514_p7 = scmp.ne.s32.totalorder %s5513_s14, 1 }
 0xb6b   :  { %v7308_v42 = vpack.c.bf16 %v2366_v34, %v2363_v31  ;;  %v2372_v7 = vld [vmem:[#allocation14 + $0x58] sm:$0xff]  ;;  %v2385_v36 = vld [vmem:[#allocation14 + $0xc0] sm:$0xff]  ;;  %v7291_v54 = vpack.c.bf16 %v2389_v40, %v2386_v56  ;;  %v2375_v30 = vld [vmem:[#allocation14 + $0x70] sm:$0xff] }
 0xb6c   :  { %7282 = vmatpush1.bf16.msra.mxu0 %v7281_v4  ;;  %v7311_v53 = vpack.c.bf16 %v2372_v7, %v2369_v44  ;;  %v2388_v29 = vld [vmem:[#allocation14 + $0xd8] sm:$0xff]  ;;  %v2378_v57 = vld [vmem:[#allocation14 + $0x88] sm:$0xff]  ;;  %v2395_v62 = vld [vmem:[#allocation14 + $0x110] sm:$0xff] }
 0xb6d   :  { %7284 = vmatprep.subr.bf16.mxu0 %v7283_v8  ;;  %7309 = vmatpush3.bf16.msra.mxu1 %v7308_v42  ;;  %v2392_v58 = vld [vmem:[#allocation14 + $0xf8] sm:$0xff]  ;;  %v7293_v11 = vpack.c.bf16 %v2388_v29, %v2385_v36  ;;  %v2391_v47 = vld [vmem:[#allocation14 + $0xf0] sm:$0xff]  ;;  %v7314_v17 = vpack.c.bf16 %v2378_v57, %v2375_v30  ;;  %v2394_v25 = vld [vmem:[#allocation14 + $0x108] sm:$0xff] }
 0xb6e   :  { %7310 = vmatprep.subr.bf16.mxu1 %v8475_v37  ;;  %v7295_v19 = vpack.c.bf16 %v2395_v62, %v2392_v58  ;;  %v2381_v39 = vld [vmem:[#allocation14 + $0xa0] sm:$0xff]  ;;  %v2384_v45 = vld [vmem:[#allocation14 + $0xb8] sm:$0xff]  ;;  %v2398_v6 = vld [vmem:[#allocation14 + $0x128] sm:$0xff]  ;;  %v7297_v35 = vpack.c.bf16 %v2394_v25, %v2391_v47 }
 0xb6f   :  { %v2401_v26 = vld [vmem:[#allocation14 + $0x140] sm:$0xff]  ;;  %v7317_v38 = vpack.c.bf16 %v2384_v45, %v2381_v39  ;;  %v2400_v49 = vld [vmem:[#allocation14 + $0x138] sm:$0xff]  ;;  %v2387_v50 = vld [vmem:[#allocation14 + $0xd0] sm:$0xff] }
 0xb70   :  { %7286 = vmatpush1.bf16.msra.mxu0 %v7285_v22  ;;  %v2397_v52 = vld [vmem:[#allocation14 + $0x120] sm:$0xff]  ;;  %v7299_v61 = vpack.c.bf16 %v2401_v26, %v2398_v6  ;;  %v2390_v55 = vld [vmem:[#allocation14 + $0xe8] sm:$0xff]  ;;  %v2404_v59 = vld [vmem:[#allocation14 + $0x158] sm:$0xff] }
 0xb71   :  { %7288 = vmatprep.subr.bf16.mxu0 %v7287_v27  ;;  %7312 = vmatpush3.bf16.msra.mxu1 %v7311_v53  ;;  %v2407_v60 = vld [vmem:[#allocation14 + $0x170] sm:$0xff]  ;;  %v7301_v1 = vpack.c.bf16 %v2400_v49, %v2397_v52  ;;  %v7320_v5 = vpack.c.bf16 %v2390_v55, %v2387_v50  ;;  %v2406_v10 = vld [vmem:[#allocation14 + $0x168] sm:$0xff]  ;;  %v2393_v15 = vld [vmem:[#allocation14 + $0x100] sm:$0xff] }
 0xb72   :  { %7313 = vmatprep.subr.bf16.mxu1 %v8475_v37  ;;  %v2403_v9 = vld [vmem:[#allocation14 + $0x150] sm:$0xff]  ;;  %v7303_v46 = vpack.c.bf16 %v2407_v60, %v2404_v59  ;;  %v2396_v21 = vld [vmem:[#allocation14 + $0x118] sm:$0xff]  ;;  %v2402_v48 = vld [vmem:[#allocation14 + $0x148] sm:$0xff] }
 0xb73   :  { %v7305_v24 = vpack.c.bf16 %v2406_v10, %v2403_v9  ;;  %v7323_v41 = vpack.c.bf16 %v2396_v21, %v2393_v15  ;;  %v2399_v16 = vld [vmem:[#allocation14 + $0x130] sm:$0xff]  ;;  %v2405_v8 = vld [vmem:[#allocation14 + $0x160] sm:$0xff]  ;;  %v2408_v13 = vld [vmem:[#allocation14 + $0x178] sm:$0xff] }
 0xb74   :  { %7290 = vmatpush1.bf16.msra.mxu0 %v7289_v32  ;;  %v7326_v4 = vpack.c.bf16 %v2402_v48, %v2399_v16  ;;  %v7329_v14 = vpack.c.bf16 %v2408_v13, %v2405_v8  ;;  %v2571_v18 = vld [vmem:[#allocation15] sm:$0xff]  ;;  %v2572_v20 = vld [vmem:[#allocation15 + $0x8] sm:$0xff]  ;;  %v2573_v23 = vld [vmem:[#allocation15 + $0x10] sm:$0xff] }
 0xb75   :  { %7292 = vmatprep.subr.bf16.mxu0 %v7291_v54  ;;  %7315 = vmatpush3.bf16.msra.mxu1 %v7314_v17  ;;  %v7332_v22 = vpack.c.bf16 %v2572_v20, %v2571_v18  ;;  %v2574_v27 = vld [vmem:[#allocation15 + $0x18] sm:$0xff]  ;;  %v2575_v31 = vld [vmem:[#allocation15 + $0x20] sm:$0xff]  ;;  %v2576_v34 = vld [vmem:[#allocation15 + $0x28] sm:$0xff] }
 0xb76   :  { %7316 = vmatprep.subr.bf16.mxu1 %v8475_v37  ;;  %v7335_v51 = vpack.c.bf16 %v2574_v27, %v2573_v23  ;;  %v7338_v56 = vpack.c.bf16 %v2576_v34, %v2575_v31  ;;  %v2577_v40 = vld [vmem:[#allocation15 + $0x30] sm:$0xff]  ;;  %v2578_v42 = vld [vmem:[#allocation15 + $0x38] sm:$0xff]  ;;  %v2579_v7 = vld [vmem:[#allocation15 + $0x40] sm:$0xff] }
 0xb77   :  { %v7341_v44 = vpack.c.bf16 %v2578_v42, %v2577_v40  ;;  %v2580_v32 = vld [vmem:[#allocation15 + $0x48] sm:$0xff]  ;;  %v2581_v53 = vld [vmem:[#allocation15 + $0x50] sm:$0xff]  ;;  %v2582_v54 = vld [vmem:[#allocation15 + $0x58] sm:$0xff] }
 0xb78   :  { %7294 = vmatpush1.bf16.msra.mxu0 %v7293_v11  ;;  %v7344_v36 = vpack.c.bf16 %v2580_v32, %v2579_v7  ;;  %v7347_v29 = vpack.c.bf16 %v2582_v54, %v2581_v53  ;;  %v2583_v30 = vld [vmem:[#allocation15 + $0x60] sm:$0xff]  ;;  %v2584_v57 = vld [vmem:[#allocation15 + $0x68] sm:$0xff]  ;;  %v2585_v62 = vld [vmem:[#allocation15 + $0x70] sm:$0xff] }
 0xb79   :  { %7296 = vmatprep.subr.bf16.mxu0 %v7295_v19  ;;  %7318 = vmatpush3.bf16.msra.mxu1 %v7317_v38  ;;  %v7350_v58 = vpack.c.bf16 %v2584_v57, %v2583_v30  ;;  %v2586_v11 = vld [vmem:[#allocation15 + $0x78] sm:$0xff]  ;;  %v2354_v17 = vld [vmem:[#allocation3] sm:$0xff]  ;;  %v2355_v6 = vld [vmem:[#allocation3 + $0x8] sm:$0xff] }
 0xb7a   :  { %7319 = vmatprep.subr.bf16.mxu1 %v8475_v37  ;;  %v7353_v47 = vpack.c.bf16 %v2586_v11, %v2585_v62  ;;  %v2358_v19 = vadd.f32 %v2354_v17, %v9108_v0  ;;  %v2356_v59 = vld [vmem:[#allocation3 + $0x10] sm:$0xff]  ;;  %v2667_v20 = vld [vmem:[#allocation4 + $0x40] sm:$0xff] (!%p5514_p7) }
 0xb7b   :  { %v2360_v9 = vadd.f32 %v2356_v59, %v9121_v43  ;;  %v2669_v23 = vld [vmem:[#allocation4 + $0x50] sm:$0xff] (!%p5514_p7)  ;;  %2671 = vst [vmem:[#allocation3] sm:$0xff] (!%p5514_p7), %v2667_v20 }
 0xb7c   :  { %7298 = vmatpush1.bf16.msra.mxu0 %v7297_v35  ;;  %v2359_v35 = vadd.f32 %v2355_v6, %v9110_v2  ;;  %2673 = vst [vmem:[#allocation3 + $0x10] sm:$0xff] (!%p5514_p7), %v2669_v23 }
 0xb7d   :  { %7300 = vmatprep.subr.bf16.mxu0 %v7299_v61  ;;  %7321 = vmatpush3.bf16.msra.mxu1 %v7320_v5 }
 0xb7e   :  { %7322 = vmatprep.subr.bf16.mxu1 %v8475_v37 }
 0xb80   :  { %7302 = vmatpush1.bf16.msra.mxu0 %v7301_v1 }
 0xb81   :  { %7304 = vmatprep.subr.bf16.mxu0 %v7303_v46  ;;  %7324 = vmatpush3.bf16.msra.mxu1 %v7323_v41 }
 0xb82   :  { %7325 = vmatprep.subr.bf16.mxu1 %v8475_v37 }
 0xb84   :  { %7306 = vmatpush1.bf16.msra.mxu0 %v7305_v24 }
 0xb85   :  { %7331 = vmatprep.subr.bf16.mxu0 %v8475_v37  ;;  %7327 = vmatpush3.bf16.msra.mxu1 %v7326_v4  ;;  %v2357_v4 = vld [vmem:[#allocation3 + $0x18] sm:$0xff] }
 0xb86   :  { %7328 = vmatprep.subr.bf16.mxu1 %v8475_v37 }
 0xb87   :  { %2474 = vmatmul.mubr.f32.vlgmr.msra.gmra.mrb[0].mxu0 %v9127_v63 }
 0xb88   :  { %6362 = vmatprep.mubr.msk.f32.mxu0 %vm8476_vm1, %v8474_v3  ;;  %7333 = vmatpush3.bf16.msra.mxu0 %v7332_v22  ;;  %v2668_v22 = vld [vmem:[#allocation4 + $0x48] sm:$0xff] (!%p5514_p7) }
 0xb89   :  { %7330 = vmatpush3.bf16.msra.mxu1 %v7329_v14  ;;  %7334 = vmatprep.subr.bf16.mxu0 %v8475_v37  ;;  %2672 = vst [vmem:[#allocation3 + $0x8] sm:$0xff] (!%p5514_p7), %v2668_v22 }
 0xb8c   :  { %6328 = vmatmul.mubr.f32.vlgmr.msra.gmra.mrb[0].mxu1 %v9127_v63  ;;  %7336 = vmatpush3.bf16.msra.mxu0 %v7335_v51 }
 0xb8d   :  { %7337 = vmatprep.subr.bf16.mxu0 %v8475_v37 }
 0xb90   :  { %7339 = vmatpush3.bf16.msra.mxu0 %v7338_v56 }
 0xb91   :  { %7340 = vmatprep.subr.bf16.mxu0 %v8475_v37 }
 0xb94   :  { %7342 = vmatpush3.bf16.msra.mxu0 %v7341_v44 }
 0xb95   :  { %7343 = vmatprep.subr.bf16.mxu0 %v8475_v37 }
 0xb98   :  { %7345 = vmatpush3.bf16.msra.mxu0 %v7344_v36 }
 0xb99   :  { %7346 = vmatprep.subr.bf16.mxu0 %v8475_v37 }
 0xb9c   :  { %7348 = vmatpush3.bf16.msra.mxu0 %v7347_v29 }
 0xb9d   :  { %7349 = vmatprep.subr.bf16.mxu0 %v8475_v37 }
 0xba0   :  { %7351 = vmatpush3.bf16.msra.mxu0 %v7350_v58 }
 0xba1   :  { %7352 = vmatprep.subr.bf16.mxu0 %v8475_v37 }
 0xba4   :  { %7354 = vmatpush3.bf16.msra.mxu0 %v7353_v47 }
 0xc5a   :  { %v2475_v25 = vpop.f32.mrb[0].mxu0 }
 0xc5b   :  { %v2550_v39 = vadd.f32 %v2475_v25, %v2358_v19  ;;  %v2477_v45 = vpop.f32.mrb[1].mxu0 }
 0xc5c   :  { %v2557_v38 = vadd.f32 %v2477_v45, %v2359_v35 }
 0xc5d   :  { %v5511_v26 = vmul.f32 -1.442695, %v2550_v39 }
 0xc5e   :  { %v5512_v49 = vmul.f32 -1.442695, %v2557_v38 }
 0xc5f   :  { %8200 = vpow2.f32 %v5511_v26  ;;  %v2546_v52 = vpop.f32.mrb[0].mxu1 }
 0xc60   :  { %v6329_v61 = vpop.f32.mrb[1].mxu1  ;;  %8202 = vpow2.f32 %v5512_v49  ;;  %v2564_v60 = vadd.f32 %v9119_v33, %v2546_v52 }
 0xc69   :  { %v8201_v50 = vpop.eup %8200 }
 0xc6a   :  { %v2554_v55 = vadd.f32 1.0, %v8201_v50  ;;  %v8203_v1 = vpop.eup %8202 }
 0xc6b   :  { %v2561_v10 = vadd.f32 1.0, %v8203_v1 }
 0xc6c   :  { %8204 = vrcp.f32 %v2554_v55 }
 0xc76   :  { %v8205_v5 = vpop.eup %8204 }
 0xc77   :  { %v2565_v46 = vmul.f32 %v8205_v5, %v2564_v60 }
 0xc79   :  { %v2566_v15 = vadd.f32 %v2565_v46, %v2360_v9 }
 0xc7b   :  { %8206 = vtanh.f32 %v2566_v15 }
 0xc7c   :  { %8208 = vrcp.f32 %v2561_v10 }
 0xc85   :  { %v8207_v21 = vpop.eup %8206 }
 0xc86   :  { %v2568_v24 = vsub.f32 %v9127_v63, %v8207_v21  ;;  %v8209_v41 = vpop.eup %8208  ;;  %v2670_v63 = vld [vmem:[#allocation4 + $0x58] sm:$0xff] (!%p5514_p7) }
 0xc87   :  { %2674 = vst [vmem:[#allocation3 + $0x18] sm:$0xff] (!%p5514_p7), %v2670_v63 }
 0xc88   :  { %v2569_v16 = vmul.f32 %v8209_v41, %v2568_v24 }
 0xc8a   :  { %v9174_v48 = vadd.f32 %v8207_v21, %v2569_v16 }
 0xc8c   :  { %6363 = vmatmul.mubr.f32.vlgmr.msra.gmra.mrb[2].mxu0 %v9174_v48 }
 0xd5e   :  { %2665 = sbr.rel (%p5514_p7) target bundleno = 3429 (0xd65), region = 105 }
 0xd5f   :  { %v2653_v8 = vpop.f32.mrb[2].mxu0 }
 0xd60   :  { %v2657_v13 = vadd.f32 %v2653_v8, %v2357_v4  ;;  %v6364_v14 = vpop.f32.mrb[3].mxu0 }
 0xd62   :  { %v2658_v18 = vadd.f32 %v2657_v13, %v9133_v12 }
 0xd64   :  { %2660 = vst [vmem:[#allocation18 + $0x10] sm:$0xff] %v2658_v18 }
 0xd65 PF:  { %p5515_p8 = scmp.eq.s32.totalorder %s5513_s14, 1 }
 0xd66   :  { %2679 = vmax.xlane.f32.xlu0 (!%p5515_p8), %v2658_v18  ;;  %v2701_v56 = vld [vmem:[#allocation11 + $0x8] sm:$0xff] (!%p5515_p8)  ;;  %v2703_v42 = vld [vmem:[#allocation11 + $0x18] sm:$0xff] (!%p5515_p8)  ;;  %v2700_v32 = vld [vmem:[#allocation11] sm:$0xff] (!%p5515_p8) }
 0xd67   :  { %2678 = sbr.rel (%p5515_p8) target bundleno = 4083 (0xff3), region = 109  ;;  %v2705_v40 = vld [vmem:[#allocation11 + $0x28] sm:$0xff] (!%p5515_p8)  ;;  %v2707_v7 = vld [vmem:[#allocation11 + $0x38] sm:$0xff] (!%p5515_p8)  ;;  %v2704_v36 = vld [vmem:[#allocation11 + $0x20] sm:$0xff] (!%p5515_p8) }
 0xd68   :  { %v7355_v44 = vpack.c.bf16 (!%p5515_p8), %v2705_v40, %v2701_v56  ;;  %v7387_v53 = vpack.c.bf16 (!%p5515_p8), %v2707_v7, %v2703_v42  ;;  %v7357_v54 = vpack.c.bf16 (!%p5515_p8), %v2704_v36, %v2700_v32  ;;  %v2702_v29 = vld [vmem:[#allocation11 + $0x10] sm:$0xff] (!%p5515_p8)  ;;  %v2709_v57 = vld [vmem:[#allocation11 + $0x48] sm:$0xff] (!%p5515_p8)  ;;  %v2711_v11 = vld [vmem:[#allocation11 + $0x58] sm:$0xff] (!%p5515_p8) }
 0xd69   :  { %v2706_v30 = vld [vmem:[#allocation11 + $0x30] sm:$0xff] (!%p5515_p8)  ;;  %v2713_v62 = vld [vmem:[#allocation11 + $0x68] sm:$0xff] (!%p5515_p8)  ;;  %v2715_v47 = vld [vmem:[#allocation11 + $0x78] sm:$0xff] (!%p5515_p8) }
 0xd6a   :  { %7356 = vmatprep.subr.bf16.mxu0 (!%p5515_p8), %v7355_v44  ;;  %v7389_v58 = vpack.c.bf16 (!%p5515_p8), %v2706_v30, %v2702_v29  ;;  %7388 = vmatprep.subr.bf16.mxu1 (!%p5515_p8), %v7387_v53  ;;  %v7359_v17 = vpack.c.bf16 (!%p5515_p8), %v2713_v62, %v2709_v57  ;;  %v7391_v19 = vpack.c.bf16 (!%p5515_p8), %v2715_v47, %v2711_v11  ;;  %v2708_v25 = vld [vmem:[#allocation11 + $0x40] sm:$0xff] (!%p5515_p8)  ;;  %v2710_v45 = vld [vmem:[#allocation11 + $0x50] sm:$0xff] (!%p5515_p8)  ;;  %v2717_v35 = vld [vmem:[#allocation11 + $0x88] sm:$0xff] (!%p5515_p8) }
 0xd6b   :  { %7358 = vmatpush1.bf16.msra.mxu0 (!%p5515_p8), %v7357_v54  ;;  %v2712_v39 = vld [vmem:[#allocation11 + $0x60] sm:$0xff] (!%p5515_p8)  ;;  %v2714_v26 = vld [vmem:[#allocation11 + $0x70] sm:$0xff] (!%p5515_p8)  ;;  %v2721_v52 = vld [vmem:[#allocation11 + $0xa8] sm:$0xff] (!%p5515_p8) }
 0xd6c   :  { %7390 = vmatpush1.bf16.msra.mxu1 (!%p5515_p8), %v7389_v58  ;;  %v7361_v6 = vpack.c.bf16 (!%p5515_p8), %v2712_v39, %v2708_v25  ;;  %7360 = vmatprep.subr.bf16.mxu0 (!%p5515_p8), %v7359_v17  ;;  %v7393_v38 = vpack.c.bf16 (!%p5515_p8), %v2714_v26, %v2710_v45  ;;  %v7363_v61 = vpack.c.bf16 (!%p5515_p8), %v2721_v52, %v2717_v35  ;;  %v2719_v49 = vld [vmem:[#allocation11 + $0x98] sm:$0xff] (!%p5515_p8)  ;;  %v2716_v55 = vld [vmem:[#allocation11 + $0x80] sm:$0xff] (!%p5515_p8)  ;;  %v2718_v1 = vld [vmem:[#allocation11 + $0x90] sm:$0xff] (!%p5515_p8) }
 0xd6d   :  { %7392 = vmatprep.subr.bf16.mxu1 (!%p5515_p8), %v7391_v19  ;;  %v2723_v50 = vld [vmem:[#allocation11 + $0xb8] sm:$0xff] (!%p5515_p8)  ;;  %v2720_v60 = vld [vmem:[#allocation11 + $0xa0] sm:$0xff] (!%p5515_p8)  ;;  %v2722_v9 = vld [vmem:[#allocation11 + $0xb0] sm:$0xff] (!%p5515_p8) }
 0xd6e   :  { %v7395_v59 = vpack.c.bf16 %v2723_v50, %v2719_v49  ;;  %v7365_v5 = vpack.c.bf16 %v2720_v60, %v2716_v55  ;;  %v2725_v46 = vld [vmem:[#allocation11 + $0xc8] sm:$0xff]  ;;  %v2727_v15 = vld [vmem:[#allocation11 + $0xd8] sm:$0xff]  ;;  %v7397_v21 = vpack.c.bf16 %v2722_v9, %v2718_v1  ;;  %v2724_v16 = vld [vmem:[#allocation11 + $0xc0] sm:$0xff] }
 0xd6f   :  { %7362 = vmatpush1.bf16.msra.mxu0 %v7361_v6  ;;  %v2729_v10 = vld [vmem:[#allocation11 + $0xe8] sm:$0xff]  ;;  %v2731_v41 = vld [vmem:[#allocation11 + $0xf8] sm:$0xff]  ;;  %v2728_v4 = vld [vmem:[#allocation11 + $0xe0] sm:$0xff] }
 0xd70   :  { %7394 = vmatpush1.bf16.msra.mxu1 %v7393_v38  ;;  %7364 = vmatprep.subr.bf16.mxu0 %v7363_v61  ;;  %v7367_v24 = vpack.c.bf16 %v2729_v10, %v2725_v46  ;;  %v7399_v8 = vpack.c.bf16 %v2731_v41, %v2727_v15  ;;  %v2726_v13 = vld [vmem:[#allocation11 + $0xd0] sm:$0xff]  ;;  %v2737_v20 = vld [vmem:[#allocation11 + $0x128] sm:$0xff]  ;;  %v2735_v22 = vld [vmem:[#allocation11 + $0x118] sm:$0xff]  ;;  %v7369_v63 = vpack.c.bf16 %v2728_v4, %v2724_v16 }
 0xd71   :  { %7396 = vmatprep.subr.bf16.mxu1 %v7395_v59  ;;  %v2730_v14 = vld [vmem:[#allocation11 + $0xf0] sm:$0xff]  ;;  %v2739_v23 = vld [vmem:[#allocation11 + $0x138] sm:$0xff]  ;;  %v2732_v56 = vld [vmem:[#allocation11 + $0x100] sm:$0xff] }
 0xd72   :  { %v2736_v40 = vld [vmem:[#allocation11 + $0x120] sm:$0xff]  ;;  %v2734_v42 = vld [vmem:[#allocation11 + $0x110] sm:$0xff]  ;;  %v7403_v44 = vpack.c.bf16 %v2739_v23, %v2735_v22  ;;  %v2741_v32 = vld [vmem:[#allocation11 + $0x148] sm:$0xff] }
 0xd73   :  { %7366 = vmatpush1.bf16.msra.mxu0 %v7365_v5  ;;  %v2738_v7 = vld [vmem:[#allocation11 + $0x130] sm:$0xff]  ;;  %v2745_v36 = vld [vmem:[#allocation11 + $0x168] sm:$0xff]  ;;  %v2743_v53 = vld [vmem:[#allocation11 + $0x158] sm:$0xff]  ;;  %v7373_v29 = vpack.c.bf16 %v2736_v40, %v2732_v56 }
 0xd74   :  { %7398 = vmatpush1.bf16.msra.mxu1 %v7397_v21  ;;  %7368 = vmatprep.subr.bf16.mxu0 %v7367_v24  ;;  %v2747_v54 = vld [vmem:[#allocation11 + $0x178] sm:$0xff]  ;;  %v7405_v30 = vpack.c.bf16 %v2738_v7, %v2734_v42  ;;  %v7375_v57 = vpack.c.bf16 %v2745_v36, %v2741_v32  ;;  %v2740_v58 = vld [vmem:[#allocation11 + $0x140] sm:$0xff]  ;;  %v2742_v11 = vld [vmem:[#allocation11 + $0x150] sm:$0xff] }
 0xd75   :  { %7400 = vmatprep.subr.bf16.mxu1 %v7399_v8  ;;  %v2744_v62 = vld [vmem:[#allocation11 + $0x160] sm:$0xff]  ;;  %v7407_v47 = vpack.c.bf16 %v2747_v54, %v2743_v53  ;;  %v2746_v17 = vld [vmem:[#allocation11 + $0x170] sm:$0xff]  ;;  %v2749_v19 = vld [vmem:[#allocation11 + $0x188] sm:$0xff] }
 0xd76   :  { %v2753_v25 = vld [vmem:[#allocation11 + $0x1a8] sm:$0xff]  ;;  %v2751_v39 = vld [vmem:[#allocation11 + $0x198] sm:$0xff]  ;;  %v7377_v6 = vpack.c.bf16 %v2744_v62, %v2740_v58  ;;  %v7409_v26 = vpack.c.bf16 %v2746_v17, %v2742_v11  ;;  %v2748_v52 = vld [vmem:[#allocation11 + $0x180] sm:$0xff] }
 0xd77   :  { %7370 = vmatpush1.bf16.msra.mxu0 %v7369_v63  ;;  %v2755_v45 = vld [vmem:[#allocation11 + $0x1b8] sm:$0xff]  ;;  %v7379_v35 = vpack.c.bf16 %v2753_v25, %v2749_v19  ;;  %v2752_v38 = vld [vmem:[#allocation11 + $0x1a0] sm:$0xff]  ;;  %v2750_v49 = vld [vmem:[#allocation11 + $0x190] sm:$0xff] }
 0xd78   :  { %v7411_v61 = vpack.c.bf16 %v2755_v45, %v2751_v39  ;;  %v2754_v50 = vld [vmem:[#allocation11 + $0x1b0] sm:$0xff]  ;;  %v7381_v55 = vpack.c.bf16 %v2752_v38, %v2748_v52  ;;  %v2757_v46 = vld [vmem:[#allocation11 + $0x1c8] sm:$0xff]  ;;  %v2759_v15 = vld [vmem:[#allocation11 + $0x1d8] sm:$0xff] }
 0xd79   :  { %v7413_v59 = vpack.c.bf16 %v2754_v50, %v2750_v49  ;;  %v2761_v10 = vld [vmem:[#allocation11 + $0x1e8] sm:$0xff]  ;;  %v2763_v24 = vld [vmem:[#allocation11 + $0x1f8] sm:$0xff]  ;;  %v2756_v41 = vld [vmem:[#allocation11 + $0x1c0] sm:$0xff] }
 0xd7a   :  { %v7383_v21 = vpack.c.bf16 %v2761_v10, %v2757_v46  ;;  %v2760_v16 = vld [vmem:[#allocation11 + $0x1e0] sm:$0xff]  ;;  %v7415_v4 = vpack.c.bf16 %v2763_v24, %v2759_v15 }
 0xd7b   :  { %v7385_v8 = vpack.c.bf16 %v2760_v16, %v2756_v41 }
 0xdf3   :  { %v2680_v27 = vpop.xlane.xlu0 %2679 }
 0xdf4   :  { %vm2681_vm5 = vcmp.eq.f32.partialorder %v2658_v18, %v2680_v27  ;;  %v2733_v18 = vld [vmem:[#allocation11 + $0x108] sm:$0xff]  ;;  %v7401_v27 = vpack.c.bf16 %v2730_v14, %v2726_v13  ;;  %v2758_v13 = vld [vmem:[#allocation11 + $0x1d0] sm:$0xff] }
 0xdf5   :  { %v9179_v51 = vsel %vm2681_vm5, %v8846_v28, 128  ;;  %v2762_v14 = vld [vmem:[#allocation11 + $0x1f0] sm:$0xff] }
 0xdf6   :  { %v2684_v31 = vshra.s32 %v9179_v51, 16  ;;  %7402 = vmatpush1.bf16.msra.mxu1 %v7401_v27  ;;  %v2683_v60 = vand.u32 65535, %v9179_v51  ;;  %v8479_v51 = vmov 0.0   ;;  %v8480_v27 = vmov 1.0  }
 0xdf7   :  { %7404 = vmatprep.subr.bf16.mxu1 %v7403_v44  ;;  %2828 = vmatprep.mubr.f32.mxu0 %v8479_v51 }
 0xdf8   :  { %v9182_v34 = vcvt.s32.f32 %v2684_v31  ;;  %v7371_v31 = vpack.c.bf16 %v2737_v20, %v2733_v18  ;;  %v2685_v9 = vcvt.s32.f32 %v2683_v60  ;;  %v7417_v18 = vpack.c.bf16 %v2762_v14, %v2758_v13  ;;  %2899 = vmatprep.mubr.f32.mxu1 %v8479_v51 }
 0xdfa   :  { %2687 = vmin.xlane.f32.xlu0 %v9182_v34  ;;  %7372 = vmatprep.subr.bf16.mxu0 %v7371_v31 }
 0xdfb   :  { %7374 = vmatpush1.bf16.msra.mxu0 %v7373_v29  ;;  %7406 = vmatpush1.bf16.msra.mxu1 %v7405_v30 }
 0xdfc   :  { %7376 = vmatprep.subr.bf16.mxu0 %v7375_v57  ;;  %7408 = vmatprep.subr.bf16.mxu1 %v7407_v47 }
 0xdff   :  { %7378 = vmatpush1.bf16.msra.mxu0 %v7377_v6  ;;  %7410 = vmatpush1.bf16.msra.mxu1 %v7409_v26 }
 0xe00   :  { %7380 = vmatprep.subr.bf16.mxu0 %v7379_v35  ;;  %7412 = vmatprep.subr.bf16.mxu1 %v7411_v61 }
 0xe03   :  { %7382 = vmatpush1.bf16.msra.mxu0 %v7381_v55  ;;  %7414 = vmatpush1.bf16.msra.mxu1 %v7413_v59 }
 0xe04   :  { %7384 = vmatprep.subr.bf16.mxu0 %v7383_v21  ;;  %7416 = vmatprep.subr.bf16.mxu1 %v7415_v4 }
 0xe07   :  { %7386 = vmatpush1.bf16.msra.mxu0 %v7385_v8  ;;  %7418 = vmatpush1.bf16.msra.mxu1 %v7417_v18 }
 0xe87   :  { %v2688_v1 = vpop.xlane.xlu0 %2687 }
 0xe88   :  { %vm2689_vm6 = vcmp.eq.f32.partialorder %v9182_v34, %v2688_v1  ;;  %v2694_v34 = vcvt.f32.s32 %v2688_v1 }
 0xe89   :  { %v2690_v5 = vsel %vm2689_vm6, %v2685_v9, inf }
 0xe8a   :  { %2691 = vmin.xlane.f32.xlu1 %v2690_v5  ;;  %v2695_v22 = vshll.u32 %v2694_v34, 16 }
 0xf17   :  { %v2692_v20 = vpop.xlane.xlu1 %2691 }
 0xf18   :  { %v2693_v23 = vcvt.f32.s32 %v2692_v20 }
 0xf1a   :  { %v2696_v63 = vadd.s32 %v2695_v22, %v2693_v23 }
 0xf1c   :  { %vm2697_vm7 = vcmp.eq.s32.totalorder %v8846_v28, %v2696_v63 }
 0xf1d   :  { %5517 = vmatmul.mubr.msk.f32.vlgmr.msra.gmra.mrb[0].mxu0 %vm2697_vm7, %v8480_v27  ;;  %5518 = vmatmul.mubr.msk.f32.vlgmr.msra.gmra.mrb[0].mxu1 %vm2697_vm7, %v8480_v27 }
 0xff0   :  { %v2830_v31 = vpop.f32.mrb[0].mxu0  ;;  %v2901_v56 = vpop.f32.mrb[0].mxu1 }
 0xff1   :  { %2906 = vst [vmem:[#allocation3] sm:$0xff] %v2830_v31  ;;  %2908 = vst [vmem:[#allocation3 + $0x10] sm:$0xff] %v2901_v56  ;;  %v2832_v40 = vpop.f32.mrb[1].mxu0  ;;  %v2903_v42 = vpop.f32.mrb[1].mxu1 }
 0xff2   :  { %2907 = vst [vmem:[#allocation3 + $0x8] sm:$0xff] %v2832_v40  ;;  %2909 = vst [vmem:[#allocation3 + $0x18] sm:$0xff] %v2903_v42 }
 0xff3 PF:  { %v2918_v44 = vld [vmem:[#allocation14 + $0x8] sm:$0xff]  ;;  %v2921_v7 = vld [vmem:[#allocation14 + $0x20] sm:$0xff]  ;;  %7451 = vmatprep.subr.bf16.mxu1 %v8475_v37  ;;  %3029 = vmatprep.mubr.f32.mxu0 %v8474_v3  ;;  %v2920_v53 = vld [vmem:[#allocation14 + $0x18] sm:$0xff]  ;;  %s5521_s23 = sld [smem:[#allocation8 + $0x3]] }
 0xff4   :  { %v2917_v32 = vld [vmem:[#allocation14] sm:$0xff]  ;;  %v7419_v36 = vpack.c.bf16 %v2921_v7, %v2918_v44  ;;  %v2924_v54 = vld [vmem:[#allocation14 + $0x38] sm:$0xff]  ;;  %v2927_v29 = vld [vmem:[#allocation14 + $0x50] sm:$0xff]  ;;  %6397 = vmatprep.mubr.msk.f32.mxu1 %vm8476_vm1, %v8474_v3 }
 0xff5   :  { %v7421_v30 = vpack.c.bf16 %v2920_v53, %v2917_v32  ;;  %v7423_v57 = vpack.c.bf16 %v2927_v29, %v2924_v54  ;;  %v2923_v58 = vld [vmem:[#allocation14 + $0x30] sm:$0xff]  ;;  %v2926_v62 = vld [vmem:[#allocation14 + $0x48] sm:$0xff]  ;;  %v2933_v47 = vld [vmem:[#allocation14 + $0x80] sm:$0xff] }
 0xff6   :  { %v2930_v11 = vld [vmem:[#allocation14 + $0x68] sm:$0xff]  ;;  %7420 = vmatprep.subr.bf16.mxu0 %v7419_v36  ;;  %v7425_v17 = vpack.c.bf16 %v2926_v62, %v2923_v58  ;;  %v2929_v25 = vld [vmem:[#allocation14 + $0x60] sm:$0xff]  ;;  %v2932_v39 = vld [vmem:[#allocation14 + $0x78] sm:$0xff] }
 0xff7   :  { %7422 = vmatpush1.bf16.msra.mxu0 %v7421_v30  ;;  %v7427_v19 = vpack.c.bf16 %v2933_v47, %v2930_v11  ;;  %v2936_v45 = vld [vmem:[#allocation14 + $0x98] sm:$0xff]  ;;  %v2939_v6 = vld [vmem:[#allocation14 + $0xb0] sm:$0xff]  ;;  %v7429_v26 = vpack.c.bf16 %v2932_v39, %v2929_v25  ;;  %v2938_v38 = vld [vmem:[#allocation14 + $0xa8] sm:$0xff] }
 0xff8   :  { %7424 = vmatprep.subr.bf16.mxu0 %v7423_v57  ;;  %v2935_v35 = vld [vmem:[#allocation14 + $0x90] sm:$0xff]  ;;  %v7431_v52 = vpack.c.bf16 %v2939_v6, %v2936_v45  ;;  %v2922_v49 = vld [vmem:[#allocation14 + $0x28] sm:$0xff]  ;;  %v2945_v55 = vld [vmem:[#allocation14 + $0xe0] sm:$0xff] }
 0xff9   :  { %v2919_v61 = vld [vmem:[#allocation14 + $0x10] sm:$0xff]  ;;  %v2942_v50 = vld [vmem:[#allocation14 + $0xc8] sm:$0xff]  ;;  %v2925_v60 = vld [vmem:[#allocation14 + $0x40] sm:$0xff]  ;;  %v7433_v9 = vpack.c.bf16 %v2938_v38, %v2935_v35  ;;  %p5522_p9 = scmp.ne.s32.totalorder %s5521_s23, 1 }
 0xffa   :  { %v7452_v59 = vpack.c.bf16 %v2922_v49, %v2919_v61  ;;  %v2928_v1 = vld [vmem:[#allocation14 + $0x58] sm:$0xff]  ;;  %v2941_v5 = vld [vmem:[#allocation14 + $0xc0] sm:$0xff]  ;;  %v7435_v10 = vpack.c.bf16 %v2945_v55, %v2942_v50  ;;  %v2931_v21 = vld [vmem:[#allocation14 + $0x70] sm:$0xff] }
 0xffb   :  { %7426 = vmatpush1.bf16.msra.mxu0 %v7425_v17  ;;  %v7455_v46 = vpack.c.bf16 %v2928_v1, %v2925_v60  ;;  %v2944_v15 = vld [vmem:[#allocation14 + $0xd8] sm:$0xff]  ;;  %v2934_v24 = vld [vmem:[#allocation14 + $0x88] sm:$0xff]  ;;  %v2951_v16 = vld [vmem:[#allocation14 + $0x110] sm:$0xff] }
 0xffc   :  { %7428 = vmatprep.subr.bf16.mxu0 %v7427_v19  ;;  %7453 = vmatpush3.bf16.msra.mxu1 %v7452_v59  ;;  %v2948_v41 = vld [vmem:[#allocation14 + $0xf8] sm:$0xff]  ;;  %v7437_v4 = vpack.c.bf16 %v2944_v15, %v2941_v5  ;;  %v2947_v8 = vld [vmem:[#allocation14 + $0xf0] sm:$0xff]  ;;  %v7458_v13 = vpack.c.bf16 %v2934_v24, %v2931_v21  ;;  %v2950_v18 = vld [vmem:[#allocation14 + $0x108] sm:$0xff] }
 0xffd   :  { %7454 = vmatprep.subr.bf16.mxu1 %v8475_v37  ;;  %v7439_v14 = vpack.c.bf16 %v2951_v16, %v2948_v41  ;;  %v2937_v51 = vld [vmem:[#allocation14 + $0xa0] sm:$0xff]  ;;  %v2940_v34 = vld [vmem:[#allocation14 + $0xb8] sm:$0xff]  ;;  %v2954_v20 = vld [vmem:[#allocation14 + $0x128] sm:$0xff]  ;;  %v7441_v23 = vpack.c.bf16 %v2950_v18, %v2947_v8 }
 0xffe   :  { %v2957_v22 = vld [vmem:[#allocation14 + $0x140] sm:$0xff]  ;;  %v7461_v27 = vpack.c.bf16 %v2940_v34, %v2937_v51  ;;  %v2956_v56 = vld [vmem:[#allocation14 + $0x138] sm:$0xff]  ;;  %v2943_v40 = vld [vmem:[#allocation14 + $0xd0] sm:$0xff] }
 0xfff   :  { %7430 = vmatpush1.bf16.msra.mxu0 %v7429_v26  ;;  %v2953_v63 = vld [vmem:[#allocation14 + $0x120] sm:$0xff]  ;;  %v7443_v31 = vpack.c.bf16 %v2957_v22, %v2954_v20  ;;  %v2946_v42 = vld [vmem:[#allocation14 + $0xe8] sm:$0xff]  ;;  %v2960_v44 = vld [vmem:[#allocation14 + $0x158] sm:$0xff] }
0x1000   :  { %7432 = vmatprep.subr.bf16.mxu0 %v7431_v52  ;;  %7456 = vmatpush3.bf16.msra.mxu1 %v7455_v46  ;;  %v2963_v7 = vld [vmem:[#allocation14 + $0x170] sm:$0xff]  ;;  %v7445_v32 = vpack.c.bf16 %v2956_v56, %v2953_v63  ;;  %v7464_v53 = vpack.c.bf16 %v2946_v42, %v2943_v40  ;;  %v2962_v29 = vld [vmem:[#allocation14 + $0x168] sm:$0xff]  ;;  %v2949_v30 = vld [vmem:[#allocation14 + $0x100] sm:$0xff] }
0x1001   :  { %7457 = vmatprep.subr.bf16.mxu1 %v8475_v37  ;;  %v2959_v36 = vld [vmem:[#allocation14 + $0x150] sm:$0xff]  ;;  %v7447_v54 = vpack.c.bf16 %v2963_v7, %v2960_v44  ;;  %v2952_v57 = vld [vmem:[#allocation14 + $0x118] sm:$0xff]  ;;  %v2958_v47 = vld [vmem:[#allocation14 + $0x148] sm:$0xff] }
0x1002   :  { %v7449_v58 = vpack.c.bf16 %v2962_v29, %v2959_v36  ;;  %v7467_v62 = vpack.c.bf16 %v2952_v57, %v2949_v30  ;;  %v2955_v11 = vld [vmem:[#allocation14 + $0x130] sm:$0xff]  ;;  %v2961_v19 = vld [vmem:[#allocation14 + $0x160] sm:$0xff]  ;;  %v2964_v25 = vld [vmem:[#allocation14 + $0x178] sm:$0xff] }
0x1003   :  { %7434 = vmatpush1.bf16.msra.mxu0 %v7433_v9  ;;  %v7470_v17 = vpack.c.bf16 %v2958_v47, %v2955_v11  ;;  %v7473_v39 = vpack.c.bf16 %v2964_v25, %v2961_v19  ;;  %v3127_v45 = vld [vmem:[#allocation15] sm:$0xff]  ;;  %v3128_v6 = vld [vmem:[#allocation15 + $0x8] sm:$0xff]  ;;  %v3129_v35 = vld [vmem:[#allocation15 + $0x10] sm:$0xff] }
0x1004   :  { %7436 = vmatprep.subr.bf16.mxu0 %v7435_v10  ;;  %7459 = vmatpush3.bf16.msra.mxu1 %v7458_v13  ;;  %v7476_v26 = vpack.c.bf16 %v3128_v6, %v3127_v45  ;;  %v3130_v52 = vld [vmem:[#allocation15 + $0x18] sm:$0xff]  ;;  %v3131_v61 = vld [vmem:[#allocation15 + $0x20] sm:$0xff]  ;;  %v3132_v49 = vld [vmem:[#allocation15 + $0x28] sm:$0xff] }
0x1005   :  { %7460 = vmatprep.subr.bf16.mxu1 %v8475_v37  ;;  %v7479_v38 = vpack.c.bf16 %v3130_v52, %v3129_v35  ;;  %v7482_v50 = vpack.c.bf16 %v3132_v49, %v3131_v61  ;;  %v3133_v55 = vld [vmem:[#allocation15 + $0x30] sm:$0xff]  ;;  %v3134_v59 = vld [vmem:[#allocation15 + $0x38] sm:$0xff]  ;;  %v3135_v1 = vld [vmem:[#allocation15 + $0x40] sm:$0xff] }
0x1006   :  { %v7485_v60 = vpack.c.bf16 %v3134_v59, %v3133_v55  ;;  %v3136_v9 = vld [vmem:[#allocation15 + $0x48] sm:$0xff]  ;;  %v3137_v46 = vld [vmem:[#allocation15 + $0x50] sm:$0xff]  ;;  %v3138_v10 = vld [vmem:[#allocation15 + $0x58] sm:$0xff] }
0x1007   :  { %7438 = vmatpush1.bf16.msra.mxu0 %v7437_v4  ;;  %v7488_v5 = vpack.c.bf16 %v3136_v9, %v3135_v1  ;;  %v7491_v15 = vpack.c.bf16 %v3138_v10, %v3137_v46  ;;  %v3139_v21 = vld [vmem:[#allocation15 + $0x60] sm:$0xff]  ;;  %v3140_v24 = vld [vmem:[#allocation15 + $0x68] sm:$0xff]  ;;  %v3141_v16 = vld [vmem:[#allocation15 + $0x70] sm:$0xff] }
0x1008   :  { %7440 = vmatprep.subr.bf16.mxu0 %v7439_v14  ;;  %7462 = vmatpush3.bf16.msra.mxu1 %v7461_v27  ;;  %v7494_v41 = vpack.c.bf16 %v3140_v24, %v3139_v21  ;;  %v3142_v4 = vld [vmem:[#allocation15 + $0x78] sm:$0xff]  ;;  %v2910_v13 = vld [vmem:[#allocation3] sm:$0xff]  ;;  %v2911_v20 = vld [vmem:[#allocation3 + $0x8] sm:$0xff] }
0x1009   :  { %7463 = vmatprep.subr.bf16.mxu1 %v8475_v37  ;;  %v7497_v8 = vpack.c.bf16 %v3142_v4, %v3141_v16  ;;  %v2914_v14 = vadd.f32 %v2910_v13, %v9108_v0  ;;  %v2912_v44 = vld [vmem:[#allocation3 + $0x10] sm:$0xff]  ;;  %v3223_v6 = vld [vmem:[#allocation4 + $0x60] sm:$0xff] (!%p5522_p9) }
0x100a   :  { %v2916_v36 = vadd.f32 %v2912_v44, %v9121_v43  ;;  %v3225_v35 = vld [vmem:[#allocation4 + $0x70] sm:$0xff] (!%p5522_p9)  ;;  %3227 = vst [vmem:[#allocation3] sm:$0xff] (!%p5522_p9), %v3223_v6 }
0x100b   :  { %7442 = vmatpush1.bf16.msra.mxu0 %v7441_v23  ;;  %v2915_v23 = vadd.f32 %v2911_v20, %v9110_v2  ;;  %3229 = vst [vmem:[#allocation3 + $0x10] sm:$0xff] (!%p5522_p9), %v3225_v35 }
0x100c   :  { %7444 = vmatprep.subr.bf16.mxu0 %v7443_v31  ;;  %7465 = vmatpush3.bf16.msra.mxu1 %v7464_v53 }
0x100d   :  { %7466 = vmatprep.subr.bf16.mxu1 %v8475_v37 }
0x100f   :  { %7446 = vmatpush1.bf16.msra.mxu0 %v7445_v32 }
0x1010   :  { %7448 = vmatprep.subr.bf16.mxu0 %v7447_v54  ;;  %7468 = vmatpush3.bf16.msra.mxu1 %v7467_v62 }
0x1011   :  { %7469 = vmatprep.subr.bf16.mxu1 %v8475_v37 }
0x1013   :  { %7450 = vmatpush1.bf16.msra.mxu0 %v7449_v58 }
0x1014   :  { %7475 = vmatprep.subr.bf16.mxu0 %v8475_v37  ;;  %7471 = vmatpush3.bf16.msra.mxu1 %v7470_v17  ;;  %v2913_v17 = vld [vmem:[#allocation3 + $0x18] sm:$0xff] }
0x1015   :  { %7472 = vmatprep.subr.bf16.mxu1 %v8475_v37 }
0x1016   :  { %3030 = vmatmul.mubr.f32.vlgmr.msra.gmra.mrb[0].mxu0 %v9174_v48 }
0x1017   :  { %6432 = vmatprep.mubr.msk.f32.mxu0 %vm8476_vm1, %v8474_v3  ;;  %7477 = vmatpush3.bf16.msra.mxu0 %v7476_v26  ;;  %v3224_v26 = vld [vmem:[#allocation4 + $0x68] sm:$0xff] (!%p5522_p9) }
0x1018   :  { %7474 = vmatpush3.bf16.msra.mxu1 %v7473_v39  ;;  %7478 = vmatprep.subr.bf16.mxu0 %v8475_v37  ;;  %3228 = vst [vmem:[#allocation3 + $0x8] sm:$0xff] (!%p5522_p9), %v3224_v26 }
0x101b   :  { %6398 = vmatmul.mubr.f32.vlgmr.msra.gmra.mrb[0].mxu1 %v9174_v48  ;;  %7480 = vmatpush3.bf16.msra.mxu0 %v7479_v38 }
0x101c   :  { %7481 = vmatprep.subr.bf16.mxu0 %v8475_v37 }
0x101f   :  { %7483 = vmatpush3.bf16.msra.mxu0 %v7482_v50 }
0x1020   :  { %7484 = vmatprep.subr.bf16.mxu0 %v8475_v37 }
0x1023   :  { %7486 = vmatpush3.bf16.msra.mxu0 %v7485_v60 }
0x1024   :  { %7487 = vmatprep.subr.bf16.mxu0 %v8475_v37 }
0x1027   :  { %7489 = vmatpush3.bf16.msra.mxu0 %v7488_v5 }
0x1028   :  { %7490 = vmatprep.subr.bf16.mxu0 %v8475_v37 }
0x102b   :  { %7492 = vmatpush3.bf16.msra.mxu0 %v7491_v15 }
0x102c   :  { %7493 = vmatprep.subr.bf16.mxu0 %v8475_v37 }
0x102f   :  { %7495 = vmatpush3.bf16.msra.mxu0 %v7494_v41 }
0x1030   :  { %7496 = vmatprep.subr.bf16.mxu0 %v8475_v37 }
0x1033   :  { %7498 = vmatpush3.bf16.msra.mxu0 %v7497_v8 }
0x10e9   :  { %v3031_v18 = vpop.f32.mrb[0].mxu0 }
0x10ea   :  { %v3106_v51 = vadd.f32 %v3031_v18, %v2914_v14  ;;  %v3033_v34 = vpop.f32.mrb[1].mxu0 }
0x10eb   :  { %v3113_v27 = vadd.f32 %v3033_v34, %v2915_v23 }
0x10ec   :  { %v5519_v22 = vmul.f32 -1.442695, %v3106_v51 }
0x10ed   :  { %v5520_v56 = vmul.f32 -1.442695, %v3113_v27 }
0x10ee   :  { %8210 = vpow2.f32 %v5519_v22  ;;  %v3102_v63 = vpop.f32.mrb[0].mxu1 }
0x10ef   :  { %v6399_v31 = vpop.f32.mrb[1].mxu1  ;;  %8212 = vpow2.f32 %v5520_v56  ;;  %v3120_v7 = vadd.f32 %v9119_v33, %v3102_v63 }
0x10f8   :  { %v8211_v40 = vpop.eup %8210 }
0x10f9   :  { %v3110_v42 = vadd.f32 1.0, %v8211_v40  ;;  %v8213_v32 = vpop.eup %8212 }
0x10fa   :  { %v3117_v29 = vadd.f32 1.0, %v8213_v32 }
0x10fb   :  { %8214 = vrcp.f32 %v3110_v42 }
0x1105   :  { %v8215_v53 = vpop.eup %8214 }
0x1106   :  { %v3121_v54 = vmul.f32 %v8215_v53, %v3120_v7 }
0x1108   :  { %v3122_v30 = vadd.f32 %v3121_v54, %v2916_v36 }
0x110a   :  { %8216 = vtanh.f32 %v3122_v30 }
0x110b   :  { %8218 = vrcp.f32 %v3117_v29 }
0x1114   :  { %v8217_v57 = vpop.eup %8216 }
0x1115   :  { %v3124_v58 = vsub.f32 %v9174_v48, %v8217_v57  ;;  %v8219_v62 = vpop.eup %8218  ;;  %v3226_v48 = vld [vmem:[#allocation4 + $0x78] sm:$0xff] (!%p5522_p9) }
0x1116   :  { %3230 = vst [vmem:[#allocation3 + $0x18] sm:$0xff] (!%p5522_p9), %v3226_v48 }
0x1117   :  { %v3125_v11 = vmul.f32 %v8219_v62, %v3124_v58 }
0x1119   :  { %v9216_v47 = vadd.f32 %v8217_v57, %v3125_v11 }
0x111b   :  { %6433 = vmatmul.mubr.f32.vlgmr.msra.gmra.mrb[2].mxu0 %v9216_v47 }
0x11ed   :  { %3221 = sbr.rel (%p5522_p9) target bundleno = 4596 (0x11f4), region = 113 }
0x11ee   :  { %v3209_v19 = vpop.f32.mrb[2].mxu0 }
0x11ef   :  { %v3213_v25 = vadd.f32 %v3209_v19, %v2913_v17  ;;  %v6434_v39 = vpop.f32.mrb[3].mxu0 }
0x11f1   :  { %v3214_v45 = vadd.f32 %v3213_v25, %v9133_v12 }
0x11f3   :  { %3216 = vst [vmem:[#allocation18 + $0x18] sm:$0xff] %v3214_v45 }
0x11f4 PF:  { %p5523_p10 = scmp.eq.s32.totalorder %s5521_s23, 1 }
0x11f5   :  { %3235 = vmax.xlane.f32.xlu0 (!%p5523_p10), %v3214_v45  ;;  %v3257_v50 = vld [vmem:[#allocation11 + $0x8] sm:$0xff] (!%p5523_p10)  ;;  %v3259_v59 = vld [vmem:[#allocation11 + $0x18] sm:$0xff] (!%p5523_p10)  ;;  %v3256_v9 = vld [vmem:[#allocation11] sm:$0xff] (!%p5523_p10) }
0x11f6   :  { %3234 = sbr.rel (%p5523_p10) target bundleno = 5250 (0x1482), region = 117  ;;  %v3261_v55 = vld [vmem:[#allocation11 + $0x28] sm:$0xff] (!%p5523_p10)  ;;  %v3263_v1 = vld [vmem:[#allocation11 + $0x38] sm:$0xff] (!%p5523_p10)  ;;  %v3260_v5 = vld [vmem:[#allocation11 + $0x20] sm:$0xff] (!%p5523_p10) }
0x11f7   :  { %v7499_v60 = vpack.c.bf16 (!%p5523_p10), %v3261_v55, %v3257_v50  ;;  %v7531_v46 = vpack.c.bf16 (!%p5523_p10), %v3263_v1, %v3259_v59  ;;  %v7501_v10 = vpack.c.bf16 (!%p5523_p10), %v3260_v5, %v3256_v9  ;;  %v3258_v15 = vld [vmem:[#allocation11 + $0x10] sm:$0xff] (!%p5523_p10)  ;;  %v3265_v24 = vld [vmem:[#allocation11 + $0x48] sm:$0xff] (!%p5523_p10)  ;;  %v3267_v4 = vld [vmem:[#allocation11 + $0x58] sm:$0xff] (!%p5523_p10) }
0x11f8   :  { %v3262_v21 = vld [vmem:[#allocation11 + $0x30] sm:$0xff] (!%p5523_p10)  ;;  %v3269_v16 = vld [vmem:[#allocation11 + $0x68] sm:$0xff] (!%p5523_p10)  ;;  %v3271_v8 = vld [vmem:[#allocation11 + $0x78] sm:$0xff] (!%p5523_p10) }
0x11f9   :  { %7500 = vmatprep.subr.bf16.mxu0 (!%p5523_p10), %v7499_v60  ;;  %v7533_v41 = vpack.c.bf16 (!%p5523_p10), %v3262_v21, %v3258_v15  ;;  %7532 = vmatprep.subr.bf16.mxu1 (!%p5523_p10), %v7531_v46  ;;  %v7503_v13 = vpack.c.bf16 (!%p5523_p10), %v3269_v16, %v3265_v24  ;;  %v7535_v14 = vpack.c.bf16 (!%p5523_p10), %v3271_v8, %v3267_v4  ;;  %v3264_v18 = vld [vmem:[#allocation11 + $0x40] sm:$0xff] (!%p5523_p10)  ;;  %v3266_v34 = vld [vmem:[#allocation11 + $0x50] sm:$0xff] (!%p5523_p10)  ;;  %v3273_v23 = vld [vmem:[#allocation11 + $0x88] sm:$0xff] (!%p5523_p10) }
0x11fa   :  { %7502 = vmatpush1.bf16.msra.mxu0 (!%p5523_p10), %v7501_v10  ;;  %v3268_v51 = vld [vmem:[#allocation11 + $0x60] sm:$0xff] (!%p5523_p10)  ;;  %v3270_v22 = vld [vmem:[#allocation11 + $0x70] sm:$0xff] (!%p5523_p10)  ;;  %v3277_v63 = vld [vmem:[#allocation11 + $0xa8] sm:$0xff] (!%p5523_p10) }
0x11fb   :  { %7534 = vmatpush1.bf16.msra.mxu1 (!%p5523_p10), %v7533_v41  ;;  %v7505_v20 = vpack.c.bf16 (!%p5523_p10), %v3268_v51, %v3264_v18  ;;  %7504 = vmatprep.subr.bf16.mxu0 (!%p5523_p10), %v7503_v13  ;;  %v7537_v27 = vpack.c.bf16 (!%p5523_p10), %v3270_v22, %v3266_v34  ;;  %v7507_v31 = vpack.c.bf16 (!%p5523_p10), %v3277_v63, %v3273_v23  ;;  %v3275_v56 = vld [vmem:[#allocation11 + $0x98] sm:$0xff] (!%p5523_p10)  ;;  %v3272_v42 = vld [vmem:[#allocation11 + $0x80] sm:$0xff] (!%p5523_p10)  ;;  %v3274_v32 = vld [vmem:[#allocation11 + $0x90] sm:$0xff] (!%p5523_p10) }
0x11fc   :  { %7536 = vmatprep.subr.bf16.mxu1 (!%p5523_p10), %v7535_v14  ;;  %v3279_v40 = vld [vmem:[#allocation11 + $0xb8] sm:$0xff] (!%p5523_p10)  ;;  %v3276_v7 = vld [vmem:[#allocation11 + $0xa0] sm:$0xff] (!%p5523_p10)  ;;  %v3278_v36 = vld [vmem:[#allocation11 + $0xb0] sm:$0xff] (!%p5523_p10) }
0x11fd   :  { %v7539_v44 = vpack.c.bf16 %v3279_v40, %v3275_v56  ;;  %v7509_v53 = vpack.c.bf16 %v3276_v7, %v3272_v42  ;;  %v3281_v54 = vld [vmem:[#allocation11 + $0xc8] sm:$0xff]  ;;  %v3283_v30 = vld [vmem:[#allocation11 + $0xd8] sm:$0xff]  ;;  %v7541_v57 = vpack.c.bf16 %v3278_v36, %v3274_v32  ;;  %v3280_v11 = vld [vmem:[#allocation11 + $0xc0] sm:$0xff] }
0x11fe   :  { %7506 = vmatpush1.bf16.msra.mxu0 %v7505_v20  ;;  %v3285_v29 = vld [vmem:[#allocation11 + $0xe8] sm:$0xff]  ;;  %v3287_v62 = vld [vmem:[#allocation11 + $0xf8] sm:$0xff]  ;;  %v3284_v17 = vld [vmem:[#allocation11 + $0xe0] sm:$0xff] }
0x11ff   :  { %7538 = vmatpush1.bf16.msra.mxu1 %v7537_v27  ;;  %7508 = vmatprep.subr.bf16.mxu0 %v7507_v31  ;;  %v7511_v58 = vpack.c.bf16 %v3285_v29, %v3281_v54  ;;  %v7543_v19 = vpack.c.bf16 %v3287_v62, %v3283_v30  ;;  %v3282_v25 = vld [vmem:[#allocation11 + $0xd0] sm:$0xff]  ;;  %v3293_v6 = vld [vmem:[#allocation11 + $0x128] sm:$0xff]  ;;  %v3291_v26 = vld [vmem:[#allocation11 + $0x118] sm:$0xff]  ;;  %v7513_v48 = vpack.c.bf16 %v3284_v17, %v3280_v11 }
0x1200   :  { %7540 = vmatprep.subr.bf16.mxu1 %v7539_v44  ;;  %v3286_v39 = vld [vmem:[#allocation11 + $0xf0] sm:$0xff]  ;;  %v3295_v35 = vld [vmem:[#allocation11 + $0x138] sm:$0xff]  ;;  %v3288_v50 = vld [vmem:[#allocation11 + $0x100] sm:$0xff] }
0x1201   :  { %v3292_v55 = vld [vmem:[#allocation11 + $0x120] sm:$0xff]  ;;  %v3290_v59 = vld [vmem:[#allocation11 + $0x110] sm:$0xff]  ;;  %v7547_v60 = vpack.c.bf16 %v3295_v35, %v3291_v26  ;;  %v3297_v9 = vld [vmem:[#allocation11 + $0x148] sm:$0xff] }
0x1202   :  { %7510 = vmatpush1.bf16.msra.mxu0 %v7509_v53  ;;  %v3294_v1 = vld [vmem:[#allocation11 + $0x130] sm:$0xff]  ;;  %v3301_v5 = vld [vmem:[#allocation11 + $0x168] sm:$0xff]  ;;  %v3299_v46 = vld [vmem:[#allocation11 + $0x158] sm:$0xff]  ;;  %v7517_v15 = vpack.c.bf16 %v3292_v55, %v3288_v50 }
0x1203   :  { %7542 = vmatpush1.bf16.msra.mxu1 %v7541_v57  ;;  %7512 = vmatprep.subr.bf16.mxu0 %v7511_v58  ;;  %v3303_v10 = vld [vmem:[#allocation11 + $0x178] sm:$0xff]  ;;  %v7549_v21 = vpack.c.bf16 %v3294_v1, %v3290_v59  ;;  %v7519_v24 = vpack.c.bf16 %v3301_v5, %v3297_v9  ;;  %v3296_v41 = vld [vmem:[#allocation11 + $0x140] sm:$0xff]  ;;  %v3298_v4 = vld [vmem:[#allocation11 + $0x150] sm:$0xff] }
0x1204   :  { %7544 = vmatprep.subr.bf16.mxu1 %v7543_v19  ;;  %v3300_v16 = vld [vmem:[#allocation11 + $0x160] sm:$0xff]  ;;  %v7551_v8 = vpack.c.bf16 %v3303_v10, %v3299_v46  ;;  %v3302_v13 = vld [vmem:[#allocation11 + $0x170] sm:$0xff]  ;;  %v3305_v14 = vld [vmem:[#allocation11 + $0x188] sm:$0xff] }
0x1205   :  { %v3309_v18 = vld [vmem:[#allocation11 + $0x1a8] sm:$0xff]  ;;  %v3307_v51 = vld [vmem:[#allocation11 + $0x198] sm:$0xff]  ;;  %v7521_v20 = vpack.c.bf16 %v3300_v16, %v3296_v41  ;;  %v7553_v22 = vpack.c.bf16 %v3302_v13, %v3298_v4  ;;  %v3304_v63 = vld [vmem:[#allocation11 + $0x180] sm:$0xff] }
0x1206   :  { %7514 = vmatpush1.bf16.msra.mxu0 %v7513_v48  ;;  %v3311_v34 = vld [vmem:[#allocation11 + $0x1b8] sm:$0xff]  ;;  %v7523_v23 = vpack.c.bf16 %v3309_v18, %v3305_v14  ;;  %v3308_v27 = vld [vmem:[#allocation11 + $0x1a0] sm:$0xff]  ;;  %v3306_v56 = vld [vmem:[#allocation11 + $0x190] sm:$0xff] }
0x1207   :  { %v7555_v31 = vpack.c.bf16 %v3311_v34, %v3307_v51  ;;  %v3310_v40 = vld [vmem:[#allocation11 + $0x1b0] sm:$0xff]  ;;  %v7525_v42 = vpack.c.bf16 %v3308_v27, %v3304_v63  ;;  %v3313_v54 = vld [vmem:[#allocation11 + $0x1c8] sm:$0xff]  ;;  %v3315_v30 = vld [vmem:[#allocation11 + $0x1d8] sm:$0xff] }
0x1208   :  { %v7557_v44 = vpack.c.bf16 %v3310_v40, %v3306_v56  ;;  %v3317_v29 = vld [vmem:[#allocation11 + $0x1e8] sm:$0xff]  ;;  %v3319_v58 = vld [vmem:[#allocation11 + $0x1f8] sm:$0xff]  ;;  %v3312_v62 = vld [vmem:[#allocation11 + $0x1c0] sm:$0xff] }
0x1209   :  { %v7527_v57 = vpack.c.bf16 %v3317_v29, %v3313_v54  ;;  %v3316_v11 = vld [vmem:[#allocation11 + $0x1e0] sm:$0xff]  ;;  %v7559_v17 = vpack.c.bf16 %v3319_v58, %v3315_v30 }
0x120a   :  { %v7529_v19 = vpack.c.bf16 %v3316_v11, %v3312_v62 }
0x1282   :  { %v3236_v52 = vpop.xlane.xlu0 %3235 }
0x1283   :  { %vm3237_vm8 = vcmp.eq.f32.partialorder %v3214_v45, %v3236_v52  ;;  %v3289_v45 = vld [vmem:[#allocation11 + $0x108] sm:$0xff]  ;;  %v7545_v52 = vpack.c.bf16 %v3286_v39, %v3282_v25  ;;  %v3314_v25 = vld [vmem:[#allocation11 + $0x1d0] sm:$0xff] }
0x1284   :  { %v9221_v38 = vsel %vm3237_vm8, %v8846_v28, 128  ;;  %v3318_v39 = vld [vmem:[#allocation11 + $0x1f0] sm:$0xff] }
0x1285   :  { %v3240_v61 = vshra.s32 %v9221_v38, 16  ;;  %7546 = vmatpush1.bf16.msra.mxu1 %v7545_v52  ;;  %v3239_v7 = vand.u32 65535, %v9221_v38  ;;  %v8481_v38 = vmov 0.0   ;;  %v8482_v52 = vmov 1.0  }
0x1286   :  { %7548 = vmatprep.subr.bf16.mxu1 %v7547_v60  ;;  %3384 = vmatprep.mubr.f32.mxu0 %v8481_v38 }
0x1287   :  { %v9224_v49 = vcvt.s32.f32 %v3240_v61  ;;  %v7515_v61 = vpack.c.bf16 %v3293_v6, %v3289_v45  ;;  %v3241_v36 = vcvt.s32.f32 %v3239_v7  ;;  %v7561_v45 = vpack.c.bf16 %v3318_v39, %v3314_v25  ;;  %3455 = vmatprep.mubr.f32.mxu1 %v8481_v38 }
0x1289   :  { %3243 = vmin.xlane.f32.xlu0 %v9224_v49  ;;  %7516 = vmatprep.subr.bf16.mxu0 %v7515_v61 }
0x128a   :  { %7518 = vmatpush1.bf16.msra.mxu0 %v7517_v15  ;;  %7550 = vmatpush1.bf16.msra.mxu1 %v7549_v21 }
0x128b   :  { %7520 = vmatprep.subr.bf16.mxu0 %v7519_v24  ;;  %7552 = vmatprep.subr.bf16.mxu1 %v7551_v8 }
0x128e   :  { %7522 = vmatpush1.bf16.msra.mxu0 %v7521_v20  ;;  %7554 = vmatpush1.bf16.msra.mxu1 %v7553_v22 }
0x128f   :  { %7524 = vmatprep.subr.bf16.mxu0 %v7523_v23  ;;  %7556 = vmatprep.subr.bf16.mxu1 %v7555_v31 }
0x1292   :  { %7526 = vmatpush1.bf16.msra.mxu0 %v7525_v42  ;;  %7558 = vmatpush1.bf16.msra.mxu1 %v7557_v44 }
0x1293   :  { %7528 = vmatprep.subr.bf16.mxu0 %v7527_v57  ;;  %7560 = vmatprep.subr.bf16.mxu1 %v7559_v17 }
0x1296   :  { %7530 = vmatpush1.bf16.msra.mxu0 %v7529_v19  ;;  %7562 = vmatpush1.bf16.msra.mxu1 %v7561_v45 }
0x1316   :  { %v3244_v32 = vpop.xlane.xlu0 %3243 }
0x1317   :  { %vm3245_vm9 = vcmp.eq.f32.partialorder %v9224_v49, %v3244_v32  ;;  %v3250_v49 = vcvt.f32.s32 %v3244_v32 }
0x1318   :  { %v3246_v53 = vsel %vm3245_vm9, %v3241_v36, inf }
0x1319   :  { %3247 = vmin.xlane.f32.xlu1 %v3246_v53  ;;  %v3251_v26 = vshll.u32 %v3250_v49, 16 }
0x13a6   :  { %v3248_v6 = vpop.xlane.xlu1 %3247 }
0x13a7   :  { %v3249_v35 = vcvt.f32.s32 %v3248_v6 }
0x13a9   :  { %v3252_v48 = vadd.s32 %v3251_v26, %v3249_v35 }
0x13ab   :  { %vm3253_vm10 = vcmp.eq.s32.totalorder %v8846_v28, %v3252_v48 }
0x13ac   :  { %5525 = vmatmul.mubr.msk.f32.vlgmr.msra.gmra.mrb[0].mxu0 %vm3253_vm10, %v8482_v52  ;;  %5526 = vmatmul.mubr.msk.f32.vlgmr.msra.gmra.mrb[0].mxu1 %vm3253_vm10, %v8482_v52 }
0x147f   :  { %v3386_v61 = vpop.f32.mrb[0].mxu0  ;;  %v3457_v50 = vpop.f32.mrb[0].mxu1 }
0x1480   :  { %3462 = vst [vmem:[#allocation3] sm:$0xff] %v3386_v61  ;;  %3464 = vst [vmem:[#allocation3 + $0x10] sm:$0xff] %v3457_v50  ;;  %v3388_v55 = vpop.f32.mrb[1].mxu0  ;;  %v3459_v59 = vpop.f32.mrb[1].mxu1 }
0x1481   :  { %3463 = vst [vmem:[#allocation3 + $0x8] sm:$0xff] %v3388_v55  ;;  %3465 = vst [vmem:[#allocation3 + $0x18] sm:$0xff] %v3459_v59 }
0x1482 PF:  { %v3474_v60 = vld [vmem:[#allocation14 + $0x8] sm:$0xff]  ;;  %v3477_v1 = vld [vmem:[#allocation14 + $0x20] sm:$0xff]  ;;  %7595 = vmatprep.subr.bf16.mxu1 %v8475_v37  ;;  %3585 = vmatprep.mubr.f32.mxu0 %v8474_v3  ;;  %v3476_v46 = vld [vmem:[#allocation14 + $0x18] sm:$0xff]  ;;  %s5529_s1 = sld [smem:[#allocation8 + $0x4]] }
0x1483   :  { %v3473_v9 = vld [vmem:[#allocation14] sm:$0xff]  ;;  %v7563_v5 = vpack.c.bf16 %v3477_v1, %v3474_v60  ;;  %v3480_v10 = vld [vmem:[#allocation14 + $0x38] sm:$0xff]  ;;  %v3483_v15 = vld [vmem:[#allocation14 + $0x50] sm:$0xff]  ;;  %6467 = vmatprep.mubr.msk.f32.mxu1 %vm8476_vm1, %v8474_v3 }
0x1484   :  { %v7565_v21 = vpack.c.bf16 %v3476_v46, %v3473_v9  ;;  %v7567_v24 = vpack.c.bf16 %v3483_v15, %v3480_v10  ;;  %v3479_v41 = vld [vmem:[#allocation14 + $0x30] sm:$0xff]  ;;  %v3482_v16 = vld [vmem:[#allocation14 + $0x48] sm:$0xff]  ;;  %v3489_v8 = vld [vmem:[#allocation14 + $0x80] sm:$0xff] }
0x1485   :  { %v3486_v4 = vld [vmem:[#allocation14 + $0x68] sm:$0xff]  ;;  %7564 = vmatprep.subr.bf16.mxu0 %v7563_v5  ;;  %v7569_v13 = vpack.c.bf16 %v3482_v16, %v3479_v41  ;;  %v3485_v18 = vld [vmem:[#allocation14 + $0x60] sm:$0xff]  ;;  %v3488_v51 = vld [vmem:[#allocation14 + $0x78] sm:$0xff] }
0x1486   :  { %7566 = vmatpush1.bf16.msra.mxu0 %v7565_v21  ;;  %v7571_v14 = vpack.c.bf16 %v3489_v8, %v3486_v4  ;;  %v3492_v34 = vld [vmem:[#allocation14 + $0x98] sm:$0xff]  ;;  %v3495_v20 = vld [vmem:[#allocation14 + $0xb0] sm:$0xff]  ;;  %v7573_v22 = vpack.c.bf16 %v3488_v51, %v3485_v18  ;;  %v3494_v27 = vld [vmem:[#allocation14 + $0xa8] sm:$0xff] }
0x1487   :  { %7568 = vmatprep.subr.bf16.mxu0 %v7567_v24  ;;  %v3491_v23 = vld [vmem:[#allocation14 + $0x90] sm:$0xff]  ;;  %v7575_v63 = vpack.c.bf16 %v3495_v20, %v3492_v34  ;;  %v3478_v56 = vld [vmem:[#allocation14 + $0x28] sm:$0xff]  ;;  %v3501_v42 = vld [vmem:[#allocation14 + $0xe0] sm:$0xff] }
0x1488   :  { %v3475_v31 = vld [vmem:[#allocation14 + $0x10] sm:$0xff]  ;;  %v3498_v40 = vld [vmem:[#allocation14 + $0xc8] sm:$0xff]  ;;  %v3481_v7 = vld [vmem:[#allocation14 + $0x40] sm:$0xff]  ;;  %v7577_v36 = vpack.c.bf16 %v3494_v27, %v3491_v23  ;;  %p5530_p11 = scmp.ne.s32.totalorder %s5529_s1, 1 }
0x1489   :  { %v7596_v44 = vpack.c.bf16 %v3478_v56, %v3475_v31  ;;  %v3484_v32 = vld [vmem:[#allocation14 + $0x58] sm:$0xff]  ;;  %v3497_v53 = vld [vmem:[#allocation14 + $0xc0] sm:$0xff]  ;;  %v7579_v29 = vpack.c.bf16 %v3501_v42, %v3498_v40  ;;  %v3487_v57 = vld [vmem:[#allocation14 + $0x70] sm:$0xff] }
0x148a   :  { %7570 = vmatpush1.bf16.msra.mxu0 %v7569_v13  ;;  %v7599_v54 = vpack.c.bf16 %v3484_v32, %v3481_v7  ;;  %v3500_v30 = vld [vmem:[#allocation14 + $0xd8] sm:$0xff]  ;;  %v3490_v58 = vld [vmem:[#allocation14 + $0x88] sm:$0xff]  ;;  %v3507_v11 = vld [vmem:[#allocation14 + $0x110] sm:$0xff] }
0x148b   :  { %7572 = vmatprep.subr.bf16.mxu0 %v7571_v14  ;;  %7597 = vmatpush3.bf16.msra.mxu1 %v7596_v44  ;;  %v3504_v62 = vld [vmem:[#allocation14 + $0xf8] sm:$0xff]  ;;  %v7581_v17 = vpack.c.bf16 %v3500_v30, %v3497_v53  ;;  %v3503_v19 = vld [vmem:[#allocation14 + $0xf0] sm:$0xff]  ;;  %v7602_v25 = vpack.c.bf16 %v3490_v58, %v3487_v57  ;;  %v3506_v45 = vld [vmem:[#allocation14 + $0x108] sm:$0xff] }
0x148c   :  { %7598 = vmatprep.subr.bf16.mxu1 %v8475_v37  ;;  %v7583_v39 = vpack.c.bf16 %v3507_v11, %v3504_v62  ;;  %v3493_v38 = vld [vmem:[#allocation14 + $0xa0] sm:$0xff]  ;;  %v3496_v49 = vld [vmem:[#allocation14 + $0xb8] sm:$0xff]  ;;  %v3510_v6 = vld [vmem:[#allocation14 + $0x128] sm:$0xff]  ;;  %v7585_v35 = vpack.c.bf16 %v3506_v45, %v3503_v19 }
0x148d   :  { %v3513_v26 = vld [vmem:[#allocation14 + $0x140] sm:$0xff]  ;;  %v7605_v52 = vpack.c.bf16 %v3496_v49, %v3493_v38  ;;  %v3512_v50 = vld [vmem:[#allocation14 + $0x138] sm:$0xff]  ;;  %v3499_v55 = vld [vmem:[#allocation14 + $0xd0] sm:$0xff] }
0x148e   :  { %7574 = vmatpush1.bf16.msra.mxu0 %v7573_v22  ;;  %v3509_v48 = vld [vmem:[#allocation14 + $0x120] sm:$0xff]  ;;  %v7587_v61 = vpack.c.bf16 %v3513_v26, %v3510_v6  ;;  %v3502_v59 = vld [vmem:[#allocation14 + $0xe8] sm:$0xff]  ;;  %v3516_v60 = vld [vmem:[#allocation14 + $0x158] sm:$0xff] }
0x148f   :  { %7576 = vmatprep.subr.bf16.mxu0 %v7575_v63  ;;  %7600 = vmatpush3.bf16.msra.mxu1 %v7599_v54  ;;  %v3519_v1 = vld [vmem:[#allocation14 + $0x170] sm:$0xff]  ;;  %v7589_v9 = vpack.c.bf16 %v3512_v50, %v3509_v48  ;;  %v7608_v46 = vpack.c.bf16 %v3502_v59, %v3499_v55  ;;  %v3518_v15 = vld [vmem:[#allocation14 + $0x168] sm:$0xff]  ;;  %v3505_v21 = vld [vmem:[#allocation14 + $0x100] sm:$0xff] }
0x1490   :  { %7601 = vmatprep.subr.bf16.mxu1 %v8475_v37  ;;  %v3515_v5 = vld [vmem:[#allocation14 + $0x150] sm:$0xff]  ;;  %v7591_v10 = vpack.c.bf16 %v3519_v1, %v3516_v60  ;;  %v3508_v24 = vld [vmem:[#allocation14 + $0x118] sm:$0xff]  ;;  %v3514_v8 = vld [vmem:[#allocation14 + $0x148] sm:$0xff] }
0x1491   :  { %v7593_v41 = vpack.c.bf16 %v3518_v15, %v3515_v5  ;;  %v7611_v16 = vpack.c.bf16 %v3508_v24, %v3505_v21  ;;  %v3511_v4 = vld [vmem:[#allocation14 + $0x130] sm:$0xff]  ;;  %v3517_v14 = vld [vmem:[#allocation14 + $0x160] sm:$0xff]  ;;  %v3520_v18 = vld [vmem:[#allocation14 + $0x178] sm:$0xff] }
0x1492   :  { %7578 = vmatpush1.bf16.msra.mxu0 %v7577_v36  ;;  %v7614_v13 = vpack.c.bf16 %v3514_v8, %v3511_v4  ;;  %v7617_v51 = vpack.c.bf16 %v3520_v18, %v3517_v14  ;;  %v3683_v34 = vld [vmem:[#allocation15] sm:$0xff]  ;;  %v3684_v20 = vld [vmem:[#allocation15 + $0x8] sm:$0xff]  ;;  %v3685_v23 = vld [vmem:[#allocation15 + $0x10] sm:$0xff] }
0x1493   :  { %7580 = vmatprep.subr.bf16.mxu0 %v7579_v29  ;;  %7603 = vmatpush3.bf16.msra.mxu1 %v7602_v25  ;;  %v7620_v22 = vpack.c.bf16 %v3684_v20, %v3683_v34  ;;  %v3686_v63 = vld [vmem:[#allocation15 + $0x18] sm:$0xff]  ;;  %v3687_v31 = vld [vmem:[#allocation15 + $0x20] sm:$0xff]  ;;  %v3688_v56 = vld [vmem:[#allocation15 + $0x28] sm:$0xff] }
0x1494   :  { %7604 = vmatprep.subr.bf16.mxu1 %v8475_v37  ;;  %v7623_v27 = vpack.c.bf16 %v3686_v63, %v3685_v23  ;;  %v7626_v40 = vpack.c.bf16 %v3688_v56, %v3687_v31  ;;  %v3689_v42 = vld [vmem:[#allocation15 + $0x30] sm:$0xff]  ;;  %v3690_v44 = vld [vmem:[#allocation15 + $0x38] sm:$0xff]  ;;  %v3691_v32 = vld [vmem:[#allocation15 + $0x40] sm:$0xff] }
0x1495   :  { %v7629_v7 = vpack.c.bf16 %v3690_v44, %v3689_v42  ;;  %v3692_v36 = vld [vmem:[#allocation15 + $0x48] sm:$0xff]  ;;  %v3693_v54 = vld [vmem:[#allocation15 + $0x50] sm:$0xff]  ;;  %v3694_v29 = vld [vmem:[#allocation15 + $0x58] sm:$0xff] }
0x1496   :  { %7582 = vmatpush1.bf16.msra.mxu0 %v7581_v17  ;;  %v7632_v53 = vpack.c.bf16 %v3692_v36, %v3691_v32  ;;  %v7635_v30 = vpack.c.bf16 %v3694_v29, %v3693_v54  ;;  %v3695_v57 = vld [vmem:[#allocation15 + $0x60] sm:$0xff]  ;;  %v3696_v58 = vld [vmem:[#allocation15 + $0x68] sm:$0xff]  ;;  %v3697_v11 = vld [vmem:[#allocation15 + $0x70] sm:$0xff] }
0x1497   :  { %7584 = vmatprep.subr.bf16.mxu0 %v7583_v39  ;;  %7606 = vmatpush3.bf16.msra.mxu1 %v7605_v52  ;;  %v7638_v62 = vpack.c.bf16 %v3696_v58, %v3695_v57  ;;  %v3698_v17 = vld [vmem:[#allocation15 + $0x78] sm:$0xff]  ;;  %v3466_v25 = vld [vmem:[#allocation3] sm:$0xff]  ;;  %v3467_v6 = vld [vmem:[#allocation3 + $0x8] sm:$0xff] }
0x1498   :  { %7607 = vmatprep.subr.bf16.mxu1 %v8475_v37  ;;  %v7641_v19 = vpack.c.bf16 %v3698_v17, %v3697_v11  ;;  %v3470_v39 = vadd.f32 %v3466_v25, %v9108_v0  ;;  %v3468_v60 = vld [vmem:[#allocation3 + $0x10] sm:$0xff]  ;;  %v3779_v20 = vld [vmem:[#allocation4 + $0x80] sm:$0xff] (!%p5530_p11) }
0x1499   :  { %v3472_v5 = vadd.f32 %v3468_v60, %v9121_v43  ;;  %v3781_v23 = vld [vmem:[#allocation4 + $0x90] sm:$0xff] (!%p5530_p11)  ;;  %3783 = vst [vmem:[#allocation3] sm:$0xff] (!%p5530_p11), %v3779_v20 }
0x149a   :  { %7586 = vmatpush1.bf16.msra.mxu0 %v7585_v35  ;;  %v3471_v35 = vadd.f32 %v3467_v6, %v9110_v2  ;;  %3785 = vst [vmem:[#allocation3 + $0x10] sm:$0xff] (!%p5530_p11), %v3781_v23 }
0x149b   :  { %7588 = vmatprep.subr.bf16.mxu0 %v7587_v61  ;;  %7609 = vmatpush3.bf16.msra.mxu1 %v7608_v46 }
0x149c   :  { %7610 = vmatprep.subr.bf16.mxu1 %v8475_v37 }
0x149e   :  { %7590 = vmatpush1.bf16.msra.mxu0 %v7589_v9 }
0x149f   :  { %7592 = vmatprep.subr.bf16.mxu0 %v7591_v10  ;;  %7612 = vmatpush3.bf16.msra.mxu1 %v7611_v16 }
0x14a0   :  { %7613 = vmatprep.subr.bf16.mxu1 %v8475_v37 }
0x14a2   :  { %7594 = vmatpush1.bf16.msra.mxu0 %v7593_v41 }
0x14a3   :  { %7619 = vmatprep.subr.bf16.mxu0 %v8475_v37  ;;  %7615 = vmatpush3.bf16.msra.mxu1 %v7614_v13  ;;  %v3469_v13 = vld [vmem:[#allocation3 + $0x18] sm:$0xff] }
0x14a4   :  { %7616 = vmatprep.subr.bf16.mxu1 %v8475_v37 }
0x14a5   :  { %3586 = vmatmul.mubr.f32.vlgmr.msra.gmra.mrb[0].mxu0 %v9216_v47 }
0x14a6   :  { %6502 = vmatprep.mubr.msk.f32.mxu0 %vm8476_vm1, %v8474_v3  ;;  %7621 = vmatpush3.bf16.msra.mxu0 %v7620_v22  ;;  %v3780_v22 = vld [vmem:[#allocation4 + $0x88] sm:$0xff] (!%p5530_p11) }
0x14a7   :  { %7618 = vmatpush3.bf16.msra.mxu1 %v7617_v51  ;;  %7622 = vmatprep.subr.bf16.mxu0 %v8475_v37  ;;  %3784 = vst [vmem:[#allocation3 + $0x8] sm:$0xff] (!%p5530_p11), %v3780_v22 }
0x14aa   :  { %6468 = vmatmul.mubr.f32.vlgmr.msra.gmra.mrb[0].mxu1 %v9216_v47  ;;  %7624 = vmatpush3.bf16.msra.mxu0 %v7623_v27 }
0x14ab   :  { %7625 = vmatprep.subr.bf16.mxu0 %v8475_v37 }
0x14ae   :  { %7627 = vmatpush3.bf16.msra.mxu0 %v7626_v40 }
0x14af   :  { %7628 = vmatprep.subr.bf16.mxu0 %v8475_v37 }
0x14b2   :  { %7630 = vmatpush3.bf16.msra.mxu0 %v7629_v7 }
0x14b3   :  { %7631 = vmatprep.subr.bf16.mxu0 %v8475_v37 }
0x14b6   :  { %7633 = vmatpush3.bf16.msra.mxu0 %v7632_v53 }
0x14b7   :  { %7634 = vmatprep.subr.bf16.mxu0 %v8475_v37 }
0x14ba   :  { %7636 = vmatpush3.bf16.msra.mxu0 %v7635_v30 }
0x14bb   :  { %7637 = vmatprep.subr.bf16.mxu0 %v8475_v37 }
0x14be   :  { %7639 = vmatpush3.bf16.msra.mxu0 %v7638_v62 }
0x14bf   :  { %7640 = vmatprep.subr.bf16.mxu0 %v8475_v37 }
0x14c2   :  { %7642 = vmatpush3.bf16.msra.mxu0 %v7641_v19 }
0x1578   :  { %v3587_v45 = vpop.f32.mrb[0].mxu0 }
0x1579   :  { %v3662_v38 = vadd.f32 %v3587_v45, %v3470_v39  ;;  %v3589_v49 = vpop.f32.mrb[1].mxu0 }
0x157a   :  { %v3669_v52 = vadd.f32 %v3589_v49, %v3471_v35 }
0x157b   :  { %v5527_v26 = vmul.f32 -1.442695, %v3662_v38 }
0x157c   :  { %v5528_v50 = vmul.f32 -1.442695, %v3669_v52 }
0x157d   :  { %8220 = vpow2.f32 %v5527_v26  ;;  %v3658_v48 = vpop.f32.mrb[0].mxu1 }
0x157e   :  { %v6469_v61 = vpop.f32.mrb[1].mxu1  ;;  %8222 = vpow2.f32 %v5528_v50  ;;  %v3676_v1 = vadd.f32 %v9119_v33, %v3658_v48 }
0x1587   :  { %v8221_v55 = vpop.eup %8220 }
0x1588   :  { %v3666_v59 = vadd.f32 1.0, %v8221_v55  ;;  %v8223_v9 = vpop.eup %8222 }
0x1589   :  { %v3673_v15 = vadd.f32 1.0, %v8223_v9 }
0x158a   :  { %8224 = vrcp.f32 %v3666_v59 }
0x1594   :  { %v8225_v46 = vpop.eup %8224 }
0x1595   :  { %v3677_v10 = vmul.f32 %v8225_v46, %v3676_v1 }
0x1597   :  { %v3678_v21 = vadd.f32 %v3677_v10, %v3472_v5 }
0x1599   :  { %8226 = vtanh.f32 %v3678_v21 }
0x159a   :  { %8228 = vrcp.f32 %v3673_v15 }
0x15a3   :  { %v8227_v24 = vpop.eup %8226 }
0x15a4   :  { %v3680_v41 = vsub.f32 %v9216_v47, %v8227_v24  ;;  %v8229_v16 = vpop.eup %8228  ;;  %v3782_v47 = vld [vmem:[#allocation4 + $0x98] sm:$0xff] (!%p5530_p11) }
0x15a5   :  { %3786 = vst [vmem:[#allocation3 + $0x18] sm:$0xff] (!%p5530_p11), %v3782_v47 }
0x15a6   :  { %v3681_v4 = vmul.f32 %v8229_v16, %v3680_v41 }
0x15a8   :  { %v9258_v8 = vadd.f32 %v8227_v24, %v3681_v4 }
0x15aa   :  { %6503 = vmatmul.mubr.f32.vlgmr.msra.gmra.mrb[2].mxu0 %v9258_v8 }
0x167c   :  { %3777 = sbr.rel (%p5530_p11) target bundleno = 5763 (0x1683), region = 121 }
0x167d   :  { %v3765_v14 = vpop.f32.mrb[2].mxu0 }
0x167e   :  { %v3769_v18 = vadd.f32 %v3765_v14, %v3469_v13  ;;  %v6504_v51 = vpop.f32.mrb[3].mxu0 }
0x1680   :  { %v3770_v34 = vadd.f32 %v3769_v18, %v9133_v12 }
0x1682   :  { %3772 = vst [vmem:[#allocation18 + $0x20] sm:$0xff] %v3770_v34 }
0x1683 PF:  { %p5531_p12 = scmp.eq.s32.totalorder %s5529_s1, 1 }
0x1684   :  { %3791 = vmax.xlane.f32.xlu0 (!%p5531_p12), %v3770_v34  ;;  %v3813_v40 = vld [vmem:[#allocation11 + $0x8] sm:$0xff] (!%p5531_p12)  ;;  %v3815_v44 = vld [vmem:[#allocation11 + $0x18] sm:$0xff] (!%p5531_p12)  ;;  %v3812_v36 = vld [vmem:[#allocation11] sm:$0xff] (!%p5531_p12) }
0x1685   :  { %3790 = sbr.rel (%p5531_p12) target bundleno = 6417 (0x1911), region = 125  ;;  %v3817_v42 = vld [vmem:[#allocation11 + $0x28] sm:$0xff] (!%p5531_p12)  ;;  %v3819_v32 = vld [vmem:[#allocation11 + $0x38] sm:$0xff] (!%p5531_p12)  ;;  %v3816_v53 = vld [vmem:[#allocation11 + $0x20] sm:$0xff] (!%p5531_p12) }
0x1686   :  { %v7643_v7 = vpack.c.bf16 (!%p5531_p12), %v3817_v42, %v3813_v40  ;;  %v7675_v54 = vpack.c.bf16 (!%p5531_p12), %v3819_v32, %v3815_v44  ;;  %v7645_v29 = vpack.c.bf16 (!%p5531_p12), %v3816_v53, %v3812_v36  ;;  %v3814_v30 = vld [vmem:[#allocation11 + $0x10] sm:$0xff] (!%p5531_p12)  ;;  %v3821_v58 = vld [vmem:[#allocation11 + $0x48] sm:$0xff] (!%p5531_p12)  ;;  %v3823_v17 = vld [vmem:[#allocation11 + $0x58] sm:$0xff] (!%p5531_p12) }
0x1687   :  { %v3818_v57 = vld [vmem:[#allocation11 + $0x30] sm:$0xff] (!%p5531_p12)  ;;  %v3825_v11 = vld [vmem:[#allocation11 + $0x68] sm:$0xff] (!%p5531_p12)  ;;  %v3827_v19 = vld [vmem:[#allocation11 + $0x78] sm:$0xff] (!%p5531_p12) }
0x1688   :  { %7644 = vmatprep.subr.bf16.mxu0 (!%p5531_p12), %v7643_v7  ;;  %v7677_v62 = vpack.c.bf16 (!%p5531_p12), %v3818_v57, %v3814_v30  ;;  %7676 = vmatprep.subr.bf16.mxu1 (!%p5531_p12), %v7675_v54  ;;  %v7647_v25 = vpack.c.bf16 (!%p5531_p12), %v3825_v11, %v3821_v58  ;;  %v7679_v39 = vpack.c.bf16 (!%p5531_p12), %v3827_v19, %v3823_v17  ;;  %v3820_v45 = vld [vmem:[#allocation11 + $0x40] sm:$0xff] (!%p5531_p12)  ;;  %v3822_v49 = vld [vmem:[#allocation11 + $0x50] sm:$0xff] (!%p5531_p12)  ;;  %v3829_v35 = vld [vmem:[#allocation11 + $0x88] sm:$0xff] (!%p5531_p12) }
0x1689   :  { %7646 = vmatpush1.bf16.msra.mxu0 (!%p5531_p12), %v7645_v29  ;;  %v3824_v38 = vld [vmem:[#allocation11 + $0x60] sm:$0xff] (!%p5531_p12)  ;;  %v3826_v26 = vld [vmem:[#allocation11 + $0x70] sm:$0xff] (!%p5531_p12)  ;;  %v3833_v48 = vld [vmem:[#allocation11 + $0xa8] sm:$0xff] (!%p5531_p12) }
0x168a   :  { %7678 = vmatpush1.bf16.msra.mxu1 (!%p5531_p12), %v7677_v62  ;;  %v7649_v6 = vpack.c.bf16 (!%p5531_p12), %v3824_v38, %v3820_v45  ;;  %7648 = vmatprep.subr.bf16.mxu0 (!%p5531_p12), %v7647_v25  ;;  %v7681_v52 = vpack.c.bf16 (!%p5531_p12), %v3826_v26, %v3822_v49  ;;  %v7651_v61 = vpack.c.bf16 (!%p5531_p12), %v3833_v48, %v3829_v35  ;;  %v3831_v50 = vld [vmem:[#allocation11 + $0x98] sm:$0xff] (!%p5531_p12)  ;;  %v3828_v59 = vld [vmem:[#allocation11 + $0x80] sm:$0xff] (!%p5531_p12)  ;;  %v3830_v9 = vld [vmem:[#allocation11 + $0x90] sm:$0xff] (!%p5531_p12) }
0x168b   :  { %7680 = vmatprep.subr.bf16.mxu1 (!%p5531_p12), %v7679_v39  ;;  %v3835_v55 = vld [vmem:[#allocation11 + $0xb8] sm:$0xff] (!%p5531_p12)  ;;  %v3832_v1 = vld [vmem:[#allocation11 + $0xa0] sm:$0xff] (!%p5531_p12)  ;;  %v3834_v5 = vld [vmem:[#allocation11 + $0xb0] sm:$0xff] (!%p5531_p12) }
0x168c   :  { %v7683_v60 = vpack.c.bf16 %v3835_v55, %v3831_v50  ;;  %v7653_v46 = vpack.c.bf16 %v3832_v1, %v3828_v59  ;;  %v3837_v10 = vld [vmem:[#allocation11 + $0xc8] sm:$0xff]  ;;  %v3839_v21 = vld [vmem:[#allocation11 + $0xd8] sm:$0xff]  ;;  %v7685_v24 = vpack.c.bf16 %v3834_v5, %v3830_v9  ;;  %v3836_v4 = vld [vmem:[#allocation11 + $0xc0] sm:$0xff] }
0x168d   :  { %7650 = vmatpush1.bf16.msra.mxu0 %v7649_v6  ;;  %v3841_v15 = vld [vmem:[#allocation11 + $0xe8] sm:$0xff]  ;;  %v3843_v16 = vld [vmem:[#allocation11 + $0xf8] sm:$0xff]  ;;  %v3840_v13 = vld [vmem:[#allocation11 + $0xe0] sm:$0xff] }
0x168e   :  { %7682 = vmatpush1.bf16.msra.mxu1 %v7681_v52  ;;  %7652 = vmatprep.subr.bf16.mxu0 %v7651_v61  ;;  %v7655_v41 = vpack.c.bf16 %v3841_v15, %v3837_v10  ;;  %v7687_v14 = vpack.c.bf16 %v3843_v16, %v3839_v21  ;;  %v3838_v18 = vld [vmem:[#allocation11 + $0xd0] sm:$0xff]  ;;  %v3849_v20 = vld [vmem:[#allocation11 + $0x128] sm:$0xff]  ;;  %v3847_v22 = vld [vmem:[#allocation11 + $0x118] sm:$0xff]  ;;  %v7657_v47 = vpack.c.bf16 %v3840_v13, %v3836_v4 }
0x168f   :  { %7684 = vmatprep.subr.bf16.mxu1 %v7683_v60  ;;  %v3842_v51 = vld [vmem:[#allocation11 + $0xf0] sm:$0xff]  ;;  %v3851_v23 = vld [vmem:[#allocation11 + $0x138] sm:$0xff]  ;;  %v3844_v40 = vld [vmem:[#allocation11 + $0x100] sm:$0xff] }
0x1690   :  { %v3848_v42 = vld [vmem:[#allocation11 + $0x120] sm:$0xff]  ;;  %v3846_v44 = vld [vmem:[#allocation11 + $0x110] sm:$0xff]  ;;  %v7691_v7 = vpack.c.bf16 %v3851_v23, %v3847_v22  ;;  %v3853_v36 = vld [vmem:[#allocation11 + $0x148] sm:$0xff] }
0x1691   :  { %7654 = vmatpush1.bf16.msra.mxu0 %v7653_v46  ;;  %v3850_v32 = vld [vmem:[#allocation11 + $0x130] sm:$0xff]  ;;  %v3857_v53 = vld [vmem:[#allocation11 + $0x168] sm:$0xff]  ;;  %v3855_v54 = vld [vmem:[#allocation11 + $0x158] sm:$0xff]  ;;  %v7661_v30 = vpack.c.bf16 %v3848_v42, %v3844_v40 }
0x1692   :  { %7686 = vmatpush1.bf16.msra.mxu1 %v7685_v24  ;;  %7656 = vmatprep.subr.bf16.mxu0 %v7655_v41  ;;  %v3859_v29 = vld [vmem:[#allocation11 + $0x178] sm:$0xff]  ;;  %v7693_v57 = vpack.c.bf16 %v3850_v32, %v3846_v44  ;;  %v7663_v58 = vpack.c.bf16 %v3857_v53, %v3853_v36  ;;  %v3852_v62 = vld [vmem:[#allocation11 + $0x140] sm:$0xff]  ;;  %v3854_v17 = vld [vmem:[#allocation11 + $0x150] sm:$0xff] }
0x1693   :  { %7688 = vmatprep.subr.bf16.mxu1 %v7687_v14  ;;  %v3856_v11 = vld [vmem:[#allocation11 + $0x160] sm:$0xff]  ;;  %v7695_v19 = vpack.c.bf16 %v3859_v29, %v3855_v54  ;;  %v3858_v25 = vld [vmem:[#allocation11 + $0x170] sm:$0xff]  ;;  %v3861_v39 = vld [vmem:[#allocation11 + $0x188] sm:$0xff] }
0x1694   :  { %v3865_v45 = vld [vmem:[#allocation11 + $0x1a8] sm:$0xff]  ;;  %v3863_v38 = vld [vmem:[#allocation11 + $0x198] sm:$0xff]  ;;  %v7665_v6 = vpack.c.bf16 %v3856_v11, %v3852_v62  ;;  %v7697_v26 = vpack.c.bf16 %v3858_v25, %v3854_v17  ;;  %v3860_v48 = vld [vmem:[#allocation11 + $0x180] sm:$0xff] }
0x1695   :  { %7658 = vmatpush1.bf16.msra.mxu0 %v7657_v47  ;;  %v3867_v49 = vld [vmem:[#allocation11 + $0x1b8] sm:$0xff]  ;;  %v7667_v35 = vpack.c.bf16 %v3865_v45, %v3861_v39  ;;  %v3864_v52 = vld [vmem:[#allocation11 + $0x1a0] sm:$0xff]  ;;  %v3862_v50 = vld [vmem:[#allocation11 + $0x190] sm:$0xff] }
0x1696   :  { %v7699_v61 = vpack.c.bf16 %v3867_v49, %v3863_v38  ;;  %v3866_v55 = vld [vmem:[#allocation11 + $0x1b0] sm:$0xff]  ;;  %v7669_v59 = vpack.c.bf16 %v3864_v52, %v3860_v48  ;;  %v3869_v10 = vld [vmem:[#allocation11 + $0x1c8] sm:$0xff]  ;;  %v3871_v21 = vld [vmem:[#allocation11 + $0x1d8] sm:$0xff] }
0x1697   :  { %v7701_v60 = vpack.c.bf16 %v3866_v55, %v3862_v50  ;;  %v3873_v15 = vld [vmem:[#allocation11 + $0x1e8] sm:$0xff]  ;;  %v3875_v41 = vld [vmem:[#allocation11 + $0x1f8] sm:$0xff]  ;;  %v3868_v16 = vld [vmem:[#allocation11 + $0x1c0] sm:$0xff] }
0x1698   :  { %v7671_v24 = vpack.c.bf16 %v3873_v15, %v3869_v10  ;;  %v3872_v4 = vld [vmem:[#allocation11 + $0x1e0] sm:$0xff]  ;;  %v7703_v13 = vpack.c.bf16 %v3875_v41, %v3871_v21 }
0x1699   :  { %v7673_v14 = vpack.c.bf16 %v3872_v4, %v3868_v16 }
0x1711   :  { %v3792_v63 = vpop.xlane.xlu0 %3791 }
0x1712   :  { %vm3793_vm11 = vcmp.eq.f32.partialorder %v3770_v34, %v3792_v63  ;;  %v3845_v34 = vld [vmem:[#allocation11 + $0x108] sm:$0xff]  ;;  %v7689_v63 = vpack.c.bf16 %v3842_v51, %v3838_v18  ;;  %v3870_v18 = vld [vmem:[#allocation11 + $0x1d0] sm:$0xff] }
0x1713   :  { %v9263_v27 = vsel %vm3793_vm11, %v8846_v28, 128  ;;  %v3874_v51 = vld [vmem:[#allocation11 + $0x1f0] sm:$0xff] }
0x1714   :  { %v3796_v31 = vshra.s32 %v9263_v27, 16  ;;  %7690 = vmatpush1.bf16.msra.mxu1 %v7689_v63  ;;  %v3795_v1 = vand.u32 65535, %v9263_v27  ;;  %v8483_v27 = vmov 0.0   ;;  %v8484_v63 = vmov 1.0  }
0x1715   :  { %7692 = vmatprep.subr.bf16.mxu1 %v7691_v7  ;;  %3940 = vmatprep.mubr.f32.mxu0 %v8483_v27 }
0x1716   :  { %v9266_v56 = vcvt.s32.f32 %v3796_v31  ;;  %v7659_v31 = vpack.c.bf16 %v3849_v20, %v3845_v34  ;;  %v3797_v5 = vcvt.s32.f32 %v3795_v1  ;;  %v7705_v34 = vpack.c.bf16 %v3874_v51, %v3870_v18  ;;  %4011 = vmatprep.mubr.f32.mxu1 %v8483_v27 }
0x1718   :  { %3799 = vmin.xlane.f32.xlu0 %v9266_v56  ;;  %7660 = vmatprep.subr.bf16.mxu0 %v7659_v31 }
0x1719   :  { %7662 = vmatpush1.bf16.msra.mxu0 %v7661_v30  ;;  %7694 = vmatpush1.bf16.msra.mxu1 %v7693_v57 }
0x171a   :  { %7664 = vmatprep.subr.bf16.mxu0 %v7663_v58  ;;  %7696 = vmatprep.subr.bf16.mxu1 %v7695_v19 }
0x171d   :  { %7666 = vmatpush1.bf16.msra.mxu0 %v7665_v6  ;;  %7698 = vmatpush1.bf16.msra.mxu1 %v7697_v26 }
0x171e   :  { %7668 = vmatprep.subr.bf16.mxu0 %v7667_v35  ;;  %7700 = vmatprep.subr.bf16.mxu1 %v7699_v61 }
0x1721   :  { %7670 = vmatpush1.bf16.msra.mxu0 %v7669_v59  ;;  %7702 = vmatpush1.bf16.msra.mxu1 %v7701_v60 }
0x1722   :  { %7672 = vmatprep.subr.bf16.mxu0 %v7671_v24  ;;  %7704 = vmatprep.subr.bf16.mxu1 %v7703_v13 }
0x1725   :  { %7674 = vmatpush1.bf16.msra.mxu0 %v7673_v14  ;;  %7706 = vmatpush1.bf16.msra.mxu1 %v7705_v34 }
0x17a5   :  { %v3800_v9 = vpop.xlane.xlu0 %3799 }
0x17a6   :  { %vm3801_vm12 = vcmp.eq.f32.partialorder %v9266_v56, %v3800_v9  ;;  %v3806_v56 = vcvt.f32.s32 %v3800_v9 }
0x17a7   :  { %v3802_v46 = vsel %vm3801_vm12, %v3797_v5, inf }
0x17a8   :  { %3803 = vmin.xlane.f32.xlu1 %v3802_v46  ;;  %v3807_v22 = vshll.u32 %v3806_v56, 16 }
0x1835   :  { %v3804_v20 = vpop.xlane.xlu1 %3803 }
0x1836   :  { %v3805_v23 = vcvt.f32.s32 %v3804_v20 }
0x1838   :  { %v3808_v47 = vadd.s32 %v3807_v22, %v3805_v23 }
0x183a   :  { %vm3809_vm13 = vcmp.eq.s32.totalorder %v8846_v28, %v3808_v47 }
0x183b   :  { %5533 = vmatmul.mubr.msk.f32.vlgmr.msra.gmra.mrb[0].mxu0 %vm3809_vm13, %v8484_v63  ;;  %5534 = vmatmul.mubr.msk.f32.vlgmr.msra.gmra.mrb[0].mxu1 %vm3809_vm13, %v8484_v63 }
0x190e   :  { %v3942_v31 = vpop.f32.mrb[0].mxu0  ;;  %v4013_v40 = vpop.f32.mrb[0].mxu1 }
0x190f   :  { %4018 = vst [vmem:[#allocation3] sm:$0xff] %v3942_v31  ;;  %4020 = vst [vmem:[#allocation3 + $0x10] sm:$0xff] %v4013_v40  ;;  %v3944_v42 = vpop.f32.mrb[1].mxu0  ;;  %v4015_v44 = vpop.f32.mrb[1].mxu1 }
0x1910   :  { %4019 = vst [vmem:[#allocation3 + $0x8] sm:$0xff] %v3944_v42  ;;  %4021 = vst [vmem:[#allocation3 + $0x18] sm:$0xff] %v4015_v44 }
0x1911 PF:  { %v4030_v7 = vld [vmem:[#allocation14 + $0x8] sm:$0xff]  ;;  %v4033_v32 = vld [vmem:[#allocation14 + $0x20] sm:$0xff]  ;;  %7739 = vmatprep.subr.bf16.mxu1 %v8475_v37  ;;  %4141 = vmatprep.mubr.f32.mxu0 %v8474_v3  ;;  %v4032_v54 = vld [vmem:[#allocation14 + $0x18] sm:$0xff]  ;;  %s5537_s19 = sld [smem:[#allocation8 + $0x5]] }
0x1912   :  { %v4029_v36 = vld [vmem:[#allocation14] sm:$0xff]  ;;  %v7707_v53 = vpack.c.bf16 %v4033_v32, %v4030_v7  ;;  %v4036_v29 = vld [vmem:[#allocation14 + $0x38] sm:$0xff]  ;;  %v4039_v30 = vld [vmem:[#allocation14 + $0x50] sm:$0xff]  ;;  %6537 = vmatprep.mubr.msk.f32.mxu1 %vm8476_vm1, %v8474_v3 }
0x1913   :  { %v7709_v57 = vpack.c.bf16 %v4032_v54, %v4029_v36  ;;  %v7711_v58 = vpack.c.bf16 %v4039_v30, %v4036_v29  ;;  %v4035_v62 = vld [vmem:[#allocation14 + $0x30] sm:$0xff]  ;;  %v4038_v11 = vld [vmem:[#allocation14 + $0x48] sm:$0xff]  ;;  %v4045_v19 = vld [vmem:[#allocation14 + $0x80] sm:$0xff] }
0x1914   :  { %v4042_v17 = vld [vmem:[#allocation14 + $0x68] sm:$0xff]  ;;  %7708 = vmatprep.subr.bf16.mxu0 %v7707_v53  ;;  %v7713_v25 = vpack.c.bf16 %v4038_v11, %v4035_v62  ;;  %v4041_v45 = vld [vmem:[#allocation14 + $0x60] sm:$0xff]  ;;  %v4044_v38 = vld [vmem:[#allocation14 + $0x78] sm:$0xff] }
0x1915   :  { %7710 = vmatpush1.bf16.msra.mxu0 %v7709_v57  ;;  %v7715_v39 = vpack.c.bf16 %v4045_v19, %v4042_v17  ;;  %v4048_v49 = vld [vmem:[#allocation14 + $0x98] sm:$0xff]  ;;  %v4051_v6 = vld [vmem:[#allocation14 + $0xb0] sm:$0xff]  ;;  %v7717_v26 = vpack.c.bf16 %v4044_v38, %v4041_v45  ;;  %v4050_v52 = vld [vmem:[#allocation14 + $0xa8] sm:$0xff] }
0x1916   :  { %7712 = vmatprep.subr.bf16.mxu0 %v7711_v58  ;;  %v4047_v35 = vld [vmem:[#allocation14 + $0x90] sm:$0xff]  ;;  %v7719_v48 = vpack.c.bf16 %v4051_v6, %v4048_v49  ;;  %v4034_v50 = vld [vmem:[#allocation14 + $0x28] sm:$0xff]  ;;  %v4057_v59 = vld [vmem:[#allocation14 + $0xe0] sm:$0xff] }
0x1917   :  { %v4031_v61 = vld [vmem:[#allocation14 + $0x10] sm:$0xff]  ;;  %v4054_v55 = vld [vmem:[#allocation14 + $0xc8] sm:$0xff]  ;;  %v4037_v1 = vld [vmem:[#allocation14 + $0x40] sm:$0xff]  ;;  %v7721_v5 = vpack.c.bf16 %v4050_v52, %v4047_v35  ;;  %p5538_p13 = scmp.ne.s32.totalorder %s5537_s19, 1 }
0x1918   :  { %v7740_v60 = vpack.c.bf16 %v4034_v50, %v4031_v61  ;;  %v4040_v9 = vld [vmem:[#allocation14 + $0x58] sm:$0xff]  ;;  %v4053_v46 = vld [vmem:[#allocation14 + $0xc0] sm:$0xff]  ;;  %v7723_v15 = vpack.c.bf16 %v4057_v59, %v4054_v55  ;;  %v4043_v24 = vld [vmem:[#allocation14 + $0x70] sm:$0xff] }
0x1919   :  { %7714 = vmatpush1.bf16.msra.mxu0 %v7713_v25  ;;  %v7743_v10 = vpack.c.bf16 %v4040_v9, %v4037_v1  ;;  %v4056_v21 = vld [vmem:[#allocation14 + $0xd8] sm:$0xff]  ;;  %v4046_v41 = vld [vmem:[#allocation14 + $0x88] sm:$0xff]  ;;  %v4063_v4 = vld [vmem:[#allocation14 + $0x110] sm:$0xff] }
0x191a   :  { %7716 = vmatprep.subr.bf16.mxu0 %v7715_v39  ;;  %7741 = vmatpush3.bf16.msra.mxu1 %v7740_v60  ;;  %v4060_v16 = vld [vmem:[#allocation14 + $0xf8] sm:$0xff]  ;;  %v7725_v13 = vpack.c.bf16 %v4056_v21, %v4053_v46  ;;  %v4059_v14 = vld [vmem:[#allocation14 + $0xf0] sm:$0xff]  ;;  %v7746_v18 = vpack.c.bf16 %v4046_v41, %v4043_v24  ;;  %v4062_v34 = vld [vmem:[#allocation14 + $0x108] sm:$0xff] }
0x191b   :  { %7742 = vmatprep.subr.bf16.mxu1 %v8475_v37  ;;  %v7727_v51 = vpack.c.bf16 %v4063_v4, %v4060_v16  ;;  %v4049_v27 = vld [vmem:[#allocation14 + $0xa0] sm:$0xff]  ;;  %v4052_v56 = vld [vmem:[#allocation14 + $0xb8] sm:$0xff]  ;;  %v4066_v20 = vld [vmem:[#allocation14 + $0x128] sm:$0xff]  ;;  %v7729_v23 = vpack.c.bf16 %v4062_v34, %v4059_v14 }
0x191c   :  { %v4069_v22 = vld [vmem:[#allocation14 + $0x140] sm:$0xff]  ;;  %v7749_v63 = vpack.c.bf16 %v4052_v56, %v4049_v27  ;;  %v4068_v40 = vld [vmem:[#allocation14 + $0x138] sm:$0xff]  ;;  %v4055_v42 = vld [vmem:[#allocation14 + $0xd0] sm:$0xff] }
0x191d   :  { %7718 = vmatpush1.bf16.msra.mxu0 %v7717_v26  ;;  %v4065_v47 = vld [vmem:[#allocation14 + $0x120] sm:$0xff]  ;;  %v7731_v31 = vpack.c.bf16 %v4069_v22, %v4066_v20  ;;  %v4058_v44 = vld [vmem:[#allocation14 + $0xe8] sm:$0xff]  ;;  %v4072_v7 = vld [vmem:[#allocation14 + $0x158] sm:$0xff] }
0x191e   :  { %7720 = vmatprep.subr.bf16.mxu0 %v7719_v48  ;;  %7744 = vmatpush3.bf16.msra.mxu1 %v7743_v10  ;;  %v4075_v32 = vld [vmem:[#allocation14 + $0x170] sm:$0xff]  ;;  %v7733_v36 = vpack.c.bf16 %v4068_v40, %v4065_v47  ;;  %v7752_v54 = vpack.c.bf16 %v4058_v44, %v4055_v42  ;;  %v4074_v30 = vld [vmem:[#allocation14 + $0x168] sm:$0xff]  ;;  %v4061_v57 = vld [vmem:[#allocation14 + $0x100] sm:$0xff] }
0x191f   :  { %7745 = vmatprep.subr.bf16.mxu1 %v8475_v37  ;;  %v4071_v53 = vld [vmem:[#allocation14 + $0x150] sm:$0xff]  ;;  %v7735_v29 = vpack.c.bf16 %v4075_v32, %v4072_v7  ;;  %v4064_v58 = vld [vmem:[#allocation14 + $0x118] sm:$0xff]  ;;  %v4070_v19 = vld [vmem:[#allocation14 + $0x148] sm:$0xff] }
0x1920   :  { %v7737_v62 = vpack.c.bf16 %v4074_v30, %v4071_v53  ;;  %v7755_v11 = vpack.c.bf16 %v4064_v58, %v4061_v57  ;;  %v4067_v17 = vld [vmem:[#allocation14 + $0x130] sm:$0xff]  ;;  %v4073_v39 = vld [vmem:[#allocation14 + $0x160] sm:$0xff]  ;;  %v4076_v45 = vld [vmem:[#allocation14 + $0x178] sm:$0xff] }
0x1921   :  { %7722 = vmatpush1.bf16.msra.mxu0 %v7721_v5  ;;  %v7758_v25 = vpack.c.bf16 %v4070_v19, %v4067_v17  ;;  %v7761_v38 = vpack.c.bf16 %v4076_v45, %v4073_v39  ;;  %v4239_v49 = vld [vmem:[#allocation15] sm:$0xff]  ;;  %v4240_v6 = vld [vmem:[#allocation15 + $0x8] sm:$0xff]  ;;  %v4241_v35 = vld [vmem:[#allocation15 + $0x10] sm:$0xff] }
0x1922   :  { %7724 = vmatprep.subr.bf16.mxu0 %v7723_v15  ;;  %7747 = vmatpush3.bf16.msra.mxu1 %v7746_v18  ;;  %v7764_v26 = vpack.c.bf16 %v4240_v6, %v4239_v49  ;;  %v4242_v48 = vld [vmem:[#allocation15 + $0x18] sm:$0xff]  ;;  %v4243_v61 = vld [vmem:[#allocation15 + $0x20] sm:$0xff]  ;;  %v4244_v50 = vld [vmem:[#allocation15 + $0x28] sm:$0xff] }
0x1923   :  { %7748 = vmatprep.subr.bf16.mxu1 %v8475_v37  ;;  %v7767_v52 = vpack.c.bf16 %v4242_v48, %v4241_v35  ;;  %v7770_v55 = vpack.c.bf16 %v4244_v50, %v4243_v61  ;;  %v4245_v59 = vld [vmem:[#allocation15 + $0x30] sm:$0xff]  ;;  %v4246_v60 = vld [vmem:[#allocation15 + $0x38] sm:$0xff]  ;;  %v4247_v9 = vld [vmem:[#allocation15 + $0x40] sm:$0xff] }
0x1924   :  { %v7773_v1 = vpack.c.bf16 %v4246_v60, %v4245_v59  ;;  %v4248_v5 = vld [vmem:[#allocation15 + $0x48] sm:$0xff]  ;;  %v4249_v10 = vld [vmem:[#allocation15 + $0x50] sm:$0xff]  ;;  %v4250_v15 = vld [vmem:[#allocation15 + $0x58] sm:$0xff] }
0x1925   :  { %7726 = vmatpush1.bf16.msra.mxu0 %v7725_v13  ;;  %v7776_v46 = vpack.c.bf16 %v4248_v5, %v4247_v9  ;;  %v7779_v21 = vpack.c.bf16 %v4250_v15, %v4249_v10  ;;  %v4251_v24 = vld [vmem:[#allocation15 + $0x60] sm:$0xff]  ;;  %v4252_v41 = vld [vmem:[#allocation15 + $0x68] sm:$0xff]  ;;  %v4253_v4 = vld [vmem:[#allocation15 + $0x70] sm:$0xff] }
0x1926   :  { %7728 = vmatprep.subr.bf16.mxu0 %v7727_v51  ;;  %7750 = vmatpush3.bf16.msra.mxu1 %v7749_v63  ;;  %v7782_v16 = vpack.c.bf16 %v4252_v41, %v4251_v24  ;;  %v4254_v13 = vld [vmem:[#allocation15 + $0x78] sm:$0xff]  ;;  %v4022_v18 = vld [vmem:[#allocation3] sm:$0xff]  ;;  %v4023_v20 = vld [vmem:[#allocation3 + $0x8] sm:$0xff] }
0x1927   :  { %7751 = vmatprep.subr.bf16.mxu1 %v8475_v37  ;;  %v7785_v14 = vpack.c.bf16 %v4254_v13, %v4253_v4  ;;  %v4026_v51 = vadd.f32 %v4022_v18, %v9108_v0  ;;  %v4024_v7 = vld [vmem:[#allocation3 + $0x10] sm:$0xff]  ;;  %v4335_v6 = vld [vmem:[#allocation4 + $0xa0] sm:$0xff] (!%p5538_p13) }
0x1928   :  { %v4028_v53 = vadd.f32 %v4024_v7, %v9121_v43  ;;  %v4337_v35 = vld [vmem:[#allocation4 + $0xb0] sm:$0xff] (!%p5538_p13)  ;;  %4339 = vst [vmem:[#allocation3] sm:$0xff] (!%p5538_p13), %v4335_v6 }
0x1929   :  { %7730 = vmatpush1.bf16.msra.mxu0 %v7729_v23  ;;  %v4027_v23 = vadd.f32 %v4023_v20, %v9110_v2  ;;  %4341 = vst [vmem:[#allocation3 + $0x10] sm:$0xff] (!%p5538_p13), %v4337_v35 }
0x192a   :  { %7732 = vmatprep.subr.bf16.mxu0 %v7731_v31  ;;  %7753 = vmatpush3.bf16.msra.mxu1 %v7752_v54 }
0x192b   :  { %7754 = vmatprep.subr.bf16.mxu1 %v8475_v37 }
0x192d   :  { %7734 = vmatpush1.bf16.msra.mxu0 %v7733_v36 }
0x192e   :  { %7736 = vmatprep.subr.bf16.mxu0 %v7735_v29  ;;  %7756 = vmatpush3.bf16.msra.mxu1 %v7755_v11 }
0x192f   :  { %7757 = vmatprep.subr.bf16.mxu1 %v8475_v37 }
0x1931   :  { %7738 = vmatpush1.bf16.msra.mxu0 %v7737_v62 }
0x1932   :  { %7763 = vmatprep.subr.bf16.mxu0 %v8475_v37  ;;  %7759 = vmatpush3.bf16.msra.mxu1 %v7758_v25  ;;  %v4025_v25 = vld [vmem:[#allocation3 + $0x18] sm:$0xff] }
0x1933   :  { %7760 = vmatprep.subr.bf16.mxu1 %v8475_v37 }
0x1934   :  { %4142 = vmatmul.mubr.f32.vlgmr.msra.gmra.mrb[0].mxu0 %v9258_v8 }
0x1935   :  { %6572 = vmatprep.mubr.msk.f32.mxu0 %vm8476_vm1, %v8474_v3  ;;  %7765 = vmatpush3.bf16.msra.mxu0 %v7764_v26  ;;  %v4336_v26 = vld [vmem:[#allocation4 + $0xa8] sm:$0xff] (!%p5538_p13) }
0x1936   :  { %7762 = vmatpush3.bf16.msra.mxu1 %v7761_v38  ;;  %7766 = vmatprep.subr.bf16.mxu0 %v8475_v37  ;;  %4340 = vst [vmem:[#allocation3 + $0x8] sm:$0xff] (!%p5538_p13), %v4336_v26 }
0x1939   :  { %6538 = vmatmul.mubr.f32.vlgmr.msra.gmra.mrb[0].mxu1 %v9258_v8  ;;  %7768 = vmatpush3.bf16.msra.mxu0 %v7767_v52 }
0x193a   :  { %7769 = vmatprep.subr.bf16.mxu0 %v8475_v37 }
0x193d   :  { %7771 = vmatpush3.bf16.msra.mxu0 %v7770_v55 }
0x193e   :  { %7772 = vmatprep.subr.bf16.mxu0 %v8475_v37 }
0x1941   :  { %7774 = vmatpush3.bf16.msra.mxu0 %v7773_v1 }
0x1942   :  { %7775 = vmatprep.subr.bf16.mxu0 %v8475_v37 }
0x1945   :  { %7777 = vmatpush3.bf16.msra.mxu0 %v7776_v46 }
0x1946   :  { %7778 = vmatprep.subr.bf16.mxu0 %v8475_v37 }
0x1949   :  { %7780 = vmatpush3.bf16.msra.mxu0 %v7779_v21 }
0x194a   :  { %7781 = vmatprep.subr.bf16.mxu0 %v8475_v37 }
0x194d   :  { %7783 = vmatpush3.bf16.msra.mxu0 %v7782_v16 }
0x194e   :  { %7784 = vmatprep.subr.bf16.mxu0 %v8475_v37 }
0x1951   :  { %7786 = vmatpush3.bf16.msra.mxu0 %v7785_v14 }
0x1a07   :  { %v4143_v34 = vpop.f32.mrb[0].mxu0 }
0x1a08   :  { %v4218_v27 = vadd.f32 %v4143_v34, %v4026_v51  ;;  %v4145_v56 = vpop.f32.mrb[1].mxu0 }
0x1a09   :  { %v4225_v63 = vadd.f32 %v4145_v56, %v4027_v23 }
0x1a0a   :  { %v5535_v22 = vmul.f32 -1.442695, %v4218_v27 }
0x1a0b   :  { %v5536_v40 = vmul.f32 -1.442695, %v4225_v63 }
0x1a0c   :  { %8230 = vpow2.f32 %v5535_v22  ;;  %v4214_v47 = vpop.f32.mrb[0].mxu1 }
0x1a0d   :  { %v6539_v31 = vpop.f32.mrb[1].mxu1  ;;  %8232 = vpow2.f32 %v5536_v40  ;;  %v4232_v32 = vadd.f32 %v9119_v33, %v4214_v47 }
0x1a16   :  { %v8231_v42 = vpop.eup %8230 }
0x1a17   :  { %v4222_v44 = vadd.f32 1.0, %v8231_v42  ;;  %v8233_v36 = vpop.eup %8232 }
0x1a18   :  { %v4229_v30 = vadd.f32 1.0, %v8233_v36 }
0x1a19   :  { %8234 = vrcp.f32 %v4222_v44 }
0x1a23   :  { %v8235_v54 = vpop.eup %8234 }
0x1a24   :  { %v4233_v29 = vmul.f32 %v8235_v54, %v4232_v32 }
0x1a26   :  { %v4234_v57 = vadd.f32 %v4233_v29, %v4028_v53 }
0x1a28   :  { %8236 = vtanh.f32 %v4234_v57 }
0x1a29   :  { %8238 = vrcp.f32 %v4229_v30 }
0x1a32   :  { %v8237_v58 = vpop.eup %8236 }
0x1a33   :  { %v4236_v62 = vsub.f32 %v9258_v8, %v8237_v58  ;;  %v8239_v11 = vpop.eup %8238  ;;  %v4338_v8 = vld [vmem:[#allocation4 + $0xb8] sm:$0xff] (!%p5538_p13) }
0x1a34   :  { %4342 = vst [vmem:[#allocation3 + $0x18] sm:$0xff] (!%p5538_p13), %v4338_v8 }
0x1a35   :  { %v4237_v17 = vmul.f32 %v8239_v11, %v4236_v62 }
0x1a37   :  { %v9300_v19 = vadd.f32 %v8237_v58, %v4237_v17 }
0x1a39   :  { %6573 = vmatmul.mubr.f32.vlgmr.msra.gmra.mrb[2].mxu0 %v9300_v19 }
0x1b0b   :  { %4333 = sbr.rel (%p5538_p13) target bundleno = 6930 (0x1b12), region = 129 }
0x1b0c   :  { %v4321_v39 = vpop.f32.mrb[2].mxu0 }
0x1b0d   :  { %v4325_v45 = vadd.f32 %v4321_v39, %v4025_v25  ;;  %v6574_v38 = vpop.f32.mrb[3].mxu0 }
0x1b0f   :  { %v4326_v49 = vadd.f32 %v4325_v45, %v9133_v12 }
0x1b11   :  { %4328 = vst [vmem:[#allocation18 + $0x28] sm:$0xff] %v4326_v49 }
0x1b12 PF:  { %p5539_p0 = scmp.eq.s32.totalorder %s5537_s19, 1 }
0x1b13   :  { %4347 = vmax.xlane.f32.xlu0 (!%p5539_p0), %v4326_v49  ;;  %v4369_v55 = vld [vmem:[#allocation11 + $0x8] sm:$0xff] (!%p5539_p0)  ;;  %v4371_v60 = vld [vmem:[#allocation11 + $0x18] sm:$0xff] (!%p5539_p0)  ;;  %v4368_v5 = vld [vmem:[#allocation11] sm:$0xff] (!%p5539_p0) }
0x1b14   :  { %4346 = sbr.rel (%p5539_p0) target bundleno = 7584 (0x1da0), region = 133  ;;  %v4373_v59 = vld [vmem:[#allocation11 + $0x28] sm:$0xff] (!%p5539_p0)  ;;  %v4375_v9 = vld [vmem:[#allocation11 + $0x38] sm:$0xff] (!%p5539_p0)  ;;  %v4372_v46 = vld [vmem:[#allocation11 + $0x20] sm:$0xff] (!%p5539_p0) }
0x1b15   :  { %v7787_v1 = vpack.c.bf16 (!%p5539_p0), %v4373_v59, %v4369_v55  ;;  %v7819_v10 = vpack.c.bf16 (!%p5539_p0), %v4375_v9, %v4371_v60  ;;  %v7789_v15 = vpack.c.bf16 (!%p5539_p0), %v4372_v46, %v4368_v5  ;;  %v4370_v21 = vld [vmem:[#allocation11 + $0x10] sm:$0xff] (!%p5539_p0)  ;;  %v4377_v41 = vld [vmem:[#allocation11 + $0x48] sm:$0xff] (!%p5539_p0)  ;;  %v4379_v13 = vld [vmem:[#allocation11 + $0x58] sm:$0xff] (!%p5539_p0) }
0x1b16   :  { %v4374_v24 = vld [vmem:[#allocation11 + $0x30] sm:$0xff] (!%p5539_p0)  ;;  %v4381_v4 = vld [vmem:[#allocation11 + $0x68] sm:$0xff] (!%p5539_p0)  ;;  %v4383_v14 = vld [vmem:[#allocation11 + $0x78] sm:$0xff] (!%p5539_p0) }
0x1b17   :  { %7788 = vmatprep.subr.bf16.mxu0 (!%p5539_p0), %v7787_v1  ;;  %v7821_v16 = vpack.c.bf16 (!%p5539_p0), %v4374_v24, %v4370_v21  ;;  %7820 = vmatprep.subr.bf16.mxu1 (!%p5539_p0), %v7819_v10  ;;  %v7791_v18 = vpack.c.bf16 (!%p5539_p0), %v4381_v4, %v4377_v41  ;;  %v7823_v51 = vpack.c.bf16 (!%p5539_p0), %v4383_v14, %v4379_v13  ;;  %v4376_v34 = vld [vmem:[#allocation11 + $0x40] sm:$0xff] (!%p5539_p0)  ;;  %v4378_v56 = vld [vmem:[#allocation11 + $0x50] sm:$0xff] (!%p5539_p0)  ;;  %v4385_v23 = vld [vmem:[#allocation11 + $0x88] sm:$0xff] (!%p5539_p0) }
0x1b18   :  { %7790 = vmatpush1.bf16.msra.mxu0 (!%p5539_p0), %v7789_v15  ;;  %v4380_v27 = vld [vmem:[#allocation11 + $0x60] sm:$0xff] (!%p5539_p0)  ;;  %v4382_v22 = vld [vmem:[#allocation11 + $0x70] sm:$0xff] (!%p5539_p0)  ;;  %v4389_v47 = vld [vmem:[#allocation11 + $0xa8] sm:$0xff] (!%p5539_p0) }
0x1b19   :  { %7822 = vmatpush1.bf16.msra.mxu1 (!%p5539_p0), %v7821_v16  ;;  %v7793_v20 = vpack.c.bf16 (!%p5539_p0), %v4380_v27, %v4376_v34  ;;  %7792 = vmatprep.subr.bf16.mxu0 (!%p5539_p0), %v7791_v18  ;;  %v7825_v63 = vpack.c.bf16 (!%p5539_p0), %v4382_v22, %v4378_v56  ;;  %v7795_v31 = vpack.c.bf16 (!%p5539_p0), %v4389_v47, %v4385_v23  ;;  %v4387_v40 = vld [vmem:[#allocation11 + $0x98] sm:$0xff] (!%p5539_p0)  ;;  %v4384_v44 = vld [vmem:[#allocation11 + $0x80] sm:$0xff] (!%p5539_p0)  ;;  %v4386_v36 = vld [vmem:[#allocation11 + $0x90] sm:$0xff] (!%p5539_p0) }
0x1b1a   :  { %7824 = vmatprep.subr.bf16.mxu1 (!%p5539_p0), %v7823_v51  ;;  %v4391_v42 = vld [vmem:[#allocation11 + $0xb8] sm:$0xff] (!%p5539_p0)  ;;  %v4388_v32 = vld [vmem:[#allocation11 + $0xa0] sm:$0xff] (!%p5539_p0)  ;;  %v4390_v53 = vld [vmem:[#allocation11 + $0xb0] sm:$0xff] (!%p5539_p0) }
0x1b1b   :  { %v7827_v7 = vpack.c.bf16 %v4391_v42, %v4387_v40  ;;  %v7797_v54 = vpack.c.bf16 %v4388_v32, %v4384_v44  ;;  %v4393_v29 = vld [vmem:[#allocation11 + $0xc8] sm:$0xff]  ;;  %v4395_v57 = vld [vmem:[#allocation11 + $0xd8] sm:$0xff]  ;;  %v7829_v58 = vpack.c.bf16 %v4390_v53, %v4386_v36  ;;  %v4392_v17 = vld [vmem:[#allocation11 + $0xc0] sm:$0xff] }
0x1b1c   :  { %7794 = vmatpush1.bf16.msra.mxu0 %v7793_v20  ;;  %v4397_v30 = vld [vmem:[#allocation11 + $0xe8] sm:$0xff]  ;;  %v4399_v11 = vld [vmem:[#allocation11 + $0xf8] sm:$0xff]  ;;  %v4396_v25 = vld [vmem:[#allocation11 + $0xe0] sm:$0xff] }
0x1b1d   :  { %7826 = vmatpush1.bf16.msra.mxu1 %v7825_v63  ;;  %7796 = vmatprep.subr.bf16.mxu0 %v7795_v31  ;;  %v7799_v62 = vpack.c.bf16 %v4397_v30, %v4393_v29  ;;  %v7831_v39 = vpack.c.bf16 %v4399_v11, %v4395_v57  ;;  %v4394_v45 = vld [vmem:[#allocation11 + $0xd0] sm:$0xff]  ;;  %v4405_v6 = vld [vmem:[#allocation11 + $0x128] sm:$0xff]  ;;  %v4403_v26 = vld [vmem:[#allocation11 + $0x118] sm:$0xff]  ;;  %v7801_v8 = vpack.c.bf16 %v4396_v25, %v4392_v17 }
0x1b1e   :  { %7828 = vmatprep.subr.bf16.mxu1 %v7827_v7  ;;  %v4398_v38 = vld [vmem:[#allocation11 + $0xf0] sm:$0xff]  ;;  %v4407_v35 = vld [vmem:[#allocation11 + $0x138] sm:$0xff]  ;;  %v4400_v55 = vld [vmem:[#allocation11 + $0x100] sm:$0xff] }
0x1b1f   :  { %v4404_v59 = vld [vmem:[#allocation11 + $0x120] sm:$0xff]  ;;  %v4402_v60 = vld [vmem:[#allocation11 + $0x110] sm:$0xff]  ;;  %v7835_v1 = vpack.c.bf16 %v4407_v35, %v4403_v26  ;;  %v4409_v5 = vld [vmem:[#allocation11 + $0x148] sm:$0xff] }
0x1b20   :  { %7798 = vmatpush1.bf16.msra.mxu0 %v7797_v54  ;;  %v4406_v9 = vld [vmem:[#allocation11 + $0x130] sm:$0xff]  ;;  %v4413_v46 = vld [vmem:[#allocation11 + $0x168] sm:$0xff]  ;;  %v4411_v10 = vld [vmem:[#allocation11 + $0x158] sm:$0xff]  ;;  %v7805_v21 = vpack.c.bf16 %v4404_v59, %v4400_v55 }
0x1b21   :  { %7830 = vmatpush1.bf16.msra.mxu1 %v7829_v58  ;;  %7800 = vmatprep.subr.bf16.mxu0 %v7799_v62  ;;  %v4415_v15 = vld [vmem:[#allocation11 + $0x178] sm:$0xff]  ;;  %v7837_v24 = vpack.c.bf16 %v4406_v9, %v4402_v60  ;;  %v7807_v41 = vpack.c.bf16 %v4413_v46, %v4409_v5  ;;  %v4408_v16 = vld [vmem:[#allocation11 + $0x140] sm:$0xff]  ;;  %v4410_v13 = vld [vmem:[#allocation11 + $0x150] sm:$0xff] }
0x1b22   :  { %7832 = vmatprep.subr.bf16.mxu1 %v7831_v39  ;;  %v4412_v4 = vld [vmem:[#allocation11 + $0x160] sm:$0xff]  ;;  %v7839_v14 = vpack.c.bf16 %v4415_v15, %v4411_v10  ;;  %v4414_v18 = vld [vmem:[#allocation11 + $0x170] sm:$0xff]  ;;  %v4417_v51 = vld [vmem:[#allocation11 + $0x188] sm:$0xff] }
0x1b23   :  { %v4421_v34 = vld [vmem:[#allocation11 + $0x1a8] sm:$0xff]  ;;  %v4419_v27 = vld [vmem:[#allocation11 + $0x198] sm:$0xff]  ;;  %v7809_v20 = vpack.c.bf16 %v4412_v4, %v4408_v16  ;;  %v7841_v22 = vpack.c.bf16 %v4414_v18, %v4410_v13  ;;  %v4416_v47 = vld [vmem:[#allocation11 + $0x180] sm:$0xff] }
0x1b24   :  { %7802 = vmatpush1.bf16.msra.mxu0 %v7801_v8  ;;  %v4423_v56 = vld [vmem:[#allocation11 + $0x1b8] sm:$0xff]  ;;  %v7811_v23 = vpack.c.bf16 %v4421_v34, %v4417_v51  ;;  %v4420_v63 = vld [vmem:[#allocation11 + $0x1a0] sm:$0xff]  ;;  %v4418_v40 = vld [vmem:[#allocation11 + $0x190] sm:$0xff] }
0x1b25   :  { %v7843_v31 = vpack.c.bf16 %v4423_v56, %v4419_v27  ;;  %v4422_v42 = vld [vmem:[#allocation11 + $0x1b0] sm:$0xff]  ;;  %v7813_v44 = vpack.c.bf16 %v4420_v63, %v4416_v47  ;;  %v4425_v29 = vld [vmem:[#allocation11 + $0x1c8] sm:$0xff]  ;;  %v4427_v57 = vld [vmem:[#allocation11 + $0x1d8] sm:$0xff] }
0x1b26   :  { %v7845_v7 = vpack.c.bf16 %v4422_v42, %v4418_v40  ;;  %v4429_v30 = vld [vmem:[#allocation11 + $0x1e8] sm:$0xff]  ;;  %v4431_v62 = vld [vmem:[#allocation11 + $0x1f8] sm:$0xff]  ;;  %v4424_v11 = vld [vmem:[#allocation11 + $0x1c0] sm:$0xff] }
0x1b27   :  { %v7815_v58 = vpack.c.bf16 %v4429_v30, %v4425_v29  ;;  %v4428_v17 = vld [vmem:[#allocation11 + $0x1e0] sm:$0xff]  ;;  %v7847_v25 = vpack.c.bf16 %v4431_v62, %v4427_v57 }
0x1b28   :  { %v7817_v39 = vpack.c.bf16 %v4428_v17, %v4424_v11 }
0x1ba0   :  { %v4348_v48 = vpop.xlane.xlu0 %4347 }
0x1ba1   :  { %vm4349_vm14 = vcmp.eq.f32.partialorder %v4326_v49, %v4348_v48  ;;  %v4401_v49 = vld [vmem:[#allocation11 + $0x108] sm:$0xff]  ;;  %v7833_v48 = vpack.c.bf16 %v4398_v38, %v4394_v45  ;;  %v4426_v45 = vld [vmem:[#allocation11 + $0x1d0] sm:$0xff] }
0x1ba2   :  { %v9305_v52 = vsel %vm4349_vm14, %v8846_v28, 128  ;;  %v4430_v38 = vld [vmem:[#allocation11 + $0x1f0] sm:$0xff] }
0x1ba3   :  { %v4352_v61 = vshra.s32 %v9305_v52, 16  ;;  %7834 = vmatpush1.bf16.msra.mxu1 %v7833_v48  ;;  %v4351_v32 = vand.u32 65535, %v9305_v52  ;;  %v8485_v52 = vmov 0.0   ;;  %v8486_v48 = vmov 1.0  }
0x1ba4   :  { %7836 = vmatprep.subr.bf16.mxu1 %v7835_v1  ;;  %4496 = vmatprep.mubr.f32.mxu0 %v8485_v52 }
0x1ba5   :  { %v9308_v50 = vcvt.s32.f32 %v4352_v61  ;;  %v7803_v61 = vpack.c.bf16 %v4405_v6, %v4401_v49  ;;  %v4353_v53 = vcvt.s32.f32 %v4351_v32  ;;  %v7849_v49 = vpack.c.bf16 %v4430_v38, %v4426_v45  ;;  %4567 = vmatprep.mubr.f32.mxu1 %v8485_v52 }
0x1ba7   :  { %4355 = vmin.xlane.f32.xlu0 %v9308_v50  ;;  %7804 = vmatprep.subr.bf16.mxu0 %v7803_v61 }
0x1ba8   :  { %7806 = vmatpush1.bf16.msra.mxu0 %v7805_v21  ;;  %7838 = vmatpush1.bf16.msra.mxu1 %v7837_v24 }
0x1ba9   :  { %7808 = vmatprep.subr.bf16.mxu0 %v7807_v41  ;;  %7840 = vmatprep.subr.bf16.mxu1 %v7839_v14 }
0x1bac   :  { %7810 = vmatpush1.bf16.msra.mxu0 %v7809_v20  ;;  %7842 = vmatpush1.bf16.msra.mxu1 %v7841_v22 }
0x1bad   :  { %7812 = vmatprep.subr.bf16.mxu0 %v7811_v23  ;;  %7844 = vmatprep.subr.bf16.mxu1 %v7843_v31 }
0x1bb0   :  { %7814 = vmatpush1.bf16.msra.mxu0 %v7813_v44  ;;  %7846 = vmatpush1.bf16.msra.mxu1 %v7845_v7 }
0x1bb1   :  { %7816 = vmatprep.subr.bf16.mxu0 %v7815_v58  ;;  %7848 = vmatprep.subr.bf16.mxu1 %v7847_v25 }
0x1bb4   :  { %7818 = vmatpush1.bf16.msra.mxu0 %v7817_v39  ;;  %7850 = vmatpush1.bf16.msra.mxu1 %v7849_v49 }
0x1c34   :  { %v4356_v36 = vpop.xlane.xlu0 %4355 }
0x1c35   :  { %vm4357_vm15 = vcmp.eq.f32.partialorder %v9308_v50, %v4356_v36  ;;  %v4362_v50 = vcvt.f32.s32 %v4356_v36 }
0x1c36   :  { %v4358_v54 = vsel %vm4357_vm15, %v4353_v53, inf }
0x1c37   :  { %4359 = vmin.xlane.f32.xlu1 %v4358_v54  ;;  %v4363_v26 = vshll.u32 %v4362_v50, 16 }
0x1cc4   :  { %v4360_v6 = vpop.xlane.xlu1 %4359 }
0x1cc5   :  { %v4361_v35 = vcvt.f32.s32 %v4360_v6 }
0x1cc7   :  { %v4364_v8 = vadd.s32 %v4363_v26, %v4361_v35 }
0x1cc9   :  { %vm4365_vm0 = vcmp.eq.s32.totalorder %v8846_v28, %v4364_v8 }
0x1cca   :  { %5541 = vmatmul.mubr.msk.f32.vlgmr.msra.gmra.mrb[0].mxu0 %vm4365_vm0, %v8486_v48  ;;  %5542 = vmatmul.mubr.msk.f32.vlgmr.msra.gmra.mrb[0].mxu1 %vm4365_vm0, %v8486_v48 }
0x1d9d   :  { %v4498_v61 = vpop.f32.mrb[0].mxu0  ;;  %v4569_v55 = vpop.f32.mrb[0].mxu1 }
0x1d9e   :  { %4574 = vst [vmem:[#allocation3] sm:$0xff] %v4498_v61  ;;  %4576 = vst [vmem:[#allocation3 + $0x10] sm:$0xff] %v4569_v55  ;;  %v4500_v59 = vpop.f32.mrb[1].mxu0  ;;  %v4571_v60 = vpop.f32.mrb[1].mxu1 }
0x1d9f   :  { %4575 = vst [vmem:[#allocation3 + $0x8] sm:$0xff] %v4500_v59  ;;  %4577 = vst [vmem:[#allocation3 + $0x18] sm:$0xff] %v4571_v60 }
0x1da0 PF:  { %v4586_v1 = vld [vmem:[#allocation14 + $0x8] sm:$0xff]  ;;  %v4589_v9 = vld [vmem:[#allocation14 + $0x20] sm:$0xff]  ;;  %7883 = vmatprep.subr.bf16.mxu1 %v8475_v37  ;;  %4697 = vmatprep.mubr.f32.mxu0 %v8474_v3  ;;  %v4588_v10 = vld [vmem:[#allocation14 + $0x18] sm:$0xff]  ;;  %s5545_s13 = sld [smem:[#allocation8 + $0x6]] }
0x1da1   :  { %v4585_v5 = vld [vmem:[#allocation14] sm:$0xff]  ;;  %v7851_v46 = vpack.c.bf16 %v4589_v9, %v4586_v1  ;;  %v4592_v15 = vld [vmem:[#allocation14 + $0x38] sm:$0xff]  ;;  %v4595_v21 = vld [vmem:[#allocation14 + $0x50] sm:$0xff]  ;;  %6607 = vmatprep.mubr.msk.f32.mxu1 %vm8476_vm1, %v8474_v3 }
0x1da2   :  { %v7853_v24 = vpack.c.bf16 %v4588_v10, %v4585_v5  ;;  %v7855_v41 = vpack.c.bf16 %v4595_v21, %v4592_v15  ;;  %v4591_v16 = vld [vmem:[#allocation14 + $0x30] sm:$0xff]  ;;  %v4594_v4 = vld [vmem:[#allocation14 + $0x48] sm:$0xff]  ;;  %v4601_v14 = vld [vmem:[#allocation14 + $0x80] sm:$0xff] }
0x1da3   :  { %v4598_v13 = vld [vmem:[#allocation14 + $0x68] sm:$0xff]  ;;  %7852 = vmatprep.subr.bf16.mxu0 %v7851_v46  ;;  %v7857_v18 = vpack.c.bf16 %v4594_v4, %v4591_v16  ;;  %v4597_v34 = vld [vmem:[#allocation14 + $0x60] sm:$0xff]  ;;  %v4600_v27 = vld [vmem:[#allocation14 + $0x78] sm:$0xff] }
0x1da4   :  { %7854 = vmatpush1.bf16.msra.mxu0 %v7853_v24  ;;  %v7859_v51 = vpack.c.bf16 %v4601_v14, %v4598_v13  ;;  %v4604_v56 = vld [vmem:[#allocation14 + $0x98] sm:$0xff]  ;;  %v4607_v20 = vld [vmem:[#allocation14 + $0xb0] sm:$0xff]  ;;  %v7861_v22 = vpack.c.bf16 %v4600_v27, %v4597_v34  ;;  %v4606_v63 = vld [vmem:[#allocation14 + $0xa8] sm:$0xff] }
0x1da5   :  { %7856 = vmatprep.subr.bf16.mxu0 %v7855_v41  ;;  %v4603_v23 = vld [vmem:[#allocation14 + $0x90] sm:$0xff]  ;;  %v7863_v47 = vpack.c.bf16 %v4607_v20, %v4604_v56  ;;  %v4590_v40 = vld [vmem:[#allocation14 + $0x28] sm:$0xff]  ;;  %v4613_v44 = vld [vmem:[#allocation14 + $0xe0] sm:$0xff] }
0x1da6   :  { %v4587_v31 = vld [vmem:[#allocation14 + $0x10] sm:$0xff]  ;;  %v4610_v42 = vld [vmem:[#allocation14 + $0xc8] sm:$0xff]  ;;  %v4593_v32 = vld [vmem:[#allocation14 + $0x40] sm:$0xff]  ;;  %v7865_v53 = vpack.c.bf16 %v4606_v63, %v4603_v23  ;;  %p5546_p1 = scmp.ne.s32.totalorder %s5545_s13, 1 }
0x1da7   :  { %v7884_v7 = vpack.c.bf16 %v4590_v40, %v4587_v31  ;;  %v4596_v36 = vld [vmem:[#allocation14 + $0x58] sm:$0xff]  ;;  %v4609_v54 = vld [vmem:[#allocation14 + $0xc0] sm:$0xff]  ;;  %v7867_v30 = vpack.c.bf16 %v4613_v44, %v4610_v42  ;;  %v4599_v58 = vld [vmem:[#allocation14 + $0x70] sm:$0xff] }
0x1da8   :  { %7858 = vmatpush1.bf16.msra.mxu0 %v7857_v18  ;;  %v7887_v29 = vpack.c.bf16 %v4596_v36, %v4593_v32  ;;  %v4612_v57 = vld [vmem:[#allocation14 + $0xd8] sm:$0xff]  ;;  %v4602_v62 = vld [vmem:[#allocation14 + $0x88] sm:$0xff]  ;;  %v4619_v17 = vld [vmem:[#allocation14 + $0x110] sm:$0xff] }
0x1da9   :  { %7860 = vmatprep.subr.bf16.mxu0 %v7859_v51  ;;  %7885 = vmatpush3.bf16.msra.mxu1 %v7884_v7  ;;  %v4616_v11 = vld [vmem:[#allocation14 + $0xf8] sm:$0xff]  ;;  %v7869_v25 = vpack.c.bf16 %v4612_v57, %v4609_v54  ;;  %v4615_v39 = vld [vmem:[#allocation14 + $0xf0] sm:$0xff]  ;;  %v7890_v45 = vpack.c.bf16 %v4602_v62, %v4599_v58  ;;  %v4618_v49 = vld [vmem:[#allocation14 + $0x108] sm:$0xff] }
0x1daa   :  { %7886 = vmatprep.subr.bf16.mxu1 %v8475_v37  ;;  %v7871_v38 = vpack.c.bf16 %v4619_v17, %v4616_v11  ;;  %v4605_v52 = vld [vmem:[#allocation14 + $0xa0] sm:$0xff]  ;;  %v4608_v50 = vld [vmem:[#allocation14 + $0xb8] sm:$0xff]  ;;  %v4622_v6 = vld [vmem:[#allocation14 + $0x128] sm:$0xff]  ;;  %v7873_v35 = vpack.c.bf16 %v4618_v49, %v4615_v39 }
0x1dab   :  { %v4625_v26 = vld [vmem:[#allocation14 + $0x140] sm:$0xff]  ;;  %v7893_v48 = vpack.c.bf16 %v4608_v50, %v4605_v52  ;;  %v4624_v55 = vld [vmem:[#allocation14 + $0x138] sm:$0xff]  ;;  %v4611_v59 = vld [vmem:[#allocation14 + $0xd0] sm:$0xff] }
0x1dac   :  { %7862 = vmatpush1.bf16.msra.mxu0 %v7861_v22  ;;  %v4621_v8 = vld [vmem:[#allocation14 + $0x120] sm:$0xff]  ;;  %v7875_v61 = vpack.c.bf16 %v4625_v26, %v4622_v6  ;;  %v4614_v60 = vld [vmem:[#allocation14 + $0xe8] sm:$0xff]  ;;  %v4628_v1 = vld [vmem:[#allocation14 + $0x158] sm:$0xff] }
0x1dad   :  { %7864 = vmatprep.subr.bf16.mxu0 %v7863_v47  ;;  %7888 = vmatpush3.bf16.msra.mxu1 %v7887_v29  ;;  %v4631_v9 = vld [vmem:[#allocation14 + $0x170] sm:$0xff]  ;;  %v7877_v5 = vpack.c.bf16 %v4624_v55, %v4621_v8  ;;  %v7896_v10 = vpack.c.bf16 %v4614_v60, %v4611_v59  ;;  %v4630_v21 = vld [vmem:[#allocation14 + $0x168] sm:$0xff]  ;;  %v4617_v24 = vld [vmem:[#allocation14 + $0x100] sm:$0xff] }
0x1dae   :  { %7889 = vmatprep.subr.bf16.mxu1 %v8475_v37  ;;  %v4627_v46 = vld [vmem:[#allocation14 + $0x150] sm:$0xff]  ;;  %v7879_v15 = vpack.c.bf16 %v4631_v9, %v4628_v1  ;;  %v4620_v41 = vld [vmem:[#allocation14 + $0x118] sm:$0xff]  ;;  %v4626_v14 = vld [vmem:[#allocation14 + $0x148] sm:$0xff] }
0x1daf   :  { %v7881_v16 = vpack.c.bf16 %v4630_v21, %v4627_v46  ;;  %v7899_v4 = vpack.c.bf16 %v4620_v41, %v4617_v24  ;;  %v4623_v13 = vld [vmem:[#allocation14 + $0x130] sm:$0xff]  ;;  %v4629_v51 = vld [vmem:[#allocation14 + $0x160] sm:$0xff]  ;;  %v4632_v34 = vld [vmem:[#allocation14 + $0x178] sm:$0xff] }
0x1db0   :  { %7866 = vmatpush1.bf16.msra.mxu0 %v7865_v53  ;;  %v7902_v18 = vpack.c.bf16 %v4626_v14, %v4623_v13  ;;  %v7905_v27 = vpack.c.bf16 %v4632_v34, %v4629_v51  ;;  %v4795_v56 = vld [vmem:[#allocation15] sm:$0xff]  ;;  %v4796_v20 = vld [vmem:[#allocation15 + $0x8] sm:$0xff]  ;;  %v4797_v23 = vld [vmem:[#allocation15 + $0x10] sm:$0xff] }
0x1db1   :  { %7868 = vmatprep.subr.bf16.mxu0 %v7867_v30  ;;  %7891 = vmatpush3.bf16.msra.mxu1 %v7890_v45  ;;  %v7908_v22 = vpack.c.bf16 %v4796_v20, %v4795_v56  ;;  %v4798_v47 = vld [vmem:[#allocation15 + $0x18] sm:$0xff]  ;;  %v4799_v31 = vld [vmem:[#allocation15 + $0x20] sm:$0xff]  ;;  %v4800_v40 = vld [vmem:[#allocation15 + $0x28] sm:$0xff] }
0x1db2   :  { %7892 = vmatprep.subr.bf16.mxu1 %v8475_v37  ;;  %v7911_v63 = vpack.c.bf16 %v4798_v47, %v4797_v23  ;;  %v7914_v42 = vpack.c.bf16 %v4800_v40, %v4799_v31  ;;  %v4801_v44 = vld [vmem:[#allocation15 + $0x30] sm:$0xff]  ;;  %v4802_v7 = vld [vmem:[#allocation15 + $0x38] sm:$0xff]  ;;  %v4803_v36 = vld [vmem:[#allocation15 + $0x40] sm:$0xff] }
0x1db3   :  { %v7917_v32 = vpack.c.bf16 %v4802_v7, %v4801_v44  ;;  %v4804_v53 = vld [vmem:[#allocation15 + $0x48] sm:$0xff]  ;;  %v4805_v29 = vld [vmem:[#allocation15 + $0x50] sm:$0xff]  ;;  %v4806_v30 = vld [vmem:[#allocation15 + $0x58] sm:$0xff] }
0x1db4   :  { %7870 = vmatpush1.bf16.msra.mxu0 %v7869_v25  ;;  %v7920_v54 = vpack.c.bf16 %v4804_v53, %v4803_v36  ;;  %v7923_v57 = vpack.c.bf16 %v4806_v30, %v4805_v29  ;;  %v4807_v58 = vld [vmem:[#allocation15 + $0x60] sm:$0xff]  ;;  %v4808_v62 = vld [vmem:[#allocation15 + $0x68] sm:$0xff]  ;;  %v4809_v17 = vld [vmem:[#allocation15 + $0x70] sm:$0xff] }
0x1db5   :  { %7872 = vmatprep.subr.bf16.mxu0 %v7871_v38  ;;  %7894 = vmatpush3.bf16.msra.mxu1 %v7893_v48  ;;  %v7926_v11 = vpack.c.bf16 %v4808_v62, %v4807_v58  ;;  %v4810_v25 = vld [vmem:[#allocation15 + $0x78] sm:$0xff]  ;;  %v4578_v45 = vld [vmem:[#allocation3] sm:$0xff]  ;;  %v4579_v6 = vld [vmem:[#allocation3 + $0x8] sm:$0xff] }
0x1db6   :  { %7895 = vmatprep.subr.bf16.mxu1 %v8475_v37  ;;  %v7929_v39 = vpack.c.bf16 %v4810_v25, %v4809_v17  ;;  %v4582_v38 = vadd.f32 %v4578_v45, %v9108_v0  ;;  %v4580_v1 = vld [vmem:[#allocation3 + $0x10] sm:$0xff]  ;;  %v4891_v20 = vld [vmem:[#allocation4 + $0xc0] sm:$0xff] (!%p5546_p1) }
0x1db7   :  { %v4584_v46 = vadd.f32 %v4580_v1, %v9121_v43  ;;  %v4893_v23 = vld [vmem:[#allocation4 + $0xd0] sm:$0xff] (!%p5546_p1)  ;;  %4895 = vst [vmem:[#allocation3] sm:$0xff] (!%p5546_p1), %v4891_v20 }
0x1db8   :  { %7874 = vmatpush1.bf16.msra.mxu0 %v7873_v35  ;;  %v4583_v35 = vadd.f32 %v4579_v6, %v9110_v2  ;;  %4897 = vst [vmem:[#allocation3 + $0x10] sm:$0xff] (!%p5546_p1), %v4893_v23 }
0x1db9   :  { %7876 = vmatprep.subr.bf16.mxu0 %v7875_v61  ;;  %7897 = vmatpush3.bf16.msra.mxu1 %v7896_v10 }
0x1dba   :  { %7898 = vmatprep.subr.bf16.mxu1 %v8475_v37 }
0x1dbc   :  { %7878 = vmatpush1.bf16.msra.mxu0 %v7877_v5 }
0x1dbd   :  { %7880 = vmatprep.subr.bf16.mxu0 %v7879_v15  ;;  %7900 = vmatpush3.bf16.msra.mxu1 %v7899_v4 }
0x1dbe   :  { %7901 = vmatprep.subr.bf16.mxu1 %v8475_v37 }
0x1dc0   :  { %7882 = vmatpush1.bf16.msra.mxu0 %v7881_v16 }
0x1dc1   :  { %7907 = vmatprep.subr.bf16.mxu0 %v8475_v37  ;;  %7903 = vmatpush3.bf16.msra.mxu1 %v7902_v18  ;;  %v4581_v18 = vld [vmem:[#allocation3 + $0x18] sm:$0xff] }
0x1dc2   :  { %7904 = vmatprep.subr.bf16.mxu1 %v8475_v37 }
0x1dc3   :  { %4698 = vmatmul.mubr.f32.vlgmr.msra.gmra.mrb[0].mxu0 %v9300_v19 }
0x1dc4   :  { %6642 = vmatprep.mubr.msk.f32.mxu0 %vm8476_vm1, %v8474_v3  ;;  %7909 = vmatpush3.bf16.msra.mxu0 %v7908_v22  ;;  %v4892_v22 = vld [vmem:[#allocation4 + $0xc8] sm:$0xff] (!%p5546_p1) }
0x1dc5   :  { %7906 = vmatpush3.bf16.msra.mxu1 %v7905_v27  ;;  %7910 = vmatprep.subr.bf16.mxu0 %v8475_v37  ;;  %4896 = vst [vmem:[#allocation3 + $0x8] sm:$0xff] (!%p5546_p1), %v4892_v22 }
0x1dc8   :  { %6608 = vmatmul.mubr.f32.vlgmr.msra.gmra.mrb[0].mxu1 %v9300_v19  ;;  %7912 = vmatpush3.bf16.msra.mxu0 %v7911_v63 }
0x1dc9   :  { %7913 = vmatprep.subr.bf16.mxu0 %v8475_v37 }
0x1dcc   :  { %7915 = vmatpush3.bf16.msra.mxu0 %v7914_v42 }
0x1dcd   :  { %7916 = vmatprep.subr.bf16.mxu0 %v8475_v37 }
0x1dd0   :  { %7918 = vmatpush3.bf16.msra.mxu0 %v7917_v32 }
0x1dd1   :  { %7919 = vmatprep.subr.bf16.mxu0 %v8475_v37 }
0x1dd4   :  { %7921 = vmatpush3.bf16.msra.mxu0 %v7920_v54 }
0x1dd5   :  { %7922 = vmatprep.subr.bf16.mxu0 %v8475_v37 }
0x1dd8   :  { %7924 = vmatpush3.bf16.msra.mxu0 %v7923_v57 }
0x1dd9   :  { %7925 = vmatprep.subr.bf16.mxu0 %v8475_v37 }
0x1ddc   :  { %7927 = vmatpush3.bf16.msra.mxu0 %v7926_v11 }
0x1ddd   :  { %7928 = vmatprep.subr.bf16.mxu0 %v8475_v37 }
0x1de0   :  { %7930 = vmatpush3.bf16.msra.mxu0 %v7929_v39 }
0x1e96   :  { %v4699_v49 = vpop.f32.mrb[0].mxu0 }
0x1e97   :  { %v4774_v52 = vadd.f32 %v4699_v49, %v4582_v38  ;;  %v4701_v50 = vpop.f32.mrb[1].mxu0 }
0x1e98   :  { %v4781_v48 = vadd.f32 %v4701_v50, %v4583_v35 }
0x1e99   :  { %v5543_v26 = vmul.f32 -1.442695, %v4774_v52 }
0x1e9a   :  { %v5544_v55 = vmul.f32 -1.442695, %v4781_v48 }
0x1e9b   :  { %8240 = vpow2.f32 %v5543_v26  ;;  %v4770_v8 = vpop.f32.mrb[0].mxu1 }
0x1e9c   :  { %v6609_v61 = vpop.f32.mrb[1].mxu1  ;;  %8242 = vpow2.f32 %v5544_v55  ;;  %v4788_v9 = vadd.f32 %v9119_v33, %v4770_v8 }
0x1ea5   :  { %v8241_v59 = vpop.eup %8240 }
0x1ea6   :  { %v4778_v60 = vadd.f32 1.0, %v8241_v59  ;;  %v8243_v5 = vpop.eup %8242 }
0x1ea7   :  { %v4785_v21 = vadd.f32 1.0, %v8243_v5 }
0x1ea8   :  { %8244 = vrcp.f32 %v4778_v60 }
0x1eb2   :  { %v8245_v10 = vpop.eup %8244 }
0x1eb3   :  { %v4789_v15 = vmul.f32 %v8245_v10, %v4788_v9 }
0x1eb5   :  { %v4790_v24 = vadd.f32 %v4789_v15, %v4584_v46 }
0x1eb7   :  { %8246 = vtanh.f32 %v4790_v24 }
0x1eb8   :  { %8248 = vrcp.f32 %v4785_v21 }
0x1ec1   :  { %v8247_v41 = vpop.eup %8246 }
0x1ec2   :  { %v4792_v16 = vsub.f32 %v9300_v19, %v8247_v41  ;;  %v8249_v4 = vpop.eup %8248  ;;  %v4894_v19 = vld [vmem:[#allocation4 + $0xd8] sm:$0xff] (!%p5546_p1) }
0x1ec3   :  { %4898 = vst [vmem:[#allocation3 + $0x18] sm:$0xff] (!%p5546_p1), %v4894_v19 }
0x1ec4   :  { %v4793_v13 = vmul.f32 %v8249_v4, %v4792_v16 }
0x1ec6   :  { %v9342_v14 = vadd.f32 %v8247_v41, %v4793_v13 }
0x1ec8   :  { %6643 = vmatmul.mubr.f32.vlgmr.msra.gmra.mrb[2].mxu0 %v9342_v14 }
0x1f9a   :  { %4889 = sbr.rel (%p5546_p1) target bundleno = 8097 (0x1fa1), region = 137 }
0x1f9b   :  { %v4877_v51 = vpop.f32.mrb[2].mxu0 }
0x1f9c   :  { %v4881_v34 = vadd.f32 %v4877_v51, %v4581_v18  ;;  %v6644_v27 = vpop.f32.mrb[3].mxu0 }
0x1f9e   :  { %v4882_v56 = vadd.f32 %v4881_v34, %v9133_v12 }
0x1fa0   :  { %4884 = vst [vmem:[#allocation18 + $0x30] sm:$0xff] %v4882_v56 }
0x1fa1 PF:  { %p5547_p2 = scmp.eq.s32.totalorder %s5545_s13, 1 }
0x1fa2   :  { %4903 = vmax.xlane.f32.xlu0 (!%p5547_p2), %v4882_v56  ;;  %v4925_v42 = vld [vmem:[#allocation11 + $0x8] sm:$0xff] (!%p5547_p2)  ;;  %v4927_v7 = vld [vmem:[#allocation11 + $0x18] sm:$0xff] (!%p5547_p2)  ;;  %v4924_v53 = vld [vmem:[#allocation11] sm:$0xff] (!%p5547_p2) }
0x1fa3   :  { %4902 = sbr.rel (%p5547_p2) target bundleno = 8751 (0x222f), region = 141  ;;  %v4929_v44 = vld [vmem:[#allocation11 + $0x28] sm:$0xff] (!%p5547_p2)  ;;  %v4931_v36 = vld [vmem:[#allocation11 + $0x38] sm:$0xff] (!%p5547_p2)  ;;  %v4928_v54 = vld [vmem:[#allocation11 + $0x20] sm:$0xff] (!%p5547_p2) }
0x1fa4   :  { %v7931_v32 = vpack.c.bf16 (!%p5547_p2), %v4929_v44, %v4925_v42  ;;  %v7963_v29 = vpack.c.bf16 (!%p5547_p2), %v4931_v36, %v4927_v7  ;;  %v7933_v30 = vpack.c.bf16 (!%p5547_p2), %v4928_v54, %v4924_v53  ;;  %v4926_v57 = vld [vmem:[#allocation11 + $0x10] sm:$0xff] (!%p5547_p2)  ;;  %v4933_v62 = vld [vmem:[#allocation11 + $0x48] sm:$0xff] (!%p5547_p2)  ;;  %v4935_v25 = vld [vmem:[#allocation11 + $0x58] sm:$0xff] (!%p5547_p2) }
0x1fa5   :  { %v4930_v58 = vld [vmem:[#allocation11 + $0x30] sm:$0xff] (!%p5547_p2)  ;;  %v4937_v17 = vld [vmem:[#allocation11 + $0x68] sm:$0xff] (!%p5547_p2)  ;;  %v4939_v39 = vld [vmem:[#allocation11 + $0x78] sm:$0xff] (!%p5547_p2) }
0x1fa6   :  { %7932 = vmatprep.subr.bf16.mxu0 (!%p5547_p2), %v7931_v32  ;;  %v7965_v11 = vpack.c.bf16 (!%p5547_p2), %v4930_v58, %v4926_v57  ;;  %7964 = vmatprep.subr.bf16.mxu1 (!%p5547_p2), %v7963_v29  ;;  %v7935_v45 = vpack.c.bf16 (!%p5547_p2), %v4937_v17, %v4933_v62  ;;  %v7967_v38 = vpack.c.bf16 (!%p5547_p2), %v4939_v39, %v4935_v25  ;;  %v4932_v49 = vld [vmem:[#allocation11 + $0x40] sm:$0xff] (!%p5547_p2)  ;;  %v4934_v50 = vld [vmem:[#allocation11 + $0x50] sm:$0xff] (!%p5547_p2)  ;;  %v4941_v35 = vld [vmem:[#allocation11 + $0x88] sm:$0xff] (!%p5547_p2) }
0x1fa7   :  { %7934 = vmatpush1.bf16.msra.mxu0 (!%p5547_p2), %v7933_v30  ;;  %v4936_v52 = vld [vmem:[#allocation11 + $0x60] sm:$0xff] (!%p5547_p2)  ;;  %v4938_v26 = vld [vmem:[#allocation11 + $0x70] sm:$0xff] (!%p5547_p2)  ;;  %v4945_v8 = vld [vmem:[#allocation11 + $0xa8] sm:$0xff] (!%p5547_p2) }
0x1fa8   :  { %7966 = vmatpush1.bf16.msra.mxu1 (!%p5547_p2), %v7965_v11  ;;  %v7937_v6 = vpack.c.bf16 (!%p5547_p2), %v4936_v52, %v4932_v49  ;;  %7936 = vmatprep.subr.bf16.mxu0 (!%p5547_p2), %v7935_v45  ;;  %v7969_v48 = vpack.c.bf16 (!%p5547_p2), %v4938_v26, %v4934_v50  ;;  %v7939_v61 = vpack.c.bf16 (!%p5547_p2), %v4945_v8, %v4941_v35  ;;  %v4943_v55 = vld [vmem:[#allocation11 + $0x98] sm:$0xff] (!%p5547_p2)  ;;  %v4940_v60 = vld [vmem:[#allocation11 + $0x80] sm:$0xff] (!%p5547_p2)  ;;  %v4942_v5 = vld [vmem:[#allocation11 + $0x90] sm:$0xff] (!%p5547_p2) }
0x1fa9   :  { %7968 = vmatprep.subr.bf16.mxu1 (!%p5547_p2), %v7967_v38  ;;  %v4947_v59 = vld [vmem:[#allocation11 + $0xb8] sm:$0xff] (!%p5547_p2)  ;;  %v4944_v9 = vld [vmem:[#allocation11 + $0xa0] sm:$0xff] (!%p5547_p2)  ;;  %v4946_v46 = vld [vmem:[#allocation11 + $0xb0] sm:$0xff] (!%p5547_p2) }
0x1faa   :  { %v7971_v1 = vpack.c.bf16 %v4947_v59, %v4943_v55  ;;  %v7941_v10 = vpack.c.bf16 %v4944_v9, %v4940_v60  ;;  %v4949_v15 = vld [vmem:[#allocation11 + $0xc8] sm:$0xff]  ;;  %v4951_v24 = vld [vmem:[#allocation11 + $0xd8] sm:$0xff]  ;;  %v7973_v41 = vpack.c.bf16 %v4946_v46, %v4942_v5  ;;  %v4948_v13 = vld [vmem:[#allocation11 + $0xc0] sm:$0xff] }
0x1fab   :  { %7938 = vmatpush1.bf16.msra.mxu0 %v7937_v6  ;;  %v4953_v21 = vld [vmem:[#allocation11 + $0xe8] sm:$0xff]  ;;  %v4955_v4 = vld [vmem:[#allocation11 + $0xf8] sm:$0xff]  ;;  %v4952_v18 = vld [vmem:[#allocation11 + $0xe0] sm:$0xff] }
0x1fac   :  { %7970 = vmatpush1.bf16.msra.mxu1 %v7969_v48  ;;  %7940 = vmatprep.subr.bf16.mxu0 %v7939_v61  ;;  %v7943_v16 = vpack.c.bf16 %v4953_v21, %v4949_v15  ;;  %v7975_v51 = vpack.c.bf16 %v4955_v4, %v4951_v24  ;;  %v4950_v34 = vld [vmem:[#allocation11 + $0xd0] sm:$0xff]  ;;  %v4961_v20 = vld [vmem:[#allocation11 + $0x128] sm:$0xff]  ;;  %v4959_v22 = vld [vmem:[#allocation11 + $0x118] sm:$0xff]  ;;  %v7945_v19 = vpack.c.bf16 %v4952_v18, %v4948_v13 }
0x1fad   :  { %7972 = vmatprep.subr.bf16.mxu1 %v7971_v1  ;;  %v4954_v27 = vld [vmem:[#allocation11 + $0xf0] sm:$0xff]  ;;  %v4963_v23 = vld [vmem:[#allocation11 + $0x138] sm:$0xff]  ;;  %v4956_v42 = vld [vmem:[#allocation11 + $0x100] sm:$0xff] }
0x1fae   :  { %v4960_v44 = vld [vmem:[#allocation11 + $0x120] sm:$0xff]  ;;  %v4958_v7 = vld [vmem:[#allocation11 + $0x110] sm:$0xff]  ;;  %v7979_v32 = vpack.c.bf16 %v4963_v23, %v4959_v22  ;;  %v4965_v53 = vld [vmem:[#allocation11 + $0x148] sm:$0xff] }
0x1faf   :  { %7942 = vmatpush1.bf16.msra.mxu0 %v7941_v10  ;;  %v4962_v36 = vld [vmem:[#allocation11 + $0x130] sm:$0xff]  ;;  %v4969_v54 = vld [vmem:[#allocation11 + $0x168] sm:$0xff]  ;;  %v4967_v29 = vld [vmem:[#allocation11 + $0x158] sm:$0xff]  ;;  %v7949_v57 = vpack.c.bf16 %v4960_v44, %v4956_v42 }
0x1fb0   :  { %7974 = vmatpush1.bf16.msra.mxu1 %v7973_v41  ;;  %7944 = vmatprep.subr.bf16.mxu0 %v7943_v16  ;;  %v4971_v30 = vld [vmem:[#allocation11 + $0x178] sm:$0xff]  ;;  %v7981_v58 = vpack.c.bf16 %v4962_v36, %v4958_v7  ;;  %v7951_v62 = vpack.c.bf16 %v4969_v54, %v4965_v53  ;;  %v4964_v11 = vld [vmem:[#allocation11 + $0x140] sm:$0xff]  ;;  %v4966_v25 = vld [vmem:[#allocation11 + $0x150] sm:$0xff] }
0x1fb1   :  { %7976 = vmatprep.subr.bf16.mxu1 %v7975_v51  ;;  %v4968_v17 = vld [vmem:[#allocation11 + $0x160] sm:$0xff]  ;;  %v7983_v39 = vpack.c.bf16 %v4971_v30, %v4967_v29  ;;  %v4970_v45 = vld [vmem:[#allocation11 + $0x170] sm:$0xff]  ;;  %v4973_v38 = vld [vmem:[#allocation11 + $0x188] sm:$0xff] }
0x1fb2   :  { %v4977_v49 = vld [vmem:[#allocation11 + $0x1a8] sm:$0xff]  ;;  %v4975_v52 = vld [vmem:[#allocation11 + $0x198] sm:$0xff]  ;;  %v7953_v6 = vpack.c.bf16 %v4968_v17, %v4964_v11  ;;  %v7985_v26 = vpack.c.bf16 %v4970_v45, %v4966_v25  ;;  %v4972_v8 = vld [vmem:[#allocation11 + $0x180] sm:$0xff] }
0x1fb3   :  { %7946 = vmatpush1.bf16.msra.mxu0 %v7945_v19  ;;  %v4979_v50 = vld [vmem:[#allocation11 + $0x1b8] sm:$0xff]  ;;  %v7955_v35 = vpack.c.bf16 %v4977_v49, %v4973_v38  ;;  %v4976_v48 = vld [vmem:[#allocation11 + $0x1a0] sm:$0xff]  ;;  %v4974_v55 = vld [vmem:[#allocation11 + $0x190] sm:$0xff] }
0x1fb4   :  { %v7987_v61 = vpack.c.bf16 %v4979_v50, %v4975_v52  ;;  %v4978_v59 = vld [vmem:[#allocation11 + $0x1b0] sm:$0xff]  ;;  %v7957_v60 = vpack.c.bf16 %v4976_v48, %v4972_v8  ;;  %v4981_v15 = vld [vmem:[#allocation11 + $0x1c8] sm:$0xff]  ;;  %v4983_v24 = vld [vmem:[#allocation11 + $0x1d8] sm:$0xff] }
0x1fb5   :  { %v7989_v1 = vpack.c.bf16 %v4978_v59, %v4974_v55  ;;  %v4985_v21 = vld [vmem:[#allocation11 + $0x1e8] sm:$0xff]  ;;  %v4987_v16 = vld [vmem:[#allocation11 + $0x1f8] sm:$0xff]  ;;  %v4980_v4 = vld [vmem:[#allocation11 + $0x1c0] sm:$0xff] }
0x1fb6   :  { %v7959_v41 = vpack.c.bf16 %v4985_v21, %v4981_v15  ;;  %v4984_v13 = vld [vmem:[#allocation11 + $0x1e0] sm:$0xff]  ;;  %v7991_v18 = vpack.c.bf16 %v4987_v16, %v4983_v24 }
0x1fb7   :  { %v7961_v51 = vpack.c.bf16 %v4984_v13, %v4980_v4 }
0x202f   :  { %v4904_v47 = vpop.xlane.xlu0 %4903 }
0x2030   :  { %vm4905_vm2 = vcmp.eq.f32.partialorder %v4882_v56, %v4904_v47  ;;  %v4957_v56 = vld [vmem:[#allocation11 + $0x108] sm:$0xff]  ;;  %v7977_v47 = vpack.c.bf16 %v4954_v27, %v4950_v34  ;;  %v4982_v34 = vld [vmem:[#allocation11 + $0x1d0] sm:$0xff] }
0x2031   :  { %v9347_v63 = vsel %vm4905_vm2, %v8846_v28, 128  ;;  %v4986_v27 = vld [vmem:[#allocation11 + $0x1f0] sm:$0xff] }
0x2032   :  { %v4908_v31 = vshra.s32 %v9347_v63, 16  ;;  %7978 = vmatpush1.bf16.msra.mxu1 %v7977_v47  ;;  %v4907_v9 = vand.u32 65535, %v9347_v63  ;;  %v8487_v63 = vmov 0.0   ;;  %v8488_v47 = vmov 1.0  }
0x2033   :  { %7980 = vmatprep.subr.bf16.mxu1 %v7979_v32  ;;  %5052 = vmatprep.mubr.f32.mxu0 %v8487_v63 }
0x2034   :  { %v9350_v40 = vcvt.s32.f32 %v4908_v31  ;;  %v7947_v31 = vpack.c.bf16 %v4961_v20, %v4957_v56  ;;  %v4909_v46 = vcvt.s32.f32 %v4907_v9  ;;  %v7993_v56 = vpack.c.bf16 %v4986_v27, %v4982_v34  ;;  %5123 = vmatprep.mubr.f32.mxu1 %v8487_v63 }
0x2036   :  { %4911 = vmin.xlane.f32.xlu0 %v9350_v40  ;;  %7948 = vmatprep.subr.bf16.mxu0 %v7947_v31 }
0x2037   :  { %7950 = vmatpush1.bf16.msra.mxu0 %v7949_v57  ;;  %7982 = vmatpush1.bf16.msra.mxu1 %v7981_v58 }
0x2038   :  { %7952 = vmatprep.subr.bf16.mxu0 %v7951_v62  ;;  %7984 = vmatprep.subr.bf16.mxu1 %v7983_v39 }
0x203b   :  { %7954 = vmatpush1.bf16.msra.mxu0 %v7953_v6  ;;  %7986 = vmatpush1.bf16.msra.mxu1 %v7985_v26 }
0x203c   :  { %7956 = vmatprep.subr.bf16.mxu0 %v7955_v35  ;;  %7988 = vmatprep.subr.bf16.mxu1 %v7987_v61 }
0x203f   :  { %7958 = vmatpush1.bf16.msra.mxu0 %v7957_v60  ;;  %7990 = vmatpush1.bf16.msra.mxu1 %v7989_v1 }
0x2040   :  { %7960 = vmatprep.subr.bf16.mxu0 %v7959_v41  ;;  %7992 = vmatprep.subr.bf16.mxu1 %v7991_v18 }
0x2043   :  { %7962 = vmatpush1.bf16.msra.mxu0 %v7961_v51  ;;  %7994 = vmatpush1.bf16.msra.mxu1 %v7993_v56 }
0x20c3   :  { %v4912_v5 = vpop.xlane.xlu0 %4911 }
0x20c4   :  { %vm4913_vm3 = vcmp.eq.f32.partialorder %v9350_v40, %v4912_v5  ;;  %v4918_v40 = vcvt.f32.s32 %v4912_v5 }
0x20c5   :  { %v4914_v10 = vsel %vm4913_vm3, %v4909_v46, inf }
0x20c6   :  { %4915 = vmin.xlane.f32.xlu1 %v4914_v10  ;;  %v4919_v22 = vshll.u32 %v4918_v40, 16 }
0x2153   :  { %v4916_v20 = vpop.xlane.xlu1 %4915 }
0x2154   :  { %v4917_v23 = vcvt.f32.s32 %v4916_v20 }
0x2156   :  { %v4920_v19 = vadd.s32 %v4919_v22, %v4917_v23 }
0x2158   :  { %vm4921_vm4 = vcmp.eq.s32.totalorder %v8846_v28, %v4920_v19 }
0x2159   :  { %5549 = vmatmul.mubr.msk.f32.vlgmr.msra.gmra.mrb[0].mxu0 %vm4921_vm4, %v8488_v47  ;;  %5550 = vmatmul.mubr.msk.f32.vlgmr.msra.gmra.mrb[0].mxu1 %vm4921_vm4, %v8488_v47 }
0x222c   :  { %v5054_v31 = vpop.f32.mrb[0].mxu0  ;;  %v5125_v42 = vpop.f32.mrb[0].mxu1 }
0x222d   :  { %5130 = vst [vmem:[#allocation3] sm:$0xff] %v5054_v31  ;;  %5132 = vst [vmem:[#allocation3 + $0x10] sm:$0xff] %v5125_v42  ;;  %v5056_v44 = vpop.f32.mrb[1].mxu0  ;;  %v5127_v7 = vpop.f32.mrb[1].mxu1 }
0x222e   :  { %5131 = vst [vmem:[#allocation3 + $0x8] sm:$0xff] %v5056_v44  ;;  %5133 = vst [vmem:[#allocation3 + $0x18] sm:$0xff] %v5127_v7 }
0x222f PF:  { %v5142_v32 = vld [vmem:[#allocation14 + $0x8] sm:$0xff]  ;;  %v5145_v36 = vld [vmem:[#allocation14 + $0x20] sm:$0xff]  ;;  %8027 = vmatprep.subr.bf16.mxu1 %v8475_v37  ;;  %5253 = vmatprep.mubr.f32.mxu0 %v8474_v3  ;;  %v5144_v54 = vld [vmem:[#allocation14 + $0x18] sm:$0xff]  ;;  %s8489_s24 = smov [#allocation18]  }
0x2230   :  { %v5141_v53 = vld [vmem:[#allocation14] sm:$0xff]  ;;  %v7995_v28 = vpack.c.bf16 %v5145_v36, %v5142_v32  ;;  %v5148_v29 = vld [vmem:[#allocation14 + $0x38] sm:$0xff]  ;;  %v5151_v30 = vld [vmem:[#allocation14 + $0x50] sm:$0xff]  ;;  %6677 = vmatprep.mubr.msk.f32.mxu1 %vm8476_vm1, %v8474_v3  ;;  %s5455_s2 = sshll.u32 %s8489_s24, 4  ;;  %s5456_s2 = int_to_ptr.vmem [resolvable:$true] %s5455_s2 }
0x2231   :  { %v7997_v57 = vpack.c.bf16 %v5144_v54, %v5141_v53  ;;  %v7999_v58 = vpack.c.bf16 %v5151_v30, %v5148_v29  ;;  %v5147_v62 = vld [vmem:[#allocation14 + $0x30] sm:$0xff]  ;;  %v5150_v11 = vld [vmem:[#allocation14 + $0x48] sm:$0xff]  ;;  %v5157_v25 = vld [vmem:[#allocation14 + $0x80] sm:$0xff]  ;;  %s8426_s25 = scalar_lea.vmem %s5456_s2, 1024  ;;  %p8431_p4 = scmp.lt.s32.totalorder %s5456_s2, %s5456_s2 }
0x2232   :  { %v5154_v17 = vld [vmem:[#allocation14 + $0x68] sm:$0xff]  ;;  %7996 = vmatprep.subr.bf16.mxu0 %v7995_v28  ;;  %v8001_v39 = vpack.c.bf16 %v5150_v11, %v5147_v62  ;;  %v5153_v38 = vld [vmem:[#allocation14 + $0x60] sm:$0xff]  ;;  %v5156_v49 = vld [vmem:[#allocation14 + $0x78] sm:$0xff]  ;;  %p8427_p3 = scmp.ne.s32.totalorder %s5456_s2, %s8426_s25  ;;  %p8432_p5 = scmp.lt.s32.totalorder %s8426_s25, %s8426_s25 }
0x2233   :  { %7998 = vmatpush1.bf16.msra.mxu0 %v7997_v57  ;;  %v8003_v45 = vpack.c.bf16 %v5157_v25, %v5154_v17  ;;  %v5160_v52 = vld [vmem:[#allocation14 + $0x98] sm:$0xff]  ;;  %v5163_v50 = vld [vmem:[#allocation14 + $0xb0] sm:$0xff]  ;;  %v8005_v6 = vpack.c.bf16 %v5156_v49, %v5153_v38  ;;  %v5162_v8 = vld [vmem:[#allocation14 + $0xa8] sm:$0xff] }
0x2234   :  { %8000 = vmatprep.subr.bf16.mxu0 %v7999_v58  ;;  %v5159_v26 = vld [vmem:[#allocation14 + $0x90] sm:$0xff]  ;;  %v8007_v35 = vpack.c.bf16 %v5163_v50, %v5160_v52  ;;  %v5146_v61 = vld [vmem:[#allocation14 + $0x28] sm:$0xff]  ;;  %v5169_v59 = vld [vmem:[#allocation14 + $0xe0] sm:$0xff]  ;;  %p8433_p6 = por %p8432_p5, %p8431_p4 }
0x2235   :  { %v5143_v48 = vld [vmem:[#allocation14 + $0x10] sm:$0xff]  ;;  %v5166_v55 = vld [vmem:[#allocation14 + $0xc8] sm:$0xff]  ;;  %v5149_v1 = vld [vmem:[#allocation14 + $0x40] sm:$0xff]  ;;  %v8009_v5 = vpack.c.bf16 %v5162_v8, %v5159_v26 }
0x2236   :  { %v8028_v60 = vpack.c.bf16 %v5146_v61, %v5143_v48  ;;  %v5152_v9 = vld [vmem:[#allocation14 + $0x58] sm:$0xff]  ;;  %v5165_v46 = vld [vmem:[#allocation14 + $0xc0] sm:$0xff]  ;;  %v8011_v15 = vpack.c.bf16 %v5169_v59, %v5166_v55  ;;  %v5155_v24 = vld [vmem:[#allocation14 + $0x70] sm:$0xff]  ;;  %p8434_p7 = pnand %p8433_p6, %p8427_p3 }
0x2237   :  { %8002 = vmatpush1.bf16.msra.mxu0 %v8001_v39  ;;  %v8031_v10 = vpack.c.bf16 %v5152_v9, %v5149_v1  ;;  %v5168_v21 = vld [vmem:[#allocation14 + $0xd8] sm:$0xff]  ;;  %v5158_v41 = vld [vmem:[#allocation14 + $0x88] sm:$0xff]  ;;  %v5175_v4 = vld [vmem:[#allocation14 + $0x110] sm:$0xff] }
0x2238   :  { %8004 = vmatprep.subr.bf16.mxu0 %v8003_v45  ;;  %8029 = vmatpush3.bf16.msra.mxu1 %v8028_v60  ;;  %v5172_v16 = vld [vmem:[#allocation14 + $0xf8] sm:$0xff]  ;;  %v8013_v13 = vpack.c.bf16 %v5168_v21, %v5165_v46  ;;  %v5171_v18 = vld [vmem:[#allocation14 + $0xf0] sm:$0xff]  ;;  %v8034_v51 = vpack.c.bf16 %v5158_v41, %v5155_v24  ;;  %v5174_v27 = vld [vmem:[#allocation14 + $0x108] sm:$0xff] }
0x2239   :  { %8030 = vmatprep.subr.bf16.mxu1 %v8475_v37  ;;  %v8015_v34 = vpack.c.bf16 %v5175_v4, %v5172_v16  ;;  %v5161_v56 = vld [vmem:[#allocation14 + $0xa0] sm:$0xff]  ;;  %v5164_v63 = vld [vmem:[#allocation14 + $0xb8] sm:$0xff]  ;;  %v5178_v40 = vld [vmem:[#allocation14 + $0x128] sm:$0xff]  ;;  %v8017_v22 = vpack.c.bf16 %v5174_v27, %v5171_v18 }
0x223a   :  { %v5181_v20 = vld [vmem:[#allocation14 + $0x140] sm:$0xff]  ;;  %v8037_v19 = vpack.c.bf16 %v5164_v63, %v5161_v56  ;;  %v5180_v31 = vld [vmem:[#allocation14 + $0x138] sm:$0xff]  ;;  %v5167_v42 = vld [vmem:[#allocation14 + $0xd0] sm:$0xff] }
0x223b   :  { %8006 = vmatpush1.bf16.msra.mxu0 %v8005_v6  ;;  %v5177_v23 = vld [vmem:[#allocation14 + $0x120] sm:$0xff]  ;;  %v8019_v47 = vpack.c.bf16 %v5181_v20, %v5178_v40  ;;  %v5170_v44 = vld [vmem:[#allocation14 + $0xe8] sm:$0xff]  ;;  %v5184_v7 = vld [vmem:[#allocation14 + $0x158] sm:$0xff] }
0x223c   :  { %8008 = vmatprep.subr.bf16.mxu0 %v8007_v35  ;;  %8032 = vmatpush3.bf16.msra.mxu1 %v8031_v10  ;;  %v5187_v32 = vld [vmem:[#allocation14 + $0x170] sm:$0xff]  ;;  %v8021_v36 = vpack.c.bf16 %v5180_v31, %v5177_v23  ;;  %v8040_v28 = vpack.c.bf16 %v5170_v44, %v5167_v42  ;;  %v5186_v29 = vld [vmem:[#allocation14 + $0x168] sm:$0xff]  ;;  %v5173_v30 = vld [vmem:[#allocation14 + $0x100] sm:$0xff] }
0x223d   :  { %8033 = vmatprep.subr.bf16.mxu1 %v8475_v37  ;;  %v5183_v53 = vld [vmem:[#allocation14 + $0x150] sm:$0xff]  ;;  %v8023_v54 = vpack.c.bf16 %v5187_v32, %v5184_v7  ;;  %v5176_v57 = vld [vmem:[#allocation14 + $0x118] sm:$0xff]  ;;  %v5182_v17 = vld [vmem:[#allocation14 + $0x148] sm:$0xff] }
0x223e   :  { %v8025_v58 = vpack.c.bf16 %v5186_v29, %v5183_v53  ;;  %v8043_v62 = vpack.c.bf16 %v5176_v57, %v5173_v30  ;;  %v5179_v11 = vld [vmem:[#allocation14 + $0x130] sm:$0xff]  ;;  %v5185_v39 = vld [vmem:[#allocation14 + $0x160] sm:$0xff]  ;;  %v5188_v45 = vld [vmem:[#allocation14 + $0x178] sm:$0xff] }
0x223f   :  { %8010 = vmatpush1.bf16.msra.mxu0 %v8009_v5  ;;  %v8046_v25 = vpack.c.bf16 %v5182_v17, %v5179_v11  ;;  %v8049_v38 = vpack.c.bf16 %v5188_v45, %v5185_v39  ;;  %v5351_v49 = vld [vmem:[#allocation15] sm:$0xff]  ;;  %v5352_v52 = vld [vmem:[#allocation15 + $0x8] sm:$0xff]  ;;  %v5353_v48 = vld [vmem:[#allocation15 + $0x10] sm:$0xff] }
0x2240   :  { %8012 = vmatprep.subr.bf16.mxu0 %v8011_v15  ;;  %8035 = vmatpush3.bf16.msra.mxu1 %v8034_v51  ;;  %v8052_v50 = vpack.c.bf16 %v5352_v52, %v5351_v49  ;;  %v5134_v6 = vld [vmem:[#allocation3] sm:$0xff]  ;;  %v5135_v35 = vld [vmem:[#allocation3 + $0x8] sm:$0xff]  ;;  %v5354_v61 = vld [vmem:[#allocation15 + $0x18] sm:$0xff] }
0x2241   :  { %8036 = vmatprep.subr.bf16.mxu1 %v8475_v37  ;;  %v5442_v26 = vld [vmem:[#allocation4 + $0xe0] sm:$0xff]  ;;  %v5443_v8 = vld [vmem:[#allocation4 + $0xe8] sm:$0xff]  ;;  %v5357_v1 = vld [vmem:[#allocation15 + $0x30] sm:$0xff]  ;;  %v5138_v63 = vadd.f32 %v5134_v6, %v9108_v0  ;;  %v5139_v40 = vadd.f32 %v5135_v35, %v9110_v2 }
0x2242   :  { %5446 = vst [vmem:[#allocation3] sm:$0xff] %v5442_v26  ;;  %5447 = vst [vmem:[#allocation3 + $0x8] sm:$0xff] %v5443_v8  ;;  %v5355_v55 = vld [vmem:[#allocation15 + $0x20] sm:$0xff]  ;;  %v5356_v59 = vld [vmem:[#allocation15 + $0x28] sm:$0xff] }
0x2243   :  { %8014 = vmatpush1.bf16.msra.mxu0 %v8013_v13  ;;  %v8058_v60 = vpack.c.bf16 %v5356_v59, %v5355_v55  ;;  %v5358_v9 = vld [vmem:[#allocation15 + $0x38] sm:$0xff]  ;;  %v5136_v46 = vld [vmem:[#allocation3 + $0x10] sm:$0xff]  ;;  %v5359_v10 = vld [vmem:[#allocation15 + $0x40] sm:$0xff] }
0x2244   :  { %8016 = vmatprep.subr.bf16.mxu0 %v8015_v34  ;;  %8038 = vmatpush3.bf16.msra.mxu1 %v8037_v19  ;;  %v8061_v5 = vpack.c.bf16 %v5358_v9, %v5357_v1  ;;  %v5360_v15 = vld [vmem:[#allocation15 + $0x48] sm:$0xff]  ;;  %v5444_v21 = vld [vmem:[#allocation4 + $0xf0] sm:$0xff]  ;;  %v5362_v16 = vld [vmem:[#allocation15 + $0x58] sm:$0xff]  ;;  %v5140_v0 = vadd.f32 %v5136_v46, %v9121_v43 }
0x2245   :  { %8039 = vmatprep.subr.bf16.mxu1 %v8475_v37  ;;  %v8064_v24 = vpack.c.bf16 %v5360_v15, %v5359_v10  ;;  %v5361_v41 = vld [vmem:[#allocation15 + $0x50] sm:$0xff]  ;;  %5448 = vst [vmem:[#allocation3 + $0x10] sm:$0xff] %v5444_v21  ;;  %v5363_v13 = vld [vmem:[#allocation15 + $0x60] sm:$0xff]  ;;  %v5364_v18 = vld [vmem:[#allocation15 + $0x68] sm:$0xff] }
0x2246   :  { %v8067_v4 = vpack.c.bf16 %v5362_v16, %v5361_v41  ;;  %v8070_v51 = vpack.c.bf16 %v5364_v18, %v5363_v13  ;;  %v5365_v34 = vld [vmem:[#allocation15 + $0x70] sm:$0xff]  ;;  %v5366_v27 = vld [vmem:[#allocation15 + $0x78] sm:$0xff] }
0x2247   :  { %8018 = vmatpush1.bf16.msra.mxu0 %v8017_v22  ;;  %v8073_v56 = vpack.c.bf16 %v5366_v27, %v5365_v34  ;;  %v5137_v11 = vld [vmem:[#allocation3 + $0x18] sm:$0xff] }
0x2248   :  { %8020 = vmatprep.subr.bf16.mxu0 %v8019_v47  ;;  %8041 = vmatpush3.bf16.msra.mxu1 %v8040_v28  ;;  %v5445_v17 = vld [vmem:[#allocation4 + $0xf8] sm:$0xff] }
0x2249   :  { %8042 = vmatprep.subr.bf16.mxu1 %v8475_v37  ;;  %5449 = vst [vmem:[#allocation3 + $0x18] sm:$0xff] %v5445_v17 }
0x224b   :  { %8022 = vmatpush1.bf16.msra.mxu0 %v8021_v36 }
0x224c   :  { %8024 = vmatprep.subr.bf16.mxu0 %v8023_v54  ;;  %8044 = vmatpush3.bf16.msra.mxu1 %v8043_v62 }
0x224d   :  { %8045 = vmatprep.subr.bf16.mxu1 %v8475_v37 }
0x224f   :  { %8026 = vmatpush1.bf16.msra.mxu0 %v8025_v58 }
0x2250   :  { %8051 = vmatprep.subr.bf16.mxu0 %v8475_v37  ;;  %8047 = vmatpush3.bf16.msra.mxu1 %v8046_v25 }
0x2251   :  { %8048 = vmatprep.subr.bf16.mxu1 %v8475_v37 }
0x2252   :  { %5254 = vmatmul.mubr.f32.vlgmr.msra.gmra.mrb[0].mxu0 %v9342_v14 }
0x2253   :  { %6712 = vmatprep.mubr.msk.f32.mxu0 %vm8476_vm1, %v8474_v3  ;;  %8053 = vmatpush3.bf16.msra.mxu0 %v8052_v50  ;;  %v8055_v3 = vpack.c.bf16 %v5354_v61, %v5353_v48 }
0x2254   :  { %8050 = vmatpush3.bf16.msra.mxu1 %v8049_v38  ;;  %8054 = vmatprep.subr.bf16.mxu0 %v8475_v37 }
0x2257   :  { %6678 = vmatmul.mubr.f32.vlgmr.msra.gmra.mrb[0].mxu1 %v9342_v14  ;;  %8056 = vmatpush3.bf16.msra.mxu0 %v8055_v3 }
0x2258   :  { %8057 = vmatprep.subr.bf16.mxu0 %v8475_v37 }
0x225b   :  { %8059 = vmatpush3.bf16.msra.mxu0 %v8058_v60 }
0x225c   :  { %8060 = vmatprep.subr.bf16.mxu0 %v8475_v37 }
0x225f   :  { %8062 = vmatpush3.bf16.msra.mxu0 %v8061_v5 }
0x2260   :  { %8063 = vmatprep.subr.bf16.mxu0 %v8475_v37 }
0x2263   :  { %8065 = vmatpush3.bf16.msra.mxu0 %v8064_v24 }
0x2264   :  { %8066 = vmatprep.subr.bf16.mxu0 %v8475_v37 }
0x2267   :  { %8068 = vmatpush3.bf16.msra.mxu0 %v8067_v4 }
0x2268   :  { %8069 = vmatprep.subr.bf16.mxu0 %v8475_v37 }
0x226b   :  { %8071 = vmatpush3.bf16.msra.mxu0 %v8070_v51 }
0x226c   :  { %8072 = vmatprep.subr.bf16.mxu0 %v8475_v37 }
0x226f   :  { %8074 = vmatpush3.bf16.msra.mxu0 %v8073_v56 }
0x2325   :  { %v5255_v20 = vpop.f32.mrb[0].mxu0 }
0x2326   :  { %v5330_v22 = vadd.f32 %v5255_v20, %v5138_v63  ;;  %v5257_v23 = vpop.f32.mrb[1].mxu0 }
0x2327   :  { %v5337_v19 = vadd.f32 %v5257_v23, %v5139_v40 }
0x2328   :  { %v5551_v47 = vmul.f32 -1.442695, %v5330_v22 }
0x2329   :  { %v5552_v44 = vmul.f32 -1.442695, %v5337_v19 }
0x232a   :  { %8250 = vpow2.f32 %v5551_v47  ;;  %v5326_v31 = vpop.f32.mrb[0].mxu1 }
0x232b   :  { %v6679_v42 = vpop.f32.mrb[1].mxu1  ;;  %8252 = vpow2.f32 %v5552_v44  ;;  %v5344_v37 = vadd.f32 %v9119_v33, %v5326_v31 }
0x2334   :  { %v8251_v7 = vpop.eup %8250 }
0x2335   :  { %v5334_v32 = vadd.f32 1.0, %v8251_v7  ;;  %v8253_v36 = vpop.eup %8252 }
0x2336   :  { %v5341_v28 = vadd.f32 1.0, %v8253_v36 }
0x2337   :  { %8254 = vrcp.f32 %v5334_v32 }
0x2341   :  { %v8255_v53 = vpop.eup %8254 }
0x2342   :  { %v5345_v2 = vmul.f32 %v8255_v53, %v5344_v37 }
0x2344   :  { %v5346_v54 = vadd.f32 %v5345_v2, %v5140_v0 }
0x2346   :  { %8256 = vtanh.f32 %v5346_v54 }
0x2347   :  { %8258 = vrcp.f32 %v5341_v28 }
0x2350   :  { %v8257_v29 = vpop.eup %8256 }
0x2351   :  { %v5348_v30 = vsub.f32 %v9342_v14, %v8257_v29  ;;  %v8259_v57 = vpop.eup %8258 }
0x2353   :  { %v5349_v58 = vmul.f32 %v8259_v57, %v5348_v30 }
0x2355   :  { %v5350_v62 = vadd.f32 %v8257_v29, %v5349_v58 }
0x2357   :  { %6713 = vmatmul.mubr.f32.vlgmr.msra.gmra.mrb[2].mxu0 %v5350_v62 }
0x242a   :  { %v5433_v33 = vpop.f32.mrb[2].mxu0 }
0x242b   :  { %v5437_v43 = vadd.f32 %v5433_v33, %v5137_v11  ;;  %v6714_v25 = vpop.f32.mrb[3].mxu0 }
0x242d   :  { %v5438_v39 = vadd.f32 %v5437_v43, %v9133_v12 }
0x242f   :  { %5440 = vst [vmem:[#allocation18 + $0x38] sm:$0xff] %v5438_v39 }
0x2430   :  { %8437 = shalt.err (!%p8434_p7)
}
0x2431   :  { %s9418_s21 = sld [smem:[#allocation25_spill]] }
0x2437   :  { %s8438_s20 = scalar_lea.hbm %s9418_s21, 1024 }
0x2438   :  { %p8439_p8 = scmp.ne.s32.totalorder %s9418_s21, %s8438_s20  ;;  %p8442_p9 = scmp.lt.u32.totalorder %s8438_s20, %s9418_s21 }
0x243a   :  { %p8444_p10 = pnand %p8442_p9, %p8439_p8 }
0x243c   :  { %8447 = shalt.err (!%p8444_p10)
}
0x243d   :  { %5461 = dma.vmem_to_hbm [thread:$0]  %s5456_s2, 1024, %s9418_s21, [#allocation6], %s8465_s8, %s8465_s8, %s8466_s18  }
0x243e   :  { %8458 = dma.done.wait [#allocation6], 1024  }
0x243f   :  { %8459 = vsyncadd [#allocation6], 4294966272 }
0x2440   :  { %5465 = vsyncpa [#allocation5], 1 }
0x2441   :  { %5466 = vsyncpa [#allocation10], 1 }
0x2442   :  { %5467 = vsyncpa [#allocation13], 1 }
0x2443   :  { %5468 = vsyncpa [#allocation16], 1 }
0x2444   :  { %5469 = vsyncpa [#allocation6], 1 }
0x2445   :  { %5470 = vsyncpa [#allocation7], 1 }

</bundles_post_ra>
